<compile_context>
chip_gen: v7x
topology: tpu7x:2x2x1
jax: 0.10.0
libtpu: 0.0.40
codegen_flags: <defaults>
</compile_context>

<pallas_src>
import functools

import jax
import jax.numpy as jnp
from jax.experimental import pallas as pl
from jax.experimental.pallas import tpu as pltpu

LANE = 128
L_CHUNK = 8  # token-axis pooling chunk (sublane-aligned)


def _round_up(x, m):
    return ((x + m - 1) // m) * m


def _pad_to(x, shape):
    return jnp.pad(x, [(0, s - d) for d, s in zip(x.shape, shape)])


def gnimc_fused_kernel(emb_ref, mask_ref, gb_ref, ztext_ref, hembT_ref,
                       w_enc_t_ref, w_enc_g_ref, b_enc_ref,
                       w_fus_s_ref, w_fus_t_ref, b_fus_ref,
                       w_head_f_ref, w_head_t_ref, b_head_ref,
                       out_ref, proj_ref, *, l_chunk, n_l_chunks):
    f32 = jnp.float32
    bf16 = jnp.bfloat16

    # The enc/fus/head MLP chain depends only on the batch tile: compute it once per
    # batch tile (first H step) and cache `proj` (already bf16) in VMEM scratch.
    @pl.when(pl.program_id(1) == 0)
    def _compute_proj():
        tb = emb_ref.shape[0]
        de = emb_ref.shape[2]

        # ---- enc: masked mean pooling over the token axis, chunked so only a
        #      (tb, l_chunk, de) slice is ever live in f32 (no full-block f32 temp).
        pooled_sum = jnp.zeros((tb, de), f32)
        for c in range(n_l_chunks):          # static chunk loop, static slices
            sl = slice(c * l_chunk, (c + 1) * l_chunk)
            e = emb_ref[:, sl, :].astype(f32)                    # [tb, lch, de]
            m = mask_ref[:, sl]                                  # [tb, lch] f32
            pooled_sum = pooled_sum + jnp.sum(e * m[:, :, None], axis=1)

        msum = jnp.sum(mask_ref[...], axis=1, keepdims=True)     # [tb, 1]
        # exact divide (once per batch tile, off the hot path) -> matches reference
        pooled = (pooled_sum / jnp.maximum(msum, 1.0)).astype(bf16)

        # ---- enc: Linear(cat([pooled, gb])) + ReLU  (split matmul) ----
        z_struct = jnp.maximum(
            jnp.dot(pooled, w_enc_t_ref[...], preferred_element_type=f32)
            + jnp.dot(gb_ref[...], w_enc_g_ref[...], preferred_element_type=f32)
            + b_enc_ref[...], 0.0)                               # [tb, Dz] f32

        # ---- fus: Linear(cat([z_struct, z_text])) + ReLU ----
        z_text = ztext_ref[...]                                  # [tb, Dt] bf16
        z_fus = jnp.maximum(
            jnp.dot(z_struct.astype(bf16), w_fus_s_ref[...],
                    preferred_element_type=f32)
            + jnp.dot(z_text, w_fus_t_ref[...], preferred_element_type=f32)
            + b_fus_ref[...], 0.0)                               # [tb, Df] f32

        # ---- head: proj = cat([z_fus, z_text]) @ W_head + b  (cached in bf16) ----
        proj = (jnp.dot(z_fus.astype(bf16), w_head_f_ref[...],
                        preferred_element_type=f32)
                + jnp.dot(z_text, w_head_t_ref[...], preferred_element_type=f32)
                + b_head_ref[...])                               # [tb, Dh] f32
        proj_ref[...] = proj.astype(bf16)

    # ---- head: scores tile = proj @ h_emb.T  (h_emb pre-transposed host-side) ----
    # proj is already bf16 in scratch -> no per-step cast; output tile is lane-dense.
    out_ref[...] = jnp.dot(proj_ref[...], hembT_ref[...],
                           preferred_element_type=jnp.float32)   # [tb, th] f32


def prepare_static(params, h_emb, z_text_all, *, th=512):
    """One-time padding / bf16 casting / transpose of all static tensors.

    Hoisted out of the per-call forward so the kernel prologue does not re-read /
    re-write the weights and candidate matrix in HBM on every call.
    """
    f32, bf16 = jnp.float32, jnp.bfloat16
    V, De = params["tok_emb"].shape
    Dg = params["w_enc_g"].shape[0]
    Nq, Dt = z_text_all.shape
    Dz = params["w_enc_t"].shape[1]
    Df = params["w_fus_s"].shape[1]
    Dh = params["w_head_f"].shape[1]
    H = h_emb.shape[0]

    De_p, Dg_p, Dt_p, Dz_p, Df_p, Dh_p = (_round_up(d, LANE)
                                          for d in (De, Dg, Dt, Dz, Df, Dh))
    Hp = _round_up(H, th)

    return {
        "tok_emb":    _pad_to(params["tok_emb"], (V, De_p)).astype(bf16),
        "z_text_all": _pad_to(z_text_all, (Nq, Dt_p)).astype(bf16),
        "hembT":      _pad_to(h_emb.T, (Dh_p, Hp)).astype(bf16),   # pre-transposed
        "w_enc_t":    _pad_to(params["w_enc_t"], (De_p, Dz_p)).astype(bf16),
        "w_enc_g":    _pad_to(params["w_enc_g"], (Dg_p, Dz_p)).astype(bf16),
        "b_enc":      _pad_to(params["b_enc"], (1, Dz_p)).astype(f32),
        "w_fus_s":    _pad_to(params["w_fus_s"], (Dz_p, Df_p)).astype(bf16),
        "w_fus_t":    _pad_to(params["w_fus_t"], (Dt_p, Df_p)).astype(bf16),
        "b_fus":      _pad_to(params["b_fus"], (1, Df_p)).astype(f32),
        "w_head_f":   _pad_to(params["w_head_f"], (Df_p, Dh_p)).astype(bf16),
        "w_head_t":   _pad_to(params["w_head_t"], (Dt_p, Dh_p)).astype(bf16),
        "b_head":     _pad_to(params["b_head"], (1, Dh_p)).astype(f32),
    }


@functools.partial(jax.jit, static_argnames=("num_items", "tb", "th"))
def gnimc_forward(gb, ids, mask, q_idx, static_t, *, num_items, tb=256, th=512):
    f32, bf16 = jnp.float32, jnp.bfloat16
    B, L = ids.shape

    tok_emb = static_t["tok_emb"]
    De_p = tok_emb.shape[1]
    Dg_p = static_t["w_enc_g"].shape[0]
    Dt_p = static_t["z_text_all"].shape[1]
    Dz_p = static_t["w_enc_t"].shape[1]
    Df_p = static_t["w_fus_s"].shape[1]
    Dh_p, Hp = static_t["hembT"].shape
    assert Hp % th == 0

    # Pad the token axis to a multiple of the pooling chunk (padded tokens carry
    # mask==0, so they never contribute to the pooled sum or the length count).
    Lp = _round_up(L, L_CHUNK)
    n_l_chunks = Lp // L_CHUNK
    ids_p = jnp.pad(ids, ((0, 0), (0, Lp - L)))
    mask_f = jnp.pad(mask.astype(f32), ((0, 0), (0, Lp - L)))

    # Glue gathers (embedding lookup + q_idx fancy indexing), not the compute hot path.
    # TODO(synk): move in-kernel (scalar-prefetched ids + row DMAs from HBM tok_emb).
    emb_tok = jnp.take(tok_emb, ids_p, axis=0)                  # [B, Lp, De_p] bf16
    z_text = jnp.take(static_t["z_text_all"], q_idx, axis=0)    # [B, Dt_p] bf16

    Bp = _round_up(B, tb)
    nb, nh = Bp // tb, Hp // th

    # Padded batch rows (mask all-zero) produce garbage rows that are only removed by
    # the final [:B] slice — do not reduce over the batch axis inside the kernel.
    emb_p = _pad_to(emb_tok, (Bp, Lp, De_p))
    mask_p = _pad_to(mask_f, (Bp, Lp))
    gb_p = _pad_to(gb, (Bp, Dg_p)).astype(bf16)
    zt_p = _pad_to(z_text, (Bp, Dt_p))

    inputs = (emb_p, mask_p, gb_p, zt_p, static_t["hembT"],
              static_t["w_enc_t"], static_t["w_enc_g"], static_t["b_enc"],
              static_t["w_fus_s"], static_t["w_fus_t"], static_t["b_fus"],
              static_t["w_head_f"], static_t["w_head_t"], static_t["b_head"])

    in_specs = [
        pl.BlockSpec((tb, Lp, De_p), lambda i, j: (i, 0, 0)),   # emb_tok (per batch tile)
        pl.BlockSpec((tb, Lp), lambda i, j: (i, 0)),            # mask
        pl.BlockSpec((tb, Dg_p), lambda i, j: (i, 0)),          # gb
        pl.BlockSpec((tb, Dt_p), lambda i, j: (i, 0)),          # z_text
        pl.BlockSpec((Dh_p, th), lambda i, j: (0, j)),          # h_emb.T (per H tile)
        # weights / biases: constant block index -> VMEM-resident across the grid
        pl.BlockSpec((De_p, Dz_p), lambda i, j: (0, 0)),
        pl.BlockSpec((Dg_p, Dz_p), lambda i, j: (0, 0)),
        pl.BlockSpec((1, Dz_p), lambda i, j: (0, 0)),
        pl.BlockSpec((Dz_p, Df_p), lambda i, j: (0, 0)),
        pl.BlockSpec((Dt_p, Df_p), lambda i, j: (0, 0)),
        pl.BlockSpec((1, Df_p), lambda i, j: (0, 0)),
        pl.BlockSpec((Df_p, Dh_p), lambda i, j: (0, 0)),
        pl.BlockSpec((Dt_p, Dh_p), lambda i, j: (0, 0)),
        pl.BlockSpec((1, Dh_p), lambda i, j: (0, 0)),
    ]
    out_specs = pl.BlockSpec((tb, th), lambda i, j: (i, j))     # lane-dense scores tile

    flops = 2 * Bp * (Lp * De_p
                      + De_p * Dz_p + Dg_p * Dz_p
                      + Dz_p * Df_p + Dt_p * Df_p
                      + Df_p * Dh_p + Dt_p * Dh_p
                      + Dh_p * Hp)
    bytes_accessed = (sum(int(a.size) * a.dtype.itemsize for a in inputs)
                      + Bp * Hp * 4)
    cost = pl.CostEstimate(flops=flops, transcendentals=0,
                           bytes_accessed=bytes_accessed)

    kernel = functools.partial(gnimc_fused_kernel,
                               l_chunk=L_CHUNK, n_l_chunks=n_l_chunks)

    out_p = pl.pallas_call(
        kernel,
        out_shape=jax.ShapeDtypeStruct((Bp, Hp), f32),
        grid_spec=pltpu.PrefetchScalarGridSpec(
            num_scalar_prefetch=0,
            grid=(nb, nh),
            in_specs=in_specs,
            out_specs=out_specs,
            scratch_shapes=[pltpu.VMEM((tb, Dh_p), bf16)],      # cached proj (bf16)
        ),
        compiler_params=pltpu.CompilerParams(
            # batch tiles shard across TensorCores; the H axis carries the cached
            # proj scratch so it must stay sequential per core.
            dimension_semantics=("parallel", "arbitrary"),
            # larger tiles exceed the default scoped VMEM (16 MiB v5e / 32 MiB v6e);
            # 48 MiB stays safely under v7x's 64 MiB physical per-TC VMEM.
            vmem_limit_bytes=48 * 1024 * 1024),
        cost_estimate=cost,
    )(*inputs)

    return out_p[:B, :num_items]


def gnimc_reference(gb, ids, mask, z_text_all, q_idx, h_emb, params):
    """Pure-JAX reference of the module forward, replicating the kernel's
    bf16-input / f32-accumulation numerics (inputs rounded to bf16, math in f32)."""
    f32 = jnp.float32
    bf = lambda x: x.astype(jnp.bfloat16).astype(f32)
    emb_tok = bf(params["tok_emb"])[ids]
    z_text = bf(z_text_all[q_idx])
    m = mask.astype(f32)
    pooled = (emb_tok * m[:, :, None]).sum(1) / jnp.maximum(m.sum(1, keepdims=True), 1.0)
    z_struct = jax.nn.relu(
        jnp.concatenate([bf(pooled), bf(gb)], 1)
        @ jnp.concatenate([bf(params["w_enc_t"]), bf(params["w_enc_g"])], 0)
        + params["b_enc"])
    z_fus = jax.nn.relu(
        jnp.concatenate([bf(z_struct), z_text], 1)
        @ jnp.concatenate([bf(params["w_fus_s"]), bf(params["w_fus_t"])], 0)
        + params["b_fus"])
    z_cat = jnp.concatenate([bf(z_fus), z_text], 1)
    proj = (z_cat
            @ jnp.concatenate([bf(params["w_head_f"]), bf(params["w_head_t"])], 0)
            + params["b_head"])
    return bf(proj) @ bf(h_emb).T


def init_params(key, V, De, Dg, Dt, Dz, Df, Dh):
    ks = jax.random.split(key, 8)
    scale = lambda fan_in: 1.0 / jnp.sqrt(jnp.float32(fan_in))
    return {
        "tok_emb":  jax.random.normal(ks[0], (V, De), jnp.float32) * 0.02,
        "w_enc_t":  jax.random.normal(ks[1], (De, Dz), jnp.float32) * scale(De + Dg),
        "w_enc_g":  jax.random.normal(ks[2], (Dg, Dz), jnp.float32) * scale(De + Dg),
        "b_enc":    jnp.zeros((1, Dz), jnp.float32),
        "w_fus_s":  jax.random.normal(ks[3], (Dz, Df), jnp.float32) * scale(Dz + Dt),
        "w_fus_t":  jax.random.normal(ks[4], (Dt, Df), jnp.float32) * scale(Dz + Dt),
        "b_fus":    jnp.zeros((1, Df), jnp.float32),
        "w_head_f": jax.random.normal(ks[5], (Df, Dh), jnp.float32) * scale(Df + Dt),
        "w_head_t": jax.random.normal(ks[6], (Dt, Dh), jnp.float32) * scale(Df + Dt),
        "b_head":   jnp.zeros((1, Dh), jnp.float32),
    }


if __name__ == "__main__":
    # Small shapes consistent with the forward: B graphs, L tokens, H candidates.
    B, L, V = 2, 8, 64
    De, Dg, Dt, Dz, Df, Dh, H, Nq = 32, 16, 32, 32, 32, 32, 8, 10

    key = jax.random.PRNGKey(0)
    k_gb, k_ids, k_len, k_txt, k_q, k_h, k_p = jax.random.split(key, 7)

    gb = jax.random.normal(k_gb, (B, Dg), jnp.float32)
    ids = jax.random.randint(k_ids, (B, L), 0, V)
    lengths = jax.random.randint(k_len, (B, 1), 1, L + 1)
    mask = (jnp.arange(L)[None, :] < lengths).astype(jnp.float32)   # [B, L]
    z_text_all = jax.random.normal(k_txt, (Nq, Dt), jnp.float32)
    q_idx = jax.random.randint(k_q, (B,), 0, Nq)
    h_emb = jax.random.normal(k_h, (H, Dh), jnp.float32)

    params = init_params(k_p, V, De, Dg, Dt, Dz, Df, Dh)

    TB, TH = 256, 512
    # One-time static preparation (weight padding / casts / h_emb transpose).
    prep = prepare_static(params, h_emb, z_text_all, th=TH)
    prep = jax.tree_util.tree_map(jax.block_until_ready, prep)

    out = gnimc_forward(gb, ids, mask, q_idx, prep, num_items=H, tb=TB, th=TH)
    out = jax.block_until_ready(out)

    ref = gnimc_reference(gb, ids, mask, z_text_all, q_idx, h_emb, params)
    assert out.shape == (B, H)
    assert jnp.allclose(out, ref, atol=2e-2, rtol=2e-2), "mismatch vs reference"

    print("KERNEL_OK")
</pallas_src>

<mosaic_0001>
module attributes {stable_mosaic.version = 11 : i64} {
  func.func @gnimc_fused_kernel(%arg0: i32, %arg1: i32, %arg2: memref<256x8x128xbf16, #tpu.memory_space<vmem>>, %arg3: memref<256x8xf32, #tpu.memory_space<vmem>>, %arg4: memref<256x128xbf16, #tpu.memory_space<vmem>>, %arg5: memref<256x128xbf16, #tpu.memory_space<vmem>>, %arg6: memref<128x512xbf16, #tpu.memory_space<vmem>>, %arg7: memref<128x128xbf16, #tpu.memory_space<vmem>>, %arg8: memref<128x128xbf16, #tpu.memory_space<vmem>>, %arg9: memref<1x128xf32, #tpu.memory_space<vmem>>, %arg10: memref<128x128xbf16, #tpu.memory_space<vmem>>, %arg11: memref<128x128xbf16, #tpu.memory_space<vmem>>, %arg12: memref<1x128xf32, #tpu.memory_space<vmem>>, %arg13: memref<128x128xbf16, #tpu.memory_space<vmem>>, %arg14: memref<128x128xbf16, #tpu.memory_space<vmem>>, %arg15: memref<1x128xf32, #tpu.memory_space<vmem>>, %arg16: memref<256x512xf32, #tpu.memory_space<vmem>>, %arg17: memref<256x128xbf16, #tpu.memory_space<vmem>>) attributes {dimension_semantics = [#tpu.dimension_semantics<parallel>, #tpu.dimension_semantics<arbitrary>], iteration_bounds = array<i64: 1, 1>, scalar_prefetch = 0 : i64, scratch_operands = 1 : i64, tpu.core_type = #tpu.core_type<tc>, window_params = [{transform_indices = @transform_0, window_bounds = array<i64: 256, 8, 128>}, {transform_indices = @transform_1, window_bounds = array<i64: 256, 8>}, {transform_indices = @transform_2, window_bounds = array<i64: 256, 128>}, {transform_indices = @transform_3, window_bounds = array<i64: 256, 128>}, {transform_indices = @transform_4, window_bounds = array<i64: 128, 512>}, {pipeline_mode = #tpu.pipeline_mode<synchronous>, transform_indices = @transform_5, window_bounds = array<i64: 128, 128>}, {pipeline_mode = #tpu.pipeline_mode<synchronous>, transform_indices = @transform_6, window_bounds = array<i64: 128, 128>}, {pipeline_mode = #tpu.pipeline_mode<synchronous>, transform_indices = @transform_7, window_bounds = array<i64: 1, 128>}, {pipeline_mode = #tpu.pipeline_mode<synchronous>, transform_indices = @transform_8, window_bounds = array<i64: 128, 128>}, {pipeline_mode = #tpu.pipeline_mode<synchronous>, transform_indices = @transform_9, window_bounds = array<i64: 128, 128>}, {pipeline_mode = #tpu.pipeline_mode<synchronous>, transform_indices = @transform_10, window_bounds = array<i64: 1, 128>}, {pipeline_mode = #tpu.pipeline_mode<synchronous>, transform_indices = @transform_11, window_bounds = array<i64: 128, 128>}, {pipeline_mode = #tpu.pipeline_mode<synchronous>, transform_indices = @transform_12, window_bounds = array<i64: 128, 128>}, {pipeline_mode = #tpu.pipeline_mode<synchronous>, transform_indices = @transform_13, window_bounds = array<i64: 1, 128>}, {transform_indices = @transform_14, window_bounds = array<i64: 256, 512>}]} {
    %c0_i32 = arith.constant 0 : i32
    %0 = arith.cmpi eq, %arg1, %c0_i32 : i32
    %1 = arith.extui %0 : i1 to i32
    %c0_i32_0 = arith.constant 0 : i32
    %2 = arith.cmpi ne, %1, %c0_i32_0 : i32
    scf.if %2 {
      %cst_6 = arith.constant 0.000000e+00 : f32
      %7 = vector.broadcast %cst_6 : f32 to vector<256x128xf32>
      %c0_7 = arith.constant 0 : index
      %c0_8 = arith.constant 0 : index
      %c0_9 = arith.constant 0 : index
      %8 = vector.load %arg2[%c0_7, %c0_8, %c0_9] : memref<256x8x128xbf16, #tpu.memory_space<vmem>>, vector<256x8x128xbf16>
      %9 = arith.extf %8 : vector<256x8x128xbf16> to vector<256x8x128xf32>
      %c0_10 = arith.constant 0 : index
      %c0_11 = arith.constant 0 : index
      %10 = vector.load %arg3[%c0_10, %c0_11] : memref<256x8xf32, #tpu.memory_space<vmem>>, vector<256x8xf32>
      %11 = vector.shape_cast %10 : vector<256x8xf32> to vector<256x8x1xf32>
      %12 = vector.broadcast %11 : vector<256x8x1xf32> to vector<256x8x128xf32>
      %13 = arith.mulf %9, %12 : vector<256x8x128xf32>
      %cst_12 = arith.constant dense<0.000000e+00> : vector<256x128xf32>
      %14 = vector.multi_reduction <add>, %13, %cst_12 [1] : vector<256x8x128xf32> to vector<256x128xf32>
      %15 = arith.addf %7, %14 : vector<256x128xf32>
      %c0_13 = arith.constant 0 : index
      %c0_14 = arith.constant 0 : index
      %16 = vector.load %arg3[%c0_13, %c0_14] : memref<256x8xf32, #tpu.memory_space<vmem>>, vector<256x8xf32>
      %cst_15 = arith.constant dense<0.000000e+00> : vector<256xf32>
      %17 = vector.multi_reduction <add>, %16, %cst_15 [1] : vector<256x8xf32> to vector<256xf32>
      %18 = vector.shape_cast %17 : vector<256xf32> to vector<256x1xf32>
      %cst_16 = arith.constant 1.000000e+00 : f32
      %19 = vector.broadcast %cst_16 : f32 to vector<256x1xf32>
      %20 = arith.maximumf %18, %19 : vector<256x1xf32>
      %21 = vector.broadcast %20 : vector<256x1xf32> to vector<256x128xf32>
      %22 = arith.divf %15, %21 : vector<256x128xf32>
      %23 = arith.truncf %22 : vector<256x128xf32> to vector<256x128xbf16>
      %c0_17 = arith.constant 0 : index
      %c0_18 = arith.constant 0 : index
      %24 = vector.load %arg7[%c0_17, %c0_18] : memref<128x128xbf16, #tpu.memory_space<vmem>>, vector<128x128xbf16>
      %cst_19 = arith.constant dense<0.000000e+00> : vector<256x128xf32>
      %25 = tpu.matmul %23, %24, %cst_19 {dimension_numbers = #tpu.dot_dimension_numbers<[1], [0], [0], [1], [0, 0, 1, 1], [], []>} : vector<256x128xbf16>, vector<128x128xbf16>, vector<256x128xf32> -> vector<256x128xf32>
      %c0_20 = arith.constant 0 : index
      %c0_21 = arith.constant 0 : index
      %26 = vector.load %arg4[%c0_20, %c0_21] : memref<256x128xbf16, #tpu.memory_space<vmem>>, vector<256x128xbf16>
      %c0_22 = arith.constant 0 : index
      %c0_23 = arith.constant 0 : index
      %27 = vector.load %arg8[%c0_22, %c0_23] : memref<128x128xbf16, #tpu.memory_space<vmem>>, vector<128x128xbf16>
      %cst_24 = arith.constant dense<0.000000e+00> : vector<256x128xf32>
      %28 = tpu.matmul %26, %27, %cst_24 {dimension_numbers = #tpu.dot_dimension_numbers<[1], [0], [0], [1], [0, 0, 1, 1], [], []>} : vector<256x128xbf16>, vector<128x128xbf16>, vector<256x128xf32> -> vector<256x128xf32>
      %29 = arith.addf %25, %28 : vector<256x128xf32>
      %c0_25 = arith.constant 0 : index
      %c0_26 = arith.constant 0 : index
      %30 = vector.load %arg9[%c0_25, %c0_26] : memref<1x128xf32, #tpu.memory_space<vmem>>, vector<1x128xf32>
      %31 = vector.broadcast %30 : vector<1x128xf32> to vector<256x128xf32>
      %32 = arith.addf %29, %31 : vector<256x128xf32>
      %cst_27 = arith.constant 0.000000e+00 : f32
      %33 = vector.broadcast %cst_27 : f32 to vector<256x128xf32>
      %34 = arith.maximumf %32, %33 : vector<256x128xf32>
      %c0_28 = arith.constant 0 : index
      %c0_29 = arith.constant 0 : index
      %35 = vector.load %arg5[%c0_28, %c0_29] : memref<256x128xbf16, #tpu.memory_space<vmem>>, vector<256x128xbf16>
      %36 = arith.truncf %34 : vector<256x128xf32> to vector<256x128xbf16>
      %c0_30 = arith.constant 0 : index
      %c0_31 = arith.constant 0 : index
      %37 = vector.load %arg10[%c0_30, %c0_31] : memref<128x128xbf16, #tpu.memory_space<vmem>>, vector<128x128xbf16>
      %cst_32 = arith.constant dense<0.000000e+00> : vector<256x128xf32>
      %38 = tpu.matmul %36, %37, %cst_32 {dimension_numbers = #tpu.dot_dimension_numbers<[1], [0], [0], [1], [0, 0, 1, 1], [], []>} : vector<256x128xbf16>, vector<128x128xbf16>, vector<256x128xf32> -> vector<256x128xf32>
      %c0_33 = arith.constant 0 : index
      %c0_34 = arith.constant 0 : index
      %39 = vector.load %arg11[%c0_33, %c0_34] : memref<128x128xbf16, #tpu.memory_space<vmem>>, vector<128x128xbf16>
      %cst_35 = arith.constant dense<0.000000e+00> : vector<256x128xf32>
      %40 = tpu.matmul %35, %39, %cst_35 {dimension_numbers = #tpu.dot_dimension_numbers<[1], [0], [0], [1], [0, 0, 1, 1], [], []>} : vector<256x128xbf16>, vector<128x128xbf16>, vector<256x128xf32> -> vector<256x128xf32>
      %41 = arith.addf %38, %40 : vector<256x128xf32>
      %c0_36 = arith.constant 0 : index
      %c0_37 = arith.constant 0 : index
      %42 = vector.load %arg12[%c0_36, %c0_37] : memref<1x128xf32, #tpu.memory_space<vmem>>, vector<1x128xf32>
      %43 = vector.broadcast %42 : vector<1x128xf32> to vector<256x128xf32>
      %44 = arith.addf %41, %43 : vector<256x128xf32>
      %cst_38 = arith.constant 0.000000e+00 : f32
      %45 = vector.broadcast %cst_38 : f32 to vector<256x128xf32>
      %46 = arith.maximumf %44, %45 : vector<256x128xf32>
      %47 = arith.truncf %46 : vector<256x128xf32> to vector<256x128xbf16>
      %c0_39 = arith.constant 0 : index
      %c0_40 = arith.constant 0 : index
      %48 = vector.load %arg13[%c0_39, %c0_40] : memref<128x128xbf16, #tpu.memory_space<vmem>>, vector<128x128xbf16>
      %cst_41 = arith.constant dense<0.000000e+00> : vector<256x128xf32>
      %49 = tpu.matmul %47, %48, %cst_41 {dimension_numbers = #tpu.dot_dimension_numbers<[1], [0], [0], [1], [0, 0, 1, 1], [], []>} : vector<256x128xbf16>, vector<128x128xbf16>, vector<256x128xf32> -> vector<256x128xf32>
      %c0_42 = arith.constant 0 : index
      %c0_43 = arith.constant 0 : index
      %50 = vector.load %arg14[%c0_42, %c0_43] : memref<128x128xbf16, #tpu.memory_space<vmem>>, vector<128x128xbf16>
      %cst_44 = arith.constant dense<0.000000e+00> : vector<256x128xf32>
      %51 = tpu.matmul %35, %50, %cst_44 {dimension_numbers = #tpu.dot_dimension_numbers<[1], [0], [0], [1], [0, 0, 1, 1], [], []>} : vector<256x128xbf16>, vector<128x128xbf16>, vector<256x128xf32> -> vector<256x128xf32>
      %52 = arith.addf %49, %51 : vector<256x128xf32>
      %c0_45 = arith.constant 0 : index
      %c0_46 = arith.constant 0 : index
      %53 = vector.load %arg15[%c0_45, %c0_46] : memref<1x128xf32, #tpu.memory_space<vmem>>, vector<1x128xf32>
      %54 = vector.broadcast %53 : vector<1x128xf32> to vector<256x128xf32>
      %55 = arith.addf %52, %54 : vector<256x128xf32>
      %56 = arith.truncf %55 : vector<256x128xf32> to vector<256x128xbf16>
      %c0_47 = arith.constant 0 : index
      %c0_48 = arith.constant 0 : index
      %57 = vector.load %arg17[%c0_47, %c0_48] : memref<256x128xbf16, #tpu.memory_space<vmem>>, vector<256x128xbf16>
      tpu.vector_store %arg17[%c0_47, %c0_48], %56 {strides = array<i32>} : memref<256x128xbf16, #tpu.memory_space<vmem>>, vector<256x128xbf16>,
    } else {
    }
    %c0 = arith.constant 0 : index
    %c0_1 = arith.constant 0 : index
    %3 = vector.load %arg17[%c0, %c0_1] : memref<256x128xbf16, #tpu.memory_space<vmem>>, vector<256x128xbf16>
    %c0_2 = arith.constant 0 : index
    %c0_3 = arith.constant 0 : index
    %4 = vector.load %arg6[%c0_2, %c0_3] : memref<128x512xbf16, #tpu.memory_space<vmem>>, vector<128x512xbf16>
    %cst = arith.constant dense<0.000000e+00> : vector<256x512xf32>
    %5 = tpu.matmul %3, %4, %cst {dimension_numbers = #tpu.dot_dimension_numbers<[1], [0], [0], [1], [0, 0, 1, 1], [], []>} : vector<256x128xbf16>, vector<128x512xbf16>, vector<256x512xf32> -> vector<256x512xf32>
    %c0_4 = arith.constant 0 : index
    %c0_5 = arith.constant 0 : index
    %6 = vector.load %arg16[%c0_4, %c0_5] : memref<256x512xf32, #tpu.memory_space<vmem>>, vector<256x512xf32>
    tpu.vector_store %arg16[%c0_4, %c0_5], %5 {strides = array<i32>} : memref<256x512xf32, #tpu.memory_space<vmem>>, vector<256x512xf32>,
    return
  }
  func.func @transform_0(%arg0: i32, %arg1: i32) -> (i32, i32, i32) {
    %c0_i32 = arith.constant 0 : i32
    %c0_i32_0 = arith.constant 0 : i32
    %c0_i32_1 = arith.constant 0 : i32
    return %arg0, %c0_i32, %c0_i32_0 : i32, i32, i32
  }
  func.func @transform_1(%arg0: i32, %arg1: i32) -> (i32, i32) {
    %c0_i32 = arith.constant 0 : i32
    %c0_i32_0 = arith.constant 0 : i32
    return %arg0, %c0_i32 : i32, i32
  }
  func.func @transform_2(%arg0: i32, %arg1: i32) -> (i32, i32) {
    %c0_i32 = arith.constant 0 : i32
    %c0_i32_0 = arith.constant 0 : i32
    return %arg0, %c0_i32 : i32, i32
  }
  func.func @transform_3(%arg0: i32, %arg1: i32) -> (i32, i32) {
    %c0_i32 = arith.constant 0 : i32
    %c0_i32_0 = arith.constant 0 : i32
    return %arg0, %c0_i32 : i32, i32
  }
  func.func @transform_4(%arg0: i32, %arg1: i32) -> (i32, i32) {
    %c0_i32 = arith.constant 0 : i32
    %c0_i32_0 = arith.constant 0 : i32
    return %c0_i32, %arg1 : i32, i32
  }
  func.func @transform_5(%arg0: i32, %arg1: i32) -> (i32, i32) {
    %c0_i32 = arith.constant 0 : i32
    %c0_i32_0 = arith.constant 0 : i32
    %c0_i32_1 = arith.constant 0 : i32
    return %c0_i32, %c0_i32_0 : i32, i32
  }
  func.func @transform_6(%arg0: i32, %arg1: i32) -> (i32, i32) {
    %c0_i32 = arith.constant 0 : i32
    %c0_i32_0 = arith.constant 0 : i32
    %c0_i32_1 = arith.constant 0 : i32
    return %c0_i32, %c0_i32_0 : i32, i32
  }
  func.func @transform_7(%arg0: i32, %arg1: i32) -> (i32, i32) {
    %c0_i32 = arith.constant 0 : i32
    %c0_i32_0 = arith.constant 0 : i32
    %c0_i32_1 = arith.constant 0 : i32
    return %c0_i32, %c0_i32_0 : i32, i32
  }
  func.func @transform_8(%arg0: i32, %arg1: i32) -> (i32, i32) {
    %c0_i32 = arith.constant 0 : i32
    %c0_i32_0 = arith.constant 0 : i32
    %c0_i32_1 = arith.constant 0 : i32
    return %c0_i32, %c0_i32_0 : i32, i32
  }
  func.func @transform_9(%arg0: i32, %arg1: i32) -> (i32, i32) {
    %c0_i32 = arith.constant 0 : i32
    %c0_i32_0 = arith.constant 0 : i32
    %c0_i32_1 = arith.constant 0 : i32
    return %c0_i32, %c0_i32_0 : i32, i32
  }
  func.func @transform_10(%arg0: i32, %arg1: i32) -> (i32, i32) {
    %c0_i32 = arith.constant 0 : i32
    %c0_i32_0 = arith.constant 0 : i32
    %c0_i32_1 = arith.constant 0 : i32
    return %c0_i32, %c0_i32_0 : i32, i32
  }
  func.func @transform_11(%arg0: i32, %arg1: i32) -> (i32, i32) {
    %c0_i32 = arith.constant 0 : i32
    %c0_i32_0 = arith.constant 0 : i32
    %c0_i32_1 = arith.constant 0 : i32
    return %c0_i32, %c0_i32_0 : i32, i32
  }
  func.func @transform_12(%arg0: i32, %arg1: i32) -> (i32, i32) {
    %c0_i32 = arith.constant 0 : i32
    %c0_i32_0 = arith.constant 0 : i32
    %c0_i32_1 = arith.constant 0 : i32
    return %c0_i32, %c0_i32_0 : i32, i32
  }
  func.func @transform_13(%arg0: i32, %arg1: i32) -> (i32, i32) {
    %c0_i32 = arith.constant 0 : i32
    %c0_i32_0 = arith.constant 0 : i32
    %c0_i32_1 = arith.constant 0 : i32
    return %c0_i32, %c0_i32_0 : i32, i32
  }
  func.func @transform_14(%arg0: i32, %arg1: i32) -> (i32, i32) {
    %c0_i32 = arith.constant 0 : i32
    return %arg0, %arg1 : i32, i32
  }
}

</mosaic_0001>

<bundles_post_ra>
// kernel: gnimc_forward.1
= control target key start
LH: loop header
LB: loop body
LE: loop exit
PB: predicated region body
PF: predicated region fallthrough
CT: control target
= control target key end

     0   :  { %vm4436_vm0 = vcmask 64512   ;;  %v596_v8 = vlaneseq  ;;  %vm6727_vm1 = vcmask 1041409   ;;  %vm6730_vm2 = vcmask 1042434   ;;  %s17479_s1 = inlined_call_operand.vmem [shape: f32[256,8], index: 1, kind: input, shape index: {}]   ;;  %s17480_s6 = inlined_call_operand.vmem [shape: bf16[128,128], index: 6, kind: input, shape index: {}]   ;;  %s17481_s5 = inlined_call_operand.vmem [shape: bf16[128,128], index: 5, kind: input, shape index: {}]   ;;  %s17482_s0 = inlined_call_operand.vmem [shape: bf16[256,8,128], index: 0, kind: input, shape index: {}]   ;;  %s17483_s2 = inlined_call_operand.vmem [shape: bf16[256,128], index: 2, kind: input, shape index: {}]   ;;  %s17484_s9 = inlined_call_operand.vmem [shape: bf16[128,128], index: 9, kind: input, shape index: {}]   ;;  %s17485_s3 = inlined_call_operand.vmem [shape: bf16[256,128], index: 3, kind: input, shape index: {}]   ;;  %s17486_s8 = inlined_call_operand.vmem [shape: bf16[128,128], index: 8, kind: input, shape index: {}]   ;;  %s17487_s7 = inlined_call_operand.vmem [shape: f32[1,128], index: 7, kind: input, shape index: {}]   ;;  %s17488_s10 = inlined_call_operand.vmem [shape: f32[1,128], index: 10, kind: input, shape index: {}]   ;;  %s17489_s12 = inlined_call_operand.vmem [shape: bf16[128,128], index: 12, kind: input, shape index: {}]   ;;  %s17490_s11 = inlined_call_operand.vmem [shape: bf16[128,128], index: 11, kind: input, shape index: {}]   ;;  %s17491_s4 = inlined_call_operand.vmem [shape: bf16[128,512], index: 4, kind: input, shape index: {}]   ;;  %s17492_s13 = inlined_call_operand.vmem [shape: f32[1,128], index: 13, kind: input, shape index: {}]   ;;  %s17493_s14 = inlined_call_operand.vmem [shape: f32[256,512], index: 14, kind: output, shape index: {}]  }
   0x1   :  { %v11482_v0 = vld [vmem:[%s17479_s1 + $0x10] sm:$0xff]  ;;  %v11487_v1 = vld [vmem:[%s17479_s1] sm:$0xff]  ;;  %v11492_v2 = vld [vmem:[%s17479_s1 + $0x18] sm:$0xff]  ;;  %vm6733_vm3 = vcmask 1043459   ;;  %vm6736_vm4 = vcmask 1044484   ;;  %vm6739_vm5 = vcmask 1045509  }
   0x2   :  { %v4443_v3 = vsel %vm4436_vm0, %v11482_v0, 0.0  ;;  %v4437_v4 = vsel %vm4436_vm0, %v11487_v1, 0.0  ;;  %v11501_v5 = vld [vmem:[%s17479_s1 + $0x8] sm:$0xff]  ;;  %v4446_v6 = vsel %vm4436_vm0, %v11492_v2, 0.0  ;;  %v11507_v9 = vshrl.u32 %v596_v8, 7  ;;  %v11530_v18 = vld [vmem:[%s17479_s1 + $0x20] sm:$0xff] }
   0x3   :  { %4444 = vadd.xlane.f32.xlu1 %v4443_v3  ;;  %4438 = vadd.xlane.f32.xlu0 %v4437_v4  ;;  %v4440_v7 = vsel %vm4436_vm0, %v11501_v5, 0.0  ;;  %v4449_v19 = vsel %vm4436_vm0, %v11530_v18, 0.0  ;;  %v11537_v20 = vld [vmem:[%s17479_s1 + $0x28] sm:$0xff]  ;;  %v11562_v30 = vld [vmem:[%s17479_s1 + $0x30] sm:$0xff]  ;;  %v11569_v32 = vld [vmem:[%s17479_s1 + $0x38] sm:$0xff]  ;;  %vm6742_vm6 = vcmask 1046534  }
   0x4   :  { %v11510_v10 = vsub.s32 1, %v11507_v9  ;;  %v11515_v12 = vsub.s32 2, %v11507_v9  ;;  %17603 = vst [vmem:[#allocation5_spill] sm:$0xff] %v11537_v20  ;;  %v4452_v21 = vsel %vm4436_vm0, %v11537_v20, 0.0  ;;  %v11542_v22 = vsub.s32 0, %v11507_v9  ;;  %17606 = vst [vmem:[#allocation8_spill] sm:$0xff] %v11569_v32 }
   0x5   :  { %v11545_v23 = vsub.s32 3, %v11507_v9  ;;  %v4455_v31 = vsel %vm4436_vm0, %v11562_v30, 0.0  ;;  %v4458_v33 = vsel %vm4436_vm0, %v11569_v32, 0.0  ;;  %v11574_v34 = vsub.s32 4, %v11507_v9  ;;  %v10708_v8 = vld [vmem:[%s17480_s6 + $0x10] sm:$0xff]  }
   0x6   :  { %17601 = vst [vmem:[#allocation3_spill] sm:$0xff] %v11510_v10  ;;  %v662_v11 = vrot.slane %v11501_v5, %v11510_v10  ;;  %17602 = vst [vmem:[#allocation4_spill] sm:$0xff] %v11515_v12  ;;  %v613_v13 = vrot.slane %v11487_v1, %v11515_v12  ;;  %v606_v14 = vrot.slane %v11487_v1, %v11510_v10  ;;  %v11587_v40 = vsub.s32 5, %v11507_v9 }
   0x7   :  { %4447 = vadd.xlane.f32.xlu1 %v4446_v6  ;;  %4441 = vadd.xlane.f32.xlu0 %v4440_v7  ;;  %v669_v15 = vrot.slane %v11501_v5, %v11515_v12  ;;  %v718_v16 = vrot.slane %v11482_v0, %v11510_v10  ;;  %v774_v17 = vrot.slane %v11492_v2, %v11510_v10  ;;  %v11598_v45 = vsub.s32 6, %v11507_v9  ;;  %v10707_v6 = vld [vmem:[%s17481_s5 + $0x8] sm:$0xff]  }
   0x8   :  { %17604 = vst [vmem:[#allocation6_spill] sm:$0xff] %v11542_v22  ;;  %17605 = vst [vmem:[#allocation7_spill] sm:$0xff] %v11545_v23  ;;  %v599_v24 = vrot.slane %v11487_v1, %v11542_v22  ;;  %v620_v25 = vrot.slane %v11487_v1, %v11545_v23  ;;  %v655_v26 = vrot.slane %v11501_v5, %v11542_v22  ;;  %v11609_v50 = vsub.s32 7, %v11507_v9  ;;  %v10709_v9 = vld [vmem:[%s17481_s5 + $0x10] sm:$0xff]  }
   0x9   :  { %v676_v27 = vrot.slane %v11501_v5, %v11545_v23  ;;  %v725_v28 = vrot.slane %v11482_v0, %v11515_v12  ;;  %v781_v29 = vrot.slane %v11492_v2, %v11515_v12  ;;  %17607 = vst [vmem:[#allocation9_spill] sm:$0xff] %v11574_v34  ;;  %v627_v35 = vrot.slane %v11487_v1, %v11574_v34 }
   0xa   :  { %v683_v36 = vrot.slane %v11501_v5, %v11574_v34  ;;  %v711_v37 = vrot.slane %v11482_v0, %v11542_v22  ;;  %v732_v38 = vrot.slane %v11482_v0, %v11545_v23  ;;  %v767_v39 = vrot.slane %v11492_v2, %v11542_v22 }
   0xb   :  { %v788_v41 = vrot.slane %v11492_v2, %v11545_v23  ;;  %v634_v42 = vrot.slane %v11487_v1, %v11587_v40  ;;  %v690_v43 = vrot.slane %v11501_v5, %v11587_v40  ;;  %v739_v44 = vrot.slane %v11482_v0, %v11574_v34 }
   0xc   :  { %v795_v46 = vrot.slane %v11492_v2, %v11574_v34  ;;  %v641_v47 = vrot.slane %v11487_v1, %v11598_v45  ;;  %v697_v48 = vrot.slane %v11501_v5, %v11598_v45  ;;  %v746_v49 = vrot.slane %v11482_v0, %v11587_v40 }
   0xd   :  { %v802_v51 = vrot.slane %v11492_v2, %v11587_v40  ;;  %v648_v52 = vrot.slane %v11487_v1, %v11609_v50  ;;  %v704_v53 = vrot.slane %v11501_v5, %v11609_v50  ;;  %v753_v54 = vrot.slane %v11482_v0, %v11598_v45  ;;  %v10705_v1 = vld [vmem:[%s17481_s5] sm:$0xff]   ;;  %v10706_v5 = vld [vmem:[%s17480_s6 + $0x8] sm:$0xff]  }
   0xe   :  { %v809_v55 = vrot.slane %v11492_v2, %v11598_v45  ;;  %v760_v56 = vrot.slane %v11482_v0, %v11609_v50  ;;  %v816_v57 = vrot.slane %v11492_v2, %v11609_v50  ;;  %v830_v58 = vrot.slane %v11530_v18, %v11510_v10  ;;  %v10704_v0 = vld [vmem:[%s17480_s6] sm:$0xff]   ;;  %10367 = vmatprep.subr.bf16.mxu0 %v10705_v1 }
   0xf   :  { %v886_v59 = vrot.slane %v11537_v20, %v11510_v10  ;;  %v837_v60 = vrot.slane %v11530_v18, %v11515_v12  ;;  %v893_v61 = vrot.slane %v11537_v20, %v11515_v12  ;;  %v942_v62 = vrot.slane %v11562_v30, %v11510_v10  ;;  %10319 = vmatprep.subr.bf16.mxu1 %v10704_v0 }
  0x10   :  { %v998_v63 = vrot.slane %v11569_v32, %v11510_v10  ;;  %10320 = vmatpush3.bf16.msra.mxu1 %v10704_v0  ;;  %10368 = vmatpush3.bf16.msra.mxu0 %v10705_v1  ;;  %vm6745_vm7 = vcmask 1047559  }
  0x11   :  { %10321 = vmatprep.subr.bf16.mxu1 %v10706_v5  ;;  %10369 = vmatprep.subr.bf16.mxu0 %v10707_v6 }
  0x14   :  { %10322 = vmatpush3.bf16.msra.mxu1 %v10706_v5  ;;  %10370 = vmatpush3.bf16.msra.mxu0 %v10707_v6  ;;  %v11753_v6 = vld [vmem:[%s17482_s0 + $0x48] sm:$0xff]  }
  0x15   :  { %10323 = vmatprep.subr.bf16.mxu1 %v10708_v8  ;;  %10371 = vmatprep.subr.bf16.mxu0 %v10709_v9 }
  0x18   :  { %664 = vbcast.lane.b32.xlu1 %v662_v11, 256  ;;  %v11662_v11 = vld [vmem:[%s17482_s0 + $0x20] sm:$0xff]   ;;  %10324 = vmatpush3.bf16.msra.mxu1 %v10708_v8 }
  0x19   :  { %10372 = vmatpush3.bf16.msra.mxu0 %v10709_v9 }
  0x1c   :  { %615 = vbcast.lane.b32.xlu1 %v613_v13, 256 }
  0x1d   :  { %608 = vbcast.lane.b32.xlu0 %v606_v14, 256  ;;  %v11667_v14 = vld [vmem:[%s17482_s0] sm:$0xff]  }
  0x20   :  { %671 = vbcast.lane.b32.xlu1 %v669_v15, 256  ;;  %v9555_v15 = vunpack.c.h.bf16 %v11662_v11 }
  0x21   :  { %720 = vbcast.lane.b32.xlu0 %v718_v16, 256 }
  0x24   :  { %776 = vbcast.lane.b32.xlu1 %v774_v17, 256  ;;  %v11673_v17 = vld [vmem:[%s17479_s1 + $0x40] sm:$0xff] }
  0x40   :  { %4450 = vadd.xlane.f32.xlu0 %v4449_v19  ;;  %v9539_v19 = vunpack.c.h.bf16 %v11667_v14 }
  0x48   :  { %4453 = vadd.xlane.f32.xlu1 %v4452_v21  ;;  %v11679_v21 = vld [vmem:[%s17482_s0 + $0x8] sm:$0xff]  }
  0x56   :  { %601 = vbcast.lane.b32.xlu0 %v599_v24, 256  ;;  %v10710_v24 = vld [vmem:[%s17480_s6 + $0x18] sm:$0xff]  }
  0x57   :  { %10325 = vmatprep.subr.bf16.mxu1 %v10710_v24 }
  0x58   :  { %10326 = vmatpush3.bf16.msra.mxu1 %v10710_v24 }
  0x59   :  { %622 = vbcast.lane.b32.xlu1 %v620_v25, 256  ;;  %v10711_v25 = vld [vmem:[%s17481_s5 + $0x18] sm:$0xff]  }
  0x5a   :  { %657 = vbcast.lane.b32.xlu0 %v655_v26, 256  ;;  %v11690_v26 = vld [vmem:[%s17482_s0 + $0x40] sm:$0xff]   ;;  %10373 = vmatprep.subr.bf16.mxu0 %v10711_v25 }
  0x5b   :  { %10374 = vmatpush3.bf16.msra.mxu0 %v10711_v25 }
  0x5d   :  { %678 = vbcast.lane.b32.xlu1 %v676_v27, 256  ;;  %v4461_v27 = vsel %vm4436_vm0, %v11673_v17, 0.0 }
  0x5e   :  { %727 = vbcast.lane.b32.xlu0 %v725_v28, 256 }
  0x61   :  { %783 = vbcast.lane.b32.xlu1 %v781_v29, 256 }
  0x7d   :  { %4456 = vadd.xlane.f32.xlu0 %v4455_v31  ;;  %v9542_v31 = vunpack.c.l.bf16 %v11679_v21 }
  0x85   :  { %4459 = vadd.xlane.f32.xlu1 %v4458_v33  ;;  %v10712_v33 = vld [vmem:[%s17480_s6 + $0x20] sm:$0xff]  }
  0x86   :  { %10327 = vmatprep.subr.bf16.mxu1 %v10712_v33 }
  0x87   :  { %10328 = vmatpush3.bf16.msra.mxu1 %v10712_v33 }
  0x90   :  { %v11643_v2 = vpop.xlane.xlu1 %4444  ;;  %v4439_v3 = vpop.xlane.xlu0 %4438 }
  0x93   :  { %629 = vbcast.lane.b32.xlu0 %v627_v35, 256  ;;  %v10713_v35 = vld [vmem:[%s17481_s5 + $0x20] sm:$0xff]  }
  0x94   :  { %v11645_v4 = vpop.xlane.xlu1 %4447  ;;  %v4442_v7 = vpop.xlane.xlu0 %4441  ;;  %10375 = vmatprep.subr.bf16.mxu0 %v10713_v35 }
  0x95   :  { %10376 = vmatpush3.bf16.msra.mxu0 %v10713_v35 }
  0x96   :  { %685 = vbcast.lane.b32.xlu1 %v683_v36, 256 }
  0x97   :  { %713 = vbcast.lane.b32.xlu0 %v711_v37, 256  ;;  %v9571_v37 = vunpack.c.h.bf16 %v11690_v26 }
  0x98   :  { %v665_v13 = vpop.permute.xlu1 %664  ;;  %v609_v16 = vpop.permute.xlu0 %608 }
  0x99   :  { %v2397_v28 = vmul.f32 %v9555_v15, %v665_v13  ;;  %v2389_v36 = vmul.f32 %v9539_v19, %v609_v16  ;;  %v9538_v16 = vunpack.c.l.bf16 %v11667_v14  ;;  %v9554_v19 = vunpack.c.l.bf16 %v11662_v11 }
  0x9a   :  { %734 = vbcast.lane.b32.xlu1 %v732_v38, 256  ;;  %v11705_v38 = vld [vmem:[%s17479_s1 + $0x48] sm:$0xff] }
  0x9b   :  { %769 = vbcast.lane.b32.xlu0 %v767_v39, 256  ;;  %v10714_v39 = vld [vmem:[%s17480_s6 + $0x28] sm:$0xff]  }
  0x9c   :  { %v616_v29 = vpop.permute.xlu1 %615  ;;  %10329 = vmatprep.subr.bf16.mxu1 %v10714_v39 }
  0x9d   :  { %10330 = vmatpush3.bf16.msra.mxu1 %v10714_v39  ;;  %v823_v39 = vrot.slane %v11530_v18, %v11542_v22 }
  0x9e   :  { %790 = vbcast.lane.b32.xlu1 %v788_v41, 256  ;;  %v10715_v41 = vld [vmem:[%s17481_s5 + $0x28] sm:$0xff]  }
  0x9f   :  { %636 = vbcast.lane.b32.xlu0 %v634_v42, 256  ;;  %v11713_v42 = vmax.f32 %v4439_v3, 1.0  ;;  %10377 = vmatprep.subr.bf16.mxu0 %v10715_v41  ;;  %v10719_v3 = vld [vmem:[%s17481_s5 + $0x38] sm:$0xff]  }
  0xa0   :  { %10378 = vmatpush3.bf16.msra.mxu0 %v10715_v41  ;;  %v844_v41 = vrot.slane %v11530_v18, %v11545_v23 }
  0xa2   :  { %692 = vbcast.lane.b32.xlu1 %v690_v43, 256  ;;  %v721_v43 = vpop.permute.xlu0 %720 }
  0xa3   :  { %741 = vbcast.lane.b32.xlu0 %v739_v44, 256  ;;  %v11715_v44 = vmax.f32 %v4442_v7, 1.0  ;;  %v11758_v7 = vld [vmem:[%s17482_s0 + $0x68] sm:$0xff]  }
  0xa5   :  { %v4607_v35 = vrot.slane %v11715_v44, 4 }
  0xa6   :  { %797 = vbcast.lane.b32.xlu1 %v795_v46, 256  ;;  %v11720_v46 = vld [vmem:[%s17482_s0 + $0x28] sm:$0xff]  }
  0xa7   :  { %643 = vbcast.lane.b32.xlu0 %v641_v47, 256  ;;  %v2698_v47 = vrot.slane %v2397_v28, 4 }
  0xa9   :  { %v2699_v0 = vadd.f32 %v2698_v47, %v2397_v28 }
  0xaa   :  { %699 = vbcast.lane.b32.xlu1 %v697_v48, 256  ;;  %v2390_v48 = vmul.f32 %v9542_v31, %v616_v29  ;;  %v10721_v29 = vld [vmem:[%s17483_s2 + $0x8] sm:$0xff]  }
  0xab   :  { %748 = vbcast.lane.b32.xlu0 %v746_v49, 256  ;;  %v4464_v49 = vsel %vm4436_vm0, %v11705_v38, 0.0  ;;  %v2700_v13 = vrot.slane %v2699_v0, 2 }
  0xad   :  { %v2701_v47 = vadd.f32 %v2700_v13, %v2699_v0  ;;  %v4605_v0 = vrot.slane %v11715_v44, 2 }
  0xae   :  { %804 = vbcast.lane.b32.xlu1 %v802_v51, 256  ;;  %v10716_v51 = vld [vmem:[%s17480_s6 + $0x30] sm:$0xff]  }
  0xaf   :  { %650 = vbcast.lane.b32.xlu0 %v648_v52, 256  ;;  %v2650_v52 = vrot.slane %v2389_v36, 4  ;;  %10331 = vmatprep.subr.bf16.mxu1 %v10716_v51 }
  0xb0   :  { %10332 = vmatpush3.bf16.msra.mxu1 %v10716_v51  ;;  %v11785_v51 = vld [vmem:[%s17482_s0 + $0x10] sm:$0xff]  }
  0xb1   :  { %v2651_v1 = vadd.f32 %v2650_v52, %v2389_v36 }
  0xb2   :  { %706 = vbcast.lane.b32.xlu1 %v704_v53, 256  ;;  %v2405_v53 = vmul.f32 %v9571_v37, %v721_v43  ;;  %v879_v43 = vrot.slane %v11537_v20, %v11542_v22 }
  0xb3   :  { %755 = vbcast.lane.b32.xlu0 %v753_v54, 256  ;;  %v10717_v54 = vld [vmem:[%s17481_s5 + $0x30] sm:$0xff]   ;;  %v2652_v15 = vrot.slane %v2651_v1, 2 }
  0xb4   :  { %10379 = vmatprep.subr.bf16.mxu0 %v10717_v54 }
  0xb5   :  { %10380 = vmatpush3.bf16.msra.mxu0 %v10717_v54  ;;  %v2653_v52 = vadd.f32 %v2652_v15, %v2651_v1  ;;  %v11796_v1 = vmax.f32 %v11645_v4, 1.0 }
  0xb6   :  { %811 = vbcast.lane.b32.xlu1 %v809_v55, 256  ;;  %v11731_v55 = vmax.f32 %v11643_v2, 1.0  ;;  %v2746_v2 = vrot.slane %v2405_v53, 4  ;;  %10381 = vmatprep.subr.bf16.mxu0 %v10719_v3 }
  0xb7   :  { %762 = vbcast.lane.b32.xlu0 %v760_v56, 256  ;;  %v4597_v56 = vrot.slane %v11713_v42, 1 }
  0xb8   :  { %v2747_v25 = vadd.f32 %v2746_v2, %v2405_v53  ;;  %v4598_v53 = vrot.slane %v11713_v42, 2  ;;  %v2702_v2 = vrot.slane %v2701_v47, 1 }
  0xb9   :  { %10382 = vmatpush3.bf16.msra.mxu0 %v10719_v3  ;;  %v4600_v3 = vrot.slane %v11713_v42, 4 }
  0xba   :  { %818 = vbcast.lane.b32.xlu1 %v816_v57, 256  ;;  %v672_v57 = vpop.permute.xlu1 %671 }
  0xbb   :  { %832 = vbcast.lane.b32.xlu0 %v830_v58, 256  ;;  %v9558_v58 = vunpack.c.l.bf16 %v11720_v46 }
  0xbd   :  { %v2398_v5 = vmul.f32 %v9558_v58, %v672_v57  ;;  %v2748_v57 = vrot.slane %v2747_v25, 2  ;;  %v4611_v58 = vrot.slane %v11731_v55, 1 }
  0xbe   :  { %888 = vbcast.lane.b32.xlu1 %v886_v59, 256  ;;  %v11738_v59 = vld [vmem:[%s17482_s0 + $0x60] sm:$0xff]   ;;  %v777_v9 = vpop.permute.xlu1 %776 }
  0xbf   :  { %839 = vbcast.lane.b32.xlu0 %v837_v60, 256  ;;  %v4604_v60 = vrot.slane %v11715_v44, 1  ;;  %v9587_v8 = vunpack.c.h.bf16 %v11738_v59 }
  0xc1   :  { %v2413_v31 = vmul.f32 %v9587_v8, %v777_v9  ;;  %10832 = vrcp.f32 %v4604_v60  ;;  %v2749_v9 = vadd.f32 %v2748_v57, %v2747_v25  ;;  %v4606_v25 = vrot.slane %v11715_v44, 3 }
  0xc2   :  { %895 = vbcast.lane.b32.xlu1 %v893_v61, 256  ;;  %v10720_v61 = vld [vmem:[%s17483_s2] sm:$0xff]   ;;  %10834 = vrcp.f32 %v4597_v56 }
  0xc3   :  { %944 = vbcast.lane.b32.xlu0 %v942_v62, 256  ;;  %v2656_v62 = vrot.slane %v2390_v48, 4  ;;  %10335 = vmatprep.mubr.bf16.mxu1 %v10720_v61  ;;  %v2794_v56 = vrot.slane %v2413_v31, 4  ;;  %v1005_v61 = vrot.slane %v11569_v32, %v11515_v12  ;;  %10836 = vrcp.f32 %v11713_v42 }
  0xc4   :  { %10838 = vrcp.f32 %v11731_v55 }
  0xc5   :  { %v2657_v24 = vadd.f32 %v2656_v62, %v2390_v48  ;;  %v900_v48 = vrot.slane %v11537_v20, %v11545_v23  ;;  %v4599_v62 = vrot.slane %v11713_v42, 3  ;;  %10840 = vrcp.f32 %v4598_v53 }
  0xc6   :  { %1000 = vbcast.lane.b32.xlu1 %v998_v63, 256  ;;  %v10718_v63 = vld [vmem:[%s17480_s6 + $0x38] sm:$0xff]   ;;  %10842 = vrcp.f32 %v4611_v58  ;;  %v2703_v53 = vadd.f32 %v2702_v2, %v2701_v47  ;;  %v2750_v58 = vrot.slane %v2749_v9, 1 }
  0xc7   :  { %10333 = vmatprep.subr.bf16.mxu1 %v10718_v63  ;;  %v2658_v54 = vrot.slane %v2657_v24, 2  ;;  %10844 = vrcp.f32 %v11715_v44 }
  0xc8   :  { %10334 = vmatpush3.bf16.msra.mxu1 %v10718_v63  ;;  %v4612_v63 = vrot.slane %v11731_v55, 2  ;;  %10846 = vrcp.f32 %v4605_v0  ;;  %v4622_v0 = vrot.slane %v11796_v1, 5  ;;  %v2751_v47 = vadd.f32 %v2750_v58, %v2749_v9 }
  0xc9   :  { %v2659_v8 = vadd.f32 %v2658_v54, %v2657_v24  ;;  %v4618_v24 = vrot.slane %v11796_v1, 1 }
  0xcb   :  { %10336 = vmatmul.mubr.bf16.vlgmr.msra.gmra.mrb[0].mxu1 %v10721_v29  ;;  %v2660_v57 = vrot.slane %v2659_v8, 1  ;;  %10848 = vrcp.f32 %v4618_v24 }
  0xcc   :  { %10850 = vrcp.f32 %v4599_v62 }
  0xcd   :  { %v11770_v37 = vpop.xlane.xlu0 %4450  ;;  %v2661_v33 = vadd.f32 %v2660_v57, %v2659_v8  ;;  %10852 = vrcp.f32 %v4612_v63  ;;  %v4617_v8 = vrot.slane %v11731_v55, 7 }
  0xce   :  { %17608 = vst [vmem:[#allocation10_spill] sm:$0xff] %v11770_v37  ;;  %10854 = vrcp.f32 %v4606_v25  ;;  %v17610_v25 = vrot.slane %v11731_v55, 3 }
  0xd1   :  { %v602_v13 = vpop.permute.xlu0 %601 }
  0xd5   :  { %v11802_v36 = vpop.xlane.xlu1 %4453  ;;  %v658_v2 = vpop.permute.xlu0 %657 }
  0xd6   :  { %17609 = vst [vmem:[#allocation11_spill] sm:$0xff] %v11802_v36  ;;  %v2396_v14 = vmul.f32 %v9554_v19, %v658_v2 }
  0xd9   :  { %v623_v29 = vpop.permute.xlu1 %622 }
  0xdd   :  { %v679_v2 = vpop.permute.xlu1 %678 }
  0xe2   :  { %4462 = vadd.xlane.f32.xlu0 %v4461_v27  ;;  %v2704_v27 = vrot.slane %v2398_v5, 4 }
  0xe4   :  { %v2705_v60 = vadd.f32 %v2704_v27, %v2398_v5  ;;  %v2654_v5 = vrot.slane %v2653_v52, 1  ;;  %v2795_v27 = vadd.f32 %v2794_v56, %v2413_v31  ;;  %v10833_v31 = vpop.eup %10832  ;;  %v4619_v56 = vrot.slane %v11796_v1, 2 }
  0xe6   :  { %v2706_v15 = vrot.slane %v2705_v60, 2  ;;  %v2655_v54 = vadd.f32 %v2654_v5, %v2653_v52  ;;  %v2796_v4 = vrot.slane %v2795_v27, 2  ;;  %v5096_v5 = vmul.f32 %v10833_v31, %v2703_v53 }
  0xe7   :  { %10856 = vrcp.f32 %v4619_v56 }
  0xe8   :  { %v2707_v28 = vadd.f32 %v2706_v15, %v2705_v60  ;;  %v2388_v60 = vmul.f32 %v9538_v16, %v602_v13  ;;  %v2797_v24 = vadd.f32 %v2796_v4, %v2795_v27  ;;  %v4616_v16 = vrot.slane %v11731_v55, 6  ;;  %v11919_v4 = vld [vmem:[%s17479_s1 + $0x50] sm:$0xff] }
  0xe9   :  { %v5598_v19 = vpack.c.bf16 %v5096_v5, %v5096_v5  ;;  %10858 = vrcp.f32 %v4600_v3  ;;  %17625 = vst [vmem:[#allocation15_spill] sm:$0xff] %v11919_v4 }
  0xea   :  { %4465 = vadd.xlane.f32.xlu1 %v4464_v49  ;;  %v949_v49 = vrot.slane %v11562_v30, %v11515_v12  ;;  %v2708_v53 = vrot.slane %v2707_v28, 1  ;;  %v2644_v27 = vrot.slane %v2388_v60, 4  ;;  %v2798_v58 = vrot.slane %v2797_v24, 1 }
  0xeb   :  { %10860 = vrcp.f32 %v4607_v35  ;;  %v17611_v35 = vunpack.c.h.bf16 %v11679_v21  ;;  %v17640_v12 = vrot.slane %v11715_v44, 6 }
  0xec   :  { %10862 = vrcp.f32 %v11796_v1  ;;  %v2799_v5 = vadd.f32 %v2798_v58, %v2797_v24 }
  0xed   :  { %10864 = vrcp.f32 %v17610_v25 }
  0xf8   :  { %825 = vbcast.lane.b32.xlu0 %v823_v39, 256  ;;  %v10835_v39 = vpop.eup %10834 }
  0xf9   :  { %v11824_v15 = vpop.eup %10836 }
  0xfa   :  { %v11826_v52 = vpop.eup %10838 }
  0xfb   :  { %846 = vbcast.lane.b32.xlu1 %v844_v41, 256  ;;  %v11821_v41 = vld [vmem:[%s17482_s0 + $0x30] sm:$0xff]   ;;  %v10841_v13 = vpop.eup %10840 }
  0xfc   :  { %881 = vbcast.lane.b32.xlu0 %v879_v43, 256  ;;  %v5080_v43 = vmul.f32 %v10835_v39, %v2655_v54  ;;  %v10843_v11 = vpop.eup %10842  ;;  %v5082_v54 = vmul.f32 %v10841_v13, %v2661_v33  ;;  %v2692_v39 = vrot.slane %v2396_v14, 4 }
  0xfd   :  { %v5112_v63 = vmul.f32 %v10843_v11, %v2751_v47  ;;  %v11842_v57 = vpop.eup %10844  ;;  %v11852_v47 = vunpack.c.l.b16 %v5598_v19 }
  0xfe   :  { %v5590_v31 = vpack.c.bf16 %v5080_v43, %v5080_v43  ;;  %v728_v43 = vpop.permute.xlu0 %727  ;;  %v2693_v33 = vadd.f32 %v2692_v39, %v2396_v14  ;;  %v17614_v14 = vunpack.c.h.bf16 %v11720_v46  ;;  %v17615_v39 = vrot.slane %v11796_v1, 3 }
  0xff   :  { %902 = vbcast.lane.b32.xlu1 %v900_v48, 256  ;;  %v5606_v11 = vpack.c.bf16 %v5112_v63, %v5112_v63  ;;  %v17613_v63 = vrot.slane %v11713_v42, 5 }
 0x100   :  { %951 = vbcast.lane.b32.xlu0 %v949_v49, 256  ;;  %v2709_v49 = vadd.f32 %v2708_v53, %v2707_v28  ;;  %v2645_v28 = vadd.f32 %v2644_v27, %v2388_v60  ;;  %v10847_v53 = vpop.eup %10846  ;;  %v11855_v13 = vunpack.c.l.b16 %v5590_v31  ;;  %v2391_v60 = vmul.f32 %v17611_v35, %v623_v29 }
 0x101   :  { %v10849_v3 = vpop.eup %10848  ;;  %v17612_v27 = vunpack.c.l.bf16 %v11753_v6  ;;  %10866 = vrcp.f32 %v17613_v63  ;;  %v2399_v58 = vmul.f32 %v17614_v14, %v679_v2  ;;  %v2694_v2 = vrot.slane %v2693_v33, 2 }
 0x102   :  { %v5098_v62 = vmul.f32 %v10847_v53, %v2709_v49  ;;  %v11860_v19 = vpop.eup %10850  ;;  %v2646_v24 = vrot.slane %v2645_v28, 2  ;;  %10868 = vrcp.f32 %v17615_v39  ;;  %v784_v53 = vpop.permute.xlu1 %783  ;;  %v5128_v46 = vmul.f32 %v10849_v3, %v2799_v5 }
 0x103   :  { %1007 = vbcast.lane.b32.xlu1 %v1005_v61, 256  ;;  %v5591_v61 = vpack.c.bf16 %v5082_v54, %v5082_v54  ;;  %v2406_v31 = vmul.f32 %v17612_v27, %v728_v43  ;;  %v11874_v25 = vpop.eup %10852  ;;  %v11879_v43 = vunpack.c.l.b16 %v5606_v11  ;;  %v17618_v27 = vrot.slane %v11731_v55, 4 }
 0x104   :  { %v5599_v63 = vpack.c.bf16 %v5098_v62, %v5098_v62  ;;  %v17619_v14 = vrot.slane %v11715_v44, 5  ;;  %v11887_v39 = vpop.eup %10854  ;;  %v2662_v49 = vrot.slane %v2391_v60, 4  ;;  %v17620_v11 = vrot.slane %v11796_v1, 4 }
 0x105   :  { %v11877_v29 = vunpack.c.l.b16 %v5591_v61  ;;  %17616 = vst [vmem:[#allocation12_spill] sm:$0xff] %v11879_v43  ;;  %10870 = vrcp.f32 %v17618_v27  ;;  %v2752_v21 = vrot.slane %v2406_v31, 4  ;;  %v11892_v54 = vpop.eup %10856  ;;  %v2647_v56 = vadd.f32 %v2646_v24, %v2645_v28 }
 0x106   :  { %10872 = vrcp.f32 %v17619_v14  ;;  %v2710_v48 = vrot.slane %v2399_v58, 4  ;;  %v17621_v62 = vunpack.c.l.bf16 %v11758_v7  ;;  %v17622_v3 = vrot.slane %v11731_v55, 5  ;;  %v11898_v27 = vpop.eup %10858  ;;  %v11914_v14 = vld [vmem:[%s17482_s0 + $0x50] sm:$0xff]  }
 0x107   :  { %10874 = vrcp.f32 %v17620_v11  ;;  %v11905_v28 = vpop.eup %10860  ;;  %v11907_v24 = vunpack.c.l.b16 %v5599_v63  ;;  %v2695_v11 = vadd.f32 %v2694_v2, %v2693_v33  ;;  %v2663_v9 = vadd.f32 %v2662_v49, %v2391_v60 }
 0x108   :  { %v2414_v5 = vmul.f32 %v17621_v62, %v784_v53  ;;  %10876 = vrcp.f32 %v17622_v3  ;;  %17623 = vst [vmem:[#allocation14_spill] sm:$0xff] %v11905_v28  ;;  %v5614_v53 = vpack.c.bf16 %v5128_v46, %v5128_v46  ;;  %v17624_v62 = vunpack.c.l.bf16 %v11785_v51  ;;  %v11950_v46 = vld [vmem:[%s17482_s0 + $0x18] sm:$0xff]  }
 0x109   :  { %10878 = vrcp.f32 %v4622_v0  ;;  %v11921_v0 = vpop.eup %10862  ;;  %v2753_v63 = vadd.f32 %v2752_v21, %v2406_v31  ;;  %v2648_v2 = vrot.slane %v2647_v56, 1  ;;  %v11937_v49 = vsel %vm4436_vm0, %v11919_v4, 0.0  ;;  %v11955_v31 = vld [vmem:[%s17482_s0 + $0x70] sm:$0xff]  }
 0x10a   :  { %v11881_v35 = vpop.xlane.xlu0 %4456  ;;  %17626 = vst [vmem:[#allocation16_spill] sm:$0xff] %v11921_v0  ;;  %10880 = vrcp.f32 %v4616_v16  ;;  %v11926_v33 = vpop.eup %10864  ;;  %v17630_v16 = vrot.slane %v11796_v1, 6  ;;  %v2696_v55 = vrot.slane %v2695_v11, 1  ;;  %v17638_v0 = vrot.slane %v11713_v42, 7 }
 0x10b   :  { %17617 = vst [vmem:[#allocation13_spill] sm:$0xff] %v11881_v35  ;;  %17627 = vst [vmem:[#allocation17_spill] sm:$0xff] %v11926_v33  ;;  %10882 = vrcp.f32 %v4617_v8  ;;  %v11930_v35 = vpop.eup %10866  ;;  %v17633_v8 = vunpack.c.l.bf16 %v11690_v26  ;;  %v2754_v26 = vrot.slane %v2753_v63, 2 }
 0x10c   :  { %17628 = vst [vmem:[#allocation18_spill] sm:$0xff] %v11930_v35  ;;  %10884 = vrcp.f32 %v17630_v16  ;;  %v17634_v16 = vrot.slane %v11796_v1, 7  ;;  %v2649_v35 = vadd.f32 %v2648_v2, %v2647_v56 }
 0x10e   :  { %v630_v61 = vpop.permute.xlu0 %629  ;;  %10886 = vrcp.f32 %v17634_v16  ;;  %v5078_v56 = vmul.f32 %v11824_v15, %v2649_v35 }
 0x10f   :  { %v2392_v3 = vmul.f32 %v17624_v62, %v630_v61  ;;  %v2711_v61 = vadd.f32 %v2710_v48, %v2399_v58  ;;  %v2800_v62 = vrot.slane %v2414_v5, 4  ;;  %v11941_v48 = vpop.eup %10868  ;;  %v11943_v58 = vunpack.c.l.b16 %v5614_v53 }
 0x110   :  { %17631 = vst [vmem:[#allocation20_spill] sm:$0xff] %v11941_v48  ;;  %v2664_v48 = vrot.slane %v2663_v9, 2 }
 0x111   :  { %v2668_v36 = vrot.slane %v2392_v3, 4  ;;  %17632 = vst [vmem:[#allocation21_spill] sm:$0xff] %v11943_v58  ;;  %v2712_v33 = vrot.slane %v2711_v61, 2  ;;  %v2801_v43 = vadd.f32 %v2800_v62, %v2414_v5  ;;  %v2697_v5 = vadd.f32 %v2696_v55, %v2695_v11 }
 0x112   :  { %v11932_v37 = vpop.xlane.xlu1 %4459  ;;  %v714_v60 = vpop.permute.xlu0 %713  ;;  %v2755_v62 = vadd.f32 %v2754_v26, %v2753_v63  ;;  %v17650_v11 = vunpack.c.l.bf16 %v11738_v59 }
 0x113   :  { %17629 = vst [vmem:[#allocation19_spill] sm:$0xff] %v11932_v37  ;;  %v2404_v21 = vmul.f32 %v17633_v8, %v714_v60  ;;  %v11959_v37 = vpop.eup %10870  ;;  %v17636_v60 = vrot.slane %v11713_v42, 6  ;;  %v2669_v1 = vadd.f32 %v2668_v36, %v2392_v3  ;;  %v11980_v42 = vld [vmem:[%s17479_s1 + $0x58] sm:$0xff]  ;;  %v17644_v3 = vrot.slane %v11715_v44, 7 }
 0x114   :  { %17635 = vst [vmem:[#allocation22_spill] sm:$0xff] %v11959_v37  ;;  %v11964_v8 = vpop.eup %10872  ;;  %17642 = vst [vmem:[#allocation26_spill] sm:$0xff] %v11980_v42  ;;  %v11985_v36 = vld [vmem:[%s17482_s0 + $0x38] sm:$0xff]   ;;  %v2713_v53 = vadd.f32 %v2712_v33, %v2711_v61  ;;  %v2802_v4 = vrot.slane %v2801_v43, 2  ;;  %v5094_v61 = vmul.f32 %v11842_v57, %v2697_v5  ;;  %v2756_v35 = vrot.slane %v2755_v62, 1 }
 0x115   :  { %10888 = vrcp.f32 %v17636_v60  ;;  %17637 = vst [vmem:[#allocation23_spill] sm:$0xff] %v11964_v8  ;;  %v11968_v28 = vpop.eup %10874  ;;  %v2740_v2 = vrot.slane %v2404_v21, 4  ;;  %17643 = vst [vmem:[#allocation27_spill] sm:$0xff] %v11985_v36  ;;  %v11998_v8 = vld [vmem:[%s17482_s0 + $0x58] sm:$0xff]  }
 0x116   :  { %10890 = vrcp.f32 %v17638_v0  ;;  %17639 = vst [vmem:[#allocation24_spill] sm:$0xff] %v11968_v28  ;;  %v686_v16 = vpop.permute.xlu1 %685  ;;  %v770_v37 = vpop.permute.xlu0 %769  ;;  %v2665_v0 = vadd.f32 %v2664_v48, %v2663_v9  ;;  %17646 = vst [vmem:[#allocation29_spill] sm:$0xff] %v11998_v8  ;;  %v12006_v48 = vsel %vm4436_vm0, %v11980_v42, 0.0  ;;  %v12020_v42 = vld [vmem:[%s17482_s0 + $0x78] sm:$0xff]   ;;  %v2803_v59 = vadd.f32 %v2802_v4, %v2801_v43 }
 0x117   :  { %10892 = vrcp.f32 %v17640_v12  ;;  %v11974_v60 = vpop.eup %10876  ;;  %v2741_v26 = vadd.f32 %v2740_v2, %v2404_v21  ;;  %v5597_v4 = vpack.c.bf16 %v5094_v61, %v5094_v61 }
 0x118   :  { %17641 = vst [vmem:[#allocation25_spill] sm:$0xff] %v11974_v60  ;;  %10894 = vrcp.f32 %v17644_v3  ;;  %v11989_v12 = vpop.eup %10878  ;;  %v2670_v3 = vrot.slane %v2669_v1, 2  ;;  %v17649_v60 = vunpack.c.l.bf16 %v11821_v41  ;;  %v2666_v15 = vrot.slane %v2665_v0, 1 }
 0x119   :  { %17645 = vst [vmem:[#allocation28_spill] sm:$0xff] %v11989_v12  ;;  %v12000_v44 = vpop.eup %10880  ;;  %v2742_v43 = vrot.slane %v2741_v26, 2 }
 0x11a   :  { %17647 = vst [vmem:[#allocation30_spill] sm:$0xff] %v12000_v44  ;;  %v735_v9 = vpop.permute.xlu1 %734  ;;  %v12002_v63 = vpop.permute.xlu0 %636  ;;  %v2400_v55 = vmul.f32 %v17649_v60, %v686_v16  ;;  %v2412_v44 = vmul.f32 %v17650_v11, %v770_v37  ;;  %v5589_v16 = vpack.c.bf16 %v5078_v56, %v5078_v56  ;;  %v2714_v60 = vrot.slane %v2713_v53, 1 }
 0x11b   :  { %v12010_v33 = vpop.eup %10882  ;;  %v2671_v2 = vadd.f32 %v2670_v3, %v2669_v1  ;;  %v2667_v3 = vadd.f32 %v2666_v15, %v2665_v0  ;;  %v12069_v15 = vld [vmem:[%s17479_s1 + $0x28] sm:$0xff] }
 0x11c   :  { %17648 = vst [vmem:[#allocation31_spill] sm:$0xff] %v12010_v33  ;;  %v12022_v12 = vpop.eup %10884  ;;  %v2716_v37 = vrot.slane %v2400_v55, 4  ;;  %v2788_v28 = vrot.slane %v2412_v44, 4  ;;  %v6470_v56 = vunpack.c.l.b16 %v5589_v16  ;;  %v2715_v8 = vadd.f32 %v2714_v60, %v2713_v53  ;;  %v12080_v53 = vld [vmem:[%s17479_s1 + $0x30] sm:$0xff] }
 0x11d   :  { %17651 = vst [vmem:[#allocation32_spill] sm:$0xff] %v12022_v12  ;;  %v12027_v21 = vpop.eup %10886  ;;  %v2672_v36 = vrot.slane %v2671_v2, 1  ;;  %v6478_v16 = vunpack.c.l.b16 %v5597_v4  ;;  %v2743_v60 = vadd.f32 %v2742_v43, %v2741_v26  ;;  %v5084_v61 = vmul.f32 %v11860_v19, %v2667_v3 }
 0x11e   :  { %17652 = vst [vmem:[#allocation33_spill] sm:$0xff] %v12027_v21  ;;  %v12032_v11 = vpop.permute.xlu1 %790  ;;  %v12034_v12 = vpop.permute.xlu0 %741  ;;  %v2717_v33 = vadd.f32 %v2716_v37, %v2400_v55  ;;  %v2789_v0 = vadd.f32 %v2788_v28, %v2412_v44  ;;  %v5100_v4 = vmul.f32 %v11887_v39, %v2715_v8  ;;  %v17658_v28 = vunpack.c.h.bf16 %v11785_v51  ;;  %v17677_v51 = vld [vmem:[#allocation5_spill] sm:$0xff] }
 0x11f   :  { %v12030_v5 = vpop.eup %10888  ;;  %4468 = vadd.xlane.f32.xlu0 %v11937_v49  ;;  %v2744_v8 = vrot.slane %v2743_v60, 1  ;;  %v5592_v37 = vpack.c.bf16 %v5084_v61, %v5084_v61  ;;  %v17662_v61 = vrot.slane %v11907_v24, 6 }
 0x120   :  { %17653 = vst [vmem:[#allocation34_spill] sm:$0xff] %v12030_v5  ;;  %v12041_v21 = vpop.eup %10890  ;;  %v2757_v5 = vadd.f32 %v2756_v35, %v2755_v62  ;;  %v12062_v62 = vld [vmem:[%s17479_s1 + $0x20] sm:$0xff]  ;;  %v2393_v19 = vmul.f32 %v17658_v28, %v12002_v63  ;;  %v2790_v63 = vrot.slane %v2789_v0, 2  ;;  %v5600_v3 = vpack.c.bf16 %v5100_v4, %v5100_v4 }
 0x121   :  { %17654 = vst [vmem:[#allocation35_spill] sm:$0xff] %v12041_v21  ;;  %v12044_v1 = vpop.eup %10892  ;;  %v2804_v21 = vrot.slane %v2803_v59, 1 }
 0x122   :  { %17655 = vst [vmem:[#allocation36_spill] sm:$0xff] %v12044_v1  ;;  %v12049_v58 = vpop.eup %10894  ;;  %v12053_v20 = vpop.permute.xlu1 %692  ;;  %v5114_v57 = vmul.f32 %v11874_v25, %v2757_v5  ;;  %v17659_v25 = vrot.slane %v11855_v13, 7 }
 0x123   :  { %17656 = vst [vmem:[#allocation37_spill] sm:$0xff] %v12049_v58  ;;  %v12055_v49 = vpop.permute.xlu0 %643  ;;  %v17657_v58 = vunpack.c.h.bf16 %v11753_v6  ;;  %v2805_v26 = vadd.f32 %v2804_v21, %v2803_v59  ;;  %v17660_v21 = vrot.slane %v11852_v47, 7 }
 0x124   :  { %v6728_v6 = vsel %vm6727_vm1, %v17659_v25, %v6470_v56  ;;  %v5607_v5 = vpack.c.bf16 %v5114_v57, %v5114_v57  ;;  %v17661_v56 = vrot.slane %v11877_v29, 6  ;;  %v2674_v25 = vrot.slane %v2393_v19, 4 }
 0x125   :  { %v2407_v1 = vmul.f32 %v17657_v58, %v735_v9  ;;  %v2673_v58 = vadd.f32 %v2672_v36, %v2671_v2  ;;  %v12098_v9 = vld [vmem:[%s17479_s1 + $0x38] sm:$0xff]  ;;  %v2718_v36 = vrot.slane %v2717_v33, 2  ;;  %v6748_v59 = vsel %vm6727_vm1, %v17660_v21, %v6478_v16 }
 0x126   :  { %v12091_v55 = vpop.permute.xlu1 %797  ;;  %v6731_v43 = vsel %vm6730_vm2, %v17661_v56, %v6728_v6  ;;  %v5130_v28 = vmul.f32 %v11892_v54, %v2805_v26  ;;  %v6750_v57 = vsel %vm6730_vm2, %v17662_v61, %v6748_v59  ;;  %v2745_v54 = vadd.f32 %v2744_v8, %v2743_v60 }
 0x127   :  { %v12093_v44 = vpop.permute.xlu0 %748  ;;  %4471 = vadd.xlane.f32.xlu1 %v12006_v48  ;;  %v2758_v2 = vrot.slane %v2407_v1, 4  ;;  %v5086_v48 = vmul.f32 %v11898_v27, %v2673_v58  ;;  %v2719_v4 = vadd.f32 %v2718_v36, %v2717_v33  ;;  %v2791_v26 = vadd.f32 %v2790_v63, %v2789_v0 }
 0x128   :  { %v6473_v21 = vunpack.c.l.b16 %v5592_v37  ;;  %v12128_v27 = vunpack.c.l.b16 %v5607_v5  ;;  %v6481_v59 = vunpack.c.l.b16 %v5600_v3  ;;  %v5615_v61 = vpack.c.bf16 %v5130_v28, %v5130_v28 }
 0x129   :  { %v2759_v58 = vadd.f32 %v2758_v2, %v2407_v1  ;;  %v2675_v29 = vadd.f32 %v2674_v25, %v2393_v19  ;;  %v17663_v16 = vunpack.c.h.bf16 %v11758_v7  ;;  %v5593_v33 = vpack.c.bf16 %v5086_v48, %v5086_v48  ;;  %v17666_v7 = vld [vmem:[#allocation4_spill] sm:$0xff] }
 0x12a   :  { %v12117_v47 = vpop.permute.xlu1 %699  ;;  %v17664_v0 = vunpack.c.l.bf16 %v11914_v14  ;;  %v5110_v37 = vmul.f32 %v11826_v52, %v2745_v54  ;;  %v2720_v5 = vrot.slane %v2719_v4, 1  ;;  %v2792_v19 = vrot.slane %v2791_v26, 1 }
 0x12b   :  { %v651_v56 = vpop.permute.xlu0 %650  ;;  %v2415_v60 = vmul.f32 %v17663_v16, %v12032_v11  ;;  %v6732_v11 = vrot.slane %v6473_v21, 5  ;;  %v2760_v3 = vrot.slane %v2759_v58, 2  ;;  %v6751_v28 = vrot.slane %v6481_v59, 5 }
 0x12c   :  { %v2408_v8 = vmul.f32 %v17664_v0, %v12034_v12  ;;  %v12148_v25 = vunpack.c.l.b16 %v5615_v61  ;;  %v2676_v48 = vrot.slane %v2675_v29, 2  ;;  %v12150_v0 = vunpack.c.l.b16 %v5593_v33 }
 0x12d   :  { %v2806_v16 = vrot.slane %v2415_v60, 4  ;;  %v5605_v2 = vpack.c.bf16 %v5110_v37, %v5110_v37  ;;  %v2721_v1 = vadd.f32 %v2720_v5, %v2719_v4  ;;  %v2793_v24 = vadd.f32 %v2792_v19, %v2791_v26 }
 0x12e   :  { %v805_v36 = vpop.permute.xlu1 %804  ;;  %17665 = vst [vmem:[#allocation38_spill] sm:$0xff] %v12148_v25  ;;  %v2764_v52 = vrot.slane %v2408_v8, 4  ;;  %v2761_v61 = vadd.f32 %v2760_v3, %v2759_v58  ;;  %v17667_v33 = vunpack.c.l.bf16 %v11955_v31  ;;  %v12162_v13 = vsel %vm6733_vm3, %v6732_v11, %v6731_v43 }
 0x12f   :  { %v756_v54 = vpop.permute.xlu0 %755  ;;  %v2677_v37 = vadd.f32 %v2676_v48, %v2675_v29  ;;  %v2807_v4 = vadd.f32 %v2806_v16, %v2415_v60  ;;  %v17669_v26 = vrot.slane %v11530_v18, %v11574_v34  ;;  %v12171_v58 = vsel %vm6733_vm3, %v6751_v28, %v6750_v57  ;;  %v17672_v60 = vld [vmem:[#allocation14_spill] sm:$0xff]  ;;  %v17673_v16 = vld [vmem:[#allocation16_spill] sm:$0xff] }
 0x130   :  { %v2416_v12 = vmul.f32 %v17667_v33, %v12091_v55  ;;  %v2765_v55 = vadd.f32 %v2764_v52, %v2408_v8  ;;  %v17670_v43 = vunpack.c.h.bf16 %v11821_v41  ;;  %v17671_v11 = vunpack.c.l.bf16 %v11950_v46 }
 0x131   :  { %v6486_v29 = vunpack.c.l.b16 %v5605_v2  ;;  %v5102_v48 = vmul.f32 %v17672_v60, %v2721_v1  ;;  %v5126_v18 = vmul.f32 %v17673_v16, %v2793_v24  ;;  %v17674_v57 = vunpack.c.h.bf16 %v11914_v14  ;;  %v17679_v24 = vld [vmem:[#allocation27_spill] sm:$0xff] }
 0x132   :  { %v707_v6 = vpop.permute.xlu1 %706  ;;  %v2401_v19 = vmul.f32 %v17670_v43, %v12053_v20  ;;  %v2394_v3 = vmul.f32 %v17671_v11, %v12055_v49  ;;  %v2762_v33 = vrot.slane %v2761_v61, 1  ;;  %v17675_v8 = vunpack.c.h.bf16 %v11950_v46 }
 0x133   :  { %v2409_v28 = vmul.f32 %v17674_v57, %v12093_v44  ;;  %v17676_v20 = vunpack.c.h.bf16 %v11955_v31  ;;  %v763_v43 = vpop.permute.xlu0 %762  ;;  %v17678_v49 = vrot.slane %v17677_v51, %v11574_v34  ;;  %v2678_v1 = vrot.slane %v2677_v37, 1  ;;  %v17681_v44 = vld [vmem:[#allocation29_spill] sm:$0xff] }
 0x134   :  { %v2395_v52 = vmul.f32 %v17675_v8, %v651_v56  ;;  %v2808_v2 = vrot.slane %v2807_v4, 2  ;;  %v17680_v11 = vunpack.c.l.bf16 %v17679_v24  ;;  %v17682_v60 = vunpack.c.l.bf16 %v17681_v44 }
 0x135   :  { %853 = vbcast.lane.b32.xlu0 %v17669_v26, 256  ;;  %v2812_v26 = vrot.slane %v2416_v12, 4  ;;  %v2417_v41 = vmul.f32 %v17676_v20, %v805_v36  ;;  %v17683_v46 = vrot.slane %v11562_v30, %v11542_v22  ;;  %v2766_v31 = vrot.slane %v2765_v55, 2  ;;  %v17685_v20 = vld [vmem:[#allocation12_spill] sm:$0xff] }
 0x136   :  { %v2402_v14 = vmul.f32 %v17680_v11, %v12117_v47  ;;  %v2410_v16 = vmul.f32 %v17682_v60, %v756_v54  ;;  %v812_v57 = vpop.permute.xlu1 %811  ;;  %v2722_v56 = vrot.slane %v2401_v19, 4  ;;  %v2680_v36 = vrot.slane %v2394_v3, 4 }
 0x137   :  { %v17684_v51 = vunpack.c.h.bf16 %v17679_v24  ;;  %v5601_v47 = vpack.c.bf16 %v5102_v48, %v5102_v48  ;;  %v2770_v11 = vrot.slane %v2409_v28, 4  ;;  %v17687_v54 = vunpack.c.h.bf16 %v17681_v44 }
 0x138   :  { %909 = vbcast.lane.b32.xlu1 %v17678_v49, 256  ;;  %v17686_v49 = vrot.slane %v17685_v20, 7  ;;  %v2813_v21 = vadd.f32 %v2812_v26, %v2416_v12  ;;  %v2686_v5 = vrot.slane %v2395_v52, 4  ;;  %v2818_v39 = vrot.slane %v2417_v41, 4 }
 0x139   :  { %937 = vbcast.lane.b32.xlu0 %v17683_v46, 256  ;;  %v2403_v8 = vmul.f32 %v17684_v51, %v707_v6  ;;  %v2411_v60 = vmul.f32 %v17687_v54, %v763_v43  ;;  %v17688_v46 = vunpack.c.l.bf16 %v12020_v42  ;;  %v17689_v24 = vrot.slane %v11562_v30, %v11545_v23 }
 0x13a   :  { %v12205_v59 = vsel %vm6727_vm1, %v17686_v49, %v6486_v29  ;;  %v5613_v6 = vpack.c.bf16 %v5126_v18, %v5126_v18  ;;  %v2763_v51 = vadd.f32 %v2762_v33, %v2761_v61  ;;  %v2728_v20 = vrot.slane %v2402_v14, 4  ;;  %v17690_v49 = vld [vmem:[#allocation8_spill] sm:$0xff]  ;;  %v819_v18 = vpop.permute.xlu1 %818 }
 0x13b   :  { %v2418_v32 = vmul.f32 %v17688_v46, %v812_v57  ;;  %v2776_v29 = vrot.slane %v2410_v16, 4  ;;  %v17691_v48 = vrot.slane %v17690_v49, %v11542_v22  ;;  %v2723_v44 = vadd.f32 %v2722_v56, %v2401_v19 }
 0x13c   :  { %958 = vbcast.lane.b32.xlu1 %v17689_v24, 256  ;;  %v2681_v43 = vadd.f32 %v2680_v36, %v2394_v3  ;;  %v2734_v12 = vrot.slane %v2403_v8, 4  ;;  %v2679_v54 = vadd.f32 %v2678_v1, %v2677_v37  ;;  %v2809_v35 = vadd.f32 %v2808_v2, %v2807_v4 }
 0x13d   :  { %993 = vbcast.lane.b32.xlu0 %v17691_v48, 256  ;;  %v2824_v26 = vrot.slane %v2418_v32, 4  ;;  %v2771_v63 = vadd.f32 %v2770_v11, %v2409_v28  ;;  %v2782_v57 = vrot.slane %v2411_v60, 4  ;;  %v2767_v46 = vadd.f32 %v2766_v31, %v2765_v55  ;;  %v17695_v31 = vld [vmem:[#allocation17_spill] sm:$0xff] }
 0x13e   :  { %v2814_v25 = vrot.slane %v2813_v21, 2  ;;  %v2687_v30 = vadd.f32 %v2686_v5, %v2395_v52  ;;  %v2819_v24 = vadd.f32 %v2818_v39, %v2417_v41  ;;  %v17692_v61 = vrot.slane %v17690_v49, %v11545_v23 }
 0x13f   :  { %v12220_v33 = vunpack.c.l.b16 %v5601_v47  ;;  %v12222_v48 = vunpack.c.l.b16 %v5613_v6  ;;  %v2729_v19 = vadd.f32 %v2728_v20, %v2402_v14  ;;  %v2777_v3 = vadd.f32 %v2776_v29, %v2410_v16 }
 0x140   :  { %1014 = vbcast.lane.b32.xlu1 %v17692_v61, 256  ;;  %v17693_v37 = vrot.slane %v12062_v62, %v11587_v40  ;;  %v2724_v4 = vrot.slane %v2723_v44, 2  ;;  %v2682_v55 = vrot.slane %v2681_v43, 2  ;;  %v2735_v28 = vadd.f32 %v2734_v12, %v2403_v8 }
 0x141   :  { %v2825_v5 = vadd.f32 %v2824_v26, %v2418_v32  ;;  %v2810_v39 = vrot.slane %v2809_v35, 1  ;;  %v2772_v52 = vrot.slane %v2771_v63, 2  ;;  %v2783_v41 = vadd.f32 %v2782_v57, %v2411_v60  ;;  %v17698_v26 = vld [vmem:[#allocation18_spill] sm:$0xff] }
 0x142   :  { %860 = vbcast.lane.b32.xlu0 %v17693_v37, 256  ;;  %v17694_v1 = vunpack.c.h.bf16 %v12020_v42  ;;  %v5116_v56 = vmul.f32 %v17695_v31, %v2763_v51  ;;  %v2815_v36 = vadd.f32 %v2814_v25, %v2813_v21  ;;  %v2688_v47 = vrot.slane %v2687_v30, 2 }
 0x143   :  { %v2820_v14 = vrot.slane %v2819_v24, 2  ;;  %v17696_v16 = vrot.slane %v12069_v15, %v11587_v40  ;;  %v2768_v11 = vrot.slane %v2767_v46, 1  ;;  %v2730_v6 = vrot.slane %v2729_v19, 2 }
 0x144   :  { %v2419_v2 = vmul.f32 %v17694_v1, %v819_v18  ;;  %v2778_v20 = vrot.slane %v2777_v3, 2  ;;  %v17697_v32 = vrot.slane %v12080_v53, %v11574_v34  ;;  %v2725_v60 = vadd.f32 %v2724_v4, %v2723_v44 }
 0x145   :  { %916 = vbcast.lane.b32.xlu1 %v17696_v16, 256  ;;  %v2683_v42 = vadd.f32 %v2682_v55, %v2681_v43  ;;  %v2736_v29 = vrot.slane %v2735_v28, 2  ;;  %v2826_v49 = vrot.slane %v2825_v5, 2  ;;  %v2811_v51 = vadd.f32 %v2810_v39, %v2809_v35 }
 0x146   :  { %v2830_v8 = vrot.slane %v2419_v2, 4  ;;  %965 = vbcast.lane.b32.xlu0 %v17697_v32, 256  ;;  %v2773_v25 = vadd.f32 %v2772_v52, %v2771_v63  ;;  %v2784_v21 = vrot.slane %v2783_v41, 2  ;;  %v12237_v57 = vmul.f32 %v17698_v26, %v2679_v54 }
 0x147   :  { %v2816_v18 = vrot.slane %v2815_v36, 1  ;;  %v2689_v61 = vadd.f32 %v2688_v47, %v2687_v30  ;;  %v2821_v37 = vadd.f32 %v2820_v14, %v2819_v24  ;;  %v17699_v1 = vrot.slane %v12098_v9, %v11574_v34  ;;  %v17701_v30 = vld [vmem:[#allocation20_spill] sm:$0xff] }
 0x148   :  { %v2831_v12 = vadd.f32 %v2830_v8, %v2419_v2  ;;  %v2769_v31 = vadd.f32 %v2768_v11, %v2767_v46  ;;  %v2731_v16 = vadd.f32 %v2730_v6, %v2729_v19  ;;  %v2779_v44 = vadd.f32 %v2778_v20, %v2777_v3  ;;  %v17703_v11 = vld [vmem:[#allocation22_spill] sm:$0xff] }
 0x149   :  { %1021 = vbcast.lane.b32.xlu1 %v17699_v1, 256  ;;  %v17700_v35 = vrot.slane %v12062_v62, %v11598_v45  ;;  %v2726_v63 = vrot.slane %v2725_v60, 1  ;;  %v2684_v4 = vrot.slane %v2683_v42, 1  ;;  %v2737_v55 = vadd.f32 %v2736_v29, %v2735_v28 }
 0x14a   :  { %v2832_v43 = vrot.slane %v2831_v12, 2  ;;  %v2827_v54 = vadd.f32 %v2826_v49, %v2825_v5  ;;  %v6753_v39 = vrot.slane %v12220_v33, 4  ;;  %v5132_v24 = vmul.f32 %v17701_v30, %v2811_v51  ;;  %v17705_v51 = vld [vmem:[#allocation21_spill] sm:$0xff] }
 0x14b   :  { %867 = vbcast.lane.b32.xlu0 %v17700_v35, 256  ;;  %v2774_v52 = vrot.slane %v2773_v25, 1  ;;  %v2785_v2 = vadd.f32 %v2784_v21, %v2783_v41  ;;  %v5608_v47 = vpack.c.bf16 %v5116_v56, %v5116_v56  ;;  %v2817_v14 = vadd.f32 %v2816_v18, %v2815_v36  ;;  %v10722_v41 = vld [vmem:[%s17483_s2 + $0x10] sm:$0xff]   ;;  %v10723_v56 = vld [vmem:[%s17483_s2 + $0x18] sm:$0xff]  }
 0x14c   :  { %v2690_v46 = vrot.slane %v2689_v61, 1  ;;  %v2822_v19 = vrot.slane %v2821_v37, 1  ;;  %v17702_v3 = vrot.slane %v12069_v15, %v11598_v45  ;;  %v5118_v6 = vmul.f32 %v17703_v11, %v2769_v31  ;;  %10339 = vmatprep.mubr.bf16.mxu1 %v10722_v41 }
 0x14d   :  { %v2732_v20 = vrot.slane %v2731_v16, 1  ;;  %v2780_v8 = vrot.slane %v2779_v44, 1  ;;  %v2833_v28 = vadd.f32 %v2832_v43, %v2831_v12  ;;  %v17704_v5 = vrot.slane %v12080_v53, %v11587_v40  ;;  %v17707_v43 = vld [vmem:[#allocation24_spill] sm:$0xff]  ;;  %10340 = vmatmul.mubr.bf16.gmra.mrb[4].mxu1 %v10723_v56 }
 0x14e   :  { %923 = vbcast.lane.b32.xlu1 %v17702_v3, 256  ;;  %v2727_v36 = vadd.f32 %v2726_v63, %v2725_v60  ;;  %v2685_v32 = vadd.f32 %v2684_v4, %v2683_v42  ;;  %v2738_v29 = vrot.slane %v2737_v55, 1  ;;  %v2828_v49 = vrot.slane %v2827_v54, 1 }
 0x14f   :  { %972 = vbcast.lane.b32.xlu0 %v17704_v5, 256  ;;  %v17706_v21 = vrot.slane %v17705_v51, 7  ;;  %v5616_v26 = vpack.c.bf16 %v5132_v24, %v5132_v24  ;;  %v2775_v18 = vadd.f32 %v2774_v52, %v2773_v25  ;;  %v2786_v1 = vrot.slane %v2785_v2, 1  ;;  %v17710_v24 = vld [vmem:[#allocation23_spill] sm:$0xff]  ;;  %v17719_v51 = vld [vmem:[#allocation32_spill] sm:$0xff] }
 0x150   :  { %v12266_v31 = vunpack.c.l.b16 %v5608_v47  ;;  %v5134_v35 = vmul.f32 %v17707_v43, %v2817_v14  ;;  %v2691_v30 = vadd.f32 %v2690_v46, %v2689_v61  ;;  %v2823_v3 = vadd.f32 %v2822_v19, %v2821_v37  ;;  %v17711_v14 = vld [vmem:[#allocation34_spill] sm:$0xff]  ;;  %v17712_v19 = vld [vmem:[#allocation25_spill] sm:$0xff]  ;;  %v17714_v5 = vld [vmem:[#allocation35_spill] sm:$0xff] }
 0x151   :  { %v12264_v12 = vsel %vm6727_vm1, %v17706_v21, %v12222_v48  ;;  %v17708_v60 = vrot.slane %v12098_v9, %v11587_v40  ;;  %v5609_v42 = vpack.c.bf16 %v5118_v6, %v5118_v6  ;;  %v2733_v63 = vadd.f32 %v2732_v20, %v2731_v16 }
 0x152   :  { %v2781_v4 = vadd.f32 %v2780_v8, %v2779_v44  ;;  %v2834_v48 = vrot.slane %v2833_v28, 1  ;;  %v17709_v25 = vrot.slane %v12062_v62, %v11609_v50  ;;  %v5104_v52 = vmul.f32 %v17710_v24, %v2727_v36  ;;  %v17713_v62 = vld [vmem:[#allocation28_spill] sm:$0xff] }
 0x153   :  { %1028 = vbcast.lane.b32.xlu1 %v17708_v60, 256  ;;  %v2739_v47 = vadd.f32 %v2738_v29, %v2737_v55  ;;  %v2829_v11 = vadd.f32 %v2828_v49, %v2827_v54  ;;  %v5090_v61 = vmul.f32 %v17711_v14, %v2685_v32  ;;  %v5594_v37 = vpack.c.bf16 %v12237_v57, %v12237_v57  ;;  %v17716_v57 = vld [vmem:[#allocation30_spill] sm:$0xff]  ;;  %v17717_v32 = vld [vmem:[#allocation36_spill] sm:$0xff] }
 0x154   :  { %874 = vbcast.lane.b32.xlu0 %v17709_v25, 256  ;;  %v12279_v46 = vunpack.c.l.b16 %v5616_v26  ;;  %v5120_v6 = vmul.f32 %v17712_v19, %v2775_v18  ;;  %v2787_v16 = vadd.f32 %v2786_v1, %v2785_v2  ;;  %v6765_v44 = vrot.slane %v12266_v31, 5  ;;  %v17720_v26 = vld [vmem:[#allocation37_spill] sm:$0xff]  ;;  %v10725_v60 = vld [vmem:[%s17483_s2 + $0x28] sm:$0xff]  }
 0x155   :  { %v5617_v20 = vpack.c.bf16 %v5134_v35, %v5134_v35  ;;  %v5136_v8 = vmul.f32 %v17713_v62, %v2823_v3  ;;  %v5092_v41 = vmul.f32 %v17714_v5, %v2691_v30  ;;  %v17715_v55 = vrot.slane %v12069_v15, %v11609_v50  ;;  %v10724_v15 = vld [vmem:[%s17483_s2 + $0x20] sm:$0xff]  }
 0x156   :  { %v12288_v54 = vunpack.c.l.b16 %v5609_v42  ;;  %v5122_v56 = vmul.f32 %v17716_v57, %v2781_v4  ;;  %v2835_v36 = vadd.f32 %v2834_v48, %v2833_v28  ;;  %v5106_v2 = vmul.f32 %v17717_v32, %v2733_v63  ;;  %v17721_v35 = vld [vmem:[#allocation31_spill] sm:$0xff]  ;;  %10343 = vmatprep.mubr.bf16.mxu1 %v10724_v15 }
 0x157   :  { %930 = vbcast.lane.b32.xlu1 %v17715_v55, 256  ;;  %v17718_v29 = vrot.slane %v12080_v53, %v11598_v45  ;;  %v5602_v49 = vpack.c.bf16 %v5104_v52, %v5104_v52  ;;  %v5138_v21 = vmul.f32 %v17719_v51, %v2829_v11  ;;  %v5108_v18 = vmul.f32 %v17720_v26, %v2739_v47  ;;  %v17723_v52 = vld [vmem:[#allocation33_spill] sm:$0xff] }
 0x158   :  { %v5595_v1 = vpack.c.bf16 %v5090_v61, %v5090_v61  ;;  %v6779_v28 = vrot.slane %v12279_v46, 5  ;;  %v5610_v43 = vpack.c.bf16 %v5120_v6, %v5120_v6  ;;  %v5124_v30 = vmul.f32 %v17721_v35, %v2787_v16  ;;  %10344 = vmatmul.mubr.bf16.gmra.mrb[8].mxu1 %v10725_v60 }
 0x159   :  { %979 = vbcast.lane.b32.xlu0 %v17718_v29, 256  ;;  %v5596_v3 = vpack.c.bf16 %v5092_v41, %v5092_v41  ;;  %v6498_v42 = vunpack.c.l.b16 %v5617_v20  ;;  %v5618_v63 = vpack.c.bf16 %v5136_v8, %v5136_v8  ;;  %v5603_v4 = vpack.c.bf16 %v5106_v2, %v5106_v2 }
 0x15a   :  { %v5604_v48 = vpack.c.bf16 %v5108_v18, %v5108_v18  ;;  %v17722_v25 = vrot.slane %v12098_v9, %v11598_v45  ;;  %v5611_v24 = vpack.c.bf16 %v5122_v56, %v5122_v56  ;;  %v5140_v47 = vmul.f32 %v17723_v52, %v2835_v36 }
 0x15b   :  { %v6475_v11 = vunpack.c.l.b16 %v5594_v37  ;;  %v6476_v14 = vunpack.c.l.b16 %v5595_v1  ;;  %v17724_v61 = vrot.slane %v12080_v53, %v11609_v50  ;;  %v6767_v46 = vrot.slane %v12288_v54, 4 }
 0x15c   :  { %1035 = vbcast.lane.b32.xlu1 %v17722_v25, 256  ;;  %v5619_v19 = vpack.c.bf16 %v5138_v21, %v5138_v21  ;;  %v6477_v6 = vunpack.c.l.b16 %v5596_v3  ;;  %v6483_v16 = vunpack.c.l.b16 %v5602_v49  ;;  %v6491_v20 = vunpack.c.l.b16 %v5610_v43  ;;  %v17731_v25 = vld [vmem:[#allocation38_spill] sm:$0xff] }
 0x15d   :  { %986 = vbcast.lane.b32.xlu0 %v17724_v61, 256  ;;  %v5612_v62 = vpack.c.bf16 %v5124_v30, %v5124_v30  ;;  %v6484_v8 = vunpack.c.l.b16 %v5603_v4  ;;  %v6485_v5 = vunpack.c.l.b16 %v5604_v48  ;;  %v6781_v41 = vrot.slane %v6498_v42, 4  ;;  %v10726_v61 = vld [vmem:[%s17483_s2 + $0x30] sm:$0xff]  }
 0x15e   :  { %v6499_v55 = vunpack.c.l.b16 %v5618_v63  ;;  %v6738_v57 = vrot.slane %v6475_v11, 3  ;;  %v6741_v37 = vrot.slane %v6476_v14, 2  ;;  %v17725_v56 = vrot.slane %v12098_v9, %v11609_v50  ;;  %10347 = vmatprep.mubr.bf16.mxu1 %v10726_v61 }
 0x15f   :  { %v6492_v53 = vunpack.c.l.b16 %v5611_v24  ;;  %v5620_v36 = vpack.c.bf16 %v5140_v47, %v5140_v47  ;;  %v6744_v32 = vrot.slane %v6477_v6, 1  ;;  %v6755_v54 = vrot.slane %v6483_v16, 3  ;;  %v17735_v16 = vld [vmem:[#allocation15_spill] sm:$0xff] }
 0x160   :  { %1042 = vbcast.lane.b32.xlu1 %v17725_v56, 256  ;;  %v17726_v2 = vrot.slane %v11673_v17, %v11510_v10  ;;  %v6500_v29 = vunpack.c.l.b16 %v5619_v19  ;;  %v17727_v49 = vrot.slane %v12150_v0, 4  ;;  %v6754_v9 = vsel %vm6736_vm4, %v6753_v39, %v12171_v58  ;;  %v833_v56 = vpop.permute.xlu0 %832 }
 0x161   :  { %v6757_v21 = vrot.slane %v6484_v8, 2  ;;  %v6756_v18 = vsel %vm6739_vm5, %v6755_v54, %v6754_v9  ;;  %v6759_v1 = vrot.slane %v6485_v5, 1  ;;  %v6493_v15 = vunpack.c.l.b16 %v5612_v62  ;;  %v10732_v54 = vld [vmem:[%s17483_s2 + $0x50] sm:$0xff]  }
 0x162   :  { %1056 = vbcast.lane.b32.xlu0 %v17726_v2, 256  ;;  %v6737_v51 = vsel %vm6736_vm4, %v17727_v49, %v12162_v13  ;;  %v6769_v43 = vrot.slane %v6491_v20, 3  ;;  %v6783_v35 = vrot.slane %v6499_v55, 3  ;;  %v17728_v13 = vrot.slane %v11705_v38, %v11510_v10  ;;  %v10729_v55 = vld [vmem:[%s17483_s2 + $0x48] sm:$0xff]   ;;  %v10733_v2 = vld [vmem:[%s17483_s2 + $0x58] sm:$0xff]   ;;  %v889_v49 = vpop.permute.xlu1 %888 }
 0x163   :  { %v6740_v26 = vsel %vm6739_vm5, %v6738_v57, %v6737_v51  ;;  %v6758_v0 = vsel %vm6742_vm6, %v6757_v21, %v6756_v18  ;;  %v6771_v33 = vrot.slane %v6492_v53, 2  ;;  %v6501_v3 = vunpack.c.l.b16 %v5620_v36  ;;  %v10730_v57 = vld [vmem:[%s17484_s9] sm:$0xff]   ;;  %v12393_v36 = vld [vmem:[%s17482_s0 + $0x88] sm:$0xff]   ;;  %v10734_v51 = vld [vmem:[%s17484_s9 + $0x10] sm:$0xff]  }
 0x164   :  { %v6743_v30 = vsel %vm6742_vm6, %v6741_v37, %v6740_v26  ;;  %1112 = vbcast.lane.b32.xlu1 %v17728_v13, 256  ;;  %v6760_v39 = vsel %vm6745_vm7, %v6759_v1, %v6758_v0  ;;  %v17729_v60 = vrot.slane %v11673_v17, %v17666_v7  ;;  %v6785_v42 = vrot.slane %v6500_v29, 2  ;;  %10415 = vmatprep.subr.bf16.mxu1 %v10730_v57  ;;  %v10731_v37 = vld [vmem:[%s17484_s9 + $0x8] sm:$0xff]   ;;  %v12388_v53 = vld [vmem:[%s17482_s0 + $0x80] sm:$0xff]   ;;  %v840_v9 = vpop.permute.xlu0 %839 }
 0x165   :  { %v6746_v58 = vsel %vm6745_vm7, %v6744_v32, %v6743_v30  ;;  %v17730_v4 = vrot.slane %v12128_v27, 6  ;;  %v17732_v24 = vrot.slane %v17731_v25, 6  ;;  %v6773_v11 = vrot.slane %v6493_v15, 1  ;;  %v10727_v27 = vld [vmem:[%s17483_s2 + $0x38] sm:$0xff]   ;;  %10416 = vmatpush3.bf16.msra.mxu1 %v10730_v57  ;;  %v12409_v26 = vld [vmem:[%s17482_s0 + $0xa0] sm:$0xff]  }
 0x166   :  { %1063 = vbcast.lane.b32.xlu0 %v17729_v60, 256  ;;  %v7181_v63 = vpack.c.b16 %v6760_v39, %v6746_v58  ;;  %v6787_v14 = vrot.slane %v6501_v3, 1  ;;  %v17733_v31 = vrot.slane %v11705_v38, %v17666_v7  ;;  %v17736_v20 = vrot.slane %v17735_v16, %v11510_v10  ;;  %10348 = vmatmul.mubr.bf16.gmra.mrb[12].mxu1 %v10727_v27  ;;  %v12414_v1 = vld [vmem:[%s17479_s1 + $0x60] sm:$0xff]  ;;  %v10735_v15 = vld [vmem:[%s17484_s9 + $0x18] sm:$0xff]   ;;  %v896_v13 = vpop.permute.xlu1 %895  ;;  %v12431_v58 = vld [vmem:[%s17482_s0 + $0xa8] sm:$0xff]  }
 0x167   :  { %v6764_v48 = vsel %vm6730_vm2, %v17730_v4, %v12205_v59  ;;  %v6778_v52 = vsel %vm6730_vm2, %v17732_v24, %v12264_v12  ;;  %10417 = vmatprep.subr.bf16.mxu1 %v10731_v37  ;;  %v9603_v32 = vunpack.c.h.bf16 %v12388_v53  ;;  %v9606_v29 = vunpack.c.l.bf16 %v12393_v36  ;;  %v12426_v0 = vld [vmem:[%s17482_s0 + $0xc0] sm:$0xff]  }
 0x168   :  { %v6766_v47 = vsel %vm6733_vm3, %v6765_v44, %v6764_v48  ;;  %v6780_v17 = vsel %vm6733_vm3, %v6779_v28, %v6778_v52  ;;  %10383 = vmatprep.mubr.bf16.mxu0 %v7181_v63  ;;  %1119 = vbcast.lane.b32.xlu1 %v17733_v31, 256  ;;  %v17734_v44 = vld [vmem:[#allocation26_spill] sm:$0xff]  ;;  %v9619_v30 = vunpack.c.h.bf16 %v12409_v26  ;;  %v4473_v39 = vsel %vm4436_vm0, %v12414_v1, 0.0  ;;  %v12438_v60 = vld [vmem:[%s17482_s0 + $0xe0] sm:$0xff]   ;;  %v10737_v63 = vld [vmem:[%s17483_s2 + $0x68] sm:$0xff]  }
 0x169   :  { %v6768_v59 = vsel %vm6736_vm4, %v6767_v46, %v6766_v47  ;;  %v6782_v12 = vsel %vm6736_vm4, %v6781_v41, %v6780_v17  ;;  %v1222_v28 = vrot.slane %v17734_v44, %v11510_v10  ;;  %v10728_v41 = vld [vmem:[%s17483_s2 + $0x40] sm:$0xff]   ;;  %10418 = vmatpush3.bf16.msra.mxu1 %v10731_v37  ;;  %v2421_v21 = vmul.f32 %v9603_v32, %v833_v56  ;;  %v10739_v17 = vld [vmem:[%s17484_s9 + $0x28] sm:$0xff]   ;;  %v10741_v32 = vld [vmem:[%s17483_s2 + $0x78] sm:$0xff]  }
 0x16a   :  { %v6770_v19 = vsel %vm6739_vm5, %v6769_v43, %v6768_v59  ;;  %v6784_v6 = vsel %vm6739_vm5, %v6783_v35, %v6782_v12  ;;  %1168 = vbcast.lane.b32.xlu0 %v17736_v20, 256  ;;  %10351 = vmatprep.mubr.bf16.mxu1 %v10728_v41  ;;  %v2422_v18 = vmul.f32 %v9606_v29, %v840_v9  ;;  %v17737_v43 = vld [vmem:[#allocation10_spill] sm:$0xff]  ;;  %v17738_v4 = vld [vmem:[#allocation11_spill] sm:$0xff]  ;;  %v9635_v25 = vunpack.c.h.bf16 %v12426_v0  ;;  %v1001_v31 = vpop.permute.xlu1 %1000  ;;  %v17739_v29 = vld [vmem:[#allocation13_spill] sm:$0xff] }
 0x16b   :  { %v6772_v46 = vsel %vm6742_vm6, %v6771_v33, %v6770_v19  ;;  %v6786_v62 = vsel %vm6742_vm6, %v6785_v42, %v6784_v6  ;;  %10419 = vmatprep.subr.bf16.mxu1 %v10734_v51  ;;  %v12420_v35 = vmax.f32 %v17737_v43, 1.0  ;;  %v2842_v33 = vrot.slane %v2421_v21, 4  ;;  %v10736_v42 = vld [vmem:[%s17483_s2 + $0x60] sm:$0xff]  }
 0x16c   :  { %v6774_v38 = vsel %vm6745_vm7, %v6773_v11, %v6772_v46  ;;  %v6788_v8 = vsel %vm6745_vm7, %v6787_v14, %v6786_v62  ;;  %1224 = vbcast.lane.b32.xlu1 %v1222_v28, 256  ;;  %v2848_v3 = vrot.slane %v2422_v18, 4  ;;  %v12447_v48 = vmax.f32 %v17738_v4, 1.0  ;;  %v10738_v24 = vld [vmem:[%s17484_s9 + $0x20] sm:$0xff]   ;;  %v945_v11 = vpop.permute.xlu0 %944  ;;  %v12464_v28 = vld [vmem:[%s17479_s1 + $0x68] sm:$0xff] }
 0x16d   :  { %v7182_v5 = vpack.c.b16 %v6788_v8, %v6774_v38  ;;  %10420 = vmatpush3.bf16.msra.mxu1 %v10734_v51  ;;  %v4625_v52 = vrot.slane %v12420_v35, 1  ;;  %v2429_v47 = vmul.f32 %v9619_v30, %v889_v49  ;;  %v2843_v14 = vadd.f32 %v2842_v33, %v2421_v21  ;;  %v10740_v38 = vld [vmem:[%s17483_s2 + $0x70] sm:$0xff]   ;;  %v17740_v51 = vld [vmem:[#allocation19_spill] sm:$0xff] }
 0x16e   :  { %10352 = vmatmul.mubr.bf16.gmra.mrb[16].mxu1 %v10729_v55  ;;  %10421 = vmatprep.subr.bf16.mxu1 %v10735_v15  ;;  %v4626_v61 = vrot.slane %v12420_v35, 2  ;;  %v9622_v27 = vunpack.c.l.bf16 %v12431_v58  ;;  %v9651_v59 = vunpack.c.h.bf16 %v12438_v60  ;;  %v2849_v12 = vadd.f32 %v2848_v3, %v2422_v18 }
 0x16f   :  { %10384 = vmatmul.mubr.bf16.vlgmr.msra.gmra.mrb[0].mxu0 %v7182_v5  ;;  %10355 = vmatprep.mubr.bf16.mxu1 %v10732_v54  ;;  %v4627_v44 = vrot.slane %v12420_v35, 3  ;;  %v4628_v19 = vrot.slane %v12420_v35, 4  ;;  %v4629_v6 = vrot.slane %v12420_v35, 5  ;;  %v4632_v16 = vrot.slane %v12447_v48, 1  ;;  %v10742_v5 = vld [vmem:[%s17484_s9 + $0x30] sm:$0xff]  }
 0x170   :  { %v2437_v20 = vmul.f32 %v9635_v25, %v945_v11  ;;  %v4633_v46 = vrot.slane %v12447_v48, 2  ;;  %v4634_v62 = vrot.slane %v12447_v48, 3  ;;  %v2890_v8 = vrot.slane %v2429_v47, 4 }
 0x171   :  { %10422 = vmatpush3.bf16.msra.mxu1 %v10735_v15  ;;  %v2844_v41 = vrot.slane %v2843_v14, 2  ;;  %v2430_v55 = vmul.f32 %v9622_v27, %v896_v13  ;;  %v2445_v57 = vmul.f32 %v9651_v59, %v1001_v31  ;;  %v4476_v37 = vsel %vm4436_vm0, %v12464_v28, 0.0  ;;  %v10743_v15 = vld [vmem:[%s17484_s9 + $0x38] sm:$0xff]   ;;  %v10745_v59 = vld [vmem:[%s17485_s3 + $0x8] sm:$0xff]  }
 0x172   :  { %10423 = vmatprep.subr.bf16.mxu1 %v10738_v24  ;;  %v2850_v56 = vrot.slane %v2849_v12, 2  ;;  %v2938_v54 = vrot.slane %v2437_v20, 4  ;;  %10896 = vrcp.f32 %v12420_v35  ;;  %v12487_v49 = vmax.f32 %v17739_v29, 1.0  ;;  %v10748_v29 = vld [vmem:[%s17485_s3 + $0x20] sm:$0xff]  }
 0x173   :  { %v12490_v9 = vmax.f32 %v17740_v51, 1.0  ;;  %v2891_v21 = vadd.f32 %v2890_v8, %v2429_v47  ;;  %v4635_v18 = vrot.slane %v12447_v48, 4  ;;  %10898 = vrcp.f32 %v4625_v52 }
 0x174   :  { %v2896_v43 = vrot.slane %v2430_v55, 4  ;;  %v2986_v30 = vrot.slane %v2445_v57, 4  ;;  %v12496_v13 = vadd.f32 %v2844_v41, %v2843_v14  ;;  %v12498_v33 = vadd.f32 %v2850_v56, %v2849_v12  ;;  %v12507_v14 = vpop.xlane.xlu0 %4462  ;;  %v10746_v12 = vld [vmem:[%s17485_s3 + $0x10] sm:$0xff]   ;;  %v12528_v41 = vld [vmem:[%s17479_s1 + $0x40] sm:$0xff] }
 0x175   :  { %10424 = vmatpush3.bf16.msra.mxu1 %v10738_v24  ;;  %v4630_v3 = vrot.slane %v12420_v35, 6  ;;  %10900 = vrcp.f32 %v4626_v61  ;;  %v4631_v4 = vrot.slane %v12420_v35, 7  ;;  %v2892_v25 = vrot.slane %v2891_v21, 2  ;;  %17741 = vst [vmem:[#allocation14_spill] sm:$0xff] %v12507_v14 }
 0x176   :  { %10356 = vmatmul.mubr.bf16.gmra.mrb[20].mxu1 %v10733_v2  ;;  %10425 = vmatprep.subr.bf16.mxu1 %v10739_v17  ;;  %v10744_v2 = vld [vmem:[%s17485_s3] sm:$0xff]   ;;  %v4639_v24 = vrot.slane %v12487_v49, 1  ;;  %v4646_v52 = vrot.slane %v12490_v9, 1  ;;  %v4638_v47 = vrot.slane %v12447_v48, 7  ;;  %v2897_v11 = vadd.f32 %v2896_v43, %v2430_v55 }
 0x177   :  { %10359 = vmatprep.mubr.bf16.mxu1 %v10736_v42  ;;  %v2939_v42 = vadd.f32 %v2938_v54, %v2437_v20  ;;  %10902 = vrcp.f32 %v12447_v48  ;;  %v2846_v61 = vrot.slane %v12496_v13, 1  ;;  %v2852_v27 = vrot.slane %v12498_v33, 1  ;;  %v10754_v20 = vld [vmem:[%s17486_s8] sm:$0xff]  }
 0x178   :  { %10904 = vrcp.f32 %v4632_v16  ;;  %v2893_v16 = vadd.f32 %v2892_v25, %v2891_v21  ;;  %v2898_v8 = vrot.slane %v2897_v11, 2  ;;  %v826_v55 = vpop.permute.xlu0 %825 }
 0x179   :  { %10426 = vmatpush3.bf16.msra.mxu1 %v10739_v17  ;;  %v2987_v17 = vadd.f32 %v2986_v30, %v2445_v57  ;;  %v2940_v31 = vrot.slane %v2939_v42, 2  ;;  %10906 = vrcp.f32 %v4633_v46  ;;  %v1047_v46 = vrot.slane %v12528_v41, %v11542_v22 }
 0x17a   :  { %10427 = vmatprep.subr.bf16.mxu1 %v10742_v5  ;;  %10908 = vrcp.f32 %v4627_v44  ;;  %v2899_v54 = vadd.f32 %v2898_v8, %v2897_v11  ;;  %v2853_v35 = vadd.f32 %v2852_v27, %v12498_v33  ;;  %v12601_v8 = vld [vmem:[%s17479_s1 + $0x58] sm:$0xff]  ;;  %v4642_v27 = vrot.slane %v12487_v49, 4 }
 0x17b   :  { %10910 = vrcp.f32 %v4634_v62  ;;  %v9602_v62 = vunpack.c.l.bf16 %v12388_v53  ;;  %v2941_v56 = vadd.f32 %v2940_v31, %v2939_v42  ;;  %v12549_v53 = vld [vmem:[%s17479_s1 + $0x48] sm:$0xff]  ;;  %v1229_v33 = vrot.slane %v12601_v8, %v17666_v7 }
 0x17c   :  { %10912 = vrcp.f32 %v4628_v19  ;;  %v10747_v19 = vld [vmem:[%s17485_s3 + $0x18] sm:$0xff]   ;;  %v882_v42 = vpop.permute.xlu0 %881  ;;  %v1124_v25 = vrot.slane %v12549_v53, %v11545_v23 }
 0x17d   :  { %10428 = vmatpush3.bf16.msra.mxu1 %v10742_v5  ;;  %v2988_v5 = vrot.slane %v2987_v17, 2  ;;  %10914 = vrcp.f32 %v4635_v18  ;;  %v9618_v18 = vunpack.c.l.bf16 %v12409_v26  ;;  %v2942_v43 = vrot.slane %v2941_v56, 1  ;;  %v12570_v26 = vld [vmem:[%s17479_s1 + $0x50] sm:$0xff] }
 0x17e   :  { %10360 = vmatmul.mubr.bf16.gmra.mrb[24].mxu1 %v10737_v63  ;;  %v4637_v63 = vrot.slane %v12447_v48, 6  ;;  %10429 = vmatprep.subr.bf16.mxu1 %v10743_v15  ;;  %10916 = vrcp.f32 %v4629_v6  ;;  %v1103_v6 = vrot.slane %v12549_v53, %v11542_v22  ;;  %v2420_v30 = vmul.f32 %v9602_v62, %v826_v55  ;;  %v10749_v62 = vld [vmem:[%s17485_s3 + $0x28] sm:$0xff]  }
 0x17f   :  { %10363 = vmatprep.mubr.bf16.mxu1 %v10740_v38  ;;  %v12523_v38 = vpop.eup %10896  ;;  %v4643_v55 = vrot.slane %v12487_v49, 5 }
 0x180   :  { %v12534_v44 = vpop.eup %10898 }
 0x181   :  { %10430 = vmatpush3.bf16.msra.mxu1 %v10743_v15  ;;  %v12539_v57 = vpop.eup %10900 }
 0x182   :  { %10463 = vmatprep.subr.bf16.mxu1 %v10754_v20  ;;  %v12556_v51 = vpop.eup %10902 }
 0x183   :  { %v10905_v21 = vpop.eup %10904 }
 0x184   :  { %v10907_v15 = vpop.eup %10906 }
 0x186   :  { %10364 = vmatmul.mubr.bf16.gmra.mrb[28].mxu1 %v10741_v32  ;;  %v1068_v32 = vrot.slane %v12528_v41, %v11545_v23 }
 0x187   :  { %10431 = vmatprep.mubr.bf16.mxu1 %v10744_v2  ;;  %v2989_v2 = vadd.f32 %v2988_v5, %v2987_v17 }
 0x189   :  { %4474 = vadd.xlane.f32.xlu0 %v4473_v39  ;;  %v4636_v39 = vrot.slane %v12447_v48, 5  ;;  %v2990_v11 = vrot.slane %v2989_v2, 1  ;;  %v2943_v48 = vadd.f32 %v2942_v43, %v2941_v56 }
 0x18b   :  { %10918 = vrcp.f32 %v4636_v39  ;;  %v12559_v39 = vpop.xlane.xlu1 %4465 }
 0x18c   :  { %10920 = vrcp.f32 %v4639_v24  ;;  %17742 = vst [vmem:[#allocation16_spill] sm:$0xff] %v12559_v39  ;;  %v12565_v24 = vpop.eup %10908 }
 0x18d   :  { %10922 = vrcp.f32 %v4646_v52  ;;  %v2900_v52 = vrot.slane %v2899_v54, 1  ;;  %v12576_v17 = vpop.eup %10910 }
 0x18e   :  { %10432 = vmatmul.mubr.bf16.vlgmr.msra.gmra.mrb[32].mxu1 %v10745_v59  ;;  %10924 = vrcp.f32 %v4630_v3  ;;  %v1173_v3 = vrot.slane %v12570_v26, %v17666_v7  ;;  %v9607_v59 = vunpack.c.h.bf16 %v12393_v36  ;;  %v12585_v31 = vpop.eup %10912  ;;  %v4641_v36 = vrot.slane %v12487_v49, 3 }
 0x18f   :  { %10435 = vmatprep.mubr.bf16.mxu1 %v10746_v12  ;;  %10464 = vmatpush3.bf16.msra.mxu1 %v10754_v20  ;;  %10926 = vrcp.f32 %v4637_v63  ;;  %v2847_v63 = vadd.f32 %v2846_v61, %v12496_v13  ;;  %v4640_v12 = vrot.slane %v12487_v49, 2  ;;  %v2428_v20 = vmul.f32 %v9618_v18, %v882_v42  ;;  %v12593_v13 = vld [vmem:[%s17482_s0 + $0xc8] sm:$0xff]   ;;  %v12596_v61 = vpop.eup %10914  ;;  %v952_v42 = vpop.permute.xlu0 %951 }
 0x190   :  { %4477 = vadd.xlane.f32.xlu1 %v4476_v37  ;;  %v2894_v37 = vrot.slane %v2893_v16, 1  ;;  %10928 = vrcp.f32 %v4631_v4  ;;  %17743 = vst [vmem:[#allocation5_spill] sm:$0xff] %v12596_v61  ;;  %v2901_v5 = vadd.f32 %v2900_v52, %v2899_v54  ;;  %v4644_v54 = vrot.slane %v12487_v49, 6 }
 0x191   :  { %10930 = vrcp.f32 %v4638_v47  ;;  %v2836_v47 = vrot.slane %v2420_v30, 4  ;;  %v5144_v56 = vmul.f32 %v12534_v44, %v2847_v63  ;;  %v2884_v43 = vrot.slane %v2428_v20, 4 }
 0x192   :  { %v2895_v4 = vadd.f32 %v2894_v37, %v2893_v16  ;;  %v12606_v16 = vpop.eup %10916  ;;  %10932 = vrcp.f32 %v12487_v49  ;;  %v5162_v63 = vmul.f32 %v10907_v15, %v2901_v5  ;;  %v17771_v7 = vrot.slane %v12490_v9, 7 }
 0x193   :  { %17744 = vst [vmem:[#allocation27_spill] sm:$0xff] %v12606_v16  ;;  %10934 = vrcp.f32 %v4640_v12  ;;  %v2837_v44 = vadd.f32 %v2836_v47, %v2420_v30  ;;  %v4647_v47 = vrot.slane %v12490_v9, 2 }
 0x194   :  { %v5160_v18 = vmul.f32 %v10905_v21, %v2895_v4  ;;  %10936 = vrcp.f32 %v4641_v36  ;;  %v9623_v4 = vunpack.c.h.bf16 %v12431_v58 }
 0x195   :  { %v12613_v37 = vpop.eup %10918  ;;  %10938 = vrcp.f32 %v4642_v27  ;;  %v2838_v5 = vrot.slane %v2837_v44, 2 }
 0x196   :  { %10436 = vmatmul.mubr.bf16.gmra.mrb[36].mxu1 %v10747_v19  ;;  %17745 = vst [vmem:[#allocation29_spill] sm:$0xff] %v12613_v37  ;;  %v9638_v19 = vunpack.c.l.bf16 %v12593_v13  ;;  %10940 = vrcp.f32 %v4643_v55 }
 0x197   :  { %10439 = vmatprep.mubr.bf16.mxu1 %v10748_v29  ;;  %v5146_v29 = vmul.f32 %v12539_v57, %v2853_v35  ;;  %v12628_v57 = vld [vmem:[%s17482_s0 + $0xe8] sm:$0xff]   ;;  %v5622_v35 = vpack.c.bf16 %v5144_v56, %v5144_v56  ;;  %10942 = vrcp.f32 %v4644_v54 }
 0x198   :  { %v2438_v30 = vmul.f32 %v9638_v19, %v952_v42  ;;  %10944 = vrcp.f32 %v12490_v9  ;;  %v10751_v19 = vld [vmem:[%s17485_s3 + $0x38] sm:$0xff]   ;;  %v10755_v54 = vld [vmem:[%s17486_s8 + $0x8] sm:$0xff]  }
 0x199   :  { %v5623_v15 = vpack.c.bf16 %v5146_v29, %v5146_v29  ;;  %10465 = vmatprep.subr.bf16.mxu1 %v10755_v54  ;;  %10946 = vrcp.f32 %v4647_v47 }
 0x19a   :  { %10466 = vmatpush3.bf16.msra.mxu1 %v10755_v54  ;;  %v12688_v54 = vld [vmem:[%s17482_s0 + $0xb0] sm:$0xff]  }
 0x19e   :  { %10440 = vmatmul.mubr.bf16.gmra.mrb[40].mxu1 %v10749_v62  ;;  %v5631_v62 = vpack.c.bf16 %v5162_v63, %v5162_v63 }
 0x19f   :  { %1049 = vbcast.lane.b32.xlu0 %v1047_v46, 256  ;;  %v2991_v46 = vadd.f32 %v2990_v11, %v2989_v2  ;;  %v10750_v2 = vld [vmem:[%s17485_s3 + $0x30] sm:$0xff]  }
 0x1a0   :  { %10443 = vmatprep.mubr.bf16.mxu1 %v10750_v2  ;;  %v12652_v2 = vunpack.c.l.b16 %v5622_v35 }
 0x1a1   :  { %1070 = vbcast.lane.b32.xlu1 %v1068_v32, 256  ;;  %v847_v32 = vpop.permute.xlu1 %846 }
 0x1a2   :  { %v2423_v39 = vmul.f32 %v9607_v59, %v847_v32  ;;  %v2885_v59 = vadd.f32 %v2884_v43, %v2428_v20  ;;  %v12643_v32 = vld [vmem:[%s17482_s0 + $0x90] sm:$0xff]   ;;  %v4648_v20 = vrot.slane %v12490_v9, 3  ;;  %v10752_v43 = vld [vmem:[%s17485_s3 + $0x40] sm:$0xff]  }
 0x1a3   :  { %1105 = vbcast.lane.b32.xlu0 %v1103_v6, 256  ;;  %v10921_v6 = vpop.eup %10920  ;;  %v9610_v55 = vunpack.c.l.bf16 %v12643_v32 }
 0x1a4   :  { %v5176_v52 = vmul.f32 %v10921_v6, %v2943_v48  ;;  %v5630_v48 = vpack.c.bf16 %v5160_v18, %v5160_v18  ;;  %v2854_v56 = vrot.slane %v2423_v39, 4  ;;  %v2944_v6 = vrot.slane %v2438_v30, 4 }
 0x1a5   :  { %1126 = vbcast.lane.b32.xlu1 %v1124_v25, 256  ;;  %v10923_v25 = vpop.eup %10922  ;;  %v2886_v63 = vrot.slane %v2885_v59, 2  ;;  %v2839_v18 = vadd.f32 %v2838_v5, %v2837_v44  ;;  %10948 = vrcp.f32 %v4648_v20 }
 0x1a6   :  { %v5192_v12 = vmul.f32 %v10923_v25, %v2991_v46  ;;  %v5638_v27 = vpack.c.bf16 %v5176_v52, %v5176_v52  ;;  %v903_v46 = vpop.permute.xlu1 %902  ;;  %v12661_v25 = vunpack.c.l.b16 %v5623_v15  ;;  %v12663_v52 = vunpack.c.l.b16 %v5630_v48  ;;  %10444 = vmatmul.mubr.bf16.gmra.mrb[44].mxu1 %v10751_v19 }
 0x1a7   :  { %1175 = vbcast.lane.b32.xlu0 %v1173_v3, 256  ;;  %v12623_v3 = vpop.eup %10924  ;;  %v12675_v15 = vunpack.c.l.b16 %v5631_v62  ;;  %v2945_v5 = vadd.f32 %v2944_v6, %v2438_v30  ;;  %10447 = vmatprep.mubr.bf16.mxu1 %v10752_v43  ;;  %v9634_v62 = vunpack.c.l.bf16 %v12426_v0  ;;  %v10753_v6 = vld [vmem:[%s17485_s3 + $0x48] sm:$0xff]   ;;  %v10759_v0 = vld [vmem:[%s17486_s8 + $0x18] sm:$0xff]  }
 0x1a8   :  { %17746 = vst [vmem:[#allocation12_spill] sm:$0xff] %v12623_v3  ;;  %v12630_v21 = vpop.eup %10926  ;;  %v5646_v58 = vpack.c.bf16 %v5192_v12, %v5192_v12  ;;  %v2431_v12 = vmul.f32 %v9623_v4, %v903_v46  ;;  %v12669_v29 = vunpack.c.l.b16 %v5638_v27  ;;  %v2855_v4 = vadd.f32 %v2854_v56, %v2423_v39  ;;  %v10758_v27 = vld [vmem:[%s17486_s8 + $0x10] sm:$0xff]  }
 0x1a9   :  { %1231 = vbcast.lane.b32.xlu1 %v1229_v33, 256  ;;  %17747 = vst [vmem:[#allocation8_spill] sm:$0xff] %v12630_v21  ;;  %v12633_v36 = vpop.eup %10928  ;;  %v2887_v56 = vadd.f32 %v2886_v63, %v2885_v59  ;;  %10467 = vmatprep.subr.bf16.mxu1 %v10758_v27  ;;  %v12705_v63 = vld [vmem:[%s17482_s0 + $0xd0] sm:$0xff]  }
 0x1aa   :  { %17748 = vst [vmem:[#allocation17_spill] sm:$0xff] %v12633_v36  ;;  %v12636_v33 = vpop.eup %10930  ;;  %17751 = vst [vmem:[#allocation22_spill] sm:$0xff] %v12669_v29  ;;  %v12677_v48 = vunpack.c.l.b16 %v5646_v58  ;;  %v2902_v19 = vrot.slane %v2431_v12, 4  ;;  %v1008_v14 = vpop.permute.xlu1 %1007  ;;  %10468 = vmatpush3.bf16.msra.mxu1 %v10758_v27  ;;  %v2946_v27 = vrot.slane %v2945_v5, 2  ;;  %v12722_v59 = vld [vmem:[%s17479_s1 + $0x70] sm:$0xff]  ;;  %v17767_v29 = vrot.slane %v12487_v49, 7 }
 0x1ab   :  { %17749 = vst [vmem:[#allocation18_spill] sm:$0xff] %v12636_v33  ;;  %v12659_v42 = vpop.eup %10932  ;;  %17759 = vst [vmem:[#allocation35_spill] sm:$0xff] %v12722_v59  ;;  %v2888_v36 = vrot.slane %v2887_v56, 1  ;;  %v12739_v3 = vld [vmem:[%s17482_s0 + $0xf0] sm:$0xff]   ;;  %10469 = vmatprep.subr.bf16.mxu1 %v10759_v0  ;;  %v12749_v21 = vsel %vm4436_vm0, %v12722_v59, 0.0  ;;  %v12802_v49 = vld [vmem:[%s17482_s0 + $0xf8] sm:$0xff]  }
 0x1ac   :  { %v12665_v11 = vpop.xlane.xlu0 %4468  ;;  %v12667_v35 = vpop.eup %10934  ;;  %17753 = vst [vmem:[#allocation24_spill] sm:$0xff] %v12677_v48  ;;  %17761 = vst [vmem:[#allocation36_spill] sm:$0xff] %v12739_v3 }
 0x1ad   :  { %17750 = vst [vmem:[#allocation20_spill] sm:$0xff] %v12665_v11  ;;  %v12673_v33 = vpop.eup %10936  ;;  %v2840_v11 = vrot.slane %v2839_v18, 1 }
 0x1ae   :  { %17752 = vst [vmem:[#allocation21_spill] sm:$0xff] %v12673_v33  ;;  %v12682_v46 = vpop.eup %10938  ;;  %10470 = vmatpush3.bf16.msra.mxu1 %v10759_v0 }
 0x1af   :  { %17754 = vst [vmem:[#allocation23_spill] sm:$0xff] %v12682_v46  ;;  %v12691_v39 = vpop.eup %10940  ;;  %v10756_v46 = vld [vmem:[%s17485_s3 + $0x50] sm:$0xff]   ;;  %v2841_v37 = vadd.f32 %v2840_v11, %v2839_v18  ;;  %v12756_v11 = vld [vmem:[%s17482_s0 + $0xb8] sm:$0xff]   ;;  %10448 = vmatmul.mubr.bf16.gmra.mrb[48].mxu1 %v10753_v6  ;;  %v2947_v18 = vadd.f32 %v2946_v27, %v2945_v5  ;;  %v10760_v6 = vld [vmem:[%s17485_s3 + $0x60] sm:$0xff]  }
 0x1b0   :  { %17755 = vst [vmem:[#allocation34_spill] sm:$0xff] %v12691_v39  ;;  %v854_v44 = vpop.permute.xlu0 %853  ;;  %v12695_v30 = vpop.eup %10942  ;;  %v2856_v39 = vrot.slane %v2855_v4, 2  ;;  %17763 = vst [vmem:[#allocation37_spill] sm:$0xff] %v12756_v11  ;;  %10451 = vmatprep.mubr.bf16.mxu1 %v10756_v46 }
 0x1b1   :  { %17756 = vst [vmem:[#allocation25_spill] sm:$0xff] %v12695_v30  ;;  %v2424_v20 = vmul.f32 %v9610_v55, %v854_v44  ;;  %v12713_v55 = vpop.eup %10944  ;;  %v17758_v44 = vunpack.c.l.bf16 %v12628_v57  ;;  %v12727_v30 = vld [vmem:[%s17482_s0 + $0x98] sm:$0xff]   ;;  %v5142_v46 = vmul.f32 %v12523_v38, %v2841_v37  ;;  %v2948_v37 = vrot.slane %v2947_v18, 1 }
 0x1b2   :  { %17757 = vst [vmem:[#allocation28_spill] sm:$0xff] %v12713_v55  ;;  %v12764_v0 = vpop.eup %10946  ;;  %v10757_v38 = vld [vmem:[%s17485_s3 + $0x58] sm:$0xff]  }
 0x1b3   :  { %v2446_v47 = vmul.f32 %v17758_v44, %v1008_v14  ;;  %v2903_v14 = vadd.f32 %v2902_v19, %v2431_v12  ;;  %v2860_v48 = vrot.slane %v2424_v20, 4  ;;  %v12745_v12 = vld [vmem:[%s17479_s1 + $0x78] sm:$0xff]  ;;  %v2857_v19 = vadd.f32 %v2856_v39, %v2855_v4  ;;  %v10762_v39 = vld [vmem:[%s17486_s8 + $0x20] sm:$0xff]   ;;  %v12771_v27 = vpop.eup %10948 }
 0x1b4   :  { %v12732_v44 = vpop.xlane.xlu1 %4471  ;;  %v938_v43 = vpop.permute.xlu0 %937  ;;  %17762 = vst [vmem:[#allocation32_spill] sm:$0xff] %v12745_v12  ;;  %v12769_v5 = vsel %vm4436_vm0, %v12745_v12, 0.0  ;;  %17765 = vst [vmem:[#allocation31_spill] sm:$0xff] %v12771_v27  ;;  %10471 = vmatprep.subr.bf16.mxu1 %v10762_v39  ;;  %v17766_v12 = vrot.slane %v12490_v9, 5 }
 0x1b5   :  { %17760 = vst [vmem:[#allocation30_spill] sm:$0xff] %v12732_v44  ;;  %v2436_v16 = vmul.f32 %v9634_v62, %v938_v43  ;;  %v2992_v62 = vrot.slane %v2446_v47, 4  ;;  %v17764_v43 = vrot.slane %v12490_v9, 4  ;;  %v2889_v44 = vadd.f32 %v2888_v36, %v2887_v56  ;;  %v12778_v36 = vld [vmem:[%s17482_s0 + $0xd8] sm:$0xff]   ;;  %10472 = vmatpush3.bf16.msra.mxu1 %v10762_v39 }
 0x1b6   :  { %v2904_v58 = vrot.slane %v2903_v14, 2  ;;  %v2858_v56 = vrot.slane %v2857_v19, 1  ;;  %v17768_v39 = vrot.slane %v12490_v9, 6 }
 0x1b7   :  { %10950 = vrcp.f32 %v17764_v43  ;;  %v2861_v43 = vadd.f32 %v2860_v48, %v2424_v20  ;;  %v2932_v4 = vrot.slane %v2436_v16, 4  ;;  %v2993_v48 = vadd.f32 %v2992_v62, %v2446_v47  ;;  %10452 = vmatmul.mubr.bf16.gmra.mrb[52].mxu1 %v10757_v38 }
 0x1b8   :  { %v910_v33 = vpop.permute.xlu1 %909  ;;  %v994_v59 = vpop.permute.xlu0 %993  ;;  %10952 = vrcp.f32 %v17766_v12  ;;  %v5158_v12 = vmul.f32 %v12556_v51, %v2889_v44  ;;  %v2905_v55 = vadd.f32 %v2904_v58, %v2903_v14  ;;  %v17769_v20 = vunpack.c.l.bf16 %v12688_v54  ;;  %10455 = vmatprep.mubr.bf16.mxu1 %v10760_v6 }
 0x1b9   :  { %10954 = vrcp.f32 %v17767_v29  ;;  %v5621_v29 = vpack.c.bf16 %v5142_v46, %v5142_v46  ;;  %v2862_v47 = vrot.slane %v2861_v43, 2  ;;  %v2933_v62 = vadd.f32 %v2932_v4, %v2436_v16  ;;  %v10761_v16 = vld [vmem:[%s17485_s3 + $0x68] sm:$0xff]  }
 0x1ba   :  { %10956 = vrcp.f32 %v17768_v39  ;;  %v2432_v51 = vmul.f32 %v17769_v20, %v910_v33  ;;  %v2859_v58 = vadd.f32 %v2858_v56, %v2857_v19  ;;  %v17770_v14 = vunpack.c.l.bf16 %v12438_v60 }
 0x1bb   :  { %10958 = vrcp.f32 %v17771_v7  ;;  %v2949_v39 = vadd.f32 %v2948_v37, %v2947_v18  ;;  %v2994_v11 = vrot.slane %v2993_v48, 2  ;;  %v5629_v4 = vpack.c.bf16 %v5158_v12, %v5158_v12 }
 0x1bc   :  { %v959_v27 = vpop.permute.xlu1 %958  ;;  %v12794_v3 = vpop.permute.xlu0 %860  ;;  %v2444_v44 = vmul.f32 %v17770_v14, %v994_v59  ;;  %v2906_v33 = vrot.slane %v2905_v55, 1  ;;  %v6502_v18 = vunpack.c.l.b16 %v5621_v29  ;;  %v2863_v56 = vadd.f32 %v2862_v47, %v2861_v43 }
 0x1bd   :  { %v2934_v38 = vrot.slane %v2933_v62, 2  ;;  %v2908_v37 = vrot.slane %v2432_v51, 4  ;;  %v5148_v6 = vmul.f32 %v12565_v24, %v2859_v58  ;;  %v5178_v29 = vmul.f32 %v12667_v35, %v2949_v39 }
 0x1be   :  { %v2980_v20 = vrot.slane %v2444_v44, 4  ;;  %v2995_v43 = vadd.f32 %v2994_v11, %v2993_v48  ;;  %v6510_v61 = vunpack.c.l.b16 %v5629_v4  ;;  %v2907_v14 = vadd.f32 %v2906_v33, %v2905_v55 }
 0x1bf   :  { %v17773_v39 = vrot.slane %v12652_v2, 7  ;;  %v2864_v47 = vrot.slane %v2863_v56, 1  ;;  %v2935_v7 = vadd.f32 %v2934_v38, %v2933_v62  ;;  %v2909_v59 = vadd.f32 %v2908_v37, %v2432_v51  ;;  %10456 = vmatmul.mubr.bf16.gmra.mrb[56].mxu1 %v10761_v16  ;;  %v12862_v2 = vpop.f32.mrb[0].mxu1  ;;  %v10764_v62 = vld [vmem:[%s17485_s3 + $0x70] sm:$0xff]  }
 0x1c0   :  { %v12814_v19 = vpop.permute.xlu1 %1014  ;;  %v12816_v60 = vpop.permute.xlu0 %965  ;;  %v5624_v55 = vpack.c.bf16 %v5148_v6, %v5148_v6  ;;  %v2981_v33 = vadd.f32 %v2980_v20, %v2444_v44  ;;  %v17774_v46 = vunpack.c.h.bf16 %v12593_v13  ;;  %17775 = vst [vmem:[#allocation38_spill] sm:$0xff] %v12862_v2  ;;  %v10766_v51 = vld [vmem:[%s17486_s8 + $0x30] sm:$0xff]   ;;  %v5639_v44 = vpack.c.bf16 %v5178_v29, %v5178_v29  ;;  %10459 = vmatprep.mubr.bf16.mxu1 %v10764_v62 }
 0x1c1   :  { %v12822_v9 = vpop.eup %10950  ;;  %v6790_v24 = vsel %vm6727_vm1, %v17773_v39, %v6502_v18  ;;  %v2996_v18 = vrot.slane %v2995_v43, 1  ;;  %v17776_v13 = vunpack.c.h.bf16 %v12643_v32  ;;  %v12875_v16 = vpop.f32.mrb[1].mxu1  ;;  %v17778_v37 = vrot.slane %v12663_v52, 7  ;;  %v10767_v32 = vld [vmem:[%s17486_s8 + $0x38] sm:$0xff]  }
 0x1c2   :  { %v12841_v58 = vpop.eup %10952  ;;  %v2439_v35 = vmul.f32 %v17774_v46, %v959_v27  ;;  %17777 = vst [vmem:[#allocation26_spill] sm:$0xff] %v12875_v16  ;;  %v5164_v20 = vmul.f32 %v12576_v17, %v2907_v14  ;;  %v2910_v52 = vrot.slane %v2909_v59, 2  ;;  %v17779_v17 = vrot.slane %v12661_v25, 6  ;;  %v12895_v14 = vpop.f32.mrb[2].mxu1 }
 0x1c3   :  { %17772 = vst [vmem:[#allocation33_spill] sm:$0xff] %v12841_v58  ;;  %v12849_v48 = vpop.eup %10954  ;;  %v2425_v27 = vmul.f32 %v17776_v13, %v12794_v3  ;;  %v6804_v6 = vsel %vm6727_vm1, %v17778_v37, %v6510_v61  ;;  %v2936_v13 = vrot.slane %v2935_v7, 1  ;;  %17780 = vst [vmem:[#allocation15_spill] sm:$0xff] %v12895_v14  ;;  %v6505_v37 = vunpack.c.l.b16 %v5624_v55  ;;  %v12899_v11 = vpop.f32.mrb[3].mxu1  ;;  %v17788_v14 = vld [vmem:[#allocation37_spill] sm:$0xff] }
 0x1c4   :  { %v12843_v12 = vpop.permute.xlu1 %916  ;;  %v12854_v4 = vpop.eup %10956  ;;  %v6792_v61 = vsel %vm6730_vm2, %v17779_v17, %v6790_v24  ;;  %v2982_v46 = vrot.slane %v2981_v33, 2  ;;  %v2950_v3 = vrot.slane %v2439_v35, 4  ;;  %17781 = vst [vmem:[#allocation10_spill] sm:$0xff] %v12899_v11  ;;  %v17783_v24 = vrot.slane %v12675_v15, 6 }
 0x1c5   :  { %v12858_v58 = vpop.permute.xlu0 %867  ;;  %v12877_v38 = vpop.eup %10958  ;;  %v2866_v25 = vrot.slane %v2425_v27, 4  ;;  %v5632_v55 = vpack.c.bf16 %v5164_v20, %v5164_v20 }
 0x1c6   :  { %4480 = vadd.xlane.f32.xlu0 %v12749_v21  ;;  %v10763_v21 = vld [vmem:[%s17486_s8 + $0x28] sm:$0xff]   ;;  %v12909_v17 = vsel %vm6730_vm2, %v17783_v24, %v6804_v6  ;;  %v6793_v6 = vrot.slane %v6505_v37, 5  ;;  %v2983_v20 = vadd.f32 %v2982_v46, %v2981_v33  ;;  %v2951_v24 = vadd.f32 %v2950_v3, %v2439_v35 }
 0x1c7   :  { %10473 = vmatprep.subr.bf16.mxu1 %v10763_v21 }
 0x1c8   :  { %10474 = vmatpush3.bf16.msra.mxu1 %v10763_v21  ;;  %v12883_v29 = vpop.permute.xlu1 %1021  ;;  %v2865_v21 = vadd.f32 %v2864_v47, %v2863_v56  ;;  %v10765_v56 = vld [vmem:[%s17485_s3 + $0x78] sm:$0xff]   ;;  %v12904_v47 = vunpack.c.l.b16 %v5639_v44  ;;  %v2937_v44 = vadd.f32 %v2936_v13, %v2935_v7  ;;  %v12940_v37 = vsel %vm6733_vm3, %v6793_v6, %v6792_v61 }
 0x1c9   :  { %10475 = vmatprep.subr.bf16.mxu1 %v10766_v51  ;;  %v12911_v39 = vpop.permute.xlu0 %972  ;;  %10460 = vmatmul.mubr.bf16.gmra.mrb[60].mxu1 %v10765_v56 }
 0x1ca   :  { %17782 = vst [vmem:[#allocation11_spill] sm:$0xff] %v12904_v47  ;;  %v5150_v15 = vmul.f32 %v12585_v31, %v2865_v21  ;;  %v17784_v31 = vunpack.c.h.bf16 %v12628_v57  ;;  %v17785_v21 = vunpack.c.l.bf16 %v12705_v63  ;;  %v17789_v57 = vunpack.c.l.bf16 %v17788_v14 }
 0x1cc   :  { %10476 = vmatpush3.bf16.msra.mxu1 %v10766_v51  ;;  %v924_v62 = vpop.permute.xlu1 %923  ;;  %v2447_v7 = vmul.f32 %v17784_v31, %v12814_v19  ;;  %v2440_v33 = vmul.f32 %v17785_v21, %v12816_v60  ;;  %v5625_v3 = vpack.c.bf16 %v5150_v15, %v5150_v15  ;;  %v2984_v19 = vrot.slane %v2983_v20, 1 }
 0x1cd   :  { %4483 = vadd.xlane.f32.xlu1 %v12769_v5  ;;  %v2997_v5 = vadd.f32 %v2996_v18, %v2995_v43  ;;  %10477 = vmatprep.subr.bf16.mxu1 %v10767_v32  ;;  %v2911_v18 = vadd.f32 %v2910_v52, %v2909_v59  ;;  %v2867_v43 = vadd.f32 %v2866_v25, %v2425_v27  ;;  %v6513_v59 = vunpack.c.l.b16 %v5632_v55  ;;  %v875_v52 = vpop.permute.xlu0 %874 }
 0x1ce   :  { %v2998_v25 = vrot.slane %v2447_v7, 4  ;;  %v17787_v31 = vunpack.c.l.bf16 %v12727_v30  ;;  %v2434_v61 = vmul.f32 %v17789_v57, %v924_v62  ;;  %v12952_v6 = vunpack.c.l.b16 %v5625_v3 }
 0x1cf   :  { %v5194_v16 = vmul.f32 %v12764_v0, %v2997_v5  ;;  %v5174_v0 = vmul.f32 %v12659_v42, %v2937_v44  ;;  %v2912_v27 = vrot.slane %v2911_v18, 1  ;;  %v2868_v5 = vrot.slane %v2867_v43, 2 }
 0x1d0   :  { %10478 = vmatpush3.bf16.msra.mxu1 %v10767_v32  ;;  %v1029_v13 = vpop.permute.xlu1 %1028  ;;  %v2952_v32 = vrot.slane %v2951_v24, 2  ;;  %v17786_v42 = vunpack.c.h.bf16 %v12688_v54  ;;  %v6807_v15 = vrot.slane %v6513_v59, 5  ;;  %v2956_v44 = vrot.slane %v2440_v33, 4  ;;  %v12959_v54 = vld [vmem:[%s17479_s1 + $0x60] sm:$0xff] }
 0x1d1   :  { %v5647_v56 = vpack.c.bf16 %v5194_v16, %v5194_v16  ;;  %v2426_v21 = vmul.f32 %v17787_v31, %v12858_v58  ;;  %v5637_v46 = vpack.c.bf16 %v5174_v0, %v5174_v0  ;;  %v2913_v60 = vadd.f32 %v2912_v27, %v2911_v18 }
 0x1d2   :  { %v2433_v55 = vmul.f32 %v17786_v42, %v12843_v12  ;;  %v17790_v16 = vunpack.c.h.bf16 %v12727_v30  ;;  %v2985_v11 = vadd.f32 %v2984_v19, %v2983_v20  ;;  %v2953_v51 = vadd.f32 %v2952_v32, %v2951_v24  ;;  %v980_v19 = vpop.permute.xlu0 %979  ;;  %v17793_v42 = vld [vmem:[#allocation5_spill] sm:$0xff] }
 0x1d3   :  { %v12965_v59 = vunpack.c.l.b16 %v5647_v56  ;;  %v2869_v3 = vadd.f32 %v2868_v5, %v2867_v43  ;;  %v2999_v18 = vadd.f32 %v2998_v25, %v2447_v7  ;;  %v17792_v20 = vrot.slane %v12528_v41, %v11574_v34  ;;  %v17794_v5 = vld [vmem:[#allocation28_spill] sm:$0xff] }
 0x1d4   :  { %v2427_v35 = vmul.f32 %v17790_v16, %v875_v52  ;;  %v2914_v0 = vrot.slane %v2433_v55, 4  ;;  %v931_v30 = vpop.permute.xlu1 %930  ;;  %v2957_v24 = vadd.f32 %v2956_v44, %v2440_v33  ;;  %v2872_v27 = vrot.slane %v2426_v21, 4  ;;  %v17795_v16 = vld [vmem:[#allocation36_spill] sm:$0xff] }
 0x1d5   :  { %v2920_v57 = vrot.slane %v2434_v61, 4  ;;  %v12972_v32 = vsel %vm6733_vm3, %v6807_v15, %v12909_v17  ;;  %v6518_v56 = vunpack.c.l.b16 %v5637_v46  ;;  %v5166_v43 = vmul.f32 %v17793_v42, %v2913_v60 }
 0x1d6   :  { %v2878_v7 = vrot.slane %v2427_v35, 4  ;;  %v5190_v25 = vmul.f32 %v17794_v5, %v2985_v11  ;;  %v2954_v31 = vrot.slane %v2953_v51, 1  ;;  %v17797_v44 = vunpack.c.h.bf16 %v12705_v63 }
 0x1d7   :  { %v17798_v17 = vrot.slane %v12549_v53, %v11574_v34  ;;  %v2870_v15 = vrot.slane %v2869_v3, 1  ;;  %v3000_v46 = vrot.slane %v2999_v18, 2  ;;  %v2915_v58 = vadd.f32 %v2914_v0, %v2433_v55 }
 0x1d8   :  { %v2441_v62 = vmul.f32 %v17797_v44, %v12911_v39  ;;  %v17799_v60 = vunpack.c.h.bf16 %v17795_v16  ;;  %v17800_v11 = vrot.slane %v12570_v26, %v11542_v22  ;;  %v2958_v5 = vrot.slane %v2957_v24, 2  ;;  %v17802_v44 = vld [vmem:[#allocation22_spill] sm:$0xff] }
 0x1d9   :  { %v17801_v63 = vunpack.c.l.bf16 %v12778_v36  ;;  %v17803_v52 = vrot.slane %v17802_v44, 7  ;;  %v5633_v2 = vpack.c.bf16 %v5166_v43, %v5166_v43  ;;  %v2879_v55 = vadd.f32 %v2878_v7, %v2427_v35 }
 0x1da   :  { %v2449_v42 = vmul.f32 %v17799_v60, %v1029_v13  ;;  %v17805_v0 = vunpack.c.h.bf16 %v17788_v14  ;;  %v5645_v60 = vpack.c.bf16 %v5190_v25, %v5190_v25  ;;  %v2955_v47 = vadd.f32 %v2954_v31, %v2953_v51 }
 0x1db   :  { %v2442_v39 = vmul.f32 %v17801_v63, %v980_v19  ;;  %v2962_v12 = vrot.slane %v2441_v62, 4  ;;  %v17807_v35 = vrot.slane %v12601_v8, %v11542_v22  ;;  %v3001_v14 = vadd.f32 %v3000_v46, %v2999_v18 }
 0x1dc   :  { %1077 = vbcast.lane.b32.xlu0 %v17792_v20, 256  ;;  %v17796_v20 = vunpack.c.l.bf16 %v17795_v16  ;;  %v2435_v13 = vmul.f32 %v17805_v0, %v931_v30  ;;  %v1036_v16 = vpop.permute.xlu1 %1035  ;;  %v3010_v19 = vrot.slane %v2449_v42, 4  ;;  %v13006_v51 = vadd.f32 %v2958_v5, %v2957_v24 }
 0x1dd   :  { %v2968_v43 = vrot.slane %v2442_v39, 4  ;;  %v2880_v7 = vrot.slane %v2879_v55, 2  ;;  %v17808_v31 = vunpack.c.h.bf16 %v12778_v36  ;;  %v13010_v44 = vunpack.c.l.b16 %v5633_v2  ;;  %v17811_v36 = vld [vmem:[#allocation21_spill] sm:$0xff] }
 0x1de   :  { %v2448_v33 = vmul.f32 %v17796_v20, %v12883_v29  ;;  %1133 = vbcast.lane.b32.xlu1 %v17798_v17, 256  ;;  %v2873_v29 = vadd.f32 %v2872_v27, %v2426_v21  ;;  %v2921_v20 = vadd.f32 %v2920_v57, %v2434_v61  ;;  %v12996_v17 = vsel %vm6727_vm1, %v17803_v52, %v6518_v56  ;;  %v987_v21 = vpop.permute.xlu0 %986 }
 0x1df   :  { %17804 = vst [vmem:[#allocation13_spill] sm:$0xff] %v12996_v17  ;;  %v17806_v61 = vrot.slane %v12570_v26, %v11545_v23  ;;  %v2871_v27 = vadd.f32 %v2870_v15, %v2869_v3  ;;  %v2916_v57 = vrot.slane %v2915_v58, 2  ;;  %v2926_v52 = vrot.slane %v2435_v13, 4 }
 0x1e0   :  { %1161 = vbcast.lane.b32.xlu0 %v17800_v11, 256  ;;  %v3004_v11 = vrot.slane %v2448_v33, 4  ;;  %v2874_v30 = vrot.slane %v2873_v29, 2  ;;  %v2922_v56 = vrot.slane %v2921_v20, 2  ;;  %v2443_v63 = vmul.f32 %v17808_v31, %v987_v21  ;;  %v1043_v24 = vpop.permute.xlu1 %1042 }
 0x1e1   :  { %v2927_v25 = vadd.f32 %v2926_v52, %v2435_v13  ;;  %v6526_v3 = vunpack.c.l.b16 %v5645_v60  ;;  %v2963_v0 = vadd.f32 %v2962_v12, %v2441_v62  ;;  %v2917_v18 = vadd.f32 %v2916_v57, %v2915_v58  ;;  %v17812_v12 = vld [vmem:[#allocation27_spill] sm:$0xff] }
 0x1e2   :  { %1182 = vbcast.lane.b32.xlu1 %v17806_v61, 256  ;;  %v3005_v15 = vadd.f32 %v3004_v11, %v2448_v33  ;;  %v17809_v61 = vrot.slane %v12601_v8, %v11545_v23  ;;  %v3011_v46 = vadd.f32 %v3010_v19, %v2449_v42  ;;  %v2974_v22 = vrot.slane %v2443_v63, 4 }
 0x1e3   :  { %v17810_v5 = vrot.slane %v12528_v41, %v11587_v40  ;;  %v13019_v13 = vmul.f32 %v17811_v36, %v2955_v47  ;;  %v2875_v2 = vadd.f32 %v2874_v30, %v2873_v29  ;;  %v2923_v60 = vadd.f32 %v2922_v56, %v2921_v20 }
 0x1e4   :  { %1217 = vbcast.lane.b32.xlu0 %v17807_v35, 256  ;;  %v2928_v35 = vrot.slane %v2927_v25, 2  ;;  %v2969_v33 = vadd.f32 %v2968_v43, %v2442_v39  ;;  %v13022_v62 = vmul.f32 %v17812_v12, %v2871_v27  ;;  %v2881_v11 = vadd.f32 %v2880_v7, %v2879_v55 }
 0x1e5   :  { %v2975_v21 = vadd.f32 %v2974_v22, %v2443_v63  ;;  %v17813_v58 = vunpack.c.l.bf16 %v12802_v49  ;;  %v3002_v57 = vrot.slane %v3001_v14, 1  ;;  %v3006_v19 = vrot.slane %v3005_v15, 2 }
 0x1e6   :  { %1238 = vbcast.lane.b32.xlu1 %v17809_v61, 256  ;;  %v2964_v52 = vrot.slane %v2963_v0, 2  ;;  %v17814_v31 = vunpack.c.h.bf16 %v12802_v49  ;;  %v17815_v47 = vrot.slane %v12549_v53, %v11587_v40  ;;  %v2918_v29 = vrot.slane %v2917_v18, 1 }
 0x1e7   :  { %v2450_v42 = vmul.f32 %v17813_v58, %v1036_v16  ;;  %v3012_v20 = vrot.slane %v3011_v46, 2  ;;  %v2929_v39 = vadd.f32 %v2928_v35, %v2927_v25  ;;  %v17816_v22 = vrot.slane %v12570_v26, %v11574_v34 }
 0x1e8   :  { %1084 = vbcast.lane.b32.xlu0 %v17810_v5, 256  ;;  %v2451_v61 = vmul.f32 %v17814_v31, %v1043_v24  ;;  %v2876_v55 = vrot.slane %v2875_v2, 1  ;;  %v2924_v16 = vrot.slane %v2923_v60, 1  ;;  %v2970_v30 = vrot.slane %v2969_v33, 2 }
 0x1e9   :  { %v3016_v27 = vrot.slane %v2450_v42, 4  ;;  %v2960_v43 = vrot.slane %v13006_v51, 1  ;;  %v2882_v49 = vrot.slane %v2881_v11, 1  ;;  %v2976_v7 = vrot.slane %v2975_v21, 2 }
 0x1ea   :  { %1140 = vbcast.lane.b32.xlu1 %v17815_v47, 256  ;;  %v3022_v56 = vrot.slane %v2451_v61, 4  ;;  %v3007_v5 = vadd.f32 %v3006_v19, %v3005_v15  ;;  %v2965_v36 = vadd.f32 %v2964_v52, %v2963_v0  ;;  %v17817_v25 = vrot.slane %v12601_v8, %v11574_v34  ;;  %v17819_v52 = vld [vmem:[#allocation24_spill] sm:$0xff] }
 0x1eb   :  { %v3017_v63 = vadd.f32 %v3016_v27, %v2450_v42  ;;  %v2919_v35 = vadd.f32 %v2918_v29, %v2917_v18  ;;  %v3013_v58 = vadd.f32 %v3012_v20, %v3011_v46  ;;  %v2930_v31 = vrot.slane %v2929_v39, 1 }
 0x1ec   :  { %1189 = vbcast.lane.b32.xlu0 %v17816_v22, 256  ;;  %v3023_v12 = vadd.f32 %v3022_v56, %v2451_v61  ;;  %v17818_v22 = vrot.slane %v12528_v41, %v11598_v45  ;;  %v2877_v23 = vadd.f32 %v2876_v55, %v2875_v2  ;;  %v2925_v17 = vadd.f32 %v2924_v16, %v2923_v60  ;;  %v17822_v60 = vld [vmem:[#allocation29_spill] sm:$0xff]  ;;  %v17825_v55 = vld [vmem:[#allocation8_spill] sm:$0xff] }
 0x1ed   :  { %v3018_v47 = vrot.slane %v3017_v63, 2  ;;  %v2971_v42 = vadd.f32 %v2970_v30, %v2969_v33  ;;  %v3003_v24 = vadd.f32 %v3002_v57, %v3001_v14  ;;  %v2883_v15 = vadd.f32 %v2882_v49, %v2881_v11  ;;  %v17824_v57 = vld [vmem:[#allocation12_spill] sm:$0xff] }
 0x1ee   :  { %1245 = vbcast.lane.b32.xlu1 %v17817_v25, 256  ;;  %v3024_v27 = vrot.slane %v3023_v12, 2  ;;  %v2977_v0 = vadd.f32 %v2976_v7, %v2975_v21  ;;  %v17820_v61 = vrot.slane %v17819_v52, 7  ;;  %v3008_v18 = vrot.slane %v3007_v5, 1  ;;  %v17826_v7 = vld [vmem:[#allocation31_spill] sm:$0xff]  ;;  %v17830_v52 = vld [vmem:[#allocation18_spill] sm:$0xff] }
 0x1ef   :  { %v3019_v19 = vadd.f32 %v3018_v47, %v3017_v63  ;;  %v2966_v46 = vrot.slane %v2965_v36, 1  ;;  %v17821_v20 = vrot.slane %v12549_v53, %v11598_v45  ;;  %v2961_v2 = vadd.f32 %v2960_v43, %v13006_v51 }
 0x1f0   :  { %1091 = vbcast.lane.b32.xlu0 %v17818_v22, 256  ;;  %v13045_v56 = vsel %vm6727_vm1, %v17820_v61, %v6526_v3  ;;  %v3025_v29 = vadd.f32 %v3024_v27, %v3023_v12  ;;  %v5168_v33 = vmul.f32 %v17822_v60, %v2919_v35  ;;  %v3014_v14 = vrot.slane %v3013_v58, 1  ;;  %v17827_v12 = vld [vmem:[#allocation17_spill] sm:$0xff] }
 0x1f1   :  { %v2931_v11 = vadd.f32 %v2930_v31, %v2929_v39  ;;  %v17823_v21 = vrot.slane %v12570_v26, %v11587_v40  ;;  %v5154_v3 = vmul.f32 %v17824_v57, %v2877_v23  ;;  %v5170_v16 = vmul.f32 %v17825_v55, %v2925_v17  ;;  %v17829_v17 = vld [vmem:[#allocation23_spill] sm:$0xff] }
 0x1f2   :  { %1147 = vbcast.lane.b32.xlu1 %v17821_v20, 256  ;;  %v2972_v30 = vrot.slane %v2971_v42, 1  ;;  %v3020_v49 = vrot.slane %v3019_v19, 1  ;;  %v5196_v63 = vmul.f32 %v17826_v7, %v3003_v24  ;;  %v5156_v25 = vmul.f32 %v17827_v12, %v2883_v15 }
 0x1f3   :  { %v2978_v47 = vrot.slane %v2977_v0, 1  ;;  %v3026_v51 = vrot.slane %v3025_v29, 1  ;;  %v5640_v43 = vpack.c.bf16 %v13019_v13, %v13019_v13  ;;  %v5626_v39 = vpack.c.bf16 %v13022_v62, %v13022_v62 }
 0x1f4   :  { %1196 = vbcast.lane.b32.xlu0 %v17823_v21, 256  ;;  %v3009_v35 = vadd.f32 %v3008_v18, %v3007_v5  ;;  %v2967_v31 = vadd.f32 %v2966_v46, %v2965_v36  ;;  %v17828_v23 = vrot.slane %v12601_v8, %v11587_v40  ;;  %v5182_v22 = vmul.f32 %v17829_v17, %v2961_v2 }
 0x1f5   :  { %v5634_v27 = vpack.c.bf16 %v5168_v33, %v5168_v33  ;;  %v3015_v24 = vadd.f32 %v3014_v14, %v3013_v58  ;;  %v5172_v15 = vmul.f32 %v17830_v52, %v2931_v11  ;;  %v17831_v61 = vrot.slane %v12528_v41, %v11609_v50  ;;  %v17832_v58 = vld [vmem:[#allocation34_spill] sm:$0xff] }
 0x1f6   :  { %1252 = vbcast.lane.b32.xlu1 %v17828_v23, 256  ;;  %v5627_v13 = vpack.c.bf16 %v5154_v3, %v5154_v3  ;;  %v5635_v20 = vpack.c.bf16 %v5170_v16, %v5170_v16  ;;  %v2973_v60 = vadd.f32 %v2972_v30, %v2971_v42  ;;  %v3021_v62 = vadd.f32 %v3020_v49, %v3019_v19  ;;  %v17834_v3 = vld [vmem:[#allocation33_spill] sm:$0xff] }
 0x1f7   :  { %v5648_v5 = vpack.c.bf16 %v5196_v63, %v5196_v63  ;;  %v5628_v36 = vpack.c.bf16 %v5156_v25, %v5156_v25  ;;  %v2979_v18 = vadd.f32 %v2978_v47, %v2977_v0  ;;  %v3027_v46 = vadd.f32 %v3026_v51, %v3025_v29  ;;  %v17836_v16 = vld [vmem:[#allocation25_spill] sm:$0xff] }
 0x1f8   :  { %1098 = vbcast.lane.b32.xlu0 %v17831_v61, 256  ;;  %v13071_v21 = vunpack.c.l.b16 %v5640_v43  ;;  %v6507_v57 = vunpack.c.l.b16 %v5626_v39  ;;  %v5198_v2 = vmul.f32 %v12822_v9, %v3009_v35  ;;  %v5184_v33 = vmul.f32 %v17832_v58, %v2967_v31 }
 0x1f9   :  { %v17833_v14 = vrot.slane %v12549_v53, %v11609_v50  ;;  %v5641_v41 = vpack.c.bf16 %v5182_v22, %v5182_v22  ;;  %v6515_v11 = vunpack.c.l.b16 %v5634_v27  ;;  %v5200_v42 = vmul.f32 %v17834_v3, %v3015_v24 }
 0x1fa   :  { %v5636_v19 = vpack.c.bf16 %v5172_v15, %v5172_v15  ;;  %v17835_v0 = vrot.slane %v12570_v26, %v11598_v45  ;;  %v6508_v29 = vunpack.c.l.b16 %v5627_v13  ;;  %v6516_v55 = vunpack.c.l.b16 %v5635_v20 }
 0x1fb   :  { %1154 = vbcast.lane.b32.xlu1 %v17833_v14, 256  ;;  %v5186_v30 = vmul.f32 %v17836_v16, %v2973_v60  ;;  %v5202_v9 = vmul.f32 %v12854_v4, %v3021_v62  ;;  %v6529_v49 = vunpack.c.l.b16 %v5648_v5  ;;  %v5188_v7 = vmul.f32 %v12849_v48, %v2979_v18 }
 0x1fc   :  { %1203 = vbcast.lane.b32.xlu0 %v17835_v0, 256  ;;  %v5204_v53 = vmul.f32 %v12877_v38, %v3027_v46  ;;  %v6509_v63 = vunpack.c.l.b16 %v5628_v36  ;;  %v6821_v12 = vrot.slane %v13071_v21, 5  ;;  %v6797_v25 = vrot.slane %v6507_v57, 3  ;;  %v17844_v0 = vld [vmem:[#allocation4_spill] sm:$0xff] }
 0x1fd   :  { %v5649_v47 = vpack.c.bf16 %v5198_v2, %v5198_v2  ;;  %v5642_v51 = vpack.c.bf16 %v5184_v33, %v5184_v33  ;;  %v17837_v43 = vrot.slane %v12601_v8, %v11598_v45  ;;  %v6522_v39 = vunpack.c.l.b16 %v5641_v41 }
 0x1fe   :  { %v6811_v35 = vrot.slane %v6515_v11, 3  ;;  %v5650_v31 = vpack.c.bf16 %v5200_v42, %v5200_v42  ;;  %v6517_v23 = vunpack.c.l.b16 %v5636_v19  ;;  %v17838_v4 = vrot.slane %v12570_v26, %v11609_v50 }
 0x1ff   :  { %1259 = vbcast.lane.b32.xlu1 %v17837_v43, 256  ;;  %v6799_v48 = vrot.slane %v6508_v29, 2  ;;  %v6813_v38 = vrot.slane %v6516_v55, 2  ;;  %v5643_v17 = vpack.c.bf16 %v5186_v30, %v5186_v30  ;;  %v5651_v22 = vpack.c.bf16 %v5202_v9, %v5202_v9  ;;  %v17846_v55 = vld [vmem:[#allocation35_spill] sm:$0xff] }
 0x200   :  { %1210 = vbcast.lane.b32.xlu0 %v17838_v4, 256  ;;  %v6835_v27 = vrot.slane %v6529_v49, 5  ;;  %v5644_v24 = vpack.c.bf16 %v5188_v7, %v5188_v7  ;;  %v5652_v52 = vpack.c.bf16 %v5204_v53, %v5204_v53  ;;  %v6801_v15 = vrot.slane %v6509_v63, 1  ;;  %v17848_v49 = vld [vmem:[#allocation11_spill] sm:$0xff] }
 0x201   :  { %v6530_v61 = vunpack.c.l.b16 %v5649_v47  ;;  %v6523_v13 = vunpack.c.l.b16 %v5642_v51  ;;  %v17839_v20 = vrot.slane %v12952_v6, 4  ;;  %v17840_v62 = vrot.slane %v13010_v44, 4 }
 0x202   :  { %v17841_v5 = vrot.slane %v12601_v8, %v11609_v50  ;;  %v6531_v36 = vunpack.c.l.b16 %v5650_v31  ;;  %v6815_v21 = vrot.slane %v6517_v23, 1  ;;  %v17842_v6 = vrot.slane %v12414_v1, %v11510_v10  ;;  %v17851_v23 = vld [vmem:[#allocation32_spill] sm:$0xff] }
 0x203   :  { %v6796_v60 = vsel %vm6736_vm4, %v17839_v20, %v12940_v37  ;;  %v6810_v26 = vsel %vm6736_vm4, %v17840_v62, %v12972_v32  ;;  %v6524_v37 = vunpack.c.l.b16 %v5643_v17  ;;  %v6532_v57 = vunpack.c.l.b16 %v5651_v22  ;;  %v13154_v20 = vld [vmem:[%s17482_s0 + $0x100] sm:$0xff]   ;;  %v13159_v62 = vld [vmem:[%s17482_s0 + $0x108] sm:$0xff]  }
 0x204   :  { %1266 = vbcast.lane.b32.xlu1 %v17841_v5, 256  ;;  %v6798_v18 = vsel %vm6739_vm5, %v6797_v25, %v6796_v60  ;;  %v6812_v46 = vsel %vm6739_vm5, %v6811_v35, %v6810_v26  ;;  %1280 = vbcast.lane.b32.xlu0 %v17842_v6, 256  ;;  %v6525_v58 = vunpack.c.l.b16 %v5644_v24  ;;  %v6533_v33 = vunpack.c.l.b16 %v5652_v52  ;;  %v1113_v24 = vpop.permute.xlu1 %1112  ;;  %v17852_v52 = vld [vmem:[#allocation14_spill] sm:$0xff]  ;;  %v13164_v26 = vld [vmem:[%s17482_s0 + $0x120] sm:$0xff]  }
 0x205   :  { %v6800_v44 = vsel %vm6742_vm6, %v6799_v48, %v6798_v18  ;;  %v6814_v32 = vsel %vm6742_vm6, %v6813_v38, %v6812_v46  ;;  %v6833_v14 = vrot.slane %v12965_v59, 6  ;;  %v6823_v41 = vrot.slane %v6522_v39, 4  ;;  %v17847_v59 = vld [vmem:[#allocation13_spill] sm:$0xff]  ;;  %v13169_v5 = vld [vmem:[%s17482_s0 + $0x140] sm:$0xff]   ;;  %v13177_v46 = vld [vmem:[%s17482_s0 + $0x128] sm:$0xff]  }
 0x206   :  { %v6802_v2 = vsel %vm6745_vm7, %v6801_v15, %v6800_v44  ;;  %v6816_v8 = vsel %vm6745_vm7, %v6815_v21, %v6814_v32  ;;  %v6837_v11 = vrot.slane %v6530_v61, 4  ;;  %v17843_v1 = vrot.slane %v12464_v28, %v11510_v10  ;;  %v13149_v61 = vld [vmem:[%s17479_s1 + $0x80] sm:$0xff] }
 0x207   :  { %v7183_v3 = vpack.c.b16 %v6816_v8, %v6802_v2  ;;  %v6825_v42 = vrot.slane %v6523_v13, 3  ;;  %v6839_v19 = vrot.slane %v6531_v36, 3  ;;  %v17845_v29 = vrot.slane %v12959_v54, %v17844_v0  ;;  %17853 = vst [vmem:[#allocation19_spill] sm:$0xff] %v13149_v61  ;;  %v13182_v21 = vld [vmem:[%s17482_s0 + $0x160] sm:$0xff]  }
 0x208   :  { %1336 = vbcast.lane.b32.xlu1 %v17843_v1, 256  ;;  %v1390_v16 = vrot.slane %v17846_v55, %v11510_v10  ;;  %v6827_v30 = vrot.slane %v6524_v37, 2  ;;  %v6841_v9 = vrot.slane %v6532_v57, 2  ;;  %v17849_v7 = vrot.slane %v17848_v49, 6  ;;  %v1120_v60 = vpop.permute.xlu1 %1119  ;;  %v13200_v1 = vld [vmem:[%s17479_s1 + $0x88] sm:$0xff] }
 0x209   :  { %1287 = vbcast.lane.b32.xlu0 %v17845_v29, 256  ;;  %10387 = vmatprep.mubr.bf16.mxu0 %v7183_v3  ;;  %v6834_v63 = vsel %vm6730_vm2, %v6833_v14, %v13045_v56  ;;  %v6829_v47 = vrot.slane %v6525_v58, 1  ;;  %v6843_v43 = vrot.slane %v6533_v33, 1  ;;  %v17850_v31 = vrot.slane %v12464_v28, %v17844_v0  ;;  %v1057_v28 = vpop.permute.xlu0 %1056  ;;  %17855 = vst [vmem:[#allocation37_spill] sm:$0xff] %v13200_v1 }
 0x20a   :  { %v6820_v53 = vsel %vm6730_vm2, %v17849_v7, %v17847_v59  ;;  %v6836_v51 = vsel %vm6733_vm3, %v6835_v27, %v6834_v63  ;;  %v1446_v4 = vrot.slane %v17851_v23, %v11510_v10  ;;  %v13144_v15 = vmax.f32 %v17852_v52, 1.0 }
 0x20b   :  { %v6822_v25 = vsel %vm6733_vm3, %v6821_v12, %v6820_v53  ;;  %v6838_v35 = vsel %vm6736_vm4, %v6837_v11, %v6836_v51  ;;  %v4485_v36 = vsel %vm4436_vm0, %v13149_v61, 0.0  ;;  %v9667_v6 = vunpack.c.h.bf16 %v13154_v20 }
 0x20c   :  { %v6824_v39 = vsel %vm6736_vm4, %v6823_v41, %v6822_v25  ;;  %1343 = vbcast.lane.b32.xlu1 %v17850_v31, 256  ;;  %v6840_v56 = vsel %vm6739_vm5, %v6839_v19, %v6838_v35  ;;  %v4653_v18 = vrot.slane %v13144_v15, 1  ;;  %v4654_v37 = vrot.slane %v13144_v15, 2  ;;  %v17854_v41 = vld [vmem:[#allocation16_spill] sm:$0xff]  ;;  %v1225_v3 = vpop.permute.xlu1 %1224 }
 0x20d   :  { %v6826_v48 = vsel %vm6739_vm5, %v6825_v42, %v6824_v39  ;;  %1392 = vbcast.lane.b32.xlu0 %v1390_v16, 256  ;;  %v6842_v38 = vsel %vm6742_vm6, %v6841_v9, %v6840_v56  ;;  %v1064_v13 = vpop.permute.xlu0 %1063  ;;  %v9670_v57 = vunpack.c.l.bf16 %v13159_v62  ;;  %v9683_v44 = vunpack.c.h.bf16 %v13164_v26 }
 0x20e   :  { %v6828_v12 = vsel %vm6742_vm6, %v6827_v30, %v6826_v48  ;;  %v6844_v22 = vsel %vm6745_vm7, %v6843_v43, %v6842_v38  ;;  %v9699_v32 = vunpack.c.h.bf16 %v13169_v5  ;;  %v4655_v2 = vrot.slane %v13144_v15, 3 }
 0x20f   :  { %v6830_v17 = vsel %vm6745_vm7, %v6829_v47, %v6828_v12  ;;  %v9686_v58 = vunpack.c.l.bf16 %v13177_v46  ;;  %v9715_v33 = vunpack.c.h.bf16 %v13182_v21  ;;  %10960 = vrcp.f32 %v13144_v15 }
 0x210   :  { %v7184_v27 = vpack.c.b16 %v6844_v22, %v6830_v17  ;;  %1448 = vbcast.lane.b32.xlu1 %v1446_v4, 256  ;;  %v4656_v14 = vrot.slane %v13144_v15, 4  ;;  %v13195_v11 = vmax.f32 %v17854_v41, 1.0  ;;  %10962 = vrcp.f32 %v4653_v18 }
 0x211   :  { %v1169_v8 = vpop.permute.xlu0 %1168  ;;  %v4657_v42 = vrot.slane %v13144_v15, 5  ;;  %v2453_v19 = vmul.f32 %v9667_v6, %v1057_v28  ;;  %10964 = vrcp.f32 %v4654_v37  ;;  %v4658_v29 = vrot.slane %v13144_v15, 6  ;;  %v17858_v37 = vld [vmem:[#allocation30_spill] sm:$0xff] }
 0x212   :  { %10388 = vmatmul.mubr.bf16.gmra.mrb[4].mxu0 %v7184_v27  ;;  %v2454_v55 = vmul.f32 %v9670_v57, %v1064_v13  ;;  %v2461_v16 = vmul.f32 %v9683_v44, %v1113_v24  ;;  %v2469_v30 = vmul.f32 %v9699_v32, %v1169_v8  ;;  %10966 = vrcp.f32 %v4655_v2  ;;  %v17856_v24 = vld [vmem:[#allocation20_spill] sm:$0xff] }
 0x213   :  { %v2462_v9 = vmul.f32 %v9686_v58, %v1120_v60  ;;  %v2477_v59 = vmul.f32 %v9715_v33, %v1225_v3  ;;  %v4488_v49 = vsel %vm4436_vm0, %v13200_v1, 0.0  ;;  %10968 = vrcp.f32 %v4656_v14 }
 0x214   :  { %v4660_v7 = vrot.slane %v13195_v11, 1  ;;  %10970 = vrcp.f32 %v4657_v42  ;;  %v3034_v53 = vrot.slane %v2453_v19, 4  ;;  %v4661_v63 = vrot.slane %v13195_v11, 2  ;;  %v17869_v42 = vld [vmem:[#allocation15_spill] sm:$0xff] }
 0x215   :  { %10972 = vrcp.f32 %v4658_v29  ;;  %v3040_v25 = vrot.slane %v2454_v55, 4  ;;  %v3082_v47 = vrot.slane %v2461_v16, 4  ;;  %v3130_v51 = vrot.slane %v2469_v30, 4  ;;  %v17861_v29 = vld [vmem:[#allocation6_spill] sm:$0xff] }
 0x216   :  { %v4662_v43 = vrot.slane %v13195_v11, 3  ;;  %v3088_v39 = vrot.slane %v2462_v9, 4  ;;  %v3178_v35 = vrot.slane %v2477_v59, 4  ;;  %10974 = vrcp.f32 %v13195_v11 }
 0x217   :  { %v4663_v31 = vrot.slane %v13195_v11, 4  ;;  %10976 = vrcp.f32 %v4660_v7  ;;  %v4664_v23 = vrot.slane %v13195_v11, 5  ;;  %v3035_v48 = vadd.f32 %v3034_v53, %v2453_v19 }
 0x218   :  { %10978 = vrcp.f32 %v4661_v63  ;;  %v4665_v56 = vrot.slane %v13195_v11, 6  ;;  %v4659_v12 = vrot.slane %v13144_v15, 7  ;;  %v3041_v17 = vadd.f32 %v3040_v25, %v2454_v55 }
 0x219   :  { %v13212_v4 = vpop.eup %10960  ;;  %v3083_v22 = vadd.f32 %v3082_v47, %v2461_v16  ;;  %v3131_v27 = vadd.f32 %v3130_v51, %v2469_v30  ;;  %10980 = vrcp.f32 %v4662_v43  ;;  %v13221_v52 = vmax.f32 %v17856_v24, 1.0 }
 0x21a   :  { %v13216_v38 = vpop.eup %10962  ;;  %v3089_v13 = vadd.f32 %v3088_v39, %v2462_v9  ;;  %v3179_v60 = vadd.f32 %v3178_v35, %v2477_v59  ;;  %10982 = vrcp.f32 %v4663_v31  ;;  %v4666_v15 = vrot.slane %v13195_v11, 7  ;;  %v17862_v39 = vld [vmem:[#allocation7_spill] sm:$0xff] }
 0x21b   :  { %v13218_v28 = vpop.eup %10964  ;;  %10984 = vrcp.f32 %v4664_v23  ;;  %v13231_v57 = vmax.f32 %v17858_v37, 1.0  ;;  %v3036_v44 = vrot.slane %v3035_v48, 2  ;;  %v3042_v2 = vrot.slane %v3041_v17, 2  ;;  %v13260_v23 = vld [vmem:[%s17479_s1 + $0x68] sm:$0xff] }
 0x21c   :  { %v13225_v18 = vpop.eup %10966  ;;  %10986 = vrcp.f32 %v4665_v56  ;;  %v3084_v8 = vrot.slane %v3083_v22, 2  ;;  %v3132_v58 = vrot.slane %v3131_v27, 2  ;;  %v9666_v33 = vunpack.c.l.bf16 %v13154_v20 }
 0x21d   :  { %v13228_v6 = vpop.eup %10968  ;;  %v4667_v41 = vrot.slane %v13221_v52, 1  ;;  %v3090_v3 = vrot.slane %v3089_v13, 2  ;;  %v3180_v11 = vrot.slane %v3179_v60, 2  ;;  %10988 = vrcp.f32 %v4659_v12 }
 0x21e   :  { %v13233_v32 = vpop.eup %10970  ;;  %v4668_v19 = vrot.slane %v13221_v52, 2  ;;  %v1271_v55 = vrot.slane %v12959_v54, %v17861_v29  ;;  %10990 = vrcp.f32 %v4666_v15  ;;  %v3037_v30 = vadd.f32 %v3036_v44, %v3035_v48 }
 0x21f   :  { %17859 = vst [vmem:[#allocation28_spill] sm:$0xff] %v13233_v32  ;;  %v13236_v14 = vpop.eup %10972  ;;  %v4674_v20 = vrot.slane %v13231_v57, 1  ;;  %10992 = vrcp.f32 %v13221_v52  ;;  %v3043_v7 = vadd.f32 %v3042_v2, %v3041_v17  ;;  %v3085_v53 = vadd.f32 %v3084_v8, %v3083_v22  ;;  %v13275_v2 = vpop.xlane.xlu1 %4477  ;;  %v13280_v8 = vld [vmem:[%s17482_s0 + $0x148] sm:$0xff]  }
 0x220   :  { %17860 = vst [vmem:[#allocation36_spill] sm:$0xff] %v13236_v14  ;;  %v13243_v16 = vpop.eup %10974  ;;  %v3133_v63 = vadd.f32 %v3132_v58, %v3131_v27  ;;  %10994 = vrcp.f32 %v4667_v41  ;;  %v3091_v51 = vadd.f32 %v3090_v3, %v3089_v13  ;;  %v3181_v43 = vadd.f32 %v3180_v11, %v3179_v60  ;;  %v9453_v27 = vld [vmem:[%s17487_s7] ss:$0 sm:$0xff]  ;;  %17865 = vst [vmem:[#allocation27_spill] sm:$0xff] %v13275_v2  ;;  %v17866_v58 = vld [vmem:[#allocation38_spill] sm:$0xff] }
 0x221   :  { %v1292_v35 = vrot.slane %v12959_v54, %v17862_v39  ;;  %10996 = vrcp.f32 %v4668_v19  ;;  %v1327_v48 = vrot.slane %v13260_v23, %v17861_v29  ;;  %v3038_v22 = vrot.slane %v3037_v30, 1  ;;  %v17868_v13 = vld [vmem:[#allocation26_spill] sm:$0xff] }
 0x222   :  { %10998 = vrcp.f32 %v4674_v20  ;;  %v3044_v15 = vrot.slane %v3043_v7, 1  ;;  %v3086_v37 = vrot.slane %v3085_v53, 1  ;;  %v3134_v44 = vrot.slane %v3133_v63, 1 }
 0x223   :  { %v3092_v19 = vrot.slane %v3091_v51, 1  ;;  %v1348_v12 = vrot.slane %v13260_v23, %v17862_v39 }
 0x225   :  { %v3093_v1 = vadd.f32 %v3092_v19, %v3091_v51 }
 0x22c   :  { %4486 = vadd.xlane.f32.xlu0 %v4485_v36  ;;  %v13223_v36 = vpop.xlane.xlu0 %4474 }
 0x22d   :  { %17857 = vst [vmem:[#allocation5_spill] sm:$0xff] %v13223_v36 }
 0x230   :  { %v1050_v9 = vpop.permute.xlu0 %1049 }
 0x231   :  { %v2452_v56 = vmul.f32 %v9666_v33, %v1050_v9  ;;  %v17871_v33 = vld [vmem:[#allocation10_spill] sm:$0xff] }
 0x234   :  { %4489 = vadd.xlane.f32.xlu1 %v4488_v49  ;;  %v13248_v49 = vpop.eup %10976  ;;  %v1106_v20 = vpop.permute.xlu0 %1105 }
 0x235   :  { %v13251_v47 = vpop.eup %10978 }
 0x236   :  { %v13255_v31 = vpop.eup %10980 }
 0x237   :  { %v13266_v17 = vpop.eup %10982 }
 0x238   :  { %17863 = vst [vmem:[#allocation22_spill] sm:$0xff] %v13266_v17  ;;  %v13273_v60 = vpop.eup %10984  ;;  %v3135_v17 = vadd.f32 %v3134_v44, %v3133_v63  ;;  %v1071_v63 = vpop.permute.xlu1 %1070 }
 0x239   :  { %17864 = vst [vmem:[#allocation21_spill] sm:$0xff] %v13273_v60  ;;  %v13283_v11 = vpop.eup %10986 }
 0x23a   :  { %17867 = vst [vmem:[#allocation24_spill] sm:$0xff] %v13283_v11 }
 0x242   :  { %1273 = vbcast.lane.b32.xlu0 %v1271_v55, 256  ;;  %v10385_v54 = vpop.f32.mrb[0].mxu0  ;;  %v3182_v55 = vrot.slane %v3181_v43, 1 }
 0x243   :  { %v7304_v41 = vadd.f32 %v10385_v54, %v17866_v58  ;;  %v7295_v3 = vpop.f32.mrb[1].mxu0  ;;  %v13292_v54 = vld [vmem:[%s17479_s1 + $0x70] sm:$0xff] }
 0x244   :  { %v7296_v59 = vadd.f32 %v7295_v3, %v17868_v13  ;;  %v10386_v24 = vpop.f32.mrb[2].mxu0  ;;  %v1397_v58 = vrot.slane %v13292_v54, %v17844_v0  ;;  %v13296_v13 = vpop.eup %10988  ;;  %v9702_v3 = vunpack.c.l.bf16 %v13280_v8 }
 0x245   :  { %1294 = vbcast.lane.b32.xlu1 %v1292_v35, 256  ;;  %v7431_v25 = vadd.f32 %v9453_v27, %v7304_v41  ;;  %v7307_v2 = vadd.f32 %v10386_v24, %v17869_v42  ;;  %v7298_v36 = vpop.f32.mrb[3].mxu0  ;;  %17870 = vst [vmem:[#allocation29_spill] sm:$0xff] %v13296_v13  ;;  %v3039_v35 = vadd.f32 %v3038_v22, %v3037_v30  ;;  %v13300_v41 = vpop.eup %10990  ;;  %v17873_v24 = vunpack.c.l.bf16 %v13164_v26  ;;  %v13309_v30 = vld [vmem:[%s17479_s1 + $0x78] sm:$0xff] }
 0x246   :  { %1329 = vbcast.lane.b32.xlu0 %v1327_v48, 256  ;;  %v7429_v11 = vadd.f32 %v9453_v27, %v7296_v59  ;;  %v7299_v9 = vadd.f32 %v7298_v36, %v17871_v33  ;;  %17872 = vst [vmem:[#allocation12_spill] sm:$0xff] %v13300_v41  ;;  %v3045_v42 = vadd.f32 %v3044_v15, %v3043_v7  ;;  %v13304_v32 = vpop.eup %10992  ;;  %v3028_v7 = vrot.slane %v2452_v56, 4 }
 0x247   :  { %v3087_v48 = vadd.f32 %v3086_v37, %v3085_v53  ;;  %v2460_v14 = vmul.f32 %v17873_v24, %v1106_v20  ;;  %v7432_v60 = vadd.f32 %v9453_v27, %v7307_v2  ;;  %v1453_v36 = vrot.slane %v13309_v30, %v17844_v0  ;;  %v10995_v22 = vpop.eup %10994 }
 0x248   :  { %v7430_v61 = vadd.f32 %v9453_v27, %v7299_v9  ;;  %v3183_v59 = vadd.f32 %v3182_v55, %v3181_v43  ;;  %v7463_v53 = vmax.f32 %v7431_v25, 0.0  ;;  %v5208_v15 = vmul.f32 %v13216_v38, %v3039_v35  ;;  %v13316_v37 = vpop.eup %10996  ;;  %v1176_v38 = vpop.permute.xlu0 %1175 }
 0x249   :  { %1350 = vbcast.lane.b32.xlu1 %v1348_v12, 256  ;;  %v7464_v26 = vmax.f32 %v7432_v60, 0.0  ;;  %v7461_v51 = vmax.f32 %v7429_v11, 0.0  ;;  %v17874_v12 = vrot.slane %v13221_v52, 3  ;;  %v5210_v44 = vmul.f32 %v13218_v28, %v3045_v42  ;;  %v10999_v25 = vpop.eup %10998 }
 0x24a   :  { %1399 = vbcast.lane.b32.xlu0 %v1397_v58, 256  ;;  %v7462_v27 = vmax.f32 %v7430_v61, 0.0  ;;  %v3076_v2 = vrot.slane %v2460_v14, 4  ;;  %v17875_v43 = vrot.slane %v13221_v52, 4  ;;  %v5224_v60 = vmul.f32 %v13248_v49, %v3087_v48 }
 0x24b   :  { %11000 = vrcp.f32 %v17874_v12  ;;  %v7526_v19 = vpack.c.bf16 %v7464_v26, %v7463_v53  ;;  %v5240_v55 = vmul.f32 %v10995_v22, %v3135_v17  ;;  %v17876_v61 = vrot.slane %v13221_v52, 5 }
 0x24c   :  { %11002 = vrcp.f32 %v17875_v43  ;;  %v7525_v20 = vpack.c.bf16 %v7462_v27, %v7461_v51  ;;  %v5226_v11 = vmul.f32 %v13251_v47, %v3093_v1  ;;  %v5256_v58 = vmul.f32 %v10999_v25, %v3183_v59  ;;  %v13335_v1 = vld [vmem:[%s17482_s0 + $0x168] sm:$0xff]  }
 0x24d   :  { %1455 = vbcast.lane.b32.xlu1 %v1453_v36, 256  ;;  %11004 = vrcp.f32 %v17876_v61  ;;  %v3029_v35 = vadd.f32 %v3028_v7, %v2452_v56  ;;  %v17877_v28 = vrot.slane %v13221_v52, 6  ;;  %v5654_v33 = vpack.c.bf16 %v5208_v15, %v5208_v15 }
 0x24e   :  { %v17878_v9 = vunpack.c.h.bf16 %v13159_v62  ;;  %v9687_v49 = vunpack.c.h.bf16 %v13177_v46  ;;  %10479 = vmatprep.mubr.bf16.mxu1 %v7525_v20  ;;  %v5655_v17 = vpack.c.bf16 %v5210_v44, %v5210_v44  ;;  %v3077_v48 = vadd.f32 %v3076_v2, %v2460_v14  ;;  %v1127_v62 = vpop.permute.xlu1 %1126  ;;  %v13342_v14 = vld [vmem:[%s17482_s0 + $0x110] sm:$0xff]  }
 0x24f   :  { %11006 = vrcp.f32 %v17877_v28  ;;  %v2470_v24 = vmul.f32 %v9702_v3, %v1176_v38  ;;  %v4675_v36 = vrot.slane %v13231_v57, 2  ;;  %10480 = vmatmul.mubr.bf16.vlgmr.msra.gmra.mrb[32].mxu1 %v7526_v19  ;;  %v5662_v47 = vpack.c.bf16 %v5224_v60, %v5224_v60 }
 0x250   :  { %v2455_v42 = vmul.f32 %v17878_v9, %v1071_v63  ;;  %11008 = vrcp.f32 %v13231_v57  ;;  %v5670_v56 = vpack.c.bf16 %v5240_v55, %v5240_v55  ;;  %v4676_v59 = vrot.slane %v13231_v57, 3  ;;  %v13372_v9 = vld [vmem:[%s17482_s0 + $0x130] sm:$0xff]  }
 0x251   :  { %v4677_v46 = vrot.slane %v13231_v57, 4  ;;  %v5663_v7 = vpack.c.bf16 %v5226_v11, %v5226_v11  ;;  %v5678_v53 = vpack.c.bf16 %v5256_v58, %v5256_v58  ;;  %v3030_v26 = vrot.slane %v3029_v35, 2 }
 0x252   :  { %v13345_v22 = vunpack.c.l.b16 %v5654_v33  ;;  %v3046_v15 = vrot.slane %v2455_v42, 4  ;;  %v9718_v63 = vunpack.c.l.bf16 %v13335_v1  ;;  %v13349_v27 = vunpack.c.l.b16 %v5655_v17 }
 0x253   :  { %v3078_v12 = vrot.slane %v3077_v48, 2  ;;  %v3136_v44 = vrot.slane %v2470_v24, 4  ;;  %v2463_v2 = vmul.f32 %v9687_v49, %v1127_v62  ;;  %v13351_v19 = vpop.xlane.xlu0 %4480  ;;  %v13355_v25 = vunpack.c.l.b16 %v5662_v47  ;;  %v1232_v62 = vpop.permute.xlu1 %1231 }
 0x254   :  { %17879 = vst [vmem:[#allocation8_spill] sm:$0xff] %v13351_v19  ;;  %v13357_v60 = vunpack.c.l.b16 %v5670_v56  ;;  %11010 = vrcp.f32 %v4675_v36  ;;  %v9674_v55 = vunpack.c.l.bf16 %v13342_v14  ;;  %v13362_v20 = vunpack.c.l.b16 %v5663_v7 }
 0x255   :  { %v13353_v43 = vpop.eup %11000  ;;  %v13364_v61 = vunpack.c.l.b16 %v5678_v53  ;;  %v3031_v11 = vadd.f32 %v3030_v26, %v3029_v35  ;;  %11012 = vrcp.f32 %v4676_v59  ;;  %v3047_v33 = vadd.f32 %v3046_v15, %v2455_v42 }
 0x256   :  { %17880 = vst [vmem:[#allocation31_spill] sm:$0xff] %v13353_v43  ;;  %17881 = vst [vmem:[#allocation17_spill] sm:$0xff] %v13357_v60  ;;  %v13360_v38 = vpop.eup %11002  ;;  %11014 = vrcp.f32 %v4677_v46  ;;  %v3079_v47 = vadd.f32 %v3078_v12, %v3077_v48  ;;  %v3137_v35 = vadd.f32 %v3136_v44, %v2470_v24  ;;  %v3094_v56 = vrot.slane %v2463_v2, 4  ;;  %v13389_v24 = vld [vmem:[%s17482_s0 + $0x150] sm:$0xff]  }
 0x257   :  { %17882 = vst [vmem:[#allocation23_spill] sm:$0xff] %v13360_v38  ;;  %17883 = vst [vmem:[#allocation18_spill] sm:$0xff] %v13364_v61  ;;  %v13366_v58 = vpop.eup %11004  ;;  %v1078_v59 = vpop.permute.xlu0 %1077  ;;  %v9698_v46 = vunpack.c.l.bf16 %v13169_v5  ;;  %v3032_v49 = vrot.slane %v3031_v11, 1  ;;  %v9690_v48 = vunpack.c.l.bf16 %v13372_v9  ;;  %v3048_v12 = vrot.slane %v3047_v33, 2  ;;  %v13396_v5 = vld [vmem:[%s17479_s1 + $0x90] sm:$0xff] }
 0x258   :  { %17884 = vst [vmem:[#allocation34_spill] sm:$0xff] %v13366_v58  ;;  %v2456_v26 = vmul.f32 %v9674_v55, %v1078_v59  ;;  %v2478_v44 = vmul.f32 %v9718_v63, %v1232_v62  ;;  %v9714_v36 = vunpack.c.l.bf16 %v13182_v21  ;;  %17886 = vst [vmem:[#allocation25_spill] sm:$0xff] %v13396_v5  ;;  %v13401_v59 = vld [vmem:[%s17482_s0 + $0x118] sm:$0xff]   ;;  %v3080_v28 = vrot.slane %v3079_v47, 1  ;;  %v13409_v62 = vld [vmem:[%s17482_s0 + $0x170] sm:$0xff]  }
 0x259   :  { %v13375_v17 = vpop.eup %11006  ;;  %v3138_v53 = vrot.slane %v3137_v35, 2  ;;  %v3095_v15 = vadd.f32 %v3094_v56, %v2463_v2  ;;  %v13416_v2 = vld [vmem:[%s17479_s1 + $0x98] sm:$0xff]  ;;  %v3033_v56 = vadd.f32 %v3032_v49, %v3031_v11  ;;  %v4491_v21 = vsel %vm4436_vm0, %v13396_v5, 0.0 }
 0x25a   :  { %17885 = vst [vmem:[#allocation33_spill] sm:$0xff] %v13375_v17  ;;  %v13378_v7 = vpop.eup %11008  ;;  %v13403_v42 = vpop.xlane.xlu1 %4483  ;;  %v3052_v55 = vrot.slane %v2456_v26, 4  ;;  %17888 = vst [vmem:[#allocation13_spill] sm:$0xff] %v13416_v2  ;;  %v3049_v19 = vadd.f32 %v3048_v12, %v3047_v33  ;;  %v3184_v3 = vrot.slane %v2478_v44, 4  ;;  %v3081_v5 = vadd.f32 %v3080_v28, %v3079_v47  ;;  %v13440_v33 = vld [vmem:[%s17482_s0 + $0x158] sm:$0xff]  }
 0x25b   :  { %17887 = vst [vmem:[#allocation35_spill] sm:$0xff] %v13403_v42  ;;  %v1162_v63 = vpop.permute.xlu0 %1161  ;;  %v3139_v41 = vadd.f32 %v3138_v53, %v3137_v35  ;;  %v3096_v42 = vrot.slane %v3095_v15, 2  ;;  %v13435_v13 = vsel %vm4436_vm0, %v13416_v2, 0.0  ;;  %v5206_v47 = vmul.f32 %v13212_v4, %v3033_v56  ;;  %v13461_v2 = vld [vmem:[%s17482_s0 + $0x178] sm:$0xff]  }
 0x25c   :  { %v2468_v51 = vmul.f32 %v9698_v46, %v1162_v63  ;;  %v13425_v46 = vld [vmem:[%s17482_s0 + $0x138] sm:$0xff]   ;;  %v3053_v58 = vadd.f32 %v3052_v55, %v2456_v26  ;;  %v17891_v35 = vrot.slane %v13231_v57, 5  ;;  %v3050_v61 = vrot.slane %v3049_v19, 1  ;;  %v13454_v55 = vpop.f32.mrb[4].mxu1 }
 0x25d   :  { %v3185_v43 = vadd.f32 %v3184_v3, %v2478_v44  ;;  %v17892_v26 = vrot.slane %v13221_v52, 7  ;;  %17893 = vst [vmem:[#allocation14_spill] sm:$0xff] %v13454_v55  ;;  %v5222_v28 = vmul.f32 %v13243_v16, %v3081_v5  ;;  %v3097_v4 = vadd.f32 %v3096_v42, %v3095_v15  ;;  %v13468_v16 = vld [vmem:[%s17479_s1 + $0x60] sm:$0xff] }
 0x25e   :  { %v13427_v63 = vpop.eup %11010  ;;  %v1134_v38 = vpop.permute.xlu1 %1133  ;;  %v3124_v11 = vrot.slane %v2468_v51, 4  ;;  %11016 = vrcp.f32 %v17891_v35  ;;  %v3054_v3 = vrot.slane %v3053_v58, 2  ;;  %v17894_v52 = vrot.slane %v13231_v57, 6 }
 0x25f   :  { %v13431_v49 = vpop.eup %11012  ;;  %v1218_v17 = vpop.permute.xlu0 %1217  ;;  %11018 = vrcp.f32 %v17892_v26  ;;  %v2464_v60 = vmul.f32 %v9690_v48, %v1134_v38  ;;  %v5653_v26 = vpack.c.bf16 %v5206_v47, %v5206_v47  ;;  %v17895_v15 = vrot.slane %v13231_v57, 7 }
 0x260   :  { %17889 = vst [vmem:[#allocation11_spill] sm:$0xff] %v13431_v49  ;;  %v13442_v12 = vpop.eup %11014  ;;  %v3140_v49 = vrot.slane %v3139_v41, 1  ;;  %v3125_v44 = vadd.f32 %v3124_v11, %v2468_v51  ;;  %11020 = vrcp.f32 %v17894_v52  ;;  %v2476_v53 = vmul.f32 %v9714_v36, %v1218_v17 }
 0x261   :  { %17890 = vst [vmem:[#allocation32_spill] sm:$0xff] %v13442_v12  ;;  %11022 = vrcp.f32 %v17895_v15  ;;  %v3051_v5 = vadd.f32 %v3050_v61, %v3049_v19  ;;  %v3186_v35 = vrot.slane %v3185_v43, 2  ;;  %v5661_v48 = vpack.c.bf16 %v5222_v28, %v5222_v28 }
 0x262   :  { %v1183_v56 = vpop.permute.xlu1 %1182  ;;  %v3141_v17 = vadd.f32 %v3140_v49, %v3139_v41  ;;  %v3098_v36 = vrot.slane %v3097_v4, 1  ;;  %v3055_v42 = vadd.f32 %v3054_v3, %v3053_v58  ;;  %v3126_v57 = vrot.slane %v3125_v44, 2  ;;  %v13488_v49 = vpop.f32.mrb[5].mxu1 }
 0x263   :  { %v1085_v12 = vpop.permute.xlu0 %1084  ;;  %v3100_v15 = vrot.slane %v2464_v60, 4  ;;  %v6534_v61 = vunpack.c.l.b16 %v5653_v26  ;;  %v3172_v51 = vrot.slane %v2476_v53, 4  ;;  %17896 = vst [vmem:[#allocation16_spill] sm:$0xff] %v13488_v49  ;;  %v5212_v38 = vmul.f32 %v13225_v18, %v3051_v5  ;;  %v13495_v3 = vpop.f32.mrb[6].mxu1 }
 0x264   :  { %v3187_v55 = vadd.f32 %v3186_v35, %v3185_v43  ;;  %17897 = vst [vmem:[#allocation20_spill] sm:$0xff] %v13495_v3  ;;  %v6542_v19 = vunpack.c.l.b16 %v5661_v48  ;;  %v5242_v28 = vmul.f32 %v13316_v37, %v3141_v17  ;;  %v3099_v52 = vadd.f32 %v3098_v36, %v3097_v4  ;;  %v13508_v3 = vpop.f32.mrb[7].mxu1 }
 0x265   :  { %v3056_v35 = vrot.slane %v3055_v42, 1  ;;  %v3127_v5 = vadd.f32 %v3126_v57, %v3125_v44  ;;  %v3101_v58 = vadd.f32 %v3100_v15, %v2464_v60  ;;  %17898 = vst [vmem:[#allocation30_spill] sm:$0xff] %v13508_v3  ;;  %v17899_v48 = vrot.slane %v13345_v22, 7 }
 0x266   :  { %v13477_v11 = vpop.permute.xlu1 %1238  ;;  %v3173_v4 = vadd.f32 %v3172_v51, %v2476_v53  ;;  %v17900_v17 = vunpack.c.h.bf16 %v13280_v8  ;;  %v5656_v60 = vpack.c.bf16 %v5212_v38, %v5212_v38  ;;  %v3188_v57 = vrot.slane %v3187_v55, 1 }
 0x267   :  { %v13479_v47 = vpop.permute.xlu0 %1189  ;;  %v6846_v37 = vsel %vm6727_vm1, %v17899_v48, %v6534_v61  ;;  %v17901_v15 = vunpack.c.h.bf16 %v13342_v14  ;;  %v17902_v8 = vrot.slane %v13355_v25, 7  ;;  %v5228_v51 = vmul.f32 %v13255_v31, %v3099_v52  ;;  %v13543_v52 = vpop.f32.mrb[8].mxu1 }
 0x268   :  { %v13497_v26 = vpop.eup %11016  ;;  %v2471_v36 = vmul.f32 %v17900_v17, %v1183_v56  ;;  %v5671_v56 = vpack.c.bf16 %v5242_v28, %v5242_v28  ;;  %v3057_v17 = vadd.f32 %v3056_v35, %v3055_v42  ;;  %v3128_v14 = vrot.slane %v3127_v5, 1  ;;  %17904 = vst [vmem:[#allocation6_spill] sm:$0xff] %v13543_v52 }
 0x269   :  { %4492 = vadd.xlane.f32.xlu0 %v4491_v21  ;;  %v13504_v43 = vpop.eup %11018  ;;  %v2457_v21 = vmul.f32 %v17901_v15, %v1085_v12  ;;  %v6860_v53 = vsel %vm6727_vm1, %v17902_v8, %v6542_v19  ;;  %v3102_v12 = vrot.slane %v3101_v58, 2  ;;  %v17903_v15 = vrot.slane %v13349_v27, 6  ;;  %v13550_v27 = vpop.f32.mrb[9].mxu1 }
 0x26a   :  { %v13500_v41 = vpop.permute.xlu1 %1140  ;;  %v13519_v44 = vpop.eup %11020  ;;  %v3174_v25 = vrot.slane %v3173_v4, 2  ;;  %v3142_v18 = vrot.slane %v2471_v36, 4  ;;  %v6537_v28 = vunpack.c.l.b16 %v5656_v60  ;;  %v3189_v42 = vadd.f32 %v3188_v57, %v3187_v55  ;;  %17906 = vst [vmem:[#allocation38_spill] sm:$0xff] %v13550_v27 }
 0x26b   :  { %v13515_v49 = vpop.permute.xlu0 %1091  ;;  %v13525_v61 = vpop.eup %11022  ;;  %v6848_v22 = vsel %vm6730_vm2, %v17903_v15, %v6846_v37  ;;  %v3058_v35 = vrot.slane %v2457_v21, 4  ;;  %v17905_v8 = vrot.slane %v13362_v20, 6  ;;  %v13552_v37 = vunpack.c.l.b16 %v5671_v56 }
 0x26c   :  { %v5664_v15 = vpack.c.bf16 %v5228_v51, %v5228_v51  ;;  %v5214_v60 = vmul.f32 %v13228_v6, %v3057_v17  ;;  %v3129_v20 = vadd.f32 %v3128_v14, %v3127_v5  ;;  %v3103_v57 = vadd.f32 %v3102_v12, %v3101_v58  ;;  %v13571_v58 = vpop.f32.mrb[10].mxu1 }
 0x26d   :  { %17907 = vst [vmem:[#allocation26_spill] sm:$0xff] %v13552_v37  ;;  %v3143_v56 = vadd.f32 %v3142_v18, %v2471_v36  ;;  %v6849_v52 = vrot.slane %v6537_v28, 5  ;;  %v5258_v31 = vmul.f32 %v13427_v63, %v3189_v42  ;;  %v3059_v3 = vadd.f32 %v3058_v35, %v2457_v21  ;;  %17909 = vst [vmem:[#allocation15_spill] sm:$0xff] %v13571_v58  ;;  %v13582_v28 = vpop.f32.mrb[11].mxu1 }
 0x26e   :  { %v13531_v48 = vpop.permute.xlu1 %1245  ;;  %v17908_v6 = vunpack.c.h.bf16 %v13335_v1  ;;  %v17910_v18 = vunpack.c.l.bf16 %v13389_v24  ;;  %v5657_v12 = vpack.c.bf16 %v5214_v60, %v5214_v60  ;;  %v5238_v63 = vmul.f32 %v13304_v32, %v3129_v20  ;;  %v17911_v1 = vld [vmem:[#allocation19_spill] sm:$0xff]  ;;  %17912 = vst [vmem:[#allocation10_spill] sm:$0xff] %v13582_v28 }
 0x26f   :  { %v13554_v38 = vpop.permute.xlu0 %1196  ;;  %v3104_v21 = vrot.slane %v3103_v57, 1  ;;  %v3144_v35 = vrot.slane %v3143_v56, 2  ;;  %v5679_v60 = vpack.c.bf16 %v5258_v31, %v5258_v31  ;;  %v3060_v32 = vrot.slane %v3059_v3, 2 }
 0x270   :  { %v2479_v5 = vmul.f32 %v17908_v6, %v13477_v11  ;;  %v2472_v36 = vmul.f32 %v17910_v18, %v13479_v47  ;;  %v17913_v6 = vld [vmem:[#allocation37_spill] sm:$0xff]  ;;  %v13588_v18 = vpop.f32.mrb[12].mxu1  ;;  %v17915_v14 = vunpack.c.h.bf16 %v13372_v9  ;;  %v17917_v55 = vunpack.c.l.bf16 %v13401_v59 }
 0x271   :  { %4495 = vadd.xlane.f32.xlu1 %v13435_v13  ;;  %v13548_v13 = vsel %vm6730_vm2, %v17905_v8, %v6860_v53  ;;  %v3175_v8 = vadd.f32 %v3174_v25, %v3173_v4  ;;  %v6545_v4 = vunpack.c.l.b16 %v5664_v15  ;;  %17914 = vst [vmem:[#allocation19_spill] sm:$0xff] %v13588_v18  ;;  %v13593_v27 = vpop.f32.mrb[13].mxu1  ;;  %v17918_v28 = vunpack.c.l.bf16 %v13425_v46 }
 0x272   :  { %v1148_v19 = vpop.permute.xlu1 %1147  ;;  %v3190_v20 = vrot.slane %v2479_v5, 4  ;;  %v2465_v11 = vmul.f32 %v17915_v14, %v13500_v41  ;;  %17916 = vst [vmem:[#allocation37_spill] sm:$0xff] %v13593_v27  ;;  %v3148_v53 = vrot.slane %v2472_v36, 4  ;;  %v2458_v17 = vmul.f32 %v17917_v55, %v13515_v49 }
 0x273   :  { %v3176_v42 = vrot.slane %v3175_v8, 1  ;;  %v1099_v15 = vpop.permute.xlu0 %1098  ;;  %v6863_v51 = vrot.slane %v6545_v4, 5  ;;  %v2466_v47 = vmul.f32 %v17918_v28, %v1148_v19  ;;  %v13600_v58 = vunpack.c.l.b16 %v5657_v12 }
 0x274   :  { %v5669_v31 = vpack.c.bf16 %v5238_v63, %v5238_v63  ;;  %v3105_v18 = vadd.f32 %v3104_v21, %v3103_v57  ;;  %v17919_v37 = vunpack.c.h.bf16 %v13401_v59  ;;  %v3145_v41 = vadd.f32 %v3144_v35, %v3143_v56  ;;  %v17921_v21 = vld [vmem:[#allocation22_spill] sm:$0xff] }
 0x275   :  { %v3177_v9 = vadd.f32 %v3176_v42, %v3175_v8  ;;  %v13605_v14 = vsel %vm6733_vm3, %v6849_v52, %v6848_v22  ;;  %v13609_v27 = vunpack.c.l.b16 %v5679_v60  ;;  %v3061_v49 = vadd.f32 %v3060_v32, %v3059_v3 }
 0x276   :  { %v1253_v25 = vpop.permute.xlu1 %1252  ;;  %v2459_v10 = vmul.f32 %v17919_v37, %v1099_v15  ;;  %v3191_v55 = vadd.f32 %v3190_v20, %v2479_v5  ;;  %v3106_v19 = vrot.slane %v2465_v11, 4  ;;  %v17920_v57 = vrot.slane %v13468_v16, %v11574_v34 }
 0x277   :  { %v3149_v59 = vadd.f32 %v3148_v53, %v2472_v36  ;;  %v3064_v37 = vrot.slane %v2458_v17, 4  ;;  %v3112_v8 = vrot.slane %v2466_v47, 4  ;;  %v1204_v56 = vpop.permute.xlu0 %1203  ;;  %v13616_v22 = vsel %vm6733_vm3, %v6863_v51, %v13548_v13 }
 0x278   :  { %v6550_v63 = vunpack.c.l.b16 %v5669_v31  ;;  %v5230_v3 = vmul.f32 %v17921_v21, %v3105_v18  ;;  %v3070_v5 = vrot.slane %v2459_v10, 4  ;;  %v5254_v28 = vmul.f32 %v13378_v7, %v3177_v9 }
 0x279   :  { %v3146_v42 = vrot.slane %v3145_v41, 1  ;;  %v17922_v35 = vunpack.c.l.bf16 %v13409_v62  ;;  %v17923_v36 = vunpack.c.h.bf16 %v13389_v24  ;;  %v17924_v13 = vrot.slane %v13260_v23, %v11574_v34 }
 0x27a   :  { %v1155_v12 = vpop.permute.xlu1 %1154  ;;  %v3062_v51 = vrot.slane %v3061_v49, 1  ;;  %v3192_v60 = vrot.slane %v3191_v55, 2  ;;  %v3107_v32 = vadd.f32 %v3106_v19, %v2465_v11  ;;  %v17925_v18 = vunpack.c.h.bf16 %v13409_v62 }
 0x27b   :  { %v2480_v53 = vmul.f32 %v17922_v35, %v13531_v48  ;;  %v2473_v15 = vmul.f32 %v17923_v36, %v13554_v38  ;;  %v17926_v7 = vrot.slane %v13292_v54, %v17861_v29  ;;  %v3150_v31 = vrot.slane %v3149_v59, 2 }
 0x27c   :  { %v2481_v20 = vmul.f32 %v17925_v18, %v1253_v25  ;;  %v3065_v48 = vadd.f32 %v3064_v37, %v2458_v17  ;;  %v3113_v9 = vadd.f32 %v3112_v8, %v2466_v47  ;;  %v17927_v24 = vunpack.c.l.bf16 %v13440_v33  ;;  %v1211_v17 = vpop.permute.xlu0 %1210 }
 0x27d   :  { %v5665_v36 = vpack.c.bf16 %v5230_v3, %v5230_v3  ;;  %v3071_v11 = vadd.f32 %v3070_v5, %v2459_v10  ;;  %v17930_v62 = vunpack.c.h.bf16 %v13425_v46  ;;  %v3147_v18 = vadd.f32 %v3146_v42, %v3145_v41 }
 0x27e   :  { %v2474_v38 = vmul.f32 %v17927_v24, %v1204_v56  ;;  %v1260_v19 = vpop.permute.xlu1 %1259  ;;  %v3154_v4 = vrot.slane %v2473_v15, 4  ;;  %v17931_v47 = vrot.slane %v13292_v54, %v17862_v39  ;;  %v3063_v37 = vadd.f32 %v3062_v51, %v3061_v49 }
 0x27f   :  { %1301 = vbcast.lane.b32.xlu0 %v17920_v57, 256  ;;  %v17928_v57 = vld [vmem:[#allocation17_spill] sm:$0xff]  ;;  %v2467_v25 = vmul.f32 %v17930_v62, %v1155_v12  ;;  %v3108_v8 = vrot.slane %v3107_v32, 2  ;;  %v3202_v56 = vrot.slane %v2481_v20, 4  ;;  %v17932_v10 = vrot.slane %v13309_v30, %v17861_v29 }
 0x280   :  { %v17929_v21 = vrot.slane %v17928_v57, 7  ;;  %v13650_v46 = vadd.f32 %v3192_v60, %v3191_v55  ;;  %v3066_v12 = vrot.slane %v3065_v48, 2  ;;  %v3114_v3 = vrot.slane %v3113_v9, 2 }
 0x281   :  { %v3160_v41 = vrot.slane %v2474_v38, 4  ;;  %v13652_v5 = vadd.f32 %v3150_v31, %v3149_v59  ;;  %v17933_v24 = vunpack.c.h.bf16 %v13440_v33  ;;  %v13656_v49 = vunpack.c.l.b16 %v5665_v36  ;;  %v17936_v33 = vld [vmem:[#allocation31_spill] sm:$0xff] }
 0x282   :  { %1357 = vbcast.lane.b32.xlu1 %v17924_v13, 256  ;;  %v13640_v35 = vsel %vm6727_vm1, %v17929_v21, %v6550_v63  ;;  %v5677_v13 = vpack.c.bf16 %v5254_v28, %v5254_v28  ;;  %v3118_v63 = vrot.slane %v2467_v25, 4  ;;  %v3072_v28 = vrot.slane %v3071_v11, 2  ;;  %v1267_v59 = vpop.permute.xlu1 %1266 }
 0x283   :  { %1385 = vbcast.lane.b32.xlu0 %v17926_v7, 256  ;;  %v3196_v7 = vrot.slane %v2480_v53, 4  ;;  %v2475_v57 = vmul.f32 %v17933_v24, %v1211_v17  ;;  %v3155_v62 = vadd.f32 %v3154_v4, %v2473_v15  ;;  %v3109_v55 = vadd.f32 %v3108_v8, %v3107_v32  ;;  %v17937_v4 = vld [vmem:[#allocation28_spill] sm:$0xff] }
 0x284   :  { %v3119_v42 = vadd.f32 %v3118_v63, %v2467_v25  ;;  %v6558_v51 = vunpack.c.l.b16 %v5677_v13  ;;  %v3203_v60 = vadd.f32 %v3202_v56, %v2481_v20  ;;  %v17935_v31 = vrot.slane %v13468_v16, %v11587_v40 }
 0x285   :  { %v3197_v21 = vadd.f32 %v3196_v7, %v2480_v53  ;;  %v3166_v52 = vrot.slane %v2475_v57, 4  ;;  %v13665_v25 = vmul.f32 %v17936_v33, %v3147_v18  ;;  %v3067_v36 = vadd.f32 %v3066_v12, %v3065_v48 }
 0x286   :  { %1406 = vbcast.lane.b32.xlu1 %v17931_v47, 256  ;;  %v17934_v47 = vrot.slane %v13309_v30, %v17862_v39  ;;  %v3115_v13 = vadd.f32 %v3114_v3, %v3113_v9  ;;  %v3161_v53 = vadd.f32 %v3160_v41, %v2474_v38  ;;  %v13668_v15 = vmul.f32 %v17937_v4, %v3063_v37 }
 0x287   :  { %1441 = vbcast.lane.b32.xlu0 %v17932_v10, 256  ;;  %v3120_v10 = vrot.slane %v3119_v42, 2  ;;  %v3073_v7 = vadd.f32 %v3072_v28, %v3071_v11  ;;  %v3167_v17 = vadd.f32 %v3166_v52, %v2475_v57  ;;  %v17938_v32 = vunpack.c.l.bf16 %v13461_v2  ;;  %v13681_v11 = vpop.f32.mrb[14].mxu1 }
 0x288   :  { %v3194_v8 = vrot.slane %v13650_v46, 1  ;;  %v3198_v56 = vrot.slane %v3197_v21, 2  ;;  %v3156_v63 = vrot.slane %v3155_v62, 2  ;;  %v17939_v24 = vunpack.c.h.bf16 %v13461_v2  ;;  %17942 = vst [vmem:[#allocation22_spill] sm:$0xff] %v13681_v11  ;;  %v13683_v2 = vpop.f32.mrb[15].mxu1 }
 0x289   :  { %v2482_v20 = vmul.f32 %v17938_v32, %v1260_v19  ;;  %v17940_v48 = vrot.slane %v13260_v23, %v11587_v40  ;;  %v3110_v9 = vrot.slane %v3109_v55, 1  ;;  %v3204_v38 = vrot.slane %v3203_v60, 2  ;;  %17943 = vst [vmem:[#allocation17_spill] sm:$0xff] %v13683_v2  ;;  %v13686_v33 = vpop.f32.mrb[16].mxu1 }
 0x28a   :  { %1462 = vbcast.lane.b32.xlu1 %v17934_v47, 256  ;;  %v2483_v47 = vmul.f32 %v17939_v24, %v1267_v59  ;;  %v3121_v18 = vadd.f32 %v3120_v10, %v3119_v42  ;;  %v17941_v52 = vrot.slane %v13292_v54, %v11574_v34  ;;  %v3068_v19 = vrot.slane %v3067_v36, 1  ;;  %17944 = vst [vmem:[#allocation31_spill] sm:$0xff] %v13686_v33 }
 0x28b   :  { %1308 = vbcast.lane.b32.xlu0 %v17935_v31, 256  ;;  %v3208_v37 = vrot.slane %v2482_v20, 4  ;;  %v3116_v12 = vrot.slane %v3115_v13, 1  ;;  %v3162_v3 = vrot.slane %v3161_v53, 2  ;;  %v3152_v28 = vrot.slane %v13652_v5, 1 }
 0x28c   :  { %v3214_v41 = vrot.slane %v2483_v47, 4  ;;  %v3074_v57 = vrot.slane %v3073_v7, 1  ;;  %v3168_v59 = vrot.slane %v3167_v17, 2  ;;  %v3199_v10 = vadd.f32 %v3198_v56, %v3197_v21 }
 0x28d   :  { %v3209_v31 = vadd.f32 %v3208_v37, %v2482_v20  ;;  %v3157_v4 = vadd.f32 %v3156_v63, %v3155_v62  ;;  %v17945_v24 = vrot.slane %v13309_v30, %v11574_v34  ;;  %v3205_v2 = vadd.f32 %v3204_v38, %v3203_v60 }
 0x28e   :  { %1364 = vbcast.lane.b32.xlu1 %v17940_v48, 256  ;;  %v3215_v32 = vadd.f32 %v3214_v41, %v2483_v47  ;;  %v13692_v48 = vpop.f32.mrb[17].mxu1  ;;  %v3122_v11 = vrot.slane %v3121_v18, 1  ;;  %v17947_v20 = vrot.slane %v13468_v16, %v11598_v45  ;;  %v3069_v42 = vadd.f32 %v3068_v19, %v3067_v36 }
 0x28f   :  { %1413 = vbcast.lane.b32.xlu0 %v17941_v52, 256  ;;  %17946 = vst [vmem:[#allocation28_spill] sm:$0xff] %v13692_v48  ;;  %v3111_v52 = vadd.f32 %v3110_v9, %v3109_v55  ;;  %v3210_v39 = vrot.slane %v3209_v31, 2  ;;  %v13697_v37 = vpop.f32.mrb[18].mxu1  ;;  %v3117_v21 = vadd.f32 %v3116_v12, %v3115_v13  ;;  %v3163_v62 = vadd.f32 %v3162_v3, %v3161_v53  ;;  %v17951_v9 = vld [vmem:[#allocation18_spill] sm:$0xff]  ;;  %v17958_v12 = vld [vmem:[#allocation36_spill] sm:$0xff] }
 0x290   :  { %17948 = vst [vmem:[#allocation39_spill] sm:$0xff] %v13697_v37  ;;  %v3216_v56 = vrot.slane %v3215_v32, 2  ;;  %v13699_v63 = vpop.f32.mrb[19].mxu1  ;;  %v3195_v47 = vadd.f32 %v3194_v8, %v13650_v46  ;;  %v3075_v41 = vadd.f32 %v3074_v57, %v3073_v7  ;;  %v17952_v38 = vrot.slane %v17951_v9, 7  ;;  %v17955_v7 = vld [vmem:[#allocation21_spill] sm:$0xff]  ;;  %v17959_v57 = vld [vmem:[#allocation24_spill] sm:$0xff] }
 0x291   :  { %17949 = vst [vmem:[#allocation40_spill] sm:$0xff] %v13699_v63  ;;  %v3211_v55 = vadd.f32 %v3210_v39, %v3209_v31  ;;  %v13702_v60 = vpop.f32.mrb[20].mxu1  ;;  %v3158_v37 = vrot.slane %v3157_v4, 1  ;;  %v17953_v13 = vrot.slane %v13260_v23, %v11598_v45  ;;  %v3153_v46 = vadd.f32 %v3152_v28, %v13652_v5  ;;  %v17961_v9 = vld [vmem:[#allocation11_spill] sm:$0xff]  ;;  %v17962_v28 = vld [vmem:[#allocation29_spill] sm:$0xff] }
 0x292   :  { %1469 = vbcast.lane.b32.xlu1 %v17945_v24, 256  ;;  %v3169_v24 = vadd.f32 %v3168_v59, %v3167_v17  ;;  %17950 = vst [vmem:[#allocation41_spill] sm:$0xff] %v13702_v60  ;;  %v13707_v48 = vsel %vm6727_vm1, %v17952_v38, %v6558_v51  ;;  %v3217_v36 = vadd.f32 %v3216_v56, %v3215_v32  ;;  %v13712_v53 = vpop.f32.mrb[21].mxu1  ;;  %v3206_v17 = vrot.slane %v3205_v2, 1  ;;  %v18005_v60 = vld [vmem:[#allocation14_spill] sm:$0xff] }
 0x293   :  { %1315 = vbcast.lane.b32.xlu0 %v17947_v20, 256  ;;  %v3200_v20 = vrot.slane %v3199_v10, 1  ;;  %17954 = vst [vmem:[#allocation18_spill] sm:$0xff] %v13712_v53  ;;  %v5232_v39 = vmul.f32 %v17955_v7, %v3111_v52  ;;  %v3123_v8 = vadd.f32 %v3122_v11, %v3121_v18  ;;  %v17956_v19 = vrot.slane %v13292_v54, %v11587_v40  ;;  %v13719_v51 = vpop.f32.mrb[22].mxu1 }
 0x294   :  { %17957 = vst [vmem:[#allocation21_spill] sm:$0xff] %v13719_v51  ;;  %v5218_v3 = vmul.f32 %v17958_v12, %v3069_v42  ;;  %v5234_v59 = vmul.f32 %v17959_v57, %v3117_v21  ;;  %v3164_v31 = vrot.slane %v3163_v62, 1  ;;  %v3212_v32 = vrot.slane %v3211_v55, 1  ;;  %v13723_v56 = vpop.f32.mrb[23].mxu1 }
 0x295   :  { %17960 = vst [vmem:[#allocation36_spill] sm:$0xff] %v13723_v56  ;;  %v5260_v5 = vmul.f32 %v17961_v9, %v3195_v47  ;;  %v5220_v52 = vmul.f32 %v17962_v28, %v3075_v41  ;;  %v3170_v38 = vrot.slane %v3169_v24, 1  ;;  %v3218_v18 = vrot.slane %v3217_v36, 1  ;;  %v13727_v11 = vpop.f32.mrb[24].mxu1  ;;  %v17966_v47 = vld [vmem:[#allocation23_spill] sm:$0xff]  ;;  %v17967_v28 = vld [vmem:[#allocation12_spill] sm:$0xff] }
 0x296   :  { %1371 = vbcast.lane.b32.xlu1 %v17953_v13, 256  ;;  %17963 = vst [vmem:[#allocation24_spill] sm:$0xff] %v13727_v11  ;;  %v5672_v13 = vpack.c.bf16 %v13665_v25, %v13665_v25  ;;  %v5658_v42 = vpack.c.bf16 %v13668_v15, %v13668_v15  ;;  %v3201_v7 = vadd.f32 %v3200_v20, %v3199_v10  ;;  %v13736_v12 = vpop.f32.mrb[25].mxu1 }
 0x297   :  { %1420 = vbcast.lane.b32.xlu0 %v17956_v19, 256  ;;  %v3159_v21 = vadd.f32 %v3158_v37, %v3157_v4  ;;  %v17964_v19 = vrot.slane %v13309_v30, %v11587_v40  ;;  %17965 = vst [vmem:[#allocation11_spill] sm:$0xff] %v13736_v12  ;;  %v5246_v41 = vmul.f32 %v17966_v47, %v3153_v46  ;;  %v13743_v37 = vpop.f32.mrb[26].mxu1 }
 0x298   :  { %v5666_v57 = vpack.c.bf16 %v5232_v39, %v5232_v39  ;;  %v3207_v9 = vadd.f32 %v3206_v17, %v3205_v2  ;;  %v5236_v11 = vmul.f32 %v17967_v28, %v3123_v8  ;;  %v17968_v25 = vrot.slane %v13468_v16, %v11609_v50  ;;  %17969 = vst [vmem:[#allocation29_spill] sm:$0xff] %v13743_v37  ;;  %v13745_v53 = vpop.f32.mrb[27].mxu1  ;;  %v17971_v39 = vld [vmem:[#allocation32_spill] sm:$0xff]  ;;  %v17972_v8 = vld [vmem:[#allocation34_spill] sm:$0xff] }
 0x299   :  { %v5659_v56 = vpack.c.bf16 %v5218_v3, %v5218_v3  ;;  %v5667_v15 = vpack.c.bf16 %v5234_v59, %v5234_v59  ;;  %v3165_v10 = vadd.f32 %v3164_v31, %v3163_v62  ;;  %v3213_v4 = vadd.f32 %v3212_v32, %v3211_v55  ;;  %17970 = vst [vmem:[#allocation23_spill] sm:$0xff] %v13745_v53  ;;  %v13754_v62 = vpop.f32.mrb[28].mxu1 }
 0x29a   :  { %1476 = vbcast.lane.b32.xlu1 %v17964_v19, 256  ;;  %v5680_v20 = vpack.c.bf16 %v5260_v5, %v5260_v5  ;;  %v5660_v19 = vpack.c.bf16 %v5220_v52, %v5220_v52  ;;  %v3171_v51 = vadd.f32 %v3170_v38, %v3169_v24  ;;  %v3219_v12 = vadd.f32 %v3218_v18, %v3217_v36  ;;  %v13760_v32 = vpop.f32.mrb[29].mxu1  ;;  %v17977_v38 = vld [vmem:[#allocation33_spill] sm:$0xff] }
 0x29b   :  { %1322 = vbcast.lane.b32.xlu0 %v17968_v25, 256  ;;  %v13747_v46 = vunpack.c.l.b16 %v5672_v13  ;;  %v6539_v2 = vunpack.c.l.b16 %v5658_v42  ;;  %v5262_v17 = vmul.f32 %v17971_v39, %v3201_v7  ;;  %v5248_v16 = vmul.f32 %v17972_v8, %v3159_v21  ;;  %17974 = vst [vmem:[#allocation12_spill] sm:$0xff] %v13754_v62  ;;  %17976 = vst [vmem:[#allocation32_spill] sm:$0xff] %v13760_v32  ;;  %v13764_v13 = vpop.f32.mrb[30].mxu1 }
 0x29c   :  { %v17973_v3 = vrot.slane %v13260_v23, %v11609_v50  ;;  %v5673_v55 = vpack.c.bf16 %v5246_v41, %v5246_v41  ;;  %v6547_v59 = vunpack.c.l.b16 %v5666_v57  ;;  %v5264_v24 = vmul.f32 %v13497_v26, %v3207_v9  ;;  %17978 = vst [vmem:[#allocation34_spill] sm:$0xff] %v13764_v13  ;;  %v13768_v21 = vpop.f32.mrb[31].mxu1 }
 0x29d   :  { %v5668_v36 = vpack.c.bf16 %v5236_v11, %v5236_v11  ;;  %v17975_v31 = vrot.slane %v13292_v54, %v11598_v45  ;;  %v6540_v5 = vunpack.c.l.b16 %v5659_v56  ;;  %v6548_v52 = vunpack.c.l.b16 %v5667_v15  ;;  %17979 = vst [vmem:[#allocation33_spill] sm:$0xff] %v13768_v21 }
 0x29e   :  { %1378 = vbcast.lane.b32.xlu1 %v17973_v3, 256  ;;  %v5250_v18 = vmul.f32 %v17977_v38, %v3165_v10  ;;  %v5266_v23 = vmul.f32 %v13519_v44, %v3213_v4  ;;  %v6561_v42 = vunpack.c.l.b16 %v5680_v20  ;;  %v5252_v7 = vmul.f32 %v13504_v43, %v3171_v51 }
 0x29f   :  { %1427 = vbcast.lane.b32.xlu0 %v17975_v31, 256  ;;  %v5268_v26 = vmul.f32 %v13525_v61, %v3219_v12  ;;  %v6541_v11 = vunpack.c.l.b16 %v5660_v19  ;;  %v6877_v47 = vrot.slane %v13747_v46, 5  ;;  %v6853_v41 = vrot.slane %v6539_v2, 3  ;;  %v17985_v31 = vld [vmem:[#allocation3_spill] sm:$0xff] }
 0x2a0   :  { %v5681_v57 = vpack.c.bf16 %v5262_v17, %v5262_v17  ;;  %v5674_v56 = vpack.c.bf16 %v5248_v16, %v5248_v16  ;;  %v17980_v9 = vrot.slane %v13309_v30, %v11598_v45  ;;  %v6554_v44 = vunpack.c.l.b16 %v5673_v55 }
 0x2a1   :  { %v6867_v28 = vrot.slane %v6547_v59, 3  ;;  %v5682_v25 = vpack.c.bf16 %v5264_v24, %v5264_v24  ;;  %v6549_v15 = vunpack.c.l.b16 %v5668_v36  ;;  %v17981_v43 = vrot.slane %v13292_v54, %v11609_v50 }
 0x2a2   :  { %1483 = vbcast.lane.b32.xlu1 %v17980_v9, 256  ;;  %v6855_v61 = vrot.slane %v6540_v5, 2  ;;  %v6869_v51 = vrot.slane %v6548_v52, 2  ;;  %v5675_v12 = vpack.c.bf16 %v5250_v18, %v5250_v18  ;;  %v5683_v10 = vpack.c.bf16 %v5266_v23, %v5266_v23  ;;  %v17989_v9 = vld [vmem:[#allocation25_spill] sm:$0xff] }
 0x2a3   :  { %1434 = vbcast.lane.b32.xlu0 %v17981_v43, 256  ;;  %v6891_v4 = vrot.slane %v6561_v42, 5  ;;  %v5676_v20 = vpack.c.bf16 %v5252_v7, %v5252_v7  ;;  %v5684_v19 = vpack.c.bf16 %v5268_v26, %v5268_v26  ;;  %v6857_v46 = vrot.slane %v6541_v11, 1 }
 0x2a4   :  { %v6562_v2 = vunpack.c.l.b16 %v5681_v57  ;;  %v6555_v39 = vunpack.c.l.b16 %v5674_v56  ;;  %v17982_v17 = vrot.slane %v13600_v58, 4  ;;  %v17983_v16 = vrot.slane %v13656_v49, 4 }
 0x2a5   :  { %v17984_v3 = vrot.slane %v13309_v30, %v11609_v50  ;;  %v6563_v55 = vunpack.c.l.b16 %v5682_v25  ;;  %v6871_v36 = vrot.slane %v6549_v15, 1  ;;  %v17986_v58 = vrot.slane %v17911_v1, %v17985_v31 }
 0x2a6   :  { %v6852_v8 = vsel %vm6736_vm4, %v17982_v17, %v13605_v14  ;;  %v6866_v54 = vsel %vm6736_vm4, %v17983_v16, %v13616_v22  ;;  %v6556_v14 = vunpack.c.l.b16 %v5675_v12  ;;  %v6564_v5 = vunpack.c.l.b16 %v5683_v10 }
 0x2a7   :  { %1490 = vbcast.lane.b32.xlu1 %v17984_v3, 256  ;;  %v6854_v59 = vsel %vm6739_vm5, %v6853_v41, %v6852_v8  ;;  %v6868_v24 = vsel %vm6739_vm5, %v6867_v28, %v6866_v54  ;;  %1504 = vbcast.lane.b32.xlu0 %v17986_v58, 256  ;;  %v6557_v38 = vunpack.c.l.b16 %v5676_v20  ;;  %v6565_v18 = vunpack.c.l.b16 %v5684_v19  ;;  %v1337_v54 = vpop.permute.xlu1 %1336  ;;  %v13830_v3 = vld [vmem:[%s17482_s0 + $0x180] sm:$0xff]  }
 0x2a8   :  { %v6856_v49 = vsel %vm6742_vm6, %v6855_v61, %v6854_v59  ;;  %v6870_v22 = vsel %vm6742_vm6, %v6869_v51, %v6868_v24  ;;  %v6889_v23 = vrot.slane %v13609_v27, 6  ;;  %v6879_v42 = vrot.slane %v6554_v44, 4  ;;  %v17990_v27 = vld [vmem:[#allocation26_spill] sm:$0xff]  ;;  %v13835_v59 = vld [vmem:[%s17482_s0 + $0x188] sm:$0xff]   ;;  %v13840_v24 = vld [vmem:[%s17482_s0 + $0x1a0] sm:$0xff]  }
 0x2a9   :  { %v6858_v52 = vsel %vm6745_vm7, %v6857_v46, %v6856_v49  ;;  %v6872_v30 = vsel %vm6745_vm7, %v6871_v36, %v6870_v22  ;;  %v6893_v7 = vrot.slane %v6562_v2, 4  ;;  %v17987_v11 = vrot.slane %v17913_v6, %v17985_v31  ;;  %v17993_v2 = vld [vmem:[#allocation13_spill] sm:$0xff]  ;;  %v13845_v36 = vld [vmem:[%s17482_s0 + $0x1c0] sm:$0xff]  }
 0x2aa   :  { %v7185_v26 = vpack.c.b16 %v6872_v30, %v6858_v52  ;;  %v6881_v41 = vrot.slane %v6555_v39, 3  ;;  %v6895_v57 = vrot.slane %v6563_v55, 3  ;;  %v17988_v56 = vrot.slane %v17911_v1, %v17844_v0  ;;  %v13850_v58 = vld [vmem:[%s17479_s1 + $0xa0] sm:$0xff]  ;;  %v13860_v30 = vld [vmem:[%s17482_s0 + $0x1a8] sm:$0xff]  }
 0x2ab   :  { %1560 = vbcast.lane.b32.xlu1 %v17987_v11, 256  ;;  %v1614_v28 = vrot.slane %v17989_v9, %v17985_v31  ;;  %v6883_v25 = vrot.slane %v6556_v14, 2  ;;  %v6897_v15 = vrot.slane %v6564_v5, 2  ;;  %v17991_v44 = vrot.slane %v17990_v27, 6  ;;  %v17994_v14 = vld [vmem:[#allocation5_spill] sm:$0xff]  ;;  %v1344_v22 = vpop.permute.xlu1 %1343 }
 0x2ac   :  { %1511 = vbcast.lane.b32.xlu0 %v17988_v56, 256  ;;  %10391 = vmatprep.mubr.bf16.mxu0 %v7185_v26  ;;  %v6890_v61 = vsel %vm6730_vm2, %v6889_v23, %v13707_v48  ;;  %v6885_v12 = vrot.slane %v6557_v38, 1  ;;  %v6899_v10 = vrot.slane %v6565_v18, 1  ;;  %v17992_v46 = vrot.slane %v17913_v6, %v17844_v0  ;;  %v1281_v6 = vpop.permute.xlu0 %1280  ;;  %v13867_v23 = vld [vmem:[%s17482_s0 + $0x1e0] sm:$0xff]  }
 0x2ad   :  { %v6876_v43 = vsel %vm6730_vm2, %v17991_v44, %v13640_v35  ;;  %v6892_v1 = vsel %vm6733_vm3, %v6891_v4, %v6890_v61  ;;  %v1670_v35 = vrot.slane %v17993_v2, %v17985_v31  ;;  %v13853_v5 = vmax.f32 %v17994_v14, 1.0  ;;  %v17995_v44 = vld [vmem:[#allocation27_spill] sm:$0xff]  ;;  %v13883_v61 = vld [vmem:[%s17479_s1 + $0xa8] sm:$0xff] }
 0x2ae   :  { %v6878_v51 = vsel %vm6733_vm3, %v6877_v47, %v6876_v43  ;;  %v6894_v19 = vsel %vm6736_vm4, %v6893_v7, %v6892_v1  ;;  %v9731_v49 = vunpack.c.h.bf16 %v13830_v3  ;;  %v9734_v52 = vunpack.c.l.bf16 %v13835_v59 }
 0x2af   :  { %v6880_v20 = vsel %vm6736_vm4, %v6879_v42, %v6878_v51  ;;  %1567 = vbcast.lane.b32.xlu1 %v17992_v46, 256  ;;  %v6896_v48 = vsel %vm6739_vm5, %v6895_v57, %v6894_v19  ;;  %v9747_v38 = vunpack.c.h.bf16 %v13840_v24  ;;  %v9763_v18 = vunpack.c.h.bf16 %v13845_v36 }
 0x2b0   :  { %v6882_v39 = vsel %vm6739_vm5, %v6881_v41, %v6880_v20  ;;  %1616 = vbcast.lane.b32.xlu0 %v1614_v28, 256  ;;  %v6898_v4 = vsel %vm6742_vm6, %v6897_v15, %v6896_v48  ;;  %v1288_v55 = vpop.permute.xlu0 %1287  ;;  %v4497_v42 = vsel %vm4436_vm0, %v13850_v58, 0.0  ;;  %v4681_v26 = vrot.slane %v13853_v5, 1  ;;  %v1449_v15 = vpop.permute.xlu1 %1448 }
 0x2b1   :  { %v6884_v47 = vsel %vm6742_vm6, %v6883_v25, %v6882_v39  ;;  %v6900_v8 = vsel %vm6745_vm7, %v6899_v10, %v6898_v4  ;;  %v2485_v11 = vmul.f32 %v9731_v49, %v1281_v6  ;;  %v9750_v41 = vunpack.c.l.bf16 %v13860_v30 }
 0x2b2   :  { %v6886_v17 = vsel %vm6745_vm7, %v6885_v12, %v6884_v47  ;;  %v4682_v57 = vrot.slane %v13853_v5, 2  ;;  %v2486_v56 = vmul.f32 %v9734_v52, %v1288_v55  ;;  %v9779_v9 = vunpack.c.h.bf16 %v13867_v23 }
 0x2b3   :  { %v7186_v16 = vpack.c.b16 %v6900_v8, %v6886_v17  ;;  %1672 = vbcast.lane.b32.xlu1 %v1670_v35, 256  ;;  %v2493_v28 = vmul.f32 %v9747_v38, %v1337_v54  ;;  %v4683_v27 = vrot.slane %v13853_v5, 3  ;;  %v13877_v43 = vmax.f32 %v17995_v44, 1.0  ;;  %v17996_v38 = vld [vmem:[#allocation8_spill] sm:$0xff] }
 0x2b4   :  { %v1393_v7 = vpop.permute.xlu0 %1392  ;;  %11024 = vrcp.f32 %v13853_v5  ;;  %v4684_v51 = vrot.slane %v13853_v5, 4  ;;  %v3226_v12 = vrot.slane %v2485_v11, 4  ;;  %v2494_v1 = vmul.f32 %v9750_v41, %v1344_v22 }
 0x2b5   :  { %10392 = vmatmul.mubr.bf16.gmra.mrb[8].mxu0 %v7186_v16  ;;  %v2501_v25 = vmul.f32 %v9763_v18, %v1393_v7  ;;  %11026 = vrcp.f32 %v4681_v26  ;;  %v4685_v10 = vrot.slane %v13853_v5, 5  ;;  %v3232_v20 = vrot.slane %v2486_v56, 4 }
 0x2b6   :  { %11028 = vrcp.f32 %v4682_v57  ;;  %v2509_v19 = vmul.f32 %v9779_v9, %v1449_v15  ;;  %v4686_v46 = vrot.slane %v13853_v5, 6  ;;  %v3274_v2 = vrot.slane %v2493_v28, 4 }
 0x2b7   :  { %v3322_v35 = vrot.slane %v2501_v25, 4  ;;  %11030 = vrcp.f32 %v4683_v27  ;;  %v4500_v39 = vsel %vm4436_vm0, %v13883_v61, 0.0  ;;  %v4688_v48 = vrot.slane %v13877_v43, 1 }
 0x2b8   :  { %11032 = vrcp.f32 %v4684_v51  ;;  %v3227_v47 = vadd.f32 %v3226_v12, %v2485_v11  ;;  %v4689_v4 = vrot.slane %v13877_v43, 2  ;;  %v3280_v17 = vrot.slane %v2494_v1, 4 }
 0x2b9   :  { %11034 = vrcp.f32 %v4685_v10  ;;  %v3233_v8 = vadd.f32 %v3232_v20, %v2486_v56  ;;  %v3370_v16 = vrot.slane %v2509_v19, 4  ;;  %v4690_v6 = vrot.slane %v13877_v43, 3  ;;  %v13901_v26 = vpop.xlane.xlu0 %4486 }
 0x2ba   :  { %11036 = vrcp.f32 %v4686_v46  ;;  %v3275_v54 = vadd.f32 %v3274_v2, %v2493_v28  ;;  %v3323_v55 = vadd.f32 %v3322_v35, %v2501_v25  ;;  %v4691_v14 = vrot.slane %v13877_v43, 4  ;;  %17997 = vst [vmem:[#allocation3_spill] sm:$0xff] %v13901_v26  ;;  %v17998_v28 = vld [vmem:[#allocation35_spill] sm:$0xff]  ;;  %v18007_v26 = vld [vmem:[#allocation16_spill] sm:$0xff] }
 0x2bb   :  { %11038 = vrcp.f32 %v13877_v43  ;;  %v4692_v49 = vrot.slane %v13877_v43, 5  ;;  %v4693_v22 = vrot.slane %v13877_v43, 6  ;;  %v4687_v52 = vrot.slane %v13853_v5, 7 }
 0x2bc   :  { %11040 = vrcp.f32 %v4688_v48  ;;  %v13899_v18 = vmax.f32 %v17996_v38, 1.0  ;;  %v3281_v7 = vadd.f32 %v3280_v17, %v2494_v1  ;;  %v3234_v41 = vrot.slane %v3233_v8, 2  ;;  %v13929_v17 = vld [vmem:[%s17479_s1 + $0x80] sm:$0xff]  ;;  %v13942_v38 = vld [vmem:[%s17482_s0 + $0x1c8] sm:$0xff]  }
 0x2bd   :  { %11042 = vrcp.f32 %v4689_v4  ;;  %v3371_v57 = vadd.f32 %v3370_v16, %v2509_v19  ;;  %v4694_v56 = vrot.slane %v13877_v43, 7  ;;  %v13909_v25 = vmax.f32 %v17998_v28, 1.0  ;;  %v1274_v48 = vpop.permute.xlu0 %1273  ;;  %v18001_v28 = vld [vmem:[#allocation7_spill] sm:$0xff] }
 0x2be   :  { %v13903_v11 = vpop.eup %11024  ;;  %11044 = vrcp.f32 %v4690_v6  ;;  %v3276_v5 = vrot.slane %v3275_v54, 2  ;;  %v3324_v15 = vrot.slane %v3323_v55, 2  ;;  %v9730_v44 = vunpack.c.l.bf16 %v13830_v3 }
 0x2bf   :  { %v13906_v9 = vpop.eup %11026  ;;  %11046 = vrcp.f32 %v4691_v14  ;;  %v4695_v1 = vrot.slane %v13899_v18, 1  ;;  %v3282_v10 = vrot.slane %v3281_v7, 2  ;;  %v3235_v20 = vadd.f32 %v3234_v41, %v3233_v8 }
 0x2c0   :  { %v13911_v27 = vpop.eup %11028  ;;  %11048 = vrcp.f32 %v4692_v49  ;;  %v3372_v19 = vrot.slane %v3371_v57, 2  ;;  %v4696_v46 = vrot.slane %v13899_v18, 2  ;;  %v3277_v35 = vadd.f32 %v3276_v5, %v3275_v54 }
 0x2c1   :  { %v13914_v51 = vpop.eup %11030  ;;  %11050 = vrcp.f32 %v4693_v22  ;;  %v4702_v3 = vrot.slane %v13909_v25, 1  ;;  %v9746_v4 = vunpack.c.l.bf16 %v13840_v24  ;;  %v1495_v8 = vrot.slane %v13929_v17, %v17861_v29  ;;  %v1330_v21 = vpop.permute.xlu0 %1329 }
 0x2c2   :  { %v13917_v43 = vpop.eup %11032  ;;  %11052 = vrcp.f32 %v4687_v52  ;;  %v4697_v16 = vrot.slane %v13899_v18, 3  ;;  %v4698_v14 = vrot.slane %v13899_v18, 4  ;;  %v3236_v49 = vrot.slane %v3235_v20, 1 }
 0x2c3   :  { %v13920_v2 = vpop.eup %11034  ;;  %11054 = vrcp.f32 %v4694_v56  ;;  %v3373_v22 = vadd.f32 %v3372_v19, %v3371_v57  ;;  %v3278_v41 = vrot.slane %v3277_v35, 1  ;;  %v13955_v57 = vld [vmem:[%s17479_s1 + $0x88] sm:$0xff]  ;;  %v2484_v37 = vmul.f32 %v9730_v44, %v1274_v48  ;;  %v11359_v44 = vld [vmem:[%s17487_s7] ss:$0 sm:$0xff] }
 0x2c4   :  { %17999 = vst [vmem:[#allocation25_spill] sm:$0xff] %v13920_v2  ;;  %11056 = vrcp.f32 %v13899_v18  ;;  %v3237_v62 = vadd.f32 %v3236_v49, %v3235_v20 }
 0x2c5   :  { %11058 = vrcp.f32 %v4695_v1  ;;  %v1551_v1 = vrot.slane %v13955_v57, %v17861_v29  ;;  %v3374_v53 = vrot.slane %v3373_v22, 1  ;;  %v3279_v19 = vadd.f32 %v3278_v41, %v3277_v35  ;;  %v1400_v2 = vpop.permute.xlu0 %1399 }
 0x2c6   :  { %11060 = vrcp.f32 %v4696_v46 }
 0x2c7   :  { %11062 = vrcp.f32 %v4702_v3 }
 0x2c8   :  { %11064 = vrcp.f32 %v4697_v16 }
 0x2c9   :  { %11066 = vrcp.f32 %v4698_v14 }
 0x2cf   :  { %4498 = vadd.xlane.f32.xlu0 %v4497_v42  ;;  %v3228_v42 = vrot.slane %v3227_v47, 2 }
 0x2d1   :  { %v3229_v12 = vadd.f32 %v3228_v42, %v3227_v47  ;;  %v13923_v47 = vpop.eup %11036 }
 0x2d2   :  { %18000 = vst [vmem:[#allocation26_spill] sm:$0xff] %v13923_v47  ;;  %v13935_v6 = vpop.eup %11038  ;;  %v1572_v47 = vrot.slane %v13955_v57, %v18001_v28 }
 0x2d3   :  { %v3230_v54 = vrot.slane %v3229_v12, 1  ;;  %v11041_v24 = vpop.eup %11040 }
 0x2d4   :  { %v13944_v42 = vpop.eup %11042 }
 0x2d5   :  { %v13948_v5 = vpop.eup %11044  ;;  %v3231_v3 = vadd.f32 %v3230_v54, %v3229_v12 }
 0x2d6   :  { %v13961_v46 = vpop.eup %11046 }
 0x2d7   :  { %4501 = vadd.xlane.f32.xlu1 %v4500_v39  ;;  %v3325_v39 = vadd.f32 %v3324_v15, %v3323_v55  ;;  %v3283_v55 = vadd.f32 %v3282_v10, %v3281_v7  ;;  %v1516_v7 = vrot.slane %v13929_v17, %v18001_v28  ;;  %v13950_v15 = vpop.xlane.xlu1 %4489  ;;  %v4699_v10 = vrot.slane %v13899_v18, 5  ;;  %18003 = vst [vmem:[#allocation5_spill] sm:$0xff] %v13961_v46  ;;  %v13964_v32 = vpop.eup %11048 }
 0x2d8   :  { %18002 = vst [vmem:[#allocation13_spill] sm:$0xff] %v13950_v15  ;;  %18004 = vst [vmem:[#allocation27_spill] sm:$0xff] %v13964_v32  ;;  %v13967_v33 = vpop.eup %11050  ;;  %v2492_v32 = vmul.f32 %v9746_v4, %v1330_v21  ;;  %v18011_v4 = vld [vmem:[#allocation30_spill] sm:$0xff] }
 0x2d9   :  { %v3326_v56 = vrot.slane %v3325_v39, 1  ;;  %v3284_v52 = vrot.slane %v3283_v55, 1  ;;  %18006 = vst [vmem:[#allocation8_spill] sm:$0xff] %v13967_v33  ;;  %v13972_v14 = vpop.eup %11052  ;;  %11068 = vrcp.f32 %v4699_v10  ;;  %v5288_v33 = vmul.f32 %v11041_v24, %v3279_v19 }
 0x2da   :  { %18008 = vst [vmem:[#allocation35_spill] sm:$0xff] %v13972_v14  ;;  %v13985_v35 = vpop.eup %11054  ;;  %v5274_v14 = vmul.f32 %v13911_v27, %v3237_v62 }
 0x2db   :  { %v3327_v15 = vadd.f32 %v3326_v56, %v3325_v39  ;;  %18010 = vst [vmem:[#allocation7_spill] sm:$0xff] %v13985_v35  ;;  %v3285_v21 = vadd.f32 %v3284_v52, %v3283_v55  ;;  %v13988_v41 = vpop.eup %11056  ;;  %v5272_v56 = vmul.f32 %v13906_v9, %v3231_v3  ;;  %v13995_v55 = vld [vmem:[%s17479_s1 + $0x98] sm:$0xff] }
 0x2dc   :  { %v1677_v52 = vrot.slane %v13995_v55, %v17844_v0 }
 0x2dd   :  { %v5290_v27 = vmul.f32 %v13944_v42, %v3285_v21  ;;  %v9751_v42 = vunpack.c.h.bf16 %v13860_v30 }
 0x2e5   :  { %1497 = vbcast.lane.b32.xlu0 %v1495_v8, 256  ;;  %v9766_v8 = vunpack.c.l.bf16 %v13942_v38  ;;  %v10389_v13 = vpop.f32.mrb[4].mxu0 }
 0x2e6   :  { %v7320_v16 = vadd.f32 %v10389_v13, %v18005_v60  ;;  %v7311_v63 = vpop.f32.mrb[5].mxu0  ;;  %v18009_v13 = vld [vmem:[#allocation20_spill] sm:$0xff] }
 0x2e7   :  { %v7312_v12 = vadd.f32 %v7311_v63, %v18007_v26  ;;  %v10390_v54 = vpop.f32.mrb[6].mxu0  ;;  %v13981_v63 = vld [vmem:[%s17479_s1 + $0x90] sm:$0xff] }
 0x2e8   :  { %1518 = vbcast.lane.b32.xlu1 %v1516_v7, 256  ;;  %v7435_v60 = vadd.f32 %v11359_v44, %v7320_v16  ;;  %v7323_v20 = vadd.f32 %v10390_v54, %v18009_v13  ;;  %v7314_v48 = vpop.f32.mrb[7].mxu0  ;;  %v1621_v26 = vrot.slane %v13981_v63, %v17844_v0  ;;  %v3375_v7 = vadd.f32 %v3374_v53, %v3373_v22  ;;  %v1295_v16 = vpop.permute.xlu1 %1294 }
 0x2e9   :  { %1553 = vbcast.lane.b32.xlu0 %v1551_v1, 256  ;;  %v7433_v39 = vadd.f32 %v11359_v44, %v7312_v12  ;;  %v7315_v49 = vadd.f32 %v7314_v48, %v18011_v4  ;;  %v3220_v1 = vrot.slane %v2484_v37, 4  ;;  %v11059_v13 = vpop.eup %11058  ;;  %v3268_v22 = vrot.slane %v2492_v32, 4 }
 0x2ea   :  { %v7436_v54 = vadd.f32 %v11359_v44, %v7323_v20  ;;  %v13999_v9 = vpop.eup %11060  ;;  %v5304_v53 = vmul.f32 %v11059_v13, %v3327_v15  ;;  %v7467_v10 = vmax.f32 %v7435_v60, 0.0  ;;  %v2502_v4 = vmul.f32 %v9766_v8, %v1400_v2  ;;  %v14009_v15 = vld [vmem:[%s17482_s0 + $0x1e8] sm:$0xff]  }
 0x2eb   :  { %v7434_v46 = vadd.f32 %v11359_v44, %v7315_v49  ;;  %v11063_v62 = vpop.eup %11062  ;;  %v7465_v19 = vmax.f32 %v7433_v39, 0.0  ;;  %v3221_v48 = vadd.f32 %v3220_v1, %v2484_v37  ;;  %v5686_v39 = vpack.c.bf16 %v5272_v56, %v5272_v56 }
 0x2ec   :  { %1574 = vbcast.lane.b32.xlu1 %v1572_v47, 256  ;;  %v7468_v3 = vmax.f32 %v7436_v54, 0.0  ;;  %v18012_v47 = vunpack.c.h.bf16 %v13835_v59  ;;  %v14004_v44 = vpop.eup %11064  ;;  %v5320_v20 = vmul.f32 %v11063_v62, %v3375_v7  ;;  %v18015_v59 = vrot.slane %v13899_v18, 6  ;;  %v14032_v62 = vld [vmem:[%s17482_s0 + $0x190] sm:$0xff]  }
 0x2ed   :  { %1623 = vbcast.lane.b32.xlu0 %v1621_v26, 256  ;;  %v7466_v12 = vmax.f32 %v7434_v46, 0.0  ;;  %18013 = vst [vmem:[#allocation14_spill] sm:$0xff] %v14004_v44  ;;  %v14011_v26 = vpop.eup %11066  ;;  %v5687_v37 = vpack.c.bf16 %v5274_v14, %v5274_v14  ;;  %v3269_v2 = vadd.f32 %v3268_v22, %v2492_v32  ;;  %v4703_v8 = vrot.slane %v13909_v25, 2  ;;  %v14097_v46 = vld [vmem:[%s17482_s0 + $0x1b8] sm:$0xff]  }
 0x2ee   :  { %v2487_v24 = vmul.f32 %v18012_v47, %v1295_v16  ;;  %v7528_v60 = vpack.c.bf16 %v7468_v3, %v7467_v10  ;;  %18014 = vst [vmem:[#allocation16_spill] sm:$0xff] %v14011_v26  ;;  %11070 = vrcp.f32 %v18015_v59  ;;  %v5694_v49 = vpack.c.bf16 %v5288_v33, %v5288_v33  ;;  %v1351_v10 = vpop.permute.xlu1 %1350  ;;  %v14019_v3 = vpop.eup %11068  ;;  %v14092_v33 = vld [vmem:[%s17479_s1 + $0xb8] sm:$0xff] }
 0x2ef   :  { %v7527_v21 = vpack.c.bf16 %v7466_v12, %v7465_v19  ;;  %v5702_v7 = vpack.c.bf16 %v5304_v53, %v5304_v53  ;;  %v9782_v16 = vunpack.c.l.bf16 %v14009_v15  ;;  %v5695_v54 = vpack.c.bf16 %v5290_v27, %v5290_v27  ;;  %18016 = vst [vmem:[#allocation20_spill] sm:$0xff] %v14019_v3  ;;  %18023 = vst [vmem:[#allocation47_spill] sm:$0xff] %v14092_v33 }
 0x2f0   :  { %1679 = vbcast.lane.b32.xlu1 %v1677_v52, 256  ;;  %v3238_v1 = vrot.slane %v2487_v24, 4  ;;  %v5710_v30 = vpack.c.bf16 %v5320_v20, %v5320_v20  ;;  %v3222_v13 = vrot.slane %v3221_v48, 2  ;;  %v3328_v52 = vrot.slane %v2502_v4, 4 }
 0x2f1   :  { %10483 = vmatprep.mubr.bf16.mxu1 %v7527_v21  ;;  %11072 = vrcp.f32 %v13909_v25  ;;  %v4704_v32 = vrot.slane %v13909_v25, 3  ;;  %v4705_v14 = vrot.slane %v13909_v25, 4  ;;  %v14025_v56 = vunpack.c.l.b16 %v5686_v39 }
 0x2f2   :  { %10484 = vmatmul.mubr.bf16.gmra.mrb[36].mxu1 %v7528_v60  ;;  %v14027_v53 = vunpack.c.l.b16 %v5687_v37  ;;  %v3270_v22 = vrot.slane %v3269_v2, 2  ;;  %11074 = vrcp.f32 %v4703_v8  ;;  %v14034_v27 = vunpack.c.l.b16 %v5694_v49 }
 0x2f3   :  { %v14036_v47 = vunpack.c.l.b16 %v5702_v7  ;;  %v3239_v19 = vadd.f32 %v3238_v1, %v2487_v24  ;;  %v2495_v12 = vmul.f32 %v9751_v42, %v1351_v10  ;;  %v14038_v20 = vunpack.c.l.b16 %v5695_v54  ;;  %v14052_v1 = vld [vmem:[%s17482_s0 + $0x1b0] sm:$0xff]  }
 0x2f4   :  { %v14040_v60 = vunpack.c.l.b16 %v5710_v30  ;;  %v3223_v21 = vadd.f32 %v3222_v13, %v3221_v48  ;;  %v3329_v59 = vadd.f32 %v3328_v52, %v2502_v4  ;;  %v9738_v37 = vunpack.c.l.bf16 %v14032_v62  ;;  %v14071_v10 = vld [vmem:[%s17479_s1 + $0xb0] sm:$0xff] }
 0x2f5   :  { %18017 = vst [vmem:[#allocation30_spill] sm:$0xff] %v14036_v47  ;;  %11076 = vrcp.f32 %v4704_v32  ;;  %v3271_v42 = vadd.f32 %v3270_v22, %v3269_v2  ;;  %v3240_v30 = vrot.slane %v3239_v19, 2  ;;  %v3286_v13 = vrot.slane %v2495_v12, 4  ;;  %v1456_v22 = vpop.permute.xlu1 %1455  ;;  %18021 = vst [vmem:[#allocation45_spill] sm:$0xff] %v14071_v10 }
 0x2f6   :  { %18018 = vst [vmem:[#allocation42_spill] sm:$0xff] %v14040_v60  ;;  %v14042_v39 = vpop.xlane.xlu0 %4492  ;;  %11078 = vrcp.f32 %v4705_v14  ;;  %v3224_v32 = vrot.slane %v3223_v21, 1  ;;  %v3330_v2 = vrot.slane %v3329_v59, 2  ;;  %v14063_v14 = vld [vmem:[%s17482_s0 + $0x1d0] sm:$0xff]   ;;  %v9762_v4 = vunpack.c.l.bf16 %v13845_v36  ;;  %v14079_v36 = vld [vmem:[%s17482_s0 + $0x198] sm:$0xff]  }
 0x2f7   :  { %18019 = vst [vmem:[#allocation43_spill] sm:$0xff] %v14042_v39  ;;  %v9754_v54 = vunpack.c.l.bf16 %v14052_v1  ;;  %v9778_v49 = vunpack.c.l.bf16 %v13867_v23  ;;  %v3272_v52 = vrot.slane %v3271_v42, 1  ;;  %v14084_v23 = vld [vmem:[%s17482_s0 + $0x1f0] sm:$0xff]   ;;  %v3287_v39 = vadd.f32 %v3286_v13, %v2495_v12 }
 0x2f8   :  { %v14054_v48 = vpop.eup %11070  ;;  %v3225_v35 = vadd.f32 %v3224_v32, %v3223_v21  ;;  %v3331_v26 = vadd.f32 %v3330_v2, %v3329_v59  ;;  %v4503_v12 = vsel %vm4436_vm0, %v14071_v10, 0.0  ;;  %v14111_v21 = vsel %vm4436_vm0, %v14092_v33, 0.0 }
 0x2f9   :  { %18020 = vst [vmem:[#allocation44_spill] sm:$0xff] %v14054_v48  ;;  %v2510_v48 = vmul.f32 %v9782_v16, %v1456_v22  ;;  %v3273_v44 = vadd.f32 %v3272_v52, %v3271_v42  ;;  %v18027_v10 = vrot.slane %v13909_v25, 5 }
 0x2fa   :  { %v1302_v24 = vpop.permute.xlu0 %1301  ;;  %v5270_v22 = vmul.f32 %v13903_v11, %v3225_v35  ;;  %v3332_v8 = vrot.slane %v3331_v26, 1 }
 0x2fb   :  { %v2488_v7 = vmul.f32 %v9738_v37, %v1302_v24  ;;  %v14086_v37 = vpop.eup %11072  ;;  %v3241_v24 = vadd.f32 %v3240_v30, %v3239_v19  ;;  %11080 = vrcp.f32 %v18027_v10  ;;  %v5286_v11 = vmul.f32 %v13935_v6, %v3273_v44 }
 0x2fc   :  { %18022 = vst [vmem:[#allocation46_spill] sm:$0xff] %v14086_v37  ;;  %v14099_v3 = vpop.eup %11074 }
 0x2fd   :  { %v3244_v60 = vrot.slane %v2488_v7, 4  ;;  %v3242_v2 = vrot.slane %v3241_v24, 1 }
 0x2fe   :  { %v14101_v19 = vpop.xlane.xlu1 %4495  ;;  %v1386_v16 = vpop.permute.xlu0 %1385 }
 0x2ff   :  { %18024 = vst [vmem:[#allocation48_spill] sm:$0xff] %v14101_v19  ;;  %v2500_v30 = vmul.f32 %v9762_v4, %v1386_v16  ;;  %v14114_v32 = vpop.eup %11076  ;;  %v3288_v19 = vrot.slane %v3287_v39, 2  ;;  %v3376_v4 = vrot.slane %v2510_v48, 4  ;;  %v3245_v42 = vadd.f32 %v3244_v60, %v2488_v7 }
 0x300   :  { %18025 = vst [vmem:[#allocation49_spill] sm:$0xff] %v14114_v32  ;;  %v14116_v13 = vpop.eup %11078  ;;  %v14125_v32 = vld [vmem:[%s17482_s0 + $0x1d8] sm:$0xff]   ;;  %v18030_v7 = vrot.slane %v13909_v25, 6  ;;  %v3243_v10 = vadd.f32 %v3242_v2, %v3241_v24  ;;  %v5693_v24 = vpack.c.bf16 %v5286_v11, %v5286_v11 }
 0x301   :  { %v3316_v16 = vrot.slane %v2500_v30, 4  ;;  %18026 = vst [vmem:[#allocation50_spill] sm:$0xff] %v14116_v13  ;;  %18028 = vst [vmem:[#allocation51_spill] sm:$0xff] %v14125_v32  ;;  %v18029_v13 = vrot.slane %v13899_v18, 7  ;;  %v5685_v18 = vpack.c.bf16 %v5270_v22, %v5270_v22  ;;  %v3246_v6 = vrot.slane %v3245_v42, 2 }
 0x302   :  { %v1358_v52 = vpop.permute.xlu1 %1357  ;;  %v1442_v47 = vpop.permute.xlu0 %1441 }
 0x303   :  { %v3317_v33 = vadd.f32 %v3316_v16, %v2500_v30  ;;  %v2496_v37 = vmul.f32 %v9754_v54, %v1358_v52  ;;  %11082 = vrcp.f32 %v18029_v13  ;;  %v2508_v35 = vmul.f32 %v9778_v49, %v1442_v47  ;;  %v14136_v16 = vld [vmem:[%s17482_s0 + $0x1f8] sm:$0xff]  }
 0x304   :  { %11084 = vrcp.f32 %v18030_v7  ;;  %v3289_v54 = vadd.f32 %v3288_v19, %v3287_v39  ;;  %v3377_v30 = vadd.f32 %v3376_v4, %v2510_v48  ;;  %v18031_v52 = vrot.slane %v13909_v25, 7 }
 0x305   :  { %v3333_v13 = vadd.f32 %v3332_v8, %v3331_v26  ;;  %v3318_v60 = vrot.slane %v3317_v33, 2  ;;  %v3292_v7 = vrot.slane %v2496_v37, 4  ;;  %v3364_v19 = vrot.slane %v2508_v35, 4 }
 0x306   :  { %11086 = vrcp.f32 %v18031_v52  ;;  %v1407_v44 = vpop.permute.xlu1 %1406  ;;  %v1309_v47 = vpop.permute.xlu0 %1308  ;;  %v5276_v26 = vmul.f32 %v13914_v51, %v3243_v10  ;;  %v3290_v8 = vrot.slane %v3289_v54, 1  ;;  %v3378_v22 = vrot.slane %v3377_v30, 2 }
 0x307   :  { %v6566_v52 = vunpack.c.l.b16 %v5685_v18  ;;  %v5306_v49 = vmul.f32 %v13999_v9, %v3333_v13  ;;  %v3247_v39 = vadd.f32 %v3246_v6, %v3245_v42  ;;  %v3319_v48 = vadd.f32 %v3318_v60, %v3317_v33  ;;  %v14155_v10 = vpop.eup %11080 }
 0x308   :  { %v3293_v32 = vadd.f32 %v3292_v7, %v2496_v37  ;;  %v6574_v4 = vunpack.c.l.b16 %v5693_v24  ;;  %v3365_v18 = vadd.f32 %v3364_v19, %v2508_v35  ;;  %v18032_v9 = vunpack.c.h.bf16 %v13942_v38 }
 0x309   :  { %v5688_v33 = vpack.c.bf16 %v5276_v26, %v5276_v26  ;;  %v3291_v37 = vadd.f32 %v3290_v8, %v3289_v54  ;;  %v18033_v60 = vunpack.c.h.bf16 %v14032_v62  ;;  %v18034_v51 = vrot.slane %v14025_v56, 7 }
 0x30a   :  { %v1463_v59 = vpop.permute.xlu1 %1462  ;;  %v1414_v2 = vpop.permute.xlu0 %1413  ;;  %v2503_v42 = vmul.f32 %v18032_v9, %v1407_v44  ;;  %v5703_v24 = vpack.c.bf16 %v5306_v49, %v5306_v49  ;;  %v3248_v38 = vrot.slane %v3247_v39, 1  ;;  %v3320_v54 = vrot.slane %v3319_v48, 1 }
 0x30b   :  { %v2489_v7 = vmul.f32 %v18033_v60, %v1309_v47  ;;  %v6902_v35 = vsel %vm6727_vm1, %v18034_v51, %v6566_v52  ;;  %v18036_v56 = vrot.slane %v14034_v27, 7  ;;  %v3366_v26 = vrot.slane %v3365_v18, 2 }
 0x30c   :  { %4504 = vadd.xlane.f32.xlu0 %v4503_v12  ;;  %v3379_v12 = vadd.f32 %v3378_v22, %v3377_v30  ;;  %v3294_v30 = vrot.slane %v3293_v32, 2  ;;  %v3334_v8 = vrot.slane %v2503_v42, 4  ;;  %v6569_v52 = vunpack.c.l.b16 %v5688_v33 }
 0x30d   :  { %v14161_v6 = vpop.eup %11082  ;;  %v6916_v49 = vsel %vm6727_vm1, %v18036_v56, %v6574_v4  ;;  %v5292_v51 = vmul.f32 %v13948_v5, %v3291_v37  ;;  %v3250_v19 = vrot.slane %v2489_v7, 4  ;;  %v14186_v11 = vunpack.c.l.b16 %v5703_v24 }
 0x30e   :  { %v14165_v25 = vpop.eup %11084  ;;  %v14170_v44 = vpop.permute.xlu1 %1364  ;;  %v3380_v60 = vrot.slane %v3379_v12, 1  ;;  %v3249_v62 = vadd.f32 %v3248_v38, %v3247_v39  ;;  %v3321_v56 = vadd.f32 %v3320_v54, %v3319_v48  ;;  %v3295_v47 = vadd.f32 %v3294_v30, %v3293_v32 }
 0x30f   :  { %v1316_v13 = vpop.permute.xlu0 %1315  ;;  %18037 = vst [vmem:[#allocation53_spill] sm:$0xff] %v14186_v11  ;;  %v18038_v33 = vrot.slane %v14027_v53, 6  ;;  %v3367_v39 = vadd.f32 %v3366_v26, %v3365_v18  ;;  %v3335_v24 = vadd.f32 %v3334_v8, %v2503_v42  ;;  %v18039_v38 = vrot.slane %v14038_v20, 6 }
 0x310   :  { %v14174_v9 = vpop.eup %11086  ;;  %v6905_v48 = vrot.slane %v6569_v52, 5  ;;  %v5696_v32 = vpack.c.bf16 %v5292_v51, %v5292_v51  ;;  %v3381_v54 = vadd.f32 %v3380_v60, %v3379_v12  ;;  %v5278_v5 = vmul.f32 %v13917_v43, %v3249_v62 }
 0x311   :  { %18035 = vst [vmem:[#allocation52_spill] sm:$0xff] %v14174_v9  ;;  %v6904_v37 = vsel %vm6730_vm2, %v18038_v33, %v6902_v35  ;;  %v6918_v27 = vsel %vm6730_vm2, %v18039_v38, %v6916_v49  ;;  %v18040_v53 = vunpack.c.h.bf16 %v14009_v15  ;;  %v5302_v20 = vmul.f32 %v13988_v41, %v3321_v56 }
 0x312   :  { %v14188_v9 = vpop.permute.xlu1 %1469  ;;  %v3296_v42 = vrot.slane %v3295_v47, 1  ;;  %v18041_v49 = vunpack.c.l.bf16 %v14063_v14  ;;  %v3336_v43 = vrot.slane %v3335_v24, 2  ;;  %v6577_v62 = vunpack.c.l.b16 %v5696_v32  ;;  %v18046_v32 = vld [vmem:[#allocation46_spill] sm:$0xff] }
 0x313   :  { %v2511_v35 = vmul.f32 %v18040_v53, %v1463_v59  ;;  %v14214_v8 = vpop.permute.xlu0 %1420  ;;  %v5322_v41 = vmul.f32 %v14099_v3, %v3381_v54  ;;  %v5689_v51 = vpack.c.bf16 %v5278_v5, %v5278_v5  ;;  %v5701_v38 = vpack.c.bf16 %v5302_v20, %v5302_v20  ;;  %v18044_v5 = vld [vmem:[#allocation5_spill] sm:$0xff] }
 0x314   :  { %4507 = vadd.xlane.f32.xlu1 %v14111_v21  ;;  %v3251_v21 = vadd.f32 %v3250_v19, %v2489_v7  ;;  %v2504_v26 = vmul.f32 %v18041_v49, %v1414_v2  ;;  %v3368_v19 = vrot.slane %v3367_v39, 1  ;;  %v14224_v2 = vsel %vm6733_vm3, %v6905_v48, %v6904_v37 }
 0x315   :  { %v3382_v60 = vrot.slane %v2511_v35, 4  ;;  %v3297_v53 = vadd.f32 %v3296_v42, %v3295_v47  ;;  %v3337_v3 = vadd.f32 %v3336_v43, %v3335_v24  ;;  %v6919_v48 = vrot.slane %v6577_v62, 5 }
 0x316   :  { %v1372_v12 = vpop.permute.xlu1 %1371  ;;  %v3252_v52 = vrot.slane %v3251_v21, 2  ;;  %v3340_v49 = vrot.slane %v2504_v26, 4  ;;  %v3369_v30 = vadd.f32 %v3368_v19, %v3367_v39  ;;  %v5711_v54 = vpack.c.bf16 %v5322_v41, %v5322_v41 }
 0x317   :  { %v1323_v59 = vpop.permute.xlu0 %1322  ;;  %v14238_v20 = vunpack.c.l.b16 %v5689_v51  ;;  %v3383_v42 = vadd.f32 %v3382_v60, %v2511_v35  ;;  %v18042_v39 = vunpack.c.h.bf16 %v14052_v1  ;;  %v18043_v19 = vunpack.c.l.bf16 %v14079_v36 }
 0x318   :  { %v3253_v56 = vadd.f32 %v3252_v52, %v3251_v21  ;;  %v6582_v37 = vunpack.c.l.b16 %v5701_v38  ;;  %v5294_v62 = vmul.f32 %v18044_v5, %v3297_v53  ;;  %v3341_v41 = vadd.f32 %v3340_v49, %v2504_v26 }
 0x319   :  { %v2497_v24 = vmul.f32 %v18042_v39, %v14170_v44  ;;  %v2490_v43 = vmul.f32 %v18043_v19, %v1316_v13  ;;  %v18045_v21 = vunpack.c.l.bf16 %v14097_v46  ;;  %v5318_v33 = vmul.f32 %v18046_v32, %v3369_v30  ;;  %v9486_v13 = vld [vmem:[%s17488_s10] ss:$0 sm:$0xff]  ;;  %v18051_v32 = vld [vmem:[#allocation30_spill] sm:$0xff] }
 0x31a   :  { %v1477_v15 = vpop.permute.xlu1 %1476  ;;  %v3338_v47 = vrot.slane %v3337_v3, 1  ;;  %v18047_v51 = vunpack.c.h.bf16 %v14079_v36  ;;  %v14253_v44 = vunpack.c.l.b16 %v5711_v54  ;;  %v3254_v60 = vrot.slane %v3253_v56, 1 }
 0x31b   :  { %v2498_v52 = vmul.f32 %v18045_v21, %v1372_v12  ;;  %v18049_v26 = vrot.slane %v13929_v17, %v11574_v34  ;;  %v14262_v30 = vsel %vm6733_vm3, %v6919_v48, %v6918_v27  ;;  %v3384_v38 = vrot.slane %v3383_v42, 2  ;;  %v1428_v18 = vpop.permute.xlu0 %1427 }
 0x31c   :  { %v2491_v35 = vmul.f32 %v18047_v51, %v1323_v59  ;;  %18048 = vst [vmem:[#allocation5_spill] sm:$0xff] %v14253_v44  ;;  %v3298_v53 = vrot.slane %v2497_v24, 4  ;;  %v3256_v49 = vrot.slane %v2490_v43, 4  ;;  %v18052_v5 = vrot.slane %v18051_v32, 7 }
 0x31d   :  { %v5697_v39 = vpack.c.bf16 %v5294_v62, %v5294_v62  ;;  %v3342_v19 = vrot.slane %v3341_v41, 2  ;;  %v3304_v51 = vrot.slane %v2498_v52, 4  ;;  %v5709_v27 = vpack.c.bf16 %v5318_v33, %v5318_v33 }
 0x31e   :  { %v14270_v54 = vsel %vm6727_vm1, %v18052_v5, %v6582_v37  ;;  %v3339_v48 = vadd.f32 %v3338_v47, %v3337_v3  ;;  %v3262_v12 = vrot.slane %v2491_v35, 4  ;;  %v18054_v59 = vrot.slane %v13955_v57, %v11574_v34 }
 0x31f   :  { %18053 = vst [vmem:[#allocation46_spill] sm:$0xff] %v14270_v54  ;;  %v3255_v4 = vadd.f32 %v3254_v60, %v3253_v56  ;;  %v18055_v37 = vunpack.c.l.bf16 %v14084_v23  ;;  %v18056_v5 = vunpack.c.h.bf16 %v14063_v14  ;;  %v18057_v3 = vrot.slane %v13981_v63, %v17861_v29 }
 0x320   :  { %v3299_v47 = vadd.f32 %v3298_v53, %v2497_v24  ;;  %v18058_v56 = vunpack.c.h.bf16 %v14084_v23  ;;  %v14286_v60 = vadd.f32 %v3384_v38, %v3383_v42  ;;  %v3305_v54 = vadd.f32 %v3304_v51, %v2498_v52 }
 0x321   :  { %v2512_v62 = vmul.f32 %v18055_v37, %v14188_v9  ;;  %v2505_v33 = vmul.f32 %v18056_v5, %v14214_v8  ;;  %v18059_v9 = vld [vmem:[#allocation51_spill] sm:$0xff]  ;;  %v14290_v14 = vadd.f32 %v3342_v19, %v3341_v41  ;;  %v3263_v44 = vadd.f32 %v3262_v12, %v2491_v35 }
 0x322   :  { %1525 = vbcast.lane.b32.xlu0 %v18049_v26, 256  ;;  %v10481_v21 = vpop.f32.mrb[32].mxu1  ;;  %v1379_v26 = vpop.permute.xlu1 %1378  ;;  %v18060_v37 = vunpack.c.l.bf16 %v18059_v9  ;;  %v18061_v24 = vrot.slane %v13981_v63, %v18001_v28  ;;  %v3300_v52 = vrot.slane %v3299_v47, 2  ;;  %v14300_v35 = vunpack.c.l.b16 %v5697_v39 }
 0x323   :  { %v8096_v1 = vadd.f32 %v10481_v21, %v9486_v13  ;;  %v7960_v7 = vpop.f32.mrb[33].mxu1  ;;  %v3257_v21 = vadd.f32 %v3256_v49, %v2490_v43  ;;  %v3388_v23 = vrot.slane %v2512_v62, 4  ;;  %v3306_v12 = vrot.slane %v3305_v54, 2  ;;  %v18065_v49 = vld [vmem:[#allocation14_spill] sm:$0xff] }
 0x324   :  { %v8094_v32 = vadd.f32 %v9486_v13, %v7960_v7  ;;  %v10482_v22 = vpop.f32.mrb[34].mxu1  ;;  %v2513_v7 = vmul.f32 %v18058_v56, %v1477_v15  ;;  %v2506_v0 = vmul.f32 %v18060_v37, %v1428_v18  ;;  %v3346_v15 = vrot.slane %v2505_v33, 4 }
 0x325   :  { %1581 = vbcast.lane.b32.xlu1 %v18054_v59, 256  ;;  %v8097_v36 = vadd.f32 %v10482_v22, %v9486_v13  ;;  %v7963_v11 = vpop.f32.mrb[35].mxu1  ;;  %v8128_v8 = vmax.f32 %v8096_v1, 0.0  ;;  %v3258_v18 = vrot.slane %v3257_v21, 2  ;;  %v6590_v53 = vunpack.c.l.b16 %v5709_v27 }
 0x326   :  { %1609 = vbcast.lane.b32.xlu0 %v18057_v3, 256  ;;  %v8095_v59 = vadd.f32 %v9486_v13, %v7963_v11  ;;  %v8126_v22 = vmax.f32 %v8094_v32, 0.0  ;;  %v1484_v42 = vpop.permute.xlu1 %1483  ;;  %v18062_v11 = vrot.slane %v13995_v55, %v17861_v29  ;;  %v3394_v1 = vrot.slane %v2513_v7, 4  ;;  %v1435_v13 = vpop.permute.xlu0 %1434 }
 0x327   :  { %v8129_v5 = vmax.f32 %v8097_v36, 0.0  ;;  %v3352_v38 = vrot.slane %v2506_v0, 4  ;;  %v14305_v19 = vmul.f32 %v18065_v49, %v3339_v48  ;;  %v3264_v51 = vrot.slane %v3263_v44, 2 }
 0x328   :  { %v8127_v43 = vmax.f32 %v8095_v59, 0.0  ;;  %v18066_v32 = vunpack.c.h.bf16 %v14097_v46  ;;  %v18067_v56 = vrot.slane %v13995_v55, %v18001_v28  ;;  %v18068_v59 = vld [vmem:[#allocation25_spill] sm:$0xff]  ;;  %v3389_v39 = vadd.f32 %v3388_v23, %v2512_v62 }
 0x329   :  { %1630 = vbcast.lane.b32.xlu1 %v18061_v24, 256  ;;  %v14298_v41 = vpack.c.bf16 %v8129_v5, %v8128_v8  ;;  %v14313_v37 = vmul.f32 %v18068_v59, %v3255_v4  ;;  %v3347_v8 = vadd.f32 %v3346_v15, %v2505_v33  ;;  %v18069_v5 = vunpack.c.h.bf16 %v18059_v9 }
 0x32a   :  { %1665 = vbcast.lane.b32.xlu0 %v18062_v11, 256  ;;  %v14302_v36 = vpack.c.bf16 %v8127_v43, %v8126_v22  ;;  %v2499_v3 = vmul.f32 %v18066_v32, %v1379_v26  ;;  %v18070_v27 = vrot.slane %v13929_v17, %v11587_v40  ;;  %v3301_v48 = vadd.f32 %v3300_v52, %v3299_v47 }
 0x32b   :  { %18063 = vst [vmem:[#allocation30_spill] sm:$0xff] %v14298_v41  ;;  %v2507_v24 = vmul.f32 %v18069_v5, %v1435_v13  ;;  %v3259_v22 = vadd.f32 %v3258_v18, %v3257_v21  ;;  %v3395_v46 = vadd.f32 %v3394_v1, %v2513_v7  ;;  %v3307_v43 = vadd.f32 %v3306_v12, %v3305_v54 }
 0x32c   :  { %18064 = vst [vmem:[#allocation51_spill] sm:$0xff] %v14302_v36  ;;  %v3310_v26 = vrot.slane %v2499_v3, 4  ;;  %v3353_v11 = vadd.f32 %v3352_v38, %v2506_v0  ;;  %v18071_v32 = vunpack.c.l.bf16 %v14136_v16  ;;  %v3386_v62 = vrot.slane %v14286_v60, 1 }
 0x32d   :  { %1686 = vbcast.lane.b32.xlu1 %v18067_v56, 256  ;;  %v3358_v49 = vrot.slane %v2507_v24, 4  ;;  %v1491_v56 = vpop.permute.xlu1 %1490  ;;  %v3344_v33 = vrot.slane %v14290_v14, 1  ;;  %v3265_v9 = vadd.f32 %v3264_v51, %v3263_v44  ;;  %v18072_v15 = vrot.slane %v13955_v57, %v11587_v40 }
 0x32e   :  { %1532 = vbcast.lane.b32.xlu0 %v18070_v27, 256  ;;  %v2514_v4 = vmul.f32 %v18071_v32, %v1484_v42  ;;  %v3311_v23 = vadd.f32 %v3310_v26, %v2499_v3  ;;  %v3390_v47 = vrot.slane %v3389_v39, 2  ;;  %v3348_v21 = vrot.slane %v3347_v8, 2 }
 0x32f   :  { %v3359_v7 = vadd.f32 %v3358_v49, %v2507_v24  ;;  %v18073_v0 = vrot.slane %v13981_v63, %v11574_v34  ;;  %v3302_v42 = vrot.slane %v3301_v48, 1  ;;  %v3396_v52 = vrot.slane %v3395_v46, 2 }
 0x330   :  { %v3400_v54 = vrot.slane %v2514_v4, 4  ;;  %v3312_v18 = vrot.slane %v3311_v23, 2  ;;  %v18074_v1 = vunpack.c.h.bf16 %v14136_v16  ;;  %v3260_v44 = vrot.slane %v3259_v22, 1 }
 0x331   :  { %1588 = vbcast.lane.b32.xlu1 %v18072_v15, 256  ;;  %v3308_v12 = vrot.slane %v3307_v43, 1  ;;  %v3354_v38 = vrot.slane %v3353_v11, 2  ;;  %v3266_v3 = vrot.slane %v3265_v9, 1  ;;  %v3360_v5 = vrot.slane %v3359_v7, 2 }
 0x332   :  { %1637 = vbcast.lane.b32.xlu0 %v18073_v0, 256  ;;  %v2515_v13 = vmul.f32 %v18074_v1, %v1491_v56  ;;  %v3401_v51 = vadd.f32 %v3400_v54, %v2514_v4  ;;  %v3313_v59 = vadd.f32 %v3312_v18, %v3311_v23  ;;  %v18075_v24 = vrot.slane %v13995_v55, %v11574_v34 }
 0x333   :  { %v3391_v49 = vadd.f32 %v3390_v47, %v3389_v39  ;;  %v3349_v32 = vadd.f32 %v3348_v21, %v3347_v8  ;;  %v18076_v16 = vrot.slane %v13929_v17, %v11598_v45  ;;  %v3303_v56 = vadd.f32 %v3302_v42, %v3301_v48  ;;  %v18078_v8 = vld [vmem:[#allocation42_spill] sm:$0xff] }
 0x334   :  { %v3406_v27 = vrot.slane %v2515_v13, 4  ;;  %v3402_v15 = vrot.slane %v3401_v51, 2  ;;  %v3397_v0 = vadd.f32 %v3396_v52, %v3395_v46  ;;  %v3314_v4 = vrot.slane %v3313_v59, 1  ;;  %v18082_v42 = vld [vmem:[#allocation26_spill] sm:$0xff] }
 0x335   :  { %1693 = vbcast.lane.b32.xlu1 %v18075_v24, 256  ;;  %v3261_v23 = vadd.f32 %v3260_v44, %v3259_v22  ;;  %v3309_v18 = vadd.f32 %v3308_v12, %v3307_v43  ;;  %v3355_v1 = vadd.f32 %v3354_v38, %v3353_v11  ;;  %v3387_v36 = vadd.f32 %v3386_v62, %v14286_v60  ;;  %v18081_v60 = vld [vmem:[#allocation27_spill] sm:$0xff]  ;;  %v18084_v38 = vld [vmem:[#allocation49_spill] sm:$0xff] }
 0x336   :  { %1539 = vbcast.lane.b32.xlu0 %v18076_v16, 256  ;;  %v3407_v54 = vadd.f32 %v3406_v27, %v2515_v13  ;;  %v3403_v41 = vadd.f32 %v3402_v15, %v3401_v51  ;;  %v3267_v24 = vadd.f32 %v3266_v3, %v3265_v9  ;;  %v3361_v34 = vadd.f32 %v3360_v5, %v3359_v7  ;;  %v18083_v13 = vld [vmem:[#allocation8_spill] sm:$0xff] }
 0x337   :  { %v18077_v39 = vrot.slane %v13955_v57, %v11598_v45  ;;  %v18079_v47 = vrot.slane %v18078_v8, 7  ;;  %v3345_v46 = vadd.f32 %v3344_v33, %v14290_v14  ;;  %v3392_v22 = vrot.slane %v3391_v49, 1  ;;  %v18085_v14 = vld [vmem:[#allocation35_spill] sm:$0xff] }
 0x338   :  { %v3408_v26 = vrot.slane %v3407_v54, 2  ;;  %v3350_v43 = vrot.slane %v3349_v32, 1  ;;  %v18080_v11 = vrot.slane %v13981_v63, %v11587_v40  ;;  %v5296_v62 = vmul.f32 %v18081_v60, %v3303_v56 }
 0x339   :  { %1595 = vbcast.lane.b32.xlu1 %v18077_v39, 256  ;;  %v14346_v48 = vsel %vm6727_vm1, %v18079_v47, %v6590_v53  ;;  %v3398_v9 = vrot.slane %v3397_v0, 1  ;;  %v3315_v21 = vadd.f32 %v3314_v4, %v3313_v59  ;;  %v5282_v52 = vmul.f32 %v18082_v42, %v3261_v23 }
 0x33a   :  { %1644 = vbcast.lane.b32.xlu0 %v18080_v11, 256  ;;  %v3409_v7 = vadd.f32 %v3408_v26, %v3407_v54  ;;  %v5298_v44 = vmul.f32 %v18083_v13, %v3309_v18  ;;  %v3356_v12 = vrot.slane %v3355_v1, 1  ;;  %v3404_v53 = vrot.slane %v3403_v41, 1  ;;  %v18089_v18 = vld [vmem:[#allocation7_spill] sm:$0xff] }
 0x33b   :  { %v5324_v51 = vmul.f32 %v18084_v38, %v3387_v36  ;;  %v5284_v33 = vmul.f32 %v18085_v14, %v3267_v24  ;;  %v3362_v3 = vrot.slane %v3361_v34, 1  ;;  %v18086_v27 = vrot.slane %v13995_v55, %v11587_v40  ;;  %v18088_v36 = vld [vmem:[#allocation16_spill] sm:$0xff] }
 0x33c   :  { %v3410_v5 = vrot.slane %v3409_v7, 1  ;;  %v5704_v59 = vpack.c.bf16 %v14305_v19, %v14305_v19  ;;  %v5690_v26 = vpack.c.bf16 %v14313_v37, %v14313_v37  ;;  %v3393_v15 = vadd.f32 %v3392_v22, %v3391_v49 }
 0x33d   :  { %1700 = vbcast.lane.b32.xlu1 %v18086_v27, 256  ;;  %v3351_v16 = vadd.f32 %v3350_v43, %v3349_v32  ;;  %v18087_v56 = vrot.slane %v13929_v17, %v11609_v50  ;;  %v5310_v4 = vmul.f32 %v18088_v36, %v3345_v46  ;;  %v5698_v54 = vpack.c.bf16 %v5296_v62, %v5296_v62  ;;  %v18091_v46 = vld [vmem:[#allocation50_spill] sm:$0xff] }
 0x33e   :  { %v3399_v23 = vadd.f32 %v3398_v9, %v3397_v0  ;;  %v5300_v24 = vmul.f32 %v18089_v18, %v3315_v21  ;;  %v5691_v39 = vpack.c.bf16 %v5282_v52, %v5282_v52  ;;  %v5699_v8 = vpack.c.bf16 %v5298_v44, %v5298_v44  ;;  %v18092_v0 = vld [vmem:[#allocation20_spill] sm:$0xff] }
 0x33f   :  { %1546 = vbcast.lane.b32.xlu0 %v18087_v56, 256  ;;  %v3357_v47 = vadd.f32 %v3356_v12, %v3355_v1  ;;  %v3405_v11 = vadd.f32 %v3404_v53, %v3403_v41  ;;  %v5712_v19 = vpack.c.bf16 %v5324_v51, %v5324_v51  ;;  %v5692_v60 = vpack.c.bf16 %v5284_v33, %v5284_v33  ;;  %v18095_v53 = vld [vmem:[#allocation52_spill] sm:$0xff] }
 0x340   :  { %v3363_v42 = vadd.f32 %v3362_v3, %v3361_v34  ;;  %v3411_v37 = vadd.f32 %v3410_v5, %v3409_v7  ;;  %v18090_v49 = vrot.slane %v13955_v57, %v11609_v50  ;;  %v14372_v17 = vunpack.c.l.b16 %v5704_v59  ;;  %v18094_v57 = vld [vmem:[#allocation44_spill] sm:$0xff] }
 0x341   :  { %v6571_v32 = vunpack.c.l.b16 %v5690_v26  ;;  %v5326_v22 = vmul.f32 %v18091_v46, %v3393_v15  ;;  %v5312_v43 = vmul.f32 %v18092_v0, %v3351_v16  ;;  %v18093_v62 = vrot.slane %v13981_v63, %v11598_v45 }
 0x342   :  { %1602 = vbcast.lane.b32.xlu1 %v18090_v49, 256  ;;  %v5705_v41 = vpack.c.bf16 %v5310_v4, %v5310_v4  ;;  %v6579_v1 = vunpack.c.l.b16 %v5698_v54  ;;  %v5328_v34 = vmul.f32 %v14155_v10, %v3399_v23  ;;  %v5700_v9 = vpack.c.bf16 %v5300_v24, %v5300_v24 }
 0x343   :  { %1651 = vbcast.lane.b32.xlu0 %v18093_v62, 256  ;;  %v6572_v21 = vunpack.c.l.b16 %v5691_v39  ;;  %v6580_v7 = vunpack.c.l.b16 %v5699_v8  ;;  %v5314_v52 = vmul.f32 %v18094_v57, %v3357_v47  ;;  %v5330_v13 = vmul.f32 %v14165_v25, %v3405_v11 }
 0x344   :  { %v6593_v44 = vunpack.c.l.b16 %v5712_v19  ;;  %v5316_v12 = vmul.f32 %v14161_v6, %v3363_v42  ;;  %v5332_v38 = vmul.f32 %v18095_v53, %v3411_v37  ;;  %v6573_v51 = vunpack.c.l.b16 %v5692_v60  ;;  %v18107_v53 = vld [vmem:[#allocation46_spill] sm:$0xff] }
 0x345   :  { %v18096_v14 = vrot.slane %v13995_v55, %v11598_v45  ;;  %v6933_v33 = vrot.slane %v14372_v17, 5  ;;  %v6909_v10 = vrot.slane %v6571_v32, 3  ;;  %v5713_v3 = vpack.c.bf16 %v5326_v22, %v5326_v22 }
 0x346   :  { %v5706_v5 = vpack.c.bf16 %v5312_v43, %v5312_v43  ;;  %v18097_v27 = vrot.slane %v13981_v63, %v11609_v50  ;;  %v6586_v25 = vunpack.c.l.b16 %v5705_v41  ;;  %v6923_v59 = vrot.slane %v6579_v1, 3  ;;  %v18103_v43 = vld [vmem:[#allocation5_spill] sm:$0xff] }
 0x347   :  { %1707 = vbcast.lane.b32.xlu1 %v18096_v14, 256  ;;  %v5714_v26 = vpack.c.bf16 %v5328_v34, %v5328_v34  ;;  %v6581_v6 = vunpack.c.l.b16 %v5700_v9  ;;  %v6911_v15 = vrot.slane %v6572_v21, 2  ;;  %v6925_v16 = vrot.slane %v6580_v7, 2  ;;  %v18104_v9 = vld [vmem:[#allocation4_spill] sm:$0xff] }
 0x348   :  { %1658 = vbcast.lane.b32.xlu0 %v18097_v27, 256  ;;  %v5707_v56 = vpack.c.bf16 %v5314_v52, %v5314_v52  ;;  %v5715_v36 = vpack.c.bf16 %v5330_v13, %v5330_v13  ;;  %v6947_v4 = vrot.slane %v6593_v44, 5  ;;  %v5708_v54 = vpack.c.bf16 %v5316_v12, %v5316_v12  ;;  %v18106_v52 = vld [vmem:[#allocation47_spill] sm:$0xff] }
 0x349   :  { %v5716_v23 = vpack.c.bf16 %v5332_v38, %v5332_v38  ;;  %v6913_v18 = vrot.slane %v6573_v51, 1  ;;  %v18098_v24 = vrot.slane %v13995_v55, %v11609_v50  ;;  %v6594_v39 = vunpack.c.l.b16 %v5713_v3  ;;  %v18108_v38 = vld [vmem:[#allocation53_spill] sm:$0xff] }
 0x34a   :  { %v6587_v8 = vunpack.c.l.b16 %v5706_v5  ;;  %v18099_v63 = vrot.slane %v14238_v20, 4  ;;  %v18100_v11 = vrot.slane %v14300_v35, 4  ;;  %v18101_v60 = vrot.slane %v13850_v58, %v17985_v31 }
 0x34b   :  { %1714 = vbcast.lane.b32.xlu1 %v18098_v24, 256  ;;  %v6595_v42 = vunpack.c.l.b16 %v5714_v26  ;;  %v6927_v49 = vrot.slane %v6581_v6, 1  ;;  %v6588_v17 = vunpack.c.l.b16 %v5707_v56  ;;  %v6596_v32 = vunpack.c.l.b16 %v5715_v36  ;;  %v18111_v6 = vld [vmem:[#allocation45_spill] sm:$0xff] }
 0x34c   :  { %v6908_v47 = vsel %vm6736_vm4, %v18099_v63, %v14224_v2  ;;  %v6922_v19 = vsel %vm6736_vm4, %v18100_v11, %v14262_v30  ;;  %1728 = vbcast.lane.b32.xlu0 %v18101_v60, 256  ;;  %v6589_v46 = vunpack.c.l.b16 %v5708_v54  ;;  %v6597_v22 = vunpack.c.l.b16 %v5716_v23  ;;  %v1505_v54 = vpop.permute.xlu0 %1504  ;;  %v1561_v23 = vpop.permute.xlu1 %1560  ;;  %v14453_v63 = vld [vmem:[%s17482_s0 + $0x208] sm:$0xff]   ;;  %v14463_v11 = vld [vmem:[%s17482_s0 + $0x240] sm:$0xff]  }
 0x34d   :  { %v6910_v55 = vsel %vm6739_vm5, %v6909_v10, %v6908_v47  ;;  %v6924_v37 = vsel %vm6739_vm5, %v6923_v59, %v6922_v19  ;;  %v18102_v0 = vrot.slane %v13883_v61, %v17985_v31  ;;  %v6945_v62 = vrot.slane %v18103_v43, 6  ;;  %v14458_v47 = vld [vmem:[%s17482_s0 + $0x220] sm:$0xff]   ;;  %v18114_v43 = vld [vmem:[#allocation13_spill] sm:$0xff] }
 0x34e   :  { %v6912_v20 = vsel %vm6742_vm6, %v6911_v15, %v6910_v55  ;;  %v6926_v2 = vsel %vm6742_vm6, %v6925_v16, %v6924_v37  ;;  %v6935_v41 = vrot.slane %v6586_v25, 4  ;;  %v6949_v1 = vrot.slane %v6594_v39, 4  ;;  %v18113_v39 = vld [vmem:[#allocation3_spill] sm:$0xff]  ;;  %v14475_v37 = vld [vmem:[%s17482_s0 + $0x228] sm:$0xff]  }
 0x34f   :  { %v6914_v35 = vsel %vm6745_vm7, %v6913_v18, %v6912_v20  ;;  %v6928_v30 = vsel %vm6745_vm7, %v6927_v49, %v6926_v2  ;;  %1784 = vbcast.lane.b32.xlu1 %v18102_v0, 256  ;;  %v18105_v21 = vrot.slane %v13850_v58, %v18104_v9  ;;  %v6937_v7 = vrot.slane %v6587_v8, 3  ;;  %v14445_v18 = vld [vmem:[%s17482_s0 + $0x200] sm:$0xff]  }
 0x350   :  { %v7187_v34 = vpack.c.b16 %v6928_v30, %v6914_v35  ;;  %v6951_v57 = vrot.slane %v6595_v42, 3  ;;  %v1894_v13 = vrot.slane %v18106_v52, %v17985_v31  ;;  %v6939_v44 = vrot.slane %v6588_v17, 2  ;;  %v1512_v24 = vpop.permute.xlu0 %1511  ;;  %v14468_v19 = vld [vmem:[%s17479_s1 + $0xc0] sm:$0xff]  ;;  %v1568_v42 = vpop.permute.xlu1 %1567  ;;  %v14499_v52 = vld [vmem:[%s17479_s1 + $0xc8] sm:$0xff] }
 0x351   :  { %1735 = vbcast.lane.b32.xlu0 %v18105_v21, 256  ;;  %v6953_v12 = vrot.slane %v6596_v32, 2  ;;  %v18109_v51 = vrot.slane %v18108_v38, 6  ;;  %v6946_v10 = vsel %vm6730_vm2, %v6945_v62, %v14346_v48  ;;  %v6941_v58 = vrot.slane %v6589_v46, 1  ;;  %v14483_v20 = vld [vmem:[%s17482_s0 + $0x260] sm:$0xff]   ;;  %18115 = vst [vmem:[#allocation14_spill] sm:$0xff] %v14499_v52 }
 0x352   :  { %10395 = vmatprep.mubr.bf16.mxu0 %v7187_v34  ;;  %v6948_v5 = vsel %vm6733_vm3, %v6947_v4, %v6946_v10  ;;  %v6955_v27 = vrot.slane %v6597_v22, 1  ;;  %v18110_v25 = vrot.slane %v13883_v61, %v18104_v9  ;;  %v18112_v15 = vrot.slane %v18111_v6, %v17985_v31 }
 0x353   :  { %v6932_v14 = vsel %vm6730_vm2, %v18109_v51, %v18107_v53  ;;  %v6950_v26 = vsel %vm6736_vm4, %v6949_v1, %v6948_v5  ;;  %v14448_v8 = vmax.f32 %v18113_v39, 1.0  ;;  %v9795_v60 = vunpack.c.h.bf16 %v14445_v18 }
 0x354   :  { %v6934_v3 = vsel %vm6733_vm3, %v6933_v33, %v6932_v14  ;;  %1791 = vbcast.lane.b32.xlu1 %v18110_v25, 256  ;;  %v6952_v33 = vsel %vm6739_vm5, %v6951_v57, %v6950_v26  ;;  %v9798_v55 = vunpack.c.l.bf16 %v14453_v63  ;;  %v9811_v17 = vunpack.c.h.bf16 %v14458_v47  ;;  %v1617_v30 = vpop.permute.xlu0 %1616  ;;  %v1673_v57 = vpop.permute.xlu1 %1672 }
 0x355   :  { %v6936_v59 = vsel %vm6736_vm4, %v6935_v41, %v6934_v3  ;;  %1840 = vbcast.lane.b32.xlu0 %v18112_v15, 256  ;;  %v6954_v56 = vsel %vm6742_vm6, %v6953_v12, %v6952_v33  ;;  %v4709_v49 = vrot.slane %v14448_v8, 1  ;;  %v9827_v32 = vunpack.c.h.bf16 %v14463_v11 }
 0x356   :  { %v6938_v48 = vsel %vm6739_vm5, %v6937_v7, %v6936_v59  ;;  %v6956_v61 = vsel %vm6745_vm7, %v6955_v27, %v6954_v56  ;;  %v4509_v2 = vsel %vm4436_vm0, %v14468_v19, 0.0  ;;  %v4710_v35 = vrot.slane %v14448_v8, 2 }
 0x357   :  { %v6940_v16 = vsel %vm6742_vm6, %v6939_v44, %v6938_v48  ;;  %v2517_v46 = vmul.f32 %v9795_v60, %v1505_v54  ;;  %v9814_v22 = vunpack.c.l.bf16 %v14475_v37  ;;  %11088 = vrcp.f32 %v14448_v8 }
 0x358   :  { %v6942_v36 = vsel %vm6745_vm7, %v6941_v58, %v6940_v16  ;;  %1896 = vbcast.lane.b32.xlu1 %v1894_v13, 256  ;;  %v4711_v0 = vrot.slane %v14448_v8, 3  ;;  %v14492_v62 = vmax.f32 %v18114_v43, 1.0  ;;  %v2518_v41 = vmul.f32 %v9798_v55, %v1512_v24 }
 0x359   :  { %v7188_v4 = vpack.c.b16 %v6956_v61, %v6942_v36  ;;  %v9843_v1 = vunpack.c.h.bf16 %v14483_v20  ;;  %v4712_v34 = vrot.slane %v14448_v8, 4  ;;  %11090 = vrcp.f32 %v4709_v49 }
 0x35a   :  { %v2525_v21 = vmul.f32 %v9811_v17, %v1561_v23  ;;  %v2533_v7 = vmul.f32 %v9827_v32, %v1617_v30  ;;  %11092 = vrcp.f32 %v4710_v35  ;;  %v4713_v13 = vrot.slane %v14448_v8, 5 }
 0x35b   :  { %10396 = vmatmul.mubr.bf16.gmra.mrb[12].mxu0 %v7188_v4  ;;  %v3418_v44 = vrot.slane %v2517_v46, 4  ;;  %v2526_v12 = vmul.f32 %v9814_v22, %v1568_v42  ;;  %11094 = vrcp.f32 %v4711_v0  ;;  %v4714_v53 = vrot.slane %v14448_v8, 6  ;;  %v18116_v4 = vld [vmem:[#allocation43_spill] sm:$0xff] }
 0x35c   :  { %v3424_v38 = vrot.slane %v2518_v41, 4  ;;  %v4716_v51 = vrot.slane %v14492_v62, 1  ;;  %v2541_v14 = vmul.f32 %v9843_v1, %v1673_v57  ;;  %11096 = vrcp.f32 %v4712_v34  ;;  %v14519_v39 = vpop.xlane.xlu0 %4498 }
 0x35d   :  { %v3466_v10 = vrot.slane %v2525_v21, 4  ;;  %v3514_v3 = vrot.slane %v2533_v7, 4  ;;  %v4717_v58 = vrot.slane %v14492_v62, 2  ;;  %v4512_v5 = vsel %vm4436_vm0, %v14499_v52, 0.0  ;;  %18117 = vst [vmem:[#allocation25_spill] sm:$0xff] %v14519_v39 }
 0x35e   :  { %11098 = vrcp.f32 %v4713_v13  ;;  %v3419_v27 = vadd.f32 %v3418_v44, %v2517_v46  ;;  %v3472_v25 = vrot.slane %v2526_v12, 4  ;;  %v3425_v59 = vadd.f32 %v3424_v38, %v2518_v41  ;;  %v14546_v38 = vld [vmem:[%s17479_s1 + $0xa0] sm:$0xff] }
 0x35f   :  { %11100 = vrcp.f32 %v4714_v53  ;;  %v3562_v26 = vrot.slane %v2541_v14, 4  ;;  %v4718_v6 = vrot.slane %v14492_v62, 3  ;;  %v3467_v48 = vadd.f32 %v3466_v10, %v2525_v21 }
 0x360   :  { %11102 = vrcp.f32 %v4716_v51  ;;  %v3515_v33 = vadd.f32 %v3514_v3, %v2533_v7  ;;  %v4719_v16 = vrot.slane %v14492_v62, 4  ;;  %v4720_v56 = vrot.slane %v14492_v62, 5 }
 0x361   :  { %v14508_v15 = vpop.eup %11088  ;;  %11104 = vrcp.f32 %v4717_v58  ;;  %v4715_v36 = vrot.slane %v14448_v8, 7  ;;  %v14517_v54 = vmax.f32 %v18116_v4, 1.0  ;;  %v3420_v23 = vrot.slane %v3419_v27, 2  ;;  %v18118_v8 = vld [vmem:[#allocation48_spill] sm:$0xff] }
 0x362   :  { %11106 = vrcp.f32 %v14492_v62  ;;  %v3473_v24 = vadd.f32 %v3472_v25, %v2526_v12  ;;  %v4721_v60 = vrot.slane %v14492_v62, 6  ;;  %v3426_v55 = vrot.slane %v3425_v59, 2 }
 0x363   :  { %v14514_v61 = vpop.eup %11090  ;;  %v3563_v49 = vadd.f32 %v3562_v26, %v2541_v14  ;;  %11108 = vrcp.f32 %v4718_v6  ;;  %v4722_v17 = vrot.slane %v14492_v62, 7  ;;  %v3468_v35 = vrot.slane %v3467_v48, 2  ;;  %v14561_v26 = vld [vmem:[%s17482_s0 + $0x248] sm:$0xff]  }
 0x364   :  { %v14522_v42 = vpop.eup %11092  ;;  %v3516_v30 = vrot.slane %v3515_v33, 2  ;;  %11110 = vrcp.f32 %v4719_v16  ;;  %v9794_v22 = vunpack.c.l.bf16 %v14445_v18  ;;  %v3421_v0 = vadd.f32 %v3420_v23, %v3419_v27  ;;  %v1498_v18 = vpop.permute.xlu0 %1497 }
 0x365   :  { %v14525_v32 = vpop.eup %11094  ;;  %11112 = vrcp.f32 %v4720_v56  ;;  %v4723_v43 = vrot.slane %v14517_v54, 1  ;;  %v3474_v41 = vrot.slane %v3473_v24, 2  ;;  %v3427_v62 = vadd.f32 %v3426_v55, %v3425_v59  ;;  %v14567_v56 = vpop.xlane.xlu1 %4501 }
 0x366   :  { %v14530_v46 = vpop.eup %11096  ;;  %11114 = vrcp.f32 %v4721_v60  ;;  %v3564_v34 = vrot.slane %v3563_v49, 2  ;;  %v4724_v21 = vrot.slane %v14517_v54, 2  ;;  %v3469_v57 = vadd.f32 %v3468_v35, %v3467_v48  ;;  %18121 = vst [vmem:[#allocation26_spill] sm:$0xff] %v14567_v56  ;;  %v18126_v56 = vld [vmem:[#allocation38_spill] sm:$0xff] }
 0x367   :  { %11116 = vrcp.f32 %v4715_v36  ;;  %v3517_v13 = vadd.f32 %v3516_v30, %v3515_v33  ;;  %v9810_v53 = vunpack.c.l.bf16 %v14458_v47  ;;  %v1719_v51 = vrot.slane %v14546_v38, %v17861_v29  ;;  %v14572_v36 = vld [vmem:[%s17479_s1 + $0xa8] sm:$0xff] }
 0x368   :  { %v14534_v1 = vpop.eup %11098  ;;  %11118 = vrcp.f32 %v4722_v17  ;;  %v4725_v14 = vrot.slane %v14517_v54, 3  ;;  %v3422_v3 = vrot.slane %v3421_v0, 1  ;;  %v3475_v58 = vadd.f32 %v3474_v41, %v3473_v24  ;;  %v1554_v17 = vpop.permute.xlu0 %1553 }
 0x369   :  { %18119 = vst [vmem:[#allocation42_spill] sm:$0xff] %v14534_v1  ;;  %v14537_v7 = vpop.eup %11100  ;;  %11120 = vrcp.f32 %v14517_v54  ;;  %v3428_v27 = vrot.slane %v3427_v62, 1  ;;  %v3565_v25 = vadd.f32 %v3564_v34, %v3563_v49  ;;  %v3470_v6 = vrot.slane %v3469_v57, 1 }
 0x36a   :  { %18120 = vst [vmem:[#allocation27_spill] sm:$0xff] %v14537_v7  ;;  %v14540_v12 = vpop.eup %11102  ;;  %11122 = vrcp.f32 %v4723_v43  ;;  %v3518_v48 = vrot.slane %v3517_v13, 1  ;;  %v1740_v33 = vrot.slane %v14546_v38, %v18001_v28  ;;  %v1775_v4 = vrot.slane %v14572_v36, %v17861_v29 }
 0x36b   :  { %v14552_v10 = vpop.eup %11104  ;;  %11124 = vrcp.f32 %v4724_v21  ;;  %v4727_v23 = vrot.slane %v14517_v54, 5  ;;  %v3423_v55 = vadd.f32 %v3422_v3, %v3421_v0  ;;  %v3476_v49 = vrot.slane %v3475_v58, 1  ;;  %v18124_v21 = vld [vmem:[#allocation6_spill] sm:$0xff] }
 0x36c   :  { %v14555_v47 = vpop.eup %11106  ;;  %v3429_v43 = vadd.f32 %v3428_v27, %v3427_v62  ;;  %v3566_v41 = vrot.slane %v3565_v25, 1  ;;  %v2516_v34 = vmul.f32 %v9794_v22, %v1498_v18  ;;  %v3471_v24 = vadd.f32 %v3470_v6, %v3469_v57  ;;  %v11364_v22 = vld [vmem:[%s17487_s7] ss:$0 sm:$0xff]  ;;  %v14598_v57 = vld [vmem:[%s17479_s1 + $0xb0] sm:$0xff] }
 0x36d   :  { %v14565_v16 = vpop.eup %11108  ;;  %v3519_v59 = vadd.f32 %v3518_v48, %v3517_v13  ;;  %v1796_v39 = vrot.slane %v14572_v36, %v18001_v28  ;;  %v2524_v7 = vmul.f32 %v9810_v53, %v1554_v17  ;;  %v18128_v18 = vld [vmem:[#allocation15_spill] sm:$0xff]  ;;  %v1845_v13 = vrot.slane %v14598_v57, %v18104_v9 }
 0x36e   :  { %v14578_v60 = vpop.eup %11110  ;;  %v3477_v53 = vadd.f32 %v3476_v49, %v3475_v58  ;;  %v14613_v58 = vld [vmem:[%s17479_s1 + $0xb8] sm:$0xff] }
 0x36f   :  { %18122 = vst [vmem:[#allocation8_spill] sm:$0xff] %v14578_v60  ;;  %v14581_v30 = vpop.eup %11112 }
 0x370   :  { %18123 = vst [vmem:[#allocation49_spill] sm:$0xff] %v14581_v30  ;;  %v1624_v30 = vpop.permute.xlu0 %1623 }
 0x374   :  { %4510 = vadd.xlane.f32.xlu0 %v4509_v2  ;;  %v14528_v2 = vmax.f32 %v18118_v8, 1.0  ;;  %v9830_v8 = vunpack.c.l.bf16 %v14561_v26 }
 0x376   :  { %v4730_v44 = vrot.slane %v14528_v2, 1 }
 0x378   :  { %11126 = vrcp.f32 %v4730_v44 }
 0x379   :  { %11128 = vrcp.f32 %v4725_v14  ;;  %v14584_v14 = vpop.eup %11114 }
 0x37a   :  { %18125 = vst [vmem:[#allocation35_spill] sm:$0xff] %v14584_v14  ;;  %v5352_v14 = vmul.f32 %v14540_v12, %v3471_v24  ;;  %v5354_v12 = vmul.f32 %v14552_v10, %v3477_v53  ;;  %v9815_v10 = vunpack.c.h.bf16 %v14475_v37 }
 0x37c   :  { %4513 = vadd.xlane.f32.xlu1 %v4512_v5  ;;  %v4726_v5 = vrot.slane %v14517_v54, 4 }
 0x37e   :  { %11130 = vrcp.f32 %v4726_v5  ;;  %v14589_v5 = vpop.eup %11116 }
 0x37f   :  { %18127 = vst [vmem:[#allocation16_spill] sm:$0xff] %v14589_v5  ;;  %v14602_v6 = vpop.eup %11118  ;;  %11132 = vrcp.f32 %v4727_v23  ;;  %v5338_v5 = vmul.f32 %v14522_v42, %v3429_v43 }
 0x380   :  { %18129 = vst [vmem:[#allocation7_spill] sm:$0xff] %v14602_v6  ;;  %v14605_v17 = vpop.eup %11120 }
 0x388   :  { %v10393_v35 = vpop.f32.mrb[8].mxu0 }
 0x389   :  { %v7336_v44 = vadd.f32 %v10393_v35, %v18124_v21  ;;  %v5336_v21 = vmul.f32 %v14514_v61, %v3423_v55  ;;  %v1901_v61 = vrot.slane %v14613_v58, %v18104_v9  ;;  %v3460_v55 = vrot.slane %v2524_v7, 4 }
 0x38a   :  { %1721 = vbcast.lane.b32.xlu0 %v1719_v51, 256  ;;  %v7327_v51 = vpop.f32.mrb[9].mxu0 }
 0x38b   :  { %v7328_v0 = vadd.f32 %v7327_v51, %v18126_v56  ;;  %v10394_v3 = vpop.f32.mrb[10].mxu0  ;;  %v7439_v62 = vadd.f32 %v11364_v22, %v7336_v44  ;;  %v3412_v44 = vrot.slane %v2516_v34, 4  ;;  %v1519_v51 = vpop.permute.xlu1 %1518 }
 0x38c   :  { %v7339_v27 = vadd.f32 %v10394_v3, %v18128_v18  ;;  %v7330_v35 = vpop.f32.mrb[11].mxu0  ;;  %v11123_v18 = vpop.eup %11122 }
 0x38d   :  { %1742 = vbcast.lane.b32.xlu1 %v1740_v33, 256  ;;  %v7437_v48 = vadd.f32 %v11364_v22, %v7328_v0  ;;  %v18130_v33 = vld [vmem:[#allocation10_spill] sm:$0xff]  ;;  %v5368_v23 = vmul.f32 %v11123_v18, %v3519_v59  ;;  %v7471_v49 = vmax.f32 %v7439_v62, 0.0  ;;  %v14627_v59 = vld [vmem:[%s17482_s0 + $0x268] sm:$0xff]  }
 0x38e   :  { %1777 = vbcast.lane.b32.xlu0 %v1775_v4, 256  ;;  %v7331_v56 = vadd.f32 %v7330_v35, %v18130_v33  ;;  %v3567_v4 = vadd.f32 %v3566_v41, %v3565_v25  ;;  %v7440_v3 = vadd.f32 %v11364_v22, %v7339_v27  ;;  %v14617_v25 = vpop.eup %11124  ;;  %v3413_v35 = vadd.f32 %v3412_v44, %v2516_v34 }
 0x38f   :  { %v11127_v42 = vpop.eup %11126  ;;  %v7469_v43 = vmax.f32 %v7437_v48, 0.0  ;;  %v2534_v33 = vmul.f32 %v9830_v8, %v1624_v30  ;;  %v5718_v48 = vpack.c.bf16 %v5336_v21, %v5336_v21  ;;  %v5719_v34 = vpack.c.bf16 %v5338_v5, %v5338_v5 }
 0x390   :  { %v7438_v6 = vadd.f32 %v11364_v22, %v7331_v56  ;;  %v7472_v41 = vmax.f32 %v7440_v3, 0.0  ;;  %v14622_v22 = vpop.eup %11128  ;;  %v5384_v27 = vmul.f32 %v11127_v42, %v3567_v4  ;;  %v3461_v8 = vadd.f32 %v3460_v55, %v2524_v7  ;;  %v14650_v42 = vld [vmem:[%s17482_s0 + $0x210] sm:$0xff]  }
 0x391   :  { %1798 = vbcast.lane.b32.xlu1 %v1796_v39, 256  ;;  %v18131_v39 = vunpack.c.h.bf16 %v14453_v63  ;;  %18132 = vst [vmem:[#allocation50_spill] sm:$0xff] %v14622_v22  ;;  %v18134_v63 = vrot.slane %v14517_v54, 6  ;;  %v4731_v30 = vrot.slane %v14528_v2, 2  ;;  %v5726_v56 = vpack.c.bf16 %v5352_v14, %v5352_v14  ;;  %v14710_v14 = vld [vmem:[%s17479_s1 + $0xd8] sm:$0xff] }
 0x392   :  { %1847 = vbcast.lane.b32.xlu0 %v1845_v13, 256  ;;  %v7470_v0 = vmax.f32 %v7438_v6, 0.0  ;;  %v7530_v62 = vpack.c.bf16 %v7472_v41, %v7471_v49  ;;  %v14629_v13 = vpop.eup %11130  ;;  %v5734_v4 = vpack.c.bf16 %v5368_v23, %v5368_v23  ;;  %v5727_v3 = vpack.c.bf16 %v5354_v12, %v5354_v12  ;;  %v1575_v49 = vpop.permute.xlu1 %1574  ;;  %18143 = vst [vmem:[#allocation13_spill] sm:$0xff] %v14710_v14  ;;  %v14715_v6 = vld [vmem:[%s17482_s0 + $0x238] sm:$0xff]  }
 0x393   :  { %v2519_v24 = vmul.f32 %v18131_v39, %v1519_v51  ;;  %18133 = vst [vmem:[#allocation20_spill] sm:$0xff] %v14629_v13  ;;  %11134 = vrcp.f32 %v18134_v63  ;;  %v9846_v51 = vunpack.c.l.bf16 %v14627_v59  ;;  %v5742_v37 = vpack.c.bf16 %v5384_v27, %v5384_v27  ;;  %v14637_v41 = vpop.eup %11132 }
 0x394   :  { %v7529_v53 = vpack.c.bf16 %v7470_v0, %v7469_v43  ;;  %v3414_v18 = vrot.slane %v3413_v35, 2  ;;  %18135 = vst [vmem:[#allocation44_spill] sm:$0xff] %v14637_v41  ;;  %11136 = vrcp.f32 %v14528_v2  ;;  %v4732_v7 = vrot.slane %v14528_v2, 3 }
 0x395   :  { %1903 = vbcast.lane.b32.xlu1 %v1901_v61, 256  ;;  %v3430_v44 = vrot.slane %v2519_v24, 4  ;;  %v3520_v61 = vrot.slane %v2534_v33, 4  ;;  %v4733_v5 = vrot.slane %v14528_v2, 4  ;;  %v14643_v21 = vunpack.c.l.b16 %v5718_v48 }
 0x396   :  { %10487 = vmatprep.mubr.bf16.mxu1 %v7529_v53  ;;  %v14645_v23 = vunpack.c.l.b16 %v5719_v34  ;;  %v3462_v55 = vrot.slane %v3461_v8, 2  ;;  %11138 = vrcp.f32 %v4731_v30  ;;  %v14652_v12 = vunpack.c.l.b16 %v5726_v56 }
 0x397   :  { %10488 = vmatmul.mubr.bf16.gmra.mrb[40].mxu1 %v7530_v62  ;;  %v14654_v39 = vunpack.c.l.b16 %v5734_v4  ;;  %v3431_v43 = vadd.f32 %v3430_v44, %v2519_v24  ;;  %v2527_v0 = vmul.f32 %v9815_v10, %v1575_v49  ;;  %v14656_v27 = vunpack.c.l.b16 %v5727_v3  ;;  %v14670_v44 = vld [vmem:[%s17482_s0 + $0x230] sm:$0xff]  }
 0x398   :  { %v14658_v62 = vunpack.c.l.b16 %v5742_v37  ;;  %v3415_v53 = vadd.f32 %v3414_v18, %v3413_v35  ;;  %v3521_v63 = vadd.f32 %v3520_v61, %v2534_v33  ;;  %v9802_v34 = vunpack.c.l.bf16 %v14650_v42  ;;  %18139 = vst [vmem:[#allocation46_spill] sm:$0xff] %v14670_v44  ;;  %v14689_v49 = vld [vmem:[%s17479_s1 + $0xd0] sm:$0xff] }
 0x399   :  { %18136 = vst [vmem:[#allocation52_spill] sm:$0xff] %v14654_v39  ;;  %v14660_v48 = vpop.xlane.xlu0 %4504  ;;  %11140 = vrcp.f32 %v4732_v7  ;;  %v3463_v10 = vadd.f32 %v3462_v55, %v3461_v8  ;;  %v3432_v37 = vrot.slane %v3431_v43, 2  ;;  %v3478_v18 = vrot.slane %v2527_v0, 4  ;;  %v1680_v55 = vpop.permute.xlu1 %1679  ;;  %18141 = vst [vmem:[#allocation45_spill] sm:$0xff] %v14689_v49 }
 0x39a   :  { %18137 = vst [vmem:[#allocation5_spill] sm:$0xff] %v14658_v62  ;;  %18138 = vst [vmem:[#allocation47_spill] sm:$0xff] %v14660_v48  ;;  %11142 = vrcp.f32 %v4733_v5  ;;  %v3416_v7 = vrot.slane %v3415_v53, 1  ;;  %v3522_v8 = vrot.slane %v3521_v63, 2  ;;  %v14681_v5 = vld [vmem:[%s17482_s0 + $0x250] sm:$0xff]   ;;  %v9826_v33 = vunpack.c.l.bf16 %v14463_v11  ;;  %v14697_v11 = vld [vmem:[%s17482_s0 + $0x218] sm:$0xff]  }
 0x39b   :  { %v9818_v3 = vunpack.c.l.bf16 %v14670_v44  ;;  %v9842_v56 = vunpack.c.l.bf16 %v14483_v20  ;;  %v3464_v61 = vrot.slane %v3463_v10, 1  ;;  %v14702_v20 = vld [vmem:[%s17482_s0 + $0x270] sm:$0xff]   ;;  %v3479_v48 = vadd.f32 %v3478_v18, %v2527_v0 }
 0x39c   :  { %v3417_v13 = vadd.f32 %v3416_v7, %v3415_v53  ;;  %v3523_v62 = vadd.f32 %v3522_v8, %v3521_v63  ;;  %v4515_v0 = vsel %vm4436_vm0, %v14689_v49, 0.0  ;;  %v14729_v53 = vsel %vm4436_vm0, %v14710_v14, 0.0  ;;  %v14742_v63 = vld [vmem:[%s17482_s0 + $0x258] sm:$0xff]  }
 0x39d   :  { %v14672_v35 = vpop.eup %11134  ;;  %v1526_v24 = vpop.permute.xlu0 %1525  ;;  %v3465_v22 = vadd.f32 %v3464_v61, %v3463_v10  ;;  %v18147_v49 = vrot.slane %v14528_v2, 5 }
 0x39e   :  { %18140 = vst [vmem:[#allocation53_spill] sm:$0xff] %v14672_v35  ;;  %v2520_v4 = vmul.f32 %v9802_v34, %v1526_v24  ;;  %v14704_v34 = vpop.eup %11136  ;;  %v3433_v24 = vadd.f32 %v3432_v37, %v3431_v43  ;;  %v2542_v35 = vmul.f32 %v9846_v51, %v1680_v55  ;;  %v5334_v55 = vmul.f32 %v14508_v15, %v3417_v13 }
 0x39f   :  { %18142 = vst [vmem:[#allocation3_spill] sm:$0xff] %v14704_v34  ;;  %v3524_v30 = vrot.slane %v3523_v62, 1  ;;  %11144 = vrcp.f32 %v18147_v49  ;;  %v5350_v15 = vmul.f32 %v14555_v47, %v3465_v22 }
 0x3a0   :  { %v14717_v41 = vpop.eup %11138  ;;  %v3436_v1 = vrot.slane %v2520_v4, 4  ;;  %v3434_v8 = vrot.slane %v3433_v24, 1 }
 0x3a1   :  { %v14719_v43 = vpop.xlane.xlu1 %4507  ;;  %v1610_v51 = vpop.permute.xlu0 %1609 }
 0x3a2   :  { %18144 = vst [vmem:[#allocation43_spill] sm:$0xff] %v14719_v43  ;;  %v2532_v37 = vmul.f32 %v9826_v33, %v1610_v51  ;;  %v3480_v43 = vrot.slane %v3479_v48, 2  ;;  %v3568_v33 = vrot.slane %v2542_v35, 4  ;;  %v3437_v10 = vadd.f32 %v3436_v1, %v2520_v4 }
 0x3a3   :  { %v14732_v7 = vpop.eup %11140  ;;  %v18149_v4 = vrot.slane %v14528_v2, 6  ;;  %v3435_v49 = vadd.f32 %v3434_v8, %v3433_v24  ;;  %v5725_v24 = vpack.c.bf16 %v5350_v15, %v5350_v15  ;;  %v18151_v8 = vld [vmem:[#allocation9_spill] sm:$0xff] }
 0x3a4   :  { %18145 = vst [vmem:[#allocation48_spill] sm:$0xff] %v14732_v7  ;;  %v3508_v51 = vrot.slane %v2532_v37, 4  ;;  %v14734_v18 = vpop.eup %11142  ;;  %v3481_v60 = vadd.f32 %v3480_v43, %v3479_v48  ;;  %v3569_v44 = vadd.f32 %v3568_v33, %v2542_v35 }
 0x3a5   :  { %18146 = vst [vmem:[#allocation6_spill] sm:$0xff] %v14734_v18  ;;  %v1582_v61 = vpop.permute.xlu1 %1581  ;;  %v1666_v39 = vpop.permute.xlu0 %1665  ;;  %v18148_v18 = vrot.slane %v14517_v54, 7  ;;  %v5717_v54 = vpack.c.bf16 %v5334_v55, %v5334_v55 }
 0x3a6   :  { %v3509_v14 = vadd.f32 %v3508_v51, %v2532_v37  ;;  %v2528_v7 = vmul.f32 %v9818_v3, %v1582_v61  ;;  %v2540_v1 = vmul.f32 %v9842_v56, %v1666_v39  ;;  %v14755_v3 = vld [vmem:[%s17482_s0 + $0x278] sm:$0xff]   ;;  %v3525_v37 = vadd.f32 %v3524_v30, %v3523_v62 }
 0x3a7   :  { %11146 = vrcp.f32 %v18148_v18  ;;  %v3438_v18 = vrot.slane %v3437_v10, 2  ;;  %v18150_v39 = vrot.slane %v14528_v2, 7  ;;  %v5340_v62 = vmul.f32 %v14525_v32, %v3435_v49 }
 0x3a8   :  { %11148 = vrcp.f32 %v18149_v4  ;;  %v3510_v56 = vrot.slane %v3509_v14, 2  ;;  %v3484_v51 = vrot.slane %v2528_v7, 4  ;;  %v3556_v43 = vrot.slane %v2540_v1, 4 }
 0x3a9   :  { %v1631_v47 = vpop.permute.xlu1 %1630  ;;  %v1533_v22 = vpop.permute.xlu0 %1532  ;;  %11150 = vrcp.f32 %v18150_v39  ;;  %v3482_v30 = vrot.slane %v3481_v60, 1  ;;  %v3570_v61 = vrot.slane %v3569_v44, 2  ;;  %v6598_v4 = vunpack.c.l.b16 %v5717_v54 }
 0x3aa   :  { %v5370_v39 = vmul.f32 %v14617_v25, %v3525_v37  ;;  %v3439_v48 = vadd.f32 %v3438_v18, %v3437_v10  ;;  %v3511_v35 = vadd.f32 %v3510_v56, %v3509_v14  ;;  %v3485_v13 = vadd.f32 %v3484_v51, %v2528_v7  ;;  %v14773_v49 = vpop.eup %11144 }
 0x3ab   :  { %v6606_v2 = vunpack.c.l.b16 %v5725_v24  ;;  %v3557_v54 = vadd.f32 %v3556_v43, %v2540_v1  ;;  %v18152_v25 = vunpack.c.h.bf16 %v14561_v26  ;;  %v5720_v14 = vpack.c.bf16 %v5340_v62, %v5340_v62 }
 0x3ac   :  { %v3483_v7 = vadd.f32 %v3482_v30, %v3481_v60  ;;  %v18153_v56 = vunpack.c.h.bf16 %v14650_v42  ;;  %v18154_v32 = vrot.slane %v14643_v21, 7  ;;  %v5735_v24 = vpack.c.bf16 %v5370_v39, %v5370_v39 }
 0x3ad   :  { %v1687_v9 = vpop.permute.xlu1 %1686  ;;  %v1638_v33 = vpop.permute.xlu0 %1637  ;;  %v2535_v10 = vmul.f32 %v18152_v25, %v1631_v47  ;;  %v3440_v26 = vrot.slane %v3439_v48, 1  ;;  %v3512_v25 = vrot.slane %v3511_v35, 1  ;;  %v3486_v62 = vrot.slane %v3485_v13, 2 }
 0x3ae   :  { %v2521_v51 = vmul.f32 %v18153_v56, %v1533_v22  ;;  %v6958_v1 = vsel %vm6727_vm1, %v18154_v32, %v6598_v4  ;;  %v18155_v21 = vrot.slane %v14652_v12, 7  ;;  %v3558_v30 = vrot.slane %v3557_v54, 2 }
 0x3af   :  { %v6601_v39 = vunpack.c.l.b16 %v5720_v14  ;;  %v5356_v32 = vmul.f32 %v14565_v16, %v3483_v7  ;;  %v14804_v37 = vunpack.c.l.b16 %v5735_v24  ;;  %v3441_v42 = vadd.f32 %v3440_v26, %v3439_v48 }
 0x3b0   :  { %v6972_v22 = vsel %vm6727_vm1, %v18155_v21, %v6606_v2  ;;  %v3442_v43 = vrot.slane %v2521_v51, 4  ;;  %v3513_v21 = vadd.f32 %v3512_v25, %v3511_v35  ;;  %v3487_v34 = vadd.f32 %v3486_v62, %v3485_v13 }
 0x3b1   :  { %4516 = vadd.xlane.f32.xlu0 %v4515_v0  ;;  %v14779_v18 = vpop.eup %11146  ;;  %v3571_v0 = vadd.f32 %v3570_v61, %v3569_v44  ;;  %v14788_v47 = vpop.permute.xlu1 %1588  ;;  %v3526_v61 = vrot.slane %v2535_v10, 4  ;;  %18156 = vst [vmem:[#allocation38_spill] sm:$0xff] %v14804_v37  ;;  %v18157_v14 = vrot.slane %v14645_v23, 6  ;;  %v3559_v48 = vadd.f32 %v3558_v30, %v3557_v54 }
 0x3b2   :  { %v14783_v55 = vpop.eup %11148  ;;  %v1540_v60 = vpop.permute.xlu0 %1539  ;;  %v18158_v26 = vrot.slane %v14656_v27, 6  ;;  %v6961_v35 = vrot.slane %v6601_v39, 5  ;;  %v5728_v13 = vpack.c.bf16 %v5356_v32, %v5356_v32  ;;  %v5342_v16 = vmul.f32 %v14530_v46, %v3441_v42 }
 0x3b3   :  { %v14796_v44 = vpop.eup %11150  ;;  %v3572_v56 = vrot.slane %v3571_v0, 1  ;;  %v6960_v7 = vsel %vm6730_vm2, %v18157_v14, %v6958_v1  ;;  %v3527_v24 = vadd.f32 %v3526_v61, %v2535_v10  ;;  %v18159_v23 = vunpack.c.h.bf16 %v14627_v59 }
 0x3b4   :  { %v6974_v12 = vsel %vm6730_vm2, %v18158_v26, %v6972_v22  ;;  %v5366_v27 = vmul.f32 %v14605_v17, %v3513_v21  ;;  %v3488_v10 = vrot.slane %v3487_v34, 1  ;;  %v18160_v22 = vunpack.c.l.bf16 %v14681_v5 }
 0x3b5   :  { %v14806_v15 = vpop.permute.xlu1 %1693  ;;  %v3573_v25 = vadd.f32 %v3572_v56, %v3571_v0  ;;  %v2543_v1 = vmul.f32 %v18159_v23, %v1687_v9  ;;  %v3528_v46 = vrot.slane %v3527_v24, 2  ;;  %v6609_v42 = vunpack.c.l.b16 %v5728_v13 }
 0x3b6   :  { %v2536_v30 = vmul.f32 %v18160_v22, %v1638_v33  ;;  %v14832_v61 = vpop.permute.xlu0 %1644  ;;  %v14842_v33 = vsel %vm6733_vm3, %v6961_v35, %v6960_v7  ;;  %v5721_v32 = vpack.c.bf16 %v5342_v16, %v5342_v16  ;;  %v5733_v26 = vpack.c.bf16 %v5366_v27, %v5366_v27  ;;  %v18165_v16 = vld [vmem:[#allocation8_spill] sm:$0xff] }
 0x3b7   :  { %v5386_v17 = vmul.f32 %v14717_v41, %v3573_v25  ;;  %v3574_v56 = vrot.slane %v2543_v1, 4  ;;  %v3489_v23 = vadd.f32 %v3488_v10, %v3487_v34  ;;  %v3529_v41 = vadd.f32 %v3528_v46, %v3527_v24 }
 0x3b8   :  { %v3532_v22 = vrot.slane %v2536_v30, 4  ;;  %v6975_v35 = vrot.slane %v6609_v42, 5  ;;  %v14856_v27 = vunpack.c.l.b16 %v5721_v32  ;;  %v18164_v46 = vunpack.c.l.bf16 %v14697_v11 }
 0x3b9   :  { %4519 = vadd.xlane.f32.xlu1 %v14729_v53  ;;  %v3443_v53 = vadd.f32 %v3442_v43, %v2521_v51  ;;  %v1596_v0 = vpop.permute.xlu1 %1595  ;;  %v3560_v43 = vrot.slane %v3559_v48, 1  ;;  %v5743_v25 = vpack.c.bf16 %v5386_v17, %v5386_v17  ;;  %v3575_v10 = vadd.f32 %v3574_v56, %v2543_v1  ;;  %v18167_v51 = vld [vmem:[#allocation3_spill] sm:$0xff] }
 0x3ba   :  { %v1547_v59 = vpop.permute.xlu0 %1546  ;;  %v2522_v7 = vmul.f32 %v18164_v46, %v1540_v60  ;;  %v6614_v13 = vunpack.c.l.b16 %v5733_v26  ;;  %v5358_v42 = vmul.f32 %v18165_v16, %v3489_v23  ;;  %v3533_v17 = vadd.f32 %v3532_v22, %v2536_v30  ;;  %v18172_v23 = vld [vmem:[#allocation52_spill] sm:$0xff] }
 0x3bb   :  { %v3444_v39 = vrot.slane %v3443_v53, 2  ;;  %v3561_v62 = vadd.f32 %v3560_v43, %v3559_v48  ;;  %v18162_v48 = vld [vmem:[#allocation46_spill] sm:$0xff]  ;;  %v3530_v34 = vrot.slane %v3529_v41, 1  ;;  %v18168_v32 = vunpack.c.h.bf16 %v14697_v11 }
 0x3bc   :  { %v18163_v24 = vunpack.c.h.bf16 %v18162_v48  ;;  %v18170_v60 = vrot.slane %v14546_v38, %v18151_v8  ;;  %v14877_v30 = vsel %vm6733_vm3, %v6975_v35, %v6974_v12  ;;  %v3576_v11 = vrot.slane %v3575_v10, 2 }
 0x3bd   :  { %v3445_v21 = vadd.f32 %v3444_v39, %v3443_v53  ;;  %v1701_v9 = vpop.permute.xlu1 %1700  ;;  %v18166_v53 = vunpack.c.l.bf16 %v14715_v6  ;;  %v5382_v54 = vmul.f32 %v18167_v51, %v3561_v62  ;;  %v2523_v1 = vmul.f32 %v18168_v32, %v1547_v59 }
 0x3be   :  { %v2529_v43 = vmul.f32 %v18163_v24, %v14788_v47  ;;  %v14871_v47 = vunpack.c.l.b16 %v5743_v25  ;;  %v3448_v26 = vrot.slane %v2522_v7, 4  ;;  %v18173_v22 = vrot.slane %v18172_v23, 7  ;;  %v1652_v2 = vpop.permute.xlu0 %1651 }
 0x3bf   :  { %v2530_v39 = vmul.f32 %v18166_v53, %v1596_v0  ;;  %v3446_v48 = vrot.slane %v3445_v21, 1  ;;  %v5729_v25 = vpack.c.bf16 %v5358_v42, %v5358_v42  ;;  %v3534_v24 = vrot.slane %v3533_v17, 2 }
 0x3c0   :  { %18169 = vst [vmem:[#allocation15_spill] sm:$0xff] %v14871_v47  ;;  %v3490_v59 = vrot.slane %v2529_v43, 4  ;;  %v14885_v16 = vsel %vm6727_vm1, %v18173_v22, %v6614_v13  ;;  %v5741_v12 = vpack.c.bf16 %v5382_v54, %v5382_v54  ;;  %v3531_v35 = vadd.f32 %v3530_v34, %v3529_v41 }
 0x3c1   :  { %18174 = vst [vmem:[#allocation10_spill] sm:$0xff] %v14885_v16  ;;  %v3496_v53 = vrot.slane %v2530_v39, 4  ;;  %v1603_v32 = vpop.permute.xlu1 %1602  ;;  %v3454_v51 = vrot.slane %v2523_v1, 4  ;;  %v18175_v23 = vrot.slane %v14572_v36, %v18151_v8  ;;  %v3447_v13 = vadd.f32 %v3446_v48, %v3445_v21 }
 0x3c2   :  { %v18176_v4 = vunpack.c.l.bf16 %v14702_v20  ;;  %v18177_v41 = vunpack.c.h.bf16 %v14681_v5  ;;  %v3491_v0 = vadd.f32 %v3490_v59, %v2529_v43  ;;  %v3449_v37 = vadd.f32 %v3448_v26, %v2522_v7 }
 0x3c3   :  { %v18179_v21 = vunpack.c.h.bf16 %v14702_v20  ;;  %v14904_v48 = vadd.f32 %v3576_v11, %v3575_v10  ;;  %v3497_v47 = vadd.f32 %v3496_v53, %v2530_v39  ;;  %v14908_v5 = vadd.f32 %v3534_v24, %v3533_v17  ;;  %v1659_v11 = vpop.permute.xlu0 %1658  ;;  %v18185_v53 = vld [vmem:[#allocation50_spill] sm:$0xff] }
 0x3c4   :  { %v2544_v54 = vmul.f32 %v18176_v4, %v14806_v15  ;;  %v2537_v34 = vmul.f32 %v18177_v41, %v14832_v61  ;;  %v18180_v15 = vunpack.c.l.bf16 %v14742_v63  ;;  %v3455_v52 = vadd.f32 %v3454_v51, %v2523_v1 }
 0x3c5   :  { %v10485_v46 = vpop.f32.mrb[36].mxu1  ;;  %v18181_v7 = vrot.slane %v14598_v57, %v18001_v28  ;;  %v1708_v10 = vpop.permute.xlu1 %1707  ;;  %v3492_v39 = vrot.slane %v3491_v0, 2  ;;  %v14918_v1 = vunpack.c.l.b16 %v5729_v25  ;;  %v3498_v26 = vrot.slane %v3497_v47, 2 }
 0x3c6   :  { %v7976_v56 = vpop.f32.mrb[37].mxu1  ;;  %v2538_v4 = vmul.f32 %v18180_v15, %v1652_v2  ;;  %v3580_v20 = vrot.slane %v2544_v54, 4  ;;  %v3450_v2 = vrot.slane %v3449_v37, 2  ;;  %v6622_v24 = vunpack.c.l.b16 %v5741_v12 }
 0x3c7   :  { %1749 = vbcast.lane.b32.xlu0 %v18170_v60, 256  ;;  %v11367_v60 = vld [vmem:[%s17488_s10] ss:$0 sm:$0xff]  ;;  %v10486_v22 = vpop.f32.mrb[38].mxu1  ;;  %v18190_v12 = vrot.slane %v14546_v38, %v11587_v40 }
 0x3c8   :  { %v8100_v62 = vadd.f32 %v11367_v60, %v10485_v46  ;;  %v8098_v42 = vadd.f32 %v11367_v60, %v7976_v56  ;;  %v18178_v46 = vrot.slane %v14598_v57, %v17861_v29  ;;  %v8101_v16 = vadd.f32 %v11367_v60, %v10486_v22  ;;  %v7979_v14 = vpop.f32.mrb[39].mxu1 }
 0x3c9   :  { %v2545_v56 = vmul.f32 %v18179_v21, %v1701_v9  ;;  %v3538_v9 = vrot.slane %v2537_v34, 4  ;;  %v18186_v22 = vunpack.c.h.bf16 %v14715_v6  ;;  %v18187_v21 = vrot.slane %v14613_v58, %v18001_v28 }
 0x3ca   :  { %1805 = vbcast.lane.b32.xlu1 %v18175_v23, 256  ;;  %v8099_v23 = vadd.f32 %v11367_v60, %v7979_v14  ;;  %v8132_v61 = vmax.f32 %v8100_v62, 0.0  ;;  %v8133_v41 = vmax.f32 %v8101_v16, 0.0  ;;  %v8130_v43 = vmax.f32 %v8098_v42, 0.0 }
 0x3cb   :  { %1833 = vbcast.lane.b32.xlu0 %v18178_v46, 256  ;;  %v18182_v14 = vrot.slane %v14613_v58, %v17861_v29  ;;  %v3586_v62 = vrot.slane %v2545_v56, 4  ;;  %v3544_v16 = vrot.slane %v2538_v4, 4  ;;  %v14923_v60 = vmul.f32 %v18185_v53, %v3531_v35 }
 0x3cc   :  { %v8131_v59 = vmax.f32 %v8099_v23, 0.0  ;;  %v14916_v17 = vpack.c.bf16 %v8133_v41, %v8132_v61  ;;  %v3456_v42 = vrot.slane %v3455_v52, 2  ;;  %v2531_v46 = vmul.f32 %v18186_v22, %v1603_v32  ;;  %v18188_v23 = vld [vmem:[#allocation42_spill] sm:$0xff] }
 0x3cd   :  { %v14931_v15 = vmul.f32 %v18188_v23, %v3447_v13  ;;  %v3581_v25 = vadd.f32 %v3580_v20, %v2544_v54  ;;  %v3539_v61 = vadd.f32 %v3538_v9, %v2537_v34  ;;  %v18189_v41 = vunpack.c.h.bf16 %v14742_v63 }
 0x3ce   :  { %1854 = vbcast.lane.b32.xlu1 %v18181_v7, 256  ;;  %18183 = vst [vmem:[#allocation46_spill] sm:$0xff] %v14916_v17  ;;  %v14920_v51 = vpack.c.bf16 %v8131_v59, %v8130_v43  ;;  %v3493_v35 = vadd.f32 %v3492_v39, %v3491_v0  ;;  %v3451_v43 = vadd.f32 %v3450_v2, %v3449_v37  ;;  %v3502_v32 = vrot.slane %v2531_v46, 4 }
 0x3cf   :  { %1889 = vbcast.lane.b32.xlu0 %v18182_v14, 256  ;;  %v2539_v7 = vmul.f32 %v18189_v41, %v1659_v11  ;;  %v3587_v6 = vadd.f32 %v3586_v62, %v2545_v56  ;;  %v3499_v59 = vadd.f32 %v3498_v26, %v3497_v47  ;;  %v3545_v14 = vadd.f32 %v3544_v16, %v2538_v4 }
 0x3d0   :  { %18184 = vst [vmem:[#allocation8_spill] sm:$0xff] %v14920_v51  ;;  %v18191_v22 = vunpack.c.l.bf16 %v14755_v3  ;;  %v3578_v54 = vrot.slane %v14904_v48, 1  ;;  %v3536_v63 = vrot.slane %v14908_v5, 1  ;;  %v3457_v34 = vadd.f32 %v3456_v42, %v3455_v52 }
 0x3d1   :  { %v3550_v53 = vrot.slane %v2539_v7, 4  ;;  %v3503_v20 = vadd.f32 %v3502_v32, %v2531_v46  ;;  %v18192_v9 = vrot.slane %v14572_v36, %v11587_v40  ;;  %v3582_v37 = vrot.slane %v3581_v25, 2 }
 0x3d2   :  { %1910 = vbcast.lane.b32.xlu1 %v18187_v21, 256  ;;  %v2546_v13 = vmul.f32 %v18191_v22, %v1708_v10  ;;  %v1715_v21 = vpop.permute.xlu1 %1714  ;;  %v3540_v0 = vrot.slane %v3539_v61, 2  ;;  %v18193_v4 = vrot.slane %v14598_v57, %v18151_v8  ;;  %v3494_v10 = vrot.slane %v3493_v35, 1 }
 0x3d3   :  { %1756 = vbcast.lane.b32.xlu0 %v18190_v12, 256  ;;  %v3551_v56 = vadd.f32 %v3550_v53, %v2539_v7  ;;  %v3588_v39 = vrot.slane %v3587_v6, 2  ;;  %v3504_v2 = vrot.slane %v3503_v20, 2  ;;  %v18194_v62 = vunpack.c.h.bf16 %v14755_v3 }
 0x3d4   :  { %v3592_v47 = vrot.slane %v2546_v13, 4  ;;  %v3452_v52 = vrot.slane %v3451_v43, 1  ;;  %v3500_v26 = vrot.slane %v3499_v59, 1  ;;  %v3546_v16 = vrot.slane %v3545_v14, 2 }
 0x3d5   :  { %v2547_v11 = vmul.f32 %v18194_v62, %v1715_v21  ;;  %v3458_v46 = vrot.slane %v3457_v34, 1  ;;  %v3505_v23 = vadd.f32 %v3504_v2, %v3503_v20  ;;  %v3552_v41 = vrot.slane %v3551_v56, 2 }
 0x3d6   :  { %1812 = vbcast.lane.b32.xlu1 %v18192_v9, 256  ;;  %v3593_v42 = vadd.f32 %v3592_v47, %v2546_v13  ;;  %v18195_v7 = vrot.slane %v14613_v58, %v18151_v8  ;;  %v3583_v53 = vadd.f32 %v3582_v37, %v3581_v25  ;;  %v3541_v22 = vadd.f32 %v3540_v0, %v3539_v61  ;;  %v18198_v61 = vld [vmem:[#allocation5_spill] sm:$0xff] }
 0x3d7   :  { %1861 = vbcast.lane.b32.xlu0 %v18193_v4, 256  ;;  %v3598_v12 = vrot.slane %v2547_v11, 4  ;;  %v18196_v3 = vrot.slane %v14546_v38, %v11598_v45  ;;  %v3495_v21 = vadd.f32 %v3494_v10, %v3493_v35  ;;  %v3589_v4 = vadd.f32 %v3588_v39, %v3587_v6  ;;  %v18202_v10 = vld [vmem:[#allocation27_spill] sm:$0xff] }
 0x3d8   :  { %v3594_v9 = vrot.slane %v3593_v42, 2  ;;  %v3506_v13 = vrot.slane %v3505_v23, 1  ;;  %v3453_v20 = vadd.f32 %v3452_v52, %v3451_v43  ;;  %v3501_v2 = vadd.f32 %v3500_v26, %v3499_v59 }
 0x3d9   :  { %v3599_v47 = vadd.f32 %v3598_v12, %v2547_v11  ;;  %v3547_v62 = vadd.f32 %v3546_v16, %v3545_v14  ;;  %v3579_v51 = vadd.f32 %v3578_v54, %v14904_v48  ;;  %v3553_v8 = vadd.f32 %v3552_v41, %v3551_v56  ;;  %v18201_v48 = vld [vmem:[#allocation49_spill] sm:$0xff]  ;;  %v18203_v11 = vld [vmem:[#allocation35_spill] sm:$0xff]  ;;  %v18204_v16 = vld [vmem:[#allocation48_spill] sm:$0xff] }
 0x3da   :  { %1917 = vbcast.lane.b32.xlu1 %v18195_v7, 256  ;;  %v3595_v17 = vadd.f32 %v3594_v9, %v3593_v42  ;;  %v3459_v7 = vadd.f32 %v3458_v46, %v3457_v34  ;;  %v18197_v25 = vrot.slane %v14572_v36, %v11598_v45  ;;  %v18199_v37 = vrot.slane %v18198_v61, 7 }
 0x3db   :  { %1763 = vbcast.lane.b32.xlu0 %v18196_v3, 256  ;;  %v3600_v32 = vrot.slane %v3599_v47, 2  ;;  %v3537_v6 = vadd.f32 %v3536_v63, %v14908_v5  ;;  %v3584_v43 = vrot.slane %v3583_v53, 1  ;;  %v3542_v59 = vrot.slane %v3541_v22, 1  ;;  %v18205_v5 = vld [vmem:[#allocation16_spill] sm:$0xff] }
 0x3dc   :  { %v14964_v35 = vsel %vm6727_vm1, %v18199_v37, %v6622_v24  ;;  %v18200_v14 = vrot.slane %v14598_v57, %v11587_v40  ;;  %v5360_v54 = vmul.f32 %v18201_v48, %v3495_v21  ;;  %v3590_v34 = vrot.slane %v3589_v4, 1 }
 0x3dd   :  { %v3507_v0 = vadd.f32 %v3506_v13, %v3505_v23  ;;  %v3601_v56 = vadd.f32 %v3600_v32, %v3599_v47  ;;  %v5346_v39 = vmul.f32 %v18202_v10, %v3453_v20  ;;  %v5362_v52 = vmul.f32 %v18203_v11, %v3501_v2  ;;  %v18209_v2 = vld [vmem:[#allocation7_spill] sm:$0xff] }
 0x3de   :  { %1819 = vbcast.lane.b32.xlu1 %v18197_v25, 256  ;;  %v3548_v26 = vrot.slane %v3547_v62, 1  ;;  %v3596_v24 = vrot.slane %v3595_v17, 1  ;;  %v5388_v42 = vmul.f32 %v18204_v16, %v3579_v51  ;;  %v5348_v63 = vmul.f32 %v18205_v5, %v3459_v7  ;;  %v18208_v51 = vld [vmem:[#allocation20_spill] sm:$0xff] }
 0x3df   :  { %1868 = vbcast.lane.b32.xlu0 %v18200_v14, 256  ;;  %v3554_v46 = vrot.slane %v3553_v8, 1  ;;  %v3602_v41 = vrot.slane %v3601_v56, 1  ;;  %v18206_v12 = vrot.slane %v14613_v58, %v11587_v40  ;;  %v5736_v23 = vpack.c.bf16 %v14923_v60, %v14923_v60 }
 0x3e0   :  { %v5722_v32 = vpack.c.bf16 %v14931_v15, %v14931_v15  ;;  %v3585_v9 = vadd.f32 %v3584_v43, %v3583_v53  ;;  %v3543_v3 = vadd.f32 %v3542_v59, %v3541_v22  ;;  %v18207_v21 = vrot.slane %v14546_v38, %v11609_v50 }
 0x3e1   :  { %v5374_v13 = vmul.f32 %v18208_v51, %v3537_v6  ;;  %v5730_v47 = vpack.c.bf16 %v5360_v54, %v5360_v54  ;;  %v3591_v20 = vadd.f32 %v3590_v34, %v3589_v4  ;;  %v5364_v7 = vmul.f32 %v18209_v2, %v3507_v0  ;;  %v18211_v6 = vld [vmem:[#allocation6_spill] sm:$0xff]  ;;  %v18212_v4 = vld [vmem:[#allocation44_spill] sm:$0xff] }
 0x3e2   :  { %1924 = vbcast.lane.b32.xlu1 %v18206_v12, 256  ;;  %v5723_v25 = vpack.c.bf16 %v5346_v39, %v5346_v39  ;;  %v5731_v61 = vpack.c.bf16 %v5362_v52, %v5362_v52  ;;  %v3549_v37 = vadd.f32 %v3548_v26, %v3547_v62  ;;  %v3597_v14 = vadd.f32 %v3596_v24, %v3595_v17 }
 0x3e3   :  { %1770 = vbcast.lane.b32.xlu0 %v18207_v21, 256  ;;  %v5744_v60 = vpack.c.bf16 %v5388_v42, %v5388_v42  ;;  %v5724_v48 = vpack.c.bf16 %v5348_v63, %v5348_v63  ;;  %v3555_v10 = vadd.f32 %v3554_v46, %v3553_v8  ;;  %v3603_v15 = vadd.f32 %v3602_v41, %v3601_v56 }
 0x3e4   :  { %v18210_v53 = vrot.slane %v14572_v36, %v11609_v50  ;;  %v14990_v38 = vunpack.c.l.b16 %v5736_v23  ;;  %v6603_v22 = vunpack.c.l.b16 %v5722_v32  ;;  %v5390_v43 = vmul.f32 %v18211_v6, %v3585_v9  ;;  %v18214_v36 = vld [vmem:[#allocation53_spill] sm:$0xff]  ;;  %v18221_v6 = vld [vmem:[#allocation14_spill] sm:$0xff] }
 0x3e5   :  { %v5376_v59 = vmul.f32 %v18212_v4, %v3543_v3  ;;  %v18213_v54 = vrot.slane %v14598_v57, %v11598_v45  ;;  %v5737_v17 = vpack.c.bf16 %v5374_v13, %v5374_v13  ;;  %v6611_v62 = vunpack.c.l.b16 %v5730_v47  ;;  %v18223_v4 = vld [vmem:[#allocation15_spill] sm:$0xff] }
 0x3e6   :  { %1826 = vbcast.lane.b32.xlu1 %v18210_v53, 256  ;;  %v5392_v8 = vmul.f32 %v14773_v49, %v3591_v20  ;;  %v5732_v34 = vpack.c.bf16 %v5364_v7, %v5364_v7  ;;  %v6604_v0 = vunpack.c.l.b16 %v5723_v25  ;;  %v6612_v56 = vunpack.c.l.b16 %v5731_v61 }
 0x3e7   :  { %1875 = vbcast.lane.b32.xlu0 %v18213_v54, 256  ;;  %v5378_v39 = vmul.f32 %v18214_v36, %v3549_v37  ;;  %v5394_v11 = vmul.f32 %v14783_v55, %v3597_v14  ;;  %v6625_v52 = vunpack.c.l.b16 %v5744_v60  ;;  %v5380_v26 = vmul.f32 %v14779_v18, %v3555_v10  ;;  %v18226_v36 = vld [vmem:[#allocation13_spill] sm:$0xff] }
 0x3e8   :  { %v5396_v24 = vmul.f32 %v14796_v44, %v3603_v15  ;;  %v6605_v16 = vunpack.c.l.b16 %v5724_v48  ;;  %v18215_v42 = vrot.slane %v14613_v58, %v11598_v45  ;;  %v6989_v5 = vrot.slane %v14990_v38, 5 }
 0x3e9   :  { %v6965_v49 = vrot.slane %v6603_v22, 3  ;;  %v5745_v63 = vpack.c.bf16 %v5390_v43, %v5390_v43  ;;  %v5738_v46 = vpack.c.bf16 %v5376_v59, %v5376_v59  ;;  %v18216_v41 = vrot.slane %v14598_v57, %v11609_v50 }
 0x3ea   :  { %1931 = vbcast.lane.b32.xlu1 %v18215_v42, 256  ;;  %v6618_v55 = vunpack.c.l.b16 %v5737_v17  ;;  %v6979_v12 = vrot.slane %v6611_v62, 3  ;;  %v5746_v23 = vpack.c.bf16 %v5392_v8, %v5392_v8  ;;  %v6613_v18 = vunpack.c.l.b16 %v5732_v34  ;;  %v18224_v8 = vld [vmem:[#allocation4_spill] sm:$0xff] }
 0x3eb   :  { %1882 = vbcast.lane.b32.xlu0 %v18216_v41, 256  ;;  %v6967_v32 = vrot.slane %v6604_v0, 2  ;;  %v6981_v44 = vrot.slane %v6612_v56, 2  ;;  %v5739_v9 = vpack.c.bf16 %v5378_v39, %v5378_v39  ;;  %v5747_v3 = vpack.c.bf16 %v5394_v11, %v5394_v11 }
 0x3ec   :  { %v7003_v21 = vrot.slane %v6625_v52, 5  ;;  %v5740_v51 = vpack.c.bf16 %v5380_v26, %v5380_v26  ;;  %v5748_v13 = vpack.c.bf16 %v5396_v24, %v5396_v24  ;;  %v6969_v47 = vrot.slane %v6605_v16, 1  ;;  %v18227_v26 = vld [vmem:[#allocation10_spill] sm:$0xff] }
 0x3ed   :  { %v18217_v20 = vrot.slane %v14613_v58, %v11609_v50  ;;  %v6626_v2 = vunpack.c.l.b16 %v5745_v63  ;;  %v6619_v7 = vunpack.c.l.b16 %v5738_v46  ;;  %v18218_v57 = vrot.slane %v14856_v27, 4  ;;  %v18228_v24 = vld [vmem:[#allocation38_spill] sm:$0xff] }
 0x3ee   :  { %v18219_v61 = vrot.slane %v14918_v1, 4  ;;  %v18220_v14 = vrot.slane %v14468_v19, %v17985_v31  ;;  %v6627_v60 = vunpack.c.l.b16 %v5746_v23  ;;  %v6983_v10 = vrot.slane %v6613_v18, 1  ;;  %v18231_v18 = vld [vmem:[#allocation45_spill] sm:$0xff] }
 0x3ef   :  { %1938 = vbcast.lane.b32.xlu1 %v18217_v20, 256  ;;  %v6964_v25 = vsel %vm6736_vm4, %v18218_v57, %v14842_v33  ;;  %v6620_v15 = vunpack.c.l.b16 %v5739_v9  ;;  %v6628_v53 = vunpack.c.l.b16 %v5747_v3  ;;  %v6621_v38 = vunpack.c.l.b16 %v5740_v51  ;;  %v15063_v20 = vld [vmem:[%s17482_s0 + $0x280] sm:$0xff]  }
 0x3f0   :  { %v6978_v37 = vsel %vm6736_vm4, %v18219_v61, %v14877_v30  ;;  %1952 = vbcast.lane.b32.xlu0 %v18220_v14, 256  ;;  %v6966_v58 = vsel %vm6739_vm5, %v6965_v49, %v6964_v25  ;;  %v6629_v22 = vunpack.c.l.b16 %v5748_v13  ;;  %v18222_v43 = vrot.slane %v18221_v6, %v17985_v31  ;;  %v1729_v13 = vpop.permute.xlu0 %1728  ;;  %v15072_v61 = vld [vmem:[%s17482_s0 + $0x288] sm:$0xff]  }
 0x3f1   :  { %v6980_v48 = vsel %vm6739_vm5, %v6979_v12, %v6978_v37  ;;  %v6968_v27 = vsel %vm6742_vm6, %v6967_v32, %v6966_v58  ;;  %v7001_v59 = vrot.slane %v18223_v4, 6  ;;  %v6991_v54 = vrot.slane %v6618_v55, 4  ;;  %v15077_v37 = vld [vmem:[%s17482_s0 + $0x2a0] sm:$0xff]   ;;  %v15087_v58 = vld [vmem:[%s17482_s0 + $0x2a8] sm:$0xff]  }
 0x3f2   :  { %v6982_v33 = vsel %vm6742_vm6, %v6981_v44, %v6980_v48  ;;  %v6970_v1 = vsel %vm6745_vm7, %v6969_v47, %v6968_v27  ;;  %v7005_v17 = vrot.slane %v6626_v2, 4  ;;  %v18225_v34 = vrot.slane %v14468_v19, %v18224_v8  ;;  %v1785_v47 = vpop.permute.xlu1 %1784  ;;  %v18233_v2 = vld [vmem:[#allocation25_spill] sm:$0xff] }
 0x3f3   :  { %v6984_v30 = vsel %vm6745_vm7, %v6983_v10, %v6982_v33  ;;  %2008 = vbcast.lane.b32.xlu1 %v18222_v43, 256  ;;  %v6993_v0 = vrot.slane %v6619_v7, 3  ;;  %v7007_v56 = vrot.slane %v6627_v60, 3  ;;  %v2118_v39 = vrot.slane %v18226_v36, %v17985_v31  ;;  %v15082_v60 = vld [vmem:[%s17482_s0 + $0x2c0] sm:$0xff]   ;;  %v18234_v43 = vld [vmem:[#allocation26_spill] sm:$0xff] }
 0x3f4   :  { %v7189_v62 = vpack.c.b16 %v6984_v30, %v6970_v1  ;;  %1959 = vbcast.lane.b32.xlu0 %v18225_v34, 256  ;;  %v6995_v11 = vrot.slane %v6620_v15, 2  ;;  %v7009_v52 = vrot.slane %v6628_v53, 2  ;;  %v18229_v16 = vrot.slane %v18228_v24, 6  ;;  %v1736_v25 = vpop.permute.xlu0 %1735  ;;  %v15093_v10 = vld [vmem:[%s17482_s0 + $0x2e0] sm:$0xff]  }
 0x3f5   :  { %v7002_v49 = vsel %vm6730_vm2, %v7001_v59, %v14964_v35  ;;  %v6997_v19 = vrot.slane %v6621_v38, 1  ;;  %v7011_v41 = vrot.slane %v6629_v22, 1  ;;  %v18230_v55 = vrot.slane %v18221_v6, %v18224_v8  ;;  %v15104_v6 = vld [vmem:[%s17479_s1 + $0xe0] sm:$0xff] }
 0x3f6   :  { %10399 = vmatprep.mubr.bf16.mxu0 %v7189_v62  ;;  %v6988_v42 = vsel %vm6730_vm2, %v18229_v16, %v18227_v26  ;;  %v7004_v46 = vsel %vm6733_vm3, %v7003_v21, %v7002_v49  ;;  %v18232_v32 = vrot.slane %v18231_v18, %v17985_v31  ;;  %v15066_v7 = vmax.f32 %v18233_v2, 1.0  ;;  %v1792_v14 = vpop.permute.xlu1 %1791 }
 0x3f7   :  { %v6990_v63 = vsel %vm6733_vm3, %v6989_v5, %v6988_v42  ;;  %2015 = vbcast.lane.b32.xlu1 %v18230_v55, 256  ;;  %v7006_v23 = vsel %vm6736_vm4, %v7005_v17, %v7004_v46  ;;  %v9859_v57 = vunpack.c.h.bf16 %v15063_v20  ;;  %v9862_v48 = vunpack.c.l.bf16 %v15072_v61  ;;  %v15121_v55 = vld [vmem:[%s17479_s1 + $0xe8] sm:$0xff] }
 0x3f8   :  { %v6992_v12 = vsel %vm6736_vm4, %v6991_v54, %v6990_v63  ;;  %2064 = vbcast.lane.b32.xlu0 %v18232_v32, 256  ;;  %v7008_v5 = vsel %vm6739_vm5, %v7007_v56, %v7006_v23  ;;  %v4737_v15 = vrot.slane %v15066_v7, 1  ;;  %v9875_v27 = vunpack.c.h.bf16 %v15077_v37  ;;  %v1841_v38 = vpop.permute.xlu0 %1840  ;;  %18235 = vst [vmem:[#allocation3_spill] sm:$0xff] %v15121_v55 }
 0x3f9   :  { %v6994_v35 = vsel %vm6739_vm5, %v6993_v0, %v6992_v12  ;;  %v7010_v9 = vsel %vm6742_vm6, %v7009_v52, %v7008_v5  ;;  %v2549_v53 = vmul.f32 %v9859_v57, %v1729_v13  ;;  %v9891_v33 = vunpack.c.h.bf16 %v15082_v60  ;;  %v18236_v13 = vld [vmem:[#allocation47_spill] sm:$0xff] }
 0x3fa   :  { %v6996_v44 = vsel %vm6742_vm6, %v6995_v11, %v6994_v35  ;;  %v7012_v21 = vsel %vm6745_vm7, %v7011_v41, %v7010_v9  ;;  %v9878_v1 = vunpack.c.l.bf16 %v15087_v58  ;;  %v4738_v30 = vrot.slane %v15066_v7, 2  ;;  %v1897_v54 = vpop.permute.xlu1 %1896 }
 0x3fb   :  { %v6998_v3 = vsel %vm6745_vm7, %v6997_v19, %v6996_v44  ;;  %2120 = vbcast.lane.b32.xlu1 %v2118_v39, 256  ;;  %v9907_v22 = vunpack.c.h.bf16 %v15093_v10  ;;  %v15107_v4 = vmax.f32 %v18234_v43, 1.0  ;;  %v2550_v59 = vmul.f32 %v9862_v48, %v1736_v25  ;;  %v18237_v25 = vld [vmem:[#allocation43_spill] sm:$0xff] }
 0x3fc   :  { %v7190_v51 = vpack.c.b16 %v7012_v21, %v6998_v3  ;;  %11152 = vrcp.f32 %v15066_v7  ;;  %v4739_v17 = vrot.slane %v15066_v7, 3  ;;  %v3610_v62 = vrot.slane %v2549_v53, 4 }
 0x3fd   :  { %11154 = vrcp.f32 %v4737_v15  ;;  %v2557_v34 = vmul.f32 %v9875_v27, %v1785_v47  ;;  %v4740_v0 = vrot.slane %v15066_v7, 4  ;;  %v2565_v56 = vmul.f32 %v9891_v33, %v1841_v38 }
 0x3fe   :  { %10400 = vmatmul.mubr.bf16.gmra.mrb[16].mxu0 %v7190_v51  ;;  %v2558_v36 = vmul.f32 %v9878_v1, %v1792_v14  ;;  %v4521_v39 = vsel %vm4436_vm0, %v15104_v6, 0.0  ;;  %v4741_v11 = vrot.slane %v15066_v7, 5  ;;  %11156 = vrcp.f32 %v4738_v30 }
 0x3ff   :  { %v2573_v52 = vmul.f32 %v9907_v22, %v1897_v54  ;;  %v4742_v26 = vrot.slane %v15066_v7, 6  ;;  %v3616_v24 = vrot.slane %v2550_v59, 4  ;;  %v4744_v16 = vrot.slane %v15107_v4, 1 }
 0x400   :  { %11158 = vrcp.f32 %v4739_v17  ;;  %v3611_v42 = vadd.f32 %v3610_v62, %v2549_v53  ;;  %v3658_v49 = vrot.slane %v2557_v34, 4  ;;  %v4745_v63 = vrot.slane %v15107_v4, 2 }
 0x401   :  { %11160 = vrcp.f32 %v4740_v0  ;;  %v3706_v19 = vrot.slane %v2565_v56, 4  ;;  %v3664_v46 = vrot.slane %v2558_v36, 4  ;;  %v3754_v41 = vrot.slane %v2573_v52, 4  ;;  %v15140_v15 = vpop.xlane.xlu0 %4510 }
 0x402   :  { %11162 = vrcp.f32 %v4741_v11  ;;  %v3617_v12 = vadd.f32 %v3616_v24, %v2550_v59  ;;  %v4746_v23 = vrot.slane %v15107_v4, 3  ;;  %v3612_v18 = vrot.slane %v3611_v42, 2 }
 0x403   :  { %11164 = vrcp.f32 %v4742_v26  ;;  %v3659_v32 = vadd.f32 %v3658_v49, %v2557_v34  ;;  %v4747_v35 = vrot.slane %v15107_v4, 4  ;;  %v3707_v44 = vadd.f32 %v3706_v19, %v2565_v56 }
 0x404   :  { %11166 = vrcp.f32 %v4744_v16  ;;  %v3665_v9 = vadd.f32 %v3664_v46, %v2558_v36  ;;  %v4524_v3 = vsel %vm4436_vm0, %v15121_v55, 0.0  ;;  %v4748_v21 = vrot.slane %v15107_v4, 5 }
 0x405   :  { %11168 = vrcp.f32 %v4745_v63  ;;  %v15133_v47 = vmax.f32 %v18236_v13, 1.0  ;;  %v3755_v2 = vadd.f32 %v3754_v41, %v2573_v52  ;;  %v4749_v57 = vrot.slane %v15107_v4, 6  ;;  %v1722_v26 = vpop.permute.xlu0 %1721 }
 0x406   :  { %v15125_v5 = vpop.eup %11152  ;;  %11170 = vrcp.f32 %v15107_v4  ;;  %v15138_v14 = vmax.f32 %v18237_v25, 1.0  ;;  %v3618_v48 = vrot.slane %v3617_v12, 2  ;;  %v4743_v53 = vrot.slane %v15066_v7, 7  ;;  %v15186_v25 = vld [vmem:[%s17479_s1 + $0xc0] sm:$0xff] }
 0x407   :  { %v15130_v51 = vpop.eup %11154  ;;  %11172 = vrcp.f32 %v4746_v23  ;;  %v3613_v33 = vadd.f32 %v3612_v18, %v3611_v42  ;;  %v3660_v1 = vrot.slane %v3659_v32, 2  ;;  %v4750_v30 = vrot.slane %v15107_v4, 7  ;;  %v15172_v18 = vld [vmem:[%s17482_s0 + $0x2c8] sm:$0xff]  }
 0x408   :  { %v15143_v27 = vpop.eup %11156  ;;  %11174 = vrcp.f32 %v4747_v35  ;;  %v3708_v22 = vrot.slane %v3707_v44, 2  ;;  %v3666_v43 = vrot.slane %v3665_v9, 2  ;;  %v4751_v54 = vrot.slane %v15133_v47, 1 }
 0x409   :  { %11176 = vrcp.f32 %v4748_v21  ;;  %v3756_v17 = vrot.slane %v3755_v2, 2  ;;  %v3619_v62 = vadd.f32 %v3618_v48, %v3617_v12  ;;  %v4758_v34 = vrot.slane %v15138_v14, 1 }
 0x40a   :  { %v15146_v38 = vpop.eup %11158  ;;  %11178 = vrcp.f32 %v4749_v57  ;;  %v3614_v4 = vrot.slane %v3613_v33, 1  ;;  %v3661_v56 = vadd.f32 %v3660_v1, %v3659_v32  ;;  %v9858_v36 = vunpack.c.l.bf16 %v15063_v20  ;;  %v15181_v57 = vpop.xlane.xlu1 %4513 }
 0x40b   :  { %v15148_v59 = vpop.eup %11160  ;;  %11180 = vrcp.f32 %v4743_v53  ;;  %v3709_v11 = vadd.f32 %v3708_v22, %v3707_v44  ;;  %v3667_v52 = vadd.f32 %v3666_v43, %v3665_v9  ;;  %v4752_v24 = vrot.slane %v15133_v47, 2  ;;  %v1778_v1 = vpop.permute.xlu0 %1777  ;;  %v15197_v43 = vld [vmem:[%s17482_s0 + $0x2e8] sm:$0xff]   ;;  %v18245_v22 = vld [vmem:[#allocation19_spill] sm:$0xff] }
 0x40c   :  { %v15151_v7 = vpop.eup %11162  ;;  %11182 = vrcp.f32 %v4750_v30  ;;  %v3757_v42 = vadd.f32 %v3756_v17, %v3755_v2  ;;  %v9874_v49 = vunpack.c.l.bf16 %v15077_v37  ;;  %v4753_v63 = vrot.slane %v15133_v47, 3 }
 0x40d   :  { %18238 = vst [vmem:[#allocation52_spill] sm:$0xff] %v15151_v7  ;;  %v15154_v0 = vpop.eup %11164  ;;  %11184 = vrcp.f32 %v15133_v47  ;;  %v3620_v19 = vrot.slane %v3619_v62, 1  ;;  %v4754_v46 = vrot.slane %v15133_v47, 4  ;;  %v3615_v12 = vadd.f32 %v3614_v4, %v3613_v33 }
 0x40e   :  { %18239 = vst [vmem:[#allocation50_spill] sm:$0xff] %v15154_v0  ;;  %11186 = vrcp.f32 %v4751_v54  ;;  %v3662_v23 = vrot.slane %v3661_v56, 1  ;;  %v4755_v32 = vrot.slane %v15133_v47, 5  ;;  %v4756_v37 = vrot.slane %v15133_v47, 6 }
 0x40f   :  { %11188 = vrcp.f32 %v4758_v34  ;;  %v3710_v44 = vrot.slane %v3709_v11, 1  ;;  %v3668_v9 = vrot.slane %v3667_v52, 1  ;;  %v3758_v13 = vrot.slane %v3757_v42, 1 }
 0x410   :  { %11190 = vrcp.f32 %v4752_v24  ;;  %v2548_v2 = vmul.f32 %v9858_v36, %v1722_v26  ;;  %v1943_v48 = vrot.slane %v15186_v25, %v17861_v29  ;;  %v3621_v33 = vadd.f32 %v3620_v19, %v3619_v62 }
 0x411   :  { %11192 = vrcp.f32 %v4753_v63  ;;  %v9894_v30 = vunpack.c.l.bf16 %v15172_v18  ;;  %v15202_v17 = vmul.f32 %v15130_v51, %v3615_v12  ;;  %v3663_v34 = vadd.f32 %v3662_v23, %v3661_v56  ;;  %v15215_v51 = vld [vmem:[%s17479_s1 + $0xc8] sm:$0xff] }
 0x412   :  { %11194 = vrcp.f32 %v4754_v46  ;;  %v4759_v4 = vrot.slane %v15138_v14, 2  ;;  %v3711_v36 = vadd.f32 %v3710_v44, %v3709_v11  ;;  %v3669_v26 = vadd.f32 %v3668_v9, %v3667_v52  ;;  %v1743_v9 = vpop.permute.xlu1 %1742 }
 0x413   :  { %11196 = vrcp.f32 %v4755_v32  ;;  %v1964_v24 = vrot.slane %v15186_v25, %v18001_v28  ;;  %v3759_v19 = vadd.f32 %v3758_v13, %v3757_v42  ;;  %v3604_v46 = vrot.slane %v2548_v2, 4 }
 0x414   :  { %v1999_v56 = vrot.slane %v15215_v51, %v17861_v29  ;;  %v5402_v52 = vmul.f32 %v15143_v27, %v3621_v33  ;;  %v5750_v32 = vpack.c.bf16 %v15202_v17, %v15202_v17  ;;  %v2556_v44 = vmul.f32 %v9874_v49, %v1778_v1  ;;  %v1848_v33 = vpop.permute.xlu0 %1847  ;;  %v15236_v1 = vld [vmem:[%s17479_s1 + $0xd0] sm:$0xff] }
 0x415   :  { %v2020_v12 = vrot.slane %v15215_v51, %v18001_v28  ;;  %v3605_v17 = vadd.f32 %v3604_v46, %v2548_v2  ;;  %v11371_v2 = vld [vmem:[%s17487_s7] ss:$0 sm:$0xff] }
 0x417   :  { %4522 = vadd.xlane.f32.xlu0 %v4521_v39  ;;  %v15157_v39 = vpop.eup %11166  ;;  %11198 = vrcp.f32 %v4756_v37 }
 0x418   :  { %v15161_v16 = vpop.eup %11168  ;;  %11200 = vrcp.f32 %v15138_v14  ;;  %v5416_v37 = vmul.f32 %v15157_v39, %v3663_v34  ;;  %v5751_v34 = vpack.c.bf16 %v5402_v52, %v5402_v52 }
 0x419   :  { %v15167_v41 = vpop.eup %11170  ;;  %11202 = vrcp.f32 %v4759_v4  ;;  %v5418_v27 = vmul.f32 %v15161_v16, %v3669_v26  ;;  %v2069_v16 = vrot.slane %v15236_v1, %v18224_v8  ;;  %v18247_v4 = vunpack.c.h.bf16 %v15072_v61  ;;  %v18248_v26 = vld [vmem:[#allocation22_spill] sm:$0xff] }
 0x41a   :  { %v15176_v35 = vpop.eup %11172  ;;  %v5758_v52 = vpack.c.bf16 %v5416_v37, %v5416_v37 }
 0x41b   :  { %v15179_v21 = vpop.eup %11174 }
 0x41c   :  { %18240 = vst [vmem:[#allocation42_spill] sm:$0xff] %v15179_v21  ;;  %v15190_v53 = vpop.eup %11176 }
 0x41d   :  { %18241 = vst [vmem:[#allocation5_spill] sm:$0xff] %v15190_v53  ;;  %v15199_v54 = vpop.eup %11178 }
 0x41e   :  { %18242 = vst [vmem:[#allocation49_spill] sm:$0xff] %v15199_v54  ;;  %v15205_v62 = vpop.eup %11180 }
 0x41f   :  { %4525 = vadd.xlane.f32.xlu1 %v4524_v3  ;;  %18243 = vst [vmem:[#allocation27_spill] sm:$0xff] %v15205_v62  ;;  %v15209_v63 = vpop.eup %11182  ;;  %v18246_v62 = vld [vmem:[#allocation37_spill] sm:$0xff] }
 0x420   :  { %18244 = vst [vmem:[#allocation35_spill] sm:$0xff] %v15209_v63  ;;  %v15219_v11 = vpop.eup %11184 }
 0x421   :  { %v11187_v23 = vpop.eup %11186 }
 0x422   :  { %v5432_v3 = vmul.f32 %v11187_v23, %v3711_v36  ;;  %v2551_v36 = vmul.f32 %v18247_v4, %v1743_v9 }
 0x424   :  { %v5766_v61 = vpack.c.bf16 %v5432_v3, %v5432_v3  ;;  %v15264_v3 = vunpack.c.l.b16 %v5750_v32 }
 0x42d   :  { %1945 = vbcast.lane.b32.xlu0 %v1943_v48, 256  ;;  %v11189_v48 = vpop.eup %11188 }
 0x42e   :  { %v10397_v13 = vpop.f32.mrb[12].mxu0  ;;  %v5448_v63 = vmul.f32 %v11189_v48, %v3759_v19 }
 0x42f   :  { %v7352_v20 = vadd.f32 %v10397_v13, %v18245_v22  ;;  %v7343_v42 = vpop.f32.mrb[13].mxu0  ;;  %v15240_v22 = vpop.eup %11190  ;;  %v18250_v13 = vld [vmem:[#allocation17_spill] sm:$0xff] }
 0x430   :  { %1966 = vbcast.lane.b32.xlu1 %v1964_v24, 256  ;;  %v7344_v39 = vadd.f32 %v7343_v42, %v18246_v62  ;;  %v10398_v49 = vpop.f32.mrb[14].mxu0  ;;  %v15248_v46 = vpop.eup %11192  ;;  %v2566_v42 = vmul.f32 %v9894_v30, %v1848_v33  ;;  %v5759_v30 = vpack.c.bf16 %v5418_v27, %v5418_v27  ;;  %v5774_v33 = vpack.c.bf16 %v5448_v63, %v5448_v63 }
 0x431   :  { %2001 = vbcast.lane.b32.xlu0 %v1999_v56, 256  ;;  %v7443_v62 = vadd.f32 %v11371_v2, %v7352_v20  ;;  %v7355_v24 = vadd.f32 %v10398_v49, %v18248_v26  ;;  %v7346_v19 = vpop.f32.mrb[15].mxu0  ;;  %18249 = vst [vmem:[#allocation48_spill] sm:$0xff] %v15248_v46  ;;  %v3652_v56 = vrot.slane %v2556_v44, 4  ;;  %v15251_v54 = vpop.eup %11194  ;;  %v15256_v20 = vld [vmem:[%s17479_s1 + $0xd8] sm:$0xff]  ;;  %v15268_v46 = vunpack.c.l.b16 %v5751_v34 }
 0x432   :  { %v7441_v23 = vadd.f32 %v11371_v2, %v7344_v39  ;;  %v7347_v48 = vadd.f32 %v7346_v19, %v18250_v13  ;;  %18251 = vst [vmem:[#allocation16_spill] sm:$0xff] %v15251_v54  ;;  %v2125_v49 = vrot.slane %v15256_v20, %v18224_v8  ;;  %v15260_v4 = vpop.eup %11196  ;;  %v3606_v39 = vrot.slane %v3605_v17, 2 }
 0x433   :  { %v7444_v9 = vadd.f32 %v11371_v2, %v7355_v24  ;;  %18252 = vst [vmem:[#allocation20_spill] sm:$0xff] %v15260_v4  ;;  %v15262_v19 = vpop.eup %11198  ;;  %v7475_v37 = vmax.f32 %v7443_v62, 0.0  ;;  %v3653_v13 = vadd.f32 %v3652_v56, %v2556_v44  ;;  %v3712_v54 = vrot.slane %v2566_v42, 4  ;;  %v1799_v56 = vpop.permute.xlu1 %1798 }
 0x434   :  { %2022 = vbcast.lane.b32.xlu1 %v2020_v12, 256  ;;  %v7442_v26 = vadd.f32 %v11371_v2, %v7347_v48  ;;  %18253 = vst [vmem:[#allocation7_spill] sm:$0xff] %v15262_v19  ;;  %v3622_v12 = vrot.slane %v2551_v36, 4  ;;  %v7473_v0 = vmax.f32 %v7441_v23, 0.0  ;;  %v15266_v7 = vpop.eup %11200  ;;  %v15270_v27 = vunpack.c.l.b16 %v5758_v52 }
 0x435   :  { %2071 = vbcast.lane.b32.xlu0 %v2069_v16, 256  ;;  %v7476_v24 = vmax.f32 %v7444_v9, 0.0  ;;  %18254 = vst [vmem:[#allocation6_spill] sm:$0xff] %v15266_v7  ;;  %v15272_v63 = vunpack.c.l.b16 %v5766_v61  ;;  %v15274_v2 = vpop.eup %11202  ;;  %v15276_v32 = vunpack.c.l.b16 %v5759_v30  ;;  %v15278_v62 = vunpack.c.l.b16 %v5774_v33 }
 0x436   :  { %v7474_v53 = vmax.f32 %v7442_v26, 0.0  ;;  %v3607_v44 = vadd.f32 %v3606_v39, %v3605_v17  ;;  %v3623_v48 = vadd.f32 %v3622_v12, %v2551_v36  ;;  %v18257_v9 = vrot.slane %v15138_v14, 3  ;;  %v15347_v36 = vld [vmem:[%s17482_s0 + $0x2b8] sm:$0xff]  }
 0x437   :  { %18255 = vst [vmem:[#allocation44_spill] sm:$0xff] %v15272_v63  ;;  %v7532_v16 = vpack.c.bf16 %v7476_v24, %v7475_v37  ;;  %18256 = vst [vmem:[#allocation53_spill] sm:$0xff] %v15278_v62  ;;  %v4762_v34 = vrot.slane %v15138_v14, 5  ;;  %v3654_v61 = vrot.slane %v3653_v13, 2  ;;  %v3713_v26 = vadd.f32 %v3712_v54, %v2566_v42  ;;  %v1904_v33 = vpop.permute.xlu1 %1903 }
 0x438   :  { %2127 = vbcast.lane.b32.xlu1 %v2125_v49, 256  ;;  %v7531_v23 = vpack.c.bf16 %v7474_v53, %v7473_v0  ;;  %11204 = vrcp.f32 %v18257_v9  ;;  %v15287_v49 = vld [vmem:[%s17482_s0 + $0x290] sm:$0xff]   ;;  %v18258_v53 = vrot.slane %v15138_v14, 4  ;;  %v4764_v17 = vrot.slane %v15138_v14, 7 }
 0x439   :  { %v15292_v0 = vld [vmem:[%s17482_s0 + $0x2b0] sm:$0xff]   ;;  %v3608_v12 = vrot.slane %v3607_v44, 1  ;;  %v18259_v37 = vunpack.c.h.bf16 %v15087_v58  ;;  %v9890_v30 = vunpack.c.l.bf16 %v15082_v60  ;;  %v15321_v58 = vld [vmem:[%s17482_s0 + $0x298] sm:$0xff]   ;;  %v18264_v4 = vunpack.c.l.bf16 %v15197_v43 }
 0x43a   :  { %10491 = vmatprep.mubr.bf16.mxu1 %v7531_v23  ;;  %11206 = vrcp.f32 %v18258_v53  ;;  %v15308_v23 = vld [vmem:[%s17482_s0 + $0x2d0] sm:$0xff]   ;;  %v3624_v53 = vrot.slane %v3623_v48, 2 }
 0x43b   :  { %10492 = vmatmul.mubr.bf16.gmra.mrb[44].mxu1 %v7532_v16  ;;  %v2559_v24 = vmul.f32 %v18259_v37, %v1799_v56  ;;  %v15313_v9 = vld [vmem:[%s17479_s1 + $0xf0] sm:$0xff]  ;;  %v9866_v16 = vunpack.c.l.bf16 %v15287_v49  ;;  %v3655_v56 = vadd.f32 %v3654_v61, %v3653_v13  ;;  %v3714_v37 = vrot.slane %v3713_v26, 2  ;;  %v15342_v61 = vld [vmem:[%s17479_s1 + $0xf8] sm:$0xff] }
 0x43c   :  { %18260 = vst [vmem:[#allocation14_spill] sm:$0xff] %v15313_v9  ;;  %v15330_v60 = vld [vmem:[%s17482_s0 + $0x2f0] sm:$0xff]   ;;  %v15337_v13 = vsel %vm4436_vm0, %v15313_v9, 0.0  ;;  %18263 = vst [vmem:[#allocation10_spill] sm:$0xff] %v15342_v61  ;;  %v3609_v54 = vadd.f32 %v3608_v12, %v3607_v44  ;;  %v2574_v62 = vmul.f32 %v18264_v4, %v1904_v33  ;;  %v15357_v8 = vsel %vm4436_vm0, %v15342_v61, 0.0 }
 0x43d   :  { %18262 = vst [vmem:[#allocation13_spill] sm:$0xff] %v15330_v60  ;;  %v3670_v39 = vrot.slane %v2559_v24, 4  ;;  %v3656_v21 = vrot.slane %v3655_v56, 1  ;;  %v3715_v9 = vadd.f32 %v3714_v37, %v3713_v26  ;;  %v15368_v4 = vmax.f32 %v15140_v15, 1.0 }
 0x43e   :  { %v15323_v42 = vpop.xlane.xlu0 %4516  ;;  %11208 = vrcp.f32 %v4762_v34  ;;  %v5398_v37 = vmul.f32 %v15125_v5, %v3609_v54  ;;  %v18268_v44 = vrot.slane %v15133_v47, 7  ;;  %v3760_v52 = vrot.slane %v2574_v62, 4 }
 0x43f   :  { %18261 = vst [vmem:[#allocation15_spill] sm:$0xff] %v15323_v42  ;;  %v3625_v42 = vadd.f32 %v3624_v53, %v3623_v48  ;;  %v15363_v48 = vld [vmem:[%s17482_s0 + $0x2d8] sm:$0xff]   ;;  %18266 = vst [vmem:[#allocation45_spill] sm:$0xff] %v15368_v4  ;;  %v3671_v7 = vadd.f32 %v3670_v39, %v2559_v24  ;;  %v18269_v15 = vrot.slane %v15138_v14, 6  ;;  %v4765_v54 = vrot.slane %v15368_v4, 1 }
 0x440   :  { %11210 = vrcp.f32 %v18268_v44  ;;  %v4766_v47 = vrot.slane %v15368_v4, 2  ;;  %v5749_v39 = vpack.c.bf16 %v5398_v37, %v5398_v37  ;;  %v15392_v37 = vld [vmem:[%s17482_s0 + $0x2f8] sm:$0xff]   ;;  %v15444_v44 = vld [vmem:[%s17482_s0 + $0x328] sm:$0xff]  }
 0x441   :  { %v3626_v19 = vrot.slane %v3625_v42, 1  ;;  %11212 = vrcp.f32 %v18269_v15  ;;  %v3672_v24 = vrot.slane %v3671_v7, 2  ;;  %18271 = vst [vmem:[#allocation47_spill] sm:$0xff] %v15392_v37  ;;  %18283 = vst [vmem:[#allocation57_spill] sm:$0xff] %v15444_v44 }
 0x442   :  { %v1750_v55 = vpop.permute.xlu0 %1749  ;;  %v15365_v12 = vpop.eup %11204  ;;  %11214 = vrcp.f32 %v4764_v17 }
 0x443   :  { %18265 = vst [vmem:[#allocation38_spill] sm:$0xff] %v15365_v12  ;;  %v2552_v33 = vmul.f32 %v9866_v16, %v1750_v55  ;;  %v3657_v55 = vadd.f32 %v3656_v21, %v3655_v56  ;;  %v3716_v16 = vrot.slane %v3715_v9, 1  ;;  %11216 = vrcp.f32 %v15368_v4 }
 0x444   :  { %v15371_v53 = vpop.eup %11206  ;;  %v3627_v21 = vadd.f32 %v3626_v19, %v3625_v42  ;;  %v3761_v56 = vadd.f32 %v3760_v52, %v2574_v62  ;;  %v18272_v19 = vunpack.c.l.bf16 %v15292_v0  ;;  %11218 = vrcp.f32 %v4765_v54 }
 0x445   :  { %18267 = vst [vmem:[#allocation25_spill] sm:$0xff] %v15371_v53  ;;  %v3628_v34 = vrot.slane %v2552_v33, 4  ;;  %v5414_v17 = vmul.f32 %v15167_v41, %v3657_v55  ;;  %v6630_v41 = vunpack.c.l.b16 %v5749_v39  ;;  %11220 = vrcp.f32 %v4766_v47  ;;  %v15424_v47 = vld [vmem:[%s17482_s0 + $0x320] sm:$0xff]  }
 0x446   :  { %v15380_v26 = vpop.xlane.xlu1 %4519  ;;  %v1834_v53 = vpop.permute.xlu0 %1833 }
 0x447   :  { %18270 = vst [vmem:[#allocation26_spill] sm:$0xff] %v15380_v26  ;;  %v2564_v5 = vmul.f32 %v9890_v30, %v1834_v53  ;;  %v3717_v30 = vadd.f32 %v3716_v16, %v3715_v9  ;;  %v3629_v53 = vadd.f32 %v3628_v34, %v2552_v33  ;;  %v3673_v9 = vadd.f32 %v3672_v24, %v3671_v7  ;;  %v15404_v16 = vld [vmem:[%s17482_s0 + $0x300] sm:$0xff]   ;;  %v15413_v7 = vld [vmem:[%s17482_s0 + $0x308] sm:$0xff]  }
 0x448   :  { %v18273_v33 = vunpack.c.l.bf16 %v15093_v10  ;;  %18274 = vst [vmem:[#allocation43_spill] sm:$0xff] %v15404_v16  ;;  %v15406_v34 = vpop.eup %11208  ;;  %18276 = vst [vmem:[#allocation37_spill] sm:$0xff] %v15413_v7  ;;  %v5757_v54 = vpack.c.bf16 %v5414_v17, %v5414_v17  ;;  %v18293_v16 = vrot.slane %v15276_v32, 6 }
 0x449   :  { %v3700_v15 = vrot.slane %v2564_v5, 4  ;;  %18275 = vst [vmem:[#allocation19_spill] sm:$0xff] %v15406_v34  ;;  %v5434_v39 = vmul.f32 %v15240_v22, %v3717_v30  ;;  %v3630_v24 = vrot.slane %v3629_v53, 2  ;;  %v15433_v22 = vld [vmem:[%s17482_s0 + $0x340] sm:$0xff]   ;;  %v18282_v30 = vrot.slane %v15264_v3, 7 }
 0x44a   :  { %v1806_v63 = vpop.permute.xlu1 %1805  ;;  %v1890_v26 = vpop.permute.xlu0 %1889  ;;  %18280 = vst [vmem:[#allocation55_spill] sm:$0xff] %v15433_v22  ;;  %v3674_v14 = vrot.slane %v3673_v9, 1 }
 0x44b   :  { %v3701_v60 = vadd.f32 %v3700_v15, %v2564_v5  ;;  %v2560_v62 = vmul.f32 %v18272_v19, %v1806_v63  ;;  %v2572_v55 = vmul.f32 %v18273_v33, %v1890_v26  ;;  %v5404_v5 = vmul.f32 %v15146_v38, %v3627_v21  ;;  %v15415_v10 = vpop.eup %11210 }
 0x44c   :  { %v3762_v63 = vrot.slane %v3761_v56, 2  ;;  %18277 = vst [vmem:[#allocation22_spill] sm:$0xff] %v15415_v10  ;;  %v15418_v26 = vmax.f32 %v15181_v57, 1.0  ;;  %v15426_v21 = vpop.eup %11212  ;;  %v7014_v12 = vsel %vm6727_vm1, %v18282_v30, %v6630_v41  ;;  %v6638_v10 = vunpack.c.l.b16 %v5757_v54 }
 0x44d   :  { %18279 = vst [vmem:[#allocation54_spill] sm:$0xff] %v15426_v21  ;;  %v3702_v33 = vrot.slane %v3701_v60, 2  ;;  %v3676_v42 = vrot.slane %v2560_v62, 4  ;;  %v15435_v17 = vpop.eup %11214  ;;  %v3748_v15 = vrot.slane %v2572_v55, 4  ;;  %v5767_v41 = vpack.c.bf16 %v5434_v39, %v5434_v39 }
 0x44e   :  { %18278 = vst [vmem:[#allocation17_spill] sm:$0xff] %v15418_v26  ;;  %v1855_v19 = vpop.permute.xlu1 %1854  ;;  %v1757_v38 = vpop.permute.xlu0 %1756  ;;  %18281 = vst [vmem:[#allocation56_spill] sm:$0xff] %v15435_v17  ;;  %v5752_v26 = vpack.c.bf16 %v5404_v5, %v5404_v5  ;;  %v3763_v4 = vadd.f32 %v3762_v63, %v3761_v56  ;;  %v18285_v17 = vld [vmem:[#allocation9_spill] sm:$0xff]  ;;  %v3631_v30 = vadd.f32 %v3630_v24, %v3629_v53  ;;  %v15457_v56 = vld [vmem:[%s17482_s0 + $0x360] sm:$0xff]   ;;  %v18287_v5 = vrot.slane %v15268_v46, 6 }
 0x44f   :  { %v15446_v57 = vpop.eup %11216  ;;  %v1971_v3 = vrot.slane %v15186_v25, %v18285_v17  ;;  %v3703_v7 = vadd.f32 %v3702_v33, %v3701_v60  ;;  %v3677_v34 = vadd.f32 %v3676_v42, %v2560_v62  ;;  %18286 = vst [vmem:[#allocation59_spill] sm:$0xff] %v15457_v56  ;;  %v3675_v53 = vadd.f32 %v3674_v14, %v3673_v9 }
 0x450   :  { %18284 = vst [vmem:[#allocation58_spill] sm:$0xff] %v15446_v57  ;;  %v7016_v63 = vsel %vm6730_vm2, %v18287_v5, %v7014_v12  ;;  %v3749_v54 = vadd.f32 %v3748_v15, %v2572_v55  ;;  %v18288_v39 = vunpack.c.h.bf16 %v15172_v18  ;;  %v3764_v42 = vrot.slane %v3763_v4, 1  ;;  %v15470_v52 = vpop.eup %11218 }
 0x451   :  { %v18289_v24 = vunpack.c.h.bf16 %v15287_v49  ;;  %18290 = vst [vmem:[#allocation60_spill] sm:$0xff] %v15470_v52  ;;  %v18291_v46 = vrot.slane %v15270_v27, 7  ;;  %v15475_v14 = vunpack.c.l.b16 %v5767_v41  ;;  %v3632_v18 = vrot.slane %v3631_v30, 1  ;;  %v15480_v15 = vpop.eup %11220 }
 0x452   :  { %v1911_v21 = vpop.permute.xlu1 %1910  ;;  %v1862_v37 = vpop.permute.xlu0 %1861  ;;  %v2567_v60 = vmul.f32 %v18288_v39, %v1855_v19  ;;  %18292 = vst [vmem:[#allocation61_spill] sm:$0xff] %v15480_v15  ;;  %v3704_v49 = vrot.slane %v3703_v7, 1  ;;  %v5420_v27 = vmul.f32 %v15176_v35, %v3675_v53  ;;  %v18304_v35 = vld [vmem:[#allocation6_spill] sm:$0xff] }
 0x453   :  { %v2553_v33 = vmul.f32 %v18289_v24, %v1757_v38  ;;  %v7028_v12 = vsel %vm6727_vm1, %v18291_v46, %v6638_v10  ;;  %v3750_v10 = vrot.slane %v3749_v54, 2  ;;  %v3765_v24 = vadd.f32 %v3764_v42, %v3763_v4  ;;  %v18296_v4 = vld [vmem:[#allocation4_spill] sm:$0xff] }
 0x454   :  { %4528 = vadd.xlane.f32.xlu0 %v15337_v13  ;;  %v6633_v13 = vunpack.c.l.b16 %v5752_v26  ;;  %v3678_v26 = vrot.slane %v3677_v34, 2  ;;  %v3718_v41 = vrot.slane %v2567_v60, 4  ;;  %v15492_v62 = vsel %vm6730_vm2, %v18293_v16, %v7028_v12 }
 0x455   :  { %v3634_v46 = vrot.slane %v2553_v33, 4  ;;  %v3633_v57 = vadd.f32 %v3632_v18, %v3631_v30  ;;  %v3705_v38 = vadd.f32 %v3704_v49, %v3703_v7  ;;  %v5760_v16 = vpack.c.bf16 %v5420_v27, %v5420_v27 }
 0x456   :  { %v15477_v9 = vpop.permute.xlu1 %1812  ;;  %v7017_v39 = vrot.slane %v6633_v13, 5  ;;  %v1764_v55 = vpop.permute.xlu0 %1763  ;;  %v3679_v5 = vadd.f32 %v3678_v26, %v3677_v34  ;;  %v3751_v30 = vadd.f32 %v3750_v10, %v3749_v54  ;;  %v3719_v42 = vadd.f32 %v3718_v41, %v2567_v60 }
 0x457   :  { %v5450_v18 = vmul.f32 %v15274_v2, %v3765_v24  ;;  %v3635_v7 = vadd.f32 %v3634_v46, %v2553_v33  ;;  %v5406_v49 = vmul.f32 %v15148_v59, %v3633_v57  ;;  %v18294_v26 = vunpack.c.h.bf16 %v15197_v43 }
 0x458   :  { %v15510_v34 = vsel %vm6733_vm3, %v7017_v39, %v7016_v63  ;;  %v5430_v2 = vmul.f32 %v15219_v11, %v3705_v38  ;;  %v3680_v33 = vrot.slane %v3679_v5, 1  ;;  %v18295_v63 = vunpack.c.l.bf16 %v15308_v23 }
 0x459   :  { %v2575_v19 = vmul.f32 %v18294_v26, %v1911_v21  ;;  %v6641_v57 = vunpack.c.l.b16 %v5760_v16  ;;  %v3752_v43 = vrot.slane %v3751_v30, 1  ;;  %v3720_v21 = vrot.slane %v3719_v42, 2 }
 0x45a   :  { %v15499_v13 = vpop.permute.xlu1 %1917  ;;  %v2568_v27 = vmul.f32 %v18295_v63, %v1862_v37  ;;  %v15524_v10 = vpop.permute.xlu0 %1868  ;;  %v5775_v39 = vpack.c.bf16 %v5450_v18, %v5450_v18  ;;  %v3636_v24 = vrot.slane %v3635_v7, 2  ;;  %v5753_v38 = vpack.c.bf16 %v5406_v49, %v5406_v49  ;;  %v18298_v63 = vld [vmem:[#allocation3_spill] sm:$0xff] }
 0x45b   :  { %v3766_v26 = vrot.slane %v2575_v19, 4  ;;  %v5765_v60 = vpack.c.bf16 %v5430_v2, %v5430_v2  ;;  %v3681_v59 = vadd.f32 %v3680_v33, %v3679_v5  ;;  %v3753_v54 = vadd.f32 %v3752_v43, %v3751_v30 }
 0x45c   :  { %4531 = vadd.xlane.f32.xlu1 %v15357_v8  ;;  %v3724_v41 = vrot.slane %v2568_v27, 4  ;;  %v7031_v8 = vrot.slane %v6641_v57, 5  ;;  %v3721_v11 = vadd.f32 %v3720_v21, %v3719_v42  ;;  %v15542_v49 = vunpack.c.l.b16 %v5775_v39  ;;  %v18302_v39 = vld [vmem:[#allocation42_spill] sm:$0xff] }
 0x45d   :  { %v3637_v12 = vadd.f32 %v3636_v24, %v3635_v7  ;;  %v15548_v33 = vunpack.c.l.b16 %v5753_v38  ;;  %v3767_v16 = vadd.f32 %v3766_v26, %v2575_v19  ;;  %v18300_v30 = vunpack.c.h.bf16 %v15292_v0 }
 0x45e   :  { %v1820_v46 = vpop.permute.xlu1 %1819  ;;  %18297 = vst [vmem:[#allocation4_spill] sm:$0xff] %v15542_v49  ;;  %v1771_v53 = vpop.permute.xlu0 %1770  ;;  %v18301_v57 = vunpack.c.l.bf16 %v15321_v58  ;;  %v6646_v21 = vunpack.c.l.b16 %v5765_v60  ;;  %v5422_v7 = vmul.f32 %v18302_v39, %v3681_v59  ;;  %v3725_v24 = vadd.f32 %v3724_v41, %v2568_v27  ;;  %v18306_v59 = vld [vmem:[#allocation44_spill] sm:$0xff] }
 0x45f   :  { %v2561_v42 = vmul.f32 %v18300_v30, %v15477_v9  ;;  %v18303_v37 = vunpack.c.l.bf16 %v15347_v36  ;;  %v5446_v5 = vmul.f32 %v18304_v35, %v3753_v54  ;;  %v3722_v38 = vrot.slane %v3721_v11, 1 }
 0x460   :  { %v2554_v43 = vmul.f32 %v18301_v57, %v1764_v55  ;;  %v18305_v19 = vunpack.c.h.bf16 %v15321_v58  ;;  %v3638_v55 = vrot.slane %v3637_v12, 1  ;;  %v15569_v60 = vsel %vm6733_vm3, %v7031_v8, %v15492_v62  ;;  %v11373_v8 = vld [vmem:[%s17488_s10] ss:$0 sm:$0xff]  ;;  %v18309_v58 = vld [vmem:[#allocation13_spill] sm:$0xff] }
 0x461   :  { %v2562_v32 = vmul.f32 %v18303_v37, %v1820_v46  ;;  %v3682_v54 = vrot.slane %v2561_v42, 4  ;;  %v18307_v41 = vrot.slane %v18306_v59, 7  ;;  %v5761_v37 = vpack.c.bf16 %v5422_v7, %v5422_v7 }
 0x462   :  { %v1925_v18 = vpop.permute.xlu1 %1924  ;;  %v2555_v26 = vmul.f32 %v18305_v19, %v1771_v53  ;;  %v3768_v53 = vrot.slane %v3767_v16, 2  ;;  %v3640_v27 = vrot.slane %v2554_v43, 4  ;;  %v3726_v30 = vrot.slane %v3725_v24, 2  ;;  %v1876_v9 = vpop.permute.xlu0 %1875 }
 0x463   :  { %v15577_v46 = vsel %vm6727_vm1, %v18307_v41, %v6646_v21  ;;  %v3688_v57 = vrot.slane %v2562_v32, 4  ;;  %v5773_v39 = vpack.c.bf16 %v5446_v5, %v5446_v5  ;;  %v3723_v62 = vadd.f32 %v3722_v38, %v3721_v11 }
 0x464   :  { %v3646_v0 = vrot.slane %v2555_v26, 4  ;;  %v18308_v59 = vrot.slane %v15215_v51, %v18285_v17  ;;  %v3639_v21 = vadd.f32 %v3638_v55, %v3637_v12  ;;  %v18310_v15 = vunpack.c.l.bf16 %v18309_v58 }
 0x465   :  { %v18311_v11 = vunpack.c.h.bf16 %v15308_v23  ;;  %v3683_v61 = vadd.f32 %v3682_v54, %v2561_v42  ;;  %v3641_v56 = vadd.f32 %v3640_v27, %v2554_v43  ;;  %v18313_v12 = vunpack.c.h.bf16 %v18309_v58 }
 0x466   :  { %v2576_v5 = vmul.f32 %v18310_v15, %v15499_v13  ;;  %v1827_v52 = vpop.permute.xlu1 %1826  ;;  %v3689_v15 = vadd.f32 %v3688_v57, %v2562_v32  ;;  %v18314_v13 = vunpack.c.l.bf16 %v15363_v48  ;;  %v3647_v49 = vadd.f32 %v3646_v0, %v2555_v26  ;;  %v1883_v27 = vpop.permute.xlu0 %1882 }
 0x467   :  { %v2569_v38 = vmul.f32 %v18311_v11, %v15524_v10  ;;  %v2577_v55 = vmul.f32 %v18313_v12, %v1925_v18  ;;  %v15600_v10 = vadd.f32 %v3726_v30, %v3725_v24  ;;  %v18315_v42 = vrot.slane %v15236_v1, %v18001_v28 }
 0x468   :  { %v2570_v23 = vmul.f32 %v18314_v13, %v1876_v9  ;;  %v3772_v58 = vrot.slane %v2576_v5, 4  ;;  %v3684_v32 = vrot.slane %v3683_v61, 2  ;;  %v3690_v0 = vrot.slane %v3689_v15, 2 }
 0x469   :  { %v3730_v18 = vrot.slane %v2569_v38, 4  ;;  %v3778_v24 = vrot.slane %v2577_v55, 4 }
 0x46a   :  { %1973 = vbcast.lane.b32.xlu0 %v1971_v3, 256  ;;  %v10489_v3 = vpop.f32.mrb[40].mxu1  ;;  %v3736_v30 = vrot.slane %v2570_v23, 4  ;;  %v1932_v57 = vpop.permute.xlu1 %1931  ;;  %v3773_v12 = vadd.f32 %v3772_v58, %v2576_v5 }
 0x46b   :  { %v8104_v19 = vadd.f32 %v11373_v8, %v10489_v3  ;;  %v7992_v35 = vpop.f32.mrb[41].mxu1  ;;  %v18312_v3 = vrot.slane %v15236_v1, %v17861_v29  ;;  %v3731_v13 = vadd.f32 %v3730_v18, %v2569_v38  ;;  %v3728_v38 = vrot.slane %v15600_v10, 1 }
 0x46c   :  { %v8102_v41 = vadd.f32 %v11373_v8, %v7992_v35  ;;  %v10490_v7 = vpop.f32.mrb[42].mxu1  ;;  %v15596_v35 = vadd.f32 %v3768_v53, %v3767_v16  ;;  %v18316_v16 = vrot.slane %v15256_v20, %v17861_v29  ;;  %v3642_v53 = vrot.slane %v3641_v56, 2 }
 0x46d   :  { %2029 = vbcast.lane.b32.xlu1 %v18308_v59, 256  ;;  %v8105_v44 = vadd.f32 %v11373_v8, %v10490_v7  ;;  %v7995_v59 = vpop.f32.mrb[43].mxu1  ;;  %v8136_v11 = vmax.f32 %v8104_v19, 0.0  ;;  %v18320_v7 = vunpack.c.h.bf16 %v15347_v36  ;;  %v3779_v36 = vadd.f32 %v3778_v24, %v2577_v55 }
 0x46e   :  { %2057 = vbcast.lane.b32.xlu0 %v18312_v3, 256  ;;  %v8103_v2 = vadd.f32 %v11373_v8, %v7995_v59  ;;  %v8134_v43 = vmax.f32 %v8102_v41, 0.0  ;;  %v18319_v8 = vld [vmem:[#allocation48_spill] sm:$0xff]  ;;  %v3648_v41 = vrot.slane %v3647_v49, 2  ;;  %v3770_v5 = vrot.slane %v15596_v35, 1 }
 0x46f   :  { %v8137_v22 = vmax.f32 %v8105_v44, 0.0  ;;  %v15610_v44 = vunpack.c.l.b16 %v5761_v37  ;;  %v15615_v19 = vmul.f32 %v18319_v8, %v3723_v62  ;;  %v2563_v3 = vmul.f32 %v18320_v7, %v1827_v52  ;;  %v18322_v59 = vld [vmem:[#allocation52_spill] sm:$0xff]  ;;  %v18325_v7 = vld [vmem:[#allocation47_spill] sm:$0xff] }
 0x470   :  { %v8135_v54 = vmax.f32 %v8103_v2, 0.0  ;;  %v6654_v2 = vunpack.c.l.b16 %v5773_v39  ;;  %v15623_v37 = vmul.f32 %v18322_v59, %v3639_v21  ;;  %v18324_v39 = vrot.slane %v15186_v25, %v11587_v40 }
 0x471   :  { %2078 = vbcast.lane.b32.xlu1 %v18315_v42, 256  ;;  %v15608_v9 = vpack.c.bf16 %v8137_v22, %v8136_v11  ;;  %v18321_v22 = vrot.slane %v15256_v20, %v18001_v28  ;;  %v18323_v11 = vunpack.c.h.bf16 %v15363_v48  ;;  %v3685_v62 = vadd.f32 %v3684_v32, %v3683_v61 }
 0x472   :  { %2113 = vbcast.lane.b32.xlu0 %v18316_v16, 256  ;;  %v15612_v26 = vpack.c.bf16 %v8135_v54, %v8134_v43  ;;  %v3643_v43 = vadd.f32 %v3642_v53, %v3641_v56  ;;  %v3694_v52 = vrot.slane %v2563_v3, 4  ;;  %v3691_v54 = vadd.f32 %v3690_v0, %v3689_v15  ;;  %v1939_v15 = vpop.permute.xlu1 %1938 }
 0x473   :  { %18317 = vst [vmem:[#allocation3_spill] sm:$0xff] %v15608_v9  ;;  %v2571_v42 = vmul.f32 %v18323_v11, %v1883_v27  ;;  %v3737_v16 = vadd.f32 %v3736_v30, %v2570_v23  ;;  %v3649_v48 = vadd.f32 %v3648_v41, %v3647_v49  ;;  %v18327_v18 = vrot.slane %v15215_v51, %v11587_v40 }
 0x474   :  { %18318 = vst [vmem:[#allocation42_spill] sm:$0xff] %v15612_v26  ;;  %v3695_v58 = vadd.f32 %v3694_v52, %v2563_v3  ;;  %v3774_v61 = vrot.slane %v3773_v12, 2  ;;  %v3732_v56 = vrot.slane %v3731_v13, 2  ;;  %v18328_v23 = vrot.slane %v15236_v1, %v18285_v17 }
 0x475   :  { %2134 = vbcast.lane.b32.xlu1 %v18321_v22, 256  ;;  %v3742_v8 = vrot.slane %v2571_v42, 4  ;;  %v18326_v22 = vunpack.c.l.bf16 %v18325_v7  ;;  %v3686_v24 = vrot.slane %v3685_v62, 1  ;;  %v3780_v27 = vrot.slane %v3779_v36, 2 }
 0x476   :  { %1980 = vbcast.lane.b32.xlu0 %v18324_v39, 256  ;;  %v3696_v0 = vrot.slane %v3695_v58, 2  ;;  %v3644_v49 = vrot.slane %v3643_v43, 1  ;;  %v3692_v30 = vrot.slane %v3691_v54, 1  ;;  %v3650_v3 = vrot.slane %v3649_v48, 1 }
 0x477   :  { %v2578_v21 = vmul.f32 %v18326_v22, %v1932_v57  ;;  %v3743_v55 = vadd.f32 %v3742_v8, %v2571_v42  ;;  %v3738_v57 = vrot.slane %v3737_v16, 2  ;;  %v18329_v42 = vunpack.c.h.bf16 %v18325_v7  ;;  %v18331_v8 = vld [vmem:[#allocation53_spill] sm:$0xff] }
 0x478   :  { %v3697_v59 = vadd.f32 %v3696_v0, %v3695_v58  ;;  %v18330_v52 = vrot.slane %v15256_v20, %v18285_v17  ;;  %v18332_v22 = vrot.slane %v18331_v8, 7  ;;  %v3733_v53 = vadd.f32 %v3732_v56, %v3731_v13 }
 0x479   :  { %2036 = vbcast.lane.b32.xlu1 %v18327_v18, 256  ;;  %v3784_v32 = vrot.slane %v2578_v21, 4  ;;  %v3744_v11 = vrot.slane %v3743_v55, 2  ;;  %v2579_v39 = vmul.f32 %v18329_v42, %v1939_v15  ;;  %v3687_v58 = vadd.f32 %v3686_v24, %v3685_v62 }
 0x47a   :  { %2085 = vbcast.lane.b32.xlu0 %v18328_v23, 256  ;;  %v15649_v18 = vsel %vm6727_vm1, %v18332_v22, %v6654_v2  ;;  %v3775_v23 = vadd.f32 %v3774_v61, %v3773_v12  ;;  %v3698_v7 = vrot.slane %v3697_v59, 1  ;;  %v3645_v0 = vadd.f32 %v3644_v49, %v3643_v43 }
 0x47b   :  { %v3785_v41 = vadd.f32 %v3784_v32, %v2578_v21  ;;  %v18333_v21 = vrot.slane %v15186_v25, %v11598_v45  ;;  %v3781_v32 = vadd.f32 %v3780_v27, %v3779_v36  ;;  %v3790_v15 = vrot.slane %v2579_v39, 4 }
 0x47c   :  { %v3693_v42 = vadd.f32 %v3692_v30, %v3691_v54  ;;  %v3739_v26 = vadd.f32 %v3738_v57, %v3737_v16  ;;  %v3771_v8 = vadd.f32 %v3770_v5, %v15596_v35  ;;  %v3651_v17 = vadd.f32 %v3650_v3, %v3649_v48  ;;  %v18337_v48 = vld [vmem:[#allocation50_spill] sm:$0xff] }
 0x47d   :  { %2141 = vbcast.lane.b32.xlu1 %v18330_v52, 256  ;;  %v3786_v9 = vrot.slane %v3785_v41, 2  ;;  %v3745_v2 = vadd.f32 %v3744_v11, %v3743_v55  ;;  %v3791_v22 = vadd.f32 %v3790_v15, %v2579_v39  ;;  %v18334_v12 = vrot.slane %v15215_v51, %v11598_v45  ;;  %v18338_v55 = vld [vmem:[#allocation49_spill] sm:$0xff]  ;;  %v18342_v11 = vld [vmem:[#allocation16_spill] sm:$0xff] }
 0x47e   :  { %1987 = vbcast.lane.b32.xlu0 %v18333_v21, 256  ;;  %v5768_v13 = vpack.c.bf16 %v15615_v19, %v15615_v19  ;;  %v3729_v62 = vadd.f32 %v3728_v38, %v15600_v10  ;;  %v3776_v36 = vrot.slane %v3775_v23, 1  ;;  %v3734_v61 = vrot.slane %v3733_v53, 1  ;;  %v18339_v19 = vld [vmem:[#allocation38_spill] sm:$0xff]  ;;  %v18340_v10 = vld [vmem:[#allocation27_spill] sm:$0xff] }
 0x47f   :  { %v3787_v52 = vadd.f32 %v3786_v9, %v3785_v41  ;;  %v18335_v43 = vrot.slane %v15236_v1, %v11587_v40  ;;  %v18336_v9 = vld [vmem:[#allocation5_spill] sm:$0xff]  ;;  %v3782_v54 = vrot.slane %v3781_v32, 1  ;;  %v3699_v16 = vadd.f32 %v3698_v7, %v3697_v59 }
 0x480   :  { %v5424_v35 = vmul.f32 %v18336_v9, %v3687_v58  ;;  %v3792_v5 = vrot.slane %v3791_v22, 2  ;;  %v5410_v56 = vmul.f32 %v18337_v48, %v3645_v0  ;;  %v5426_v24 = vmul.f32 %v18338_v55, %v3693_v42 }
 0x481   :  { %2043 = vbcast.lane.b32.xlu1 %v18334_v12, 256  ;;  %v3740_v27 = vrot.slane %v3739_v26, 1  ;;  %v3788_v49 = vrot.slane %v3787_v52, 1  ;;  %v5452_v30 = vmul.f32 %v18339_v19, %v3771_v8  ;;  %v5412_v38 = vmul.f32 %v18340_v10, %v3651_v17  ;;  %v18344_v17 = vld [vmem:[#allocation35_spill] sm:$0xff] }
 0x482   :  { %2092 = vbcast.lane.b32.xlu0 %v18335_v43, 256  ;;  %v3746_v57 = vrot.slane %v3745_v2, 1  ;;  %v3793_v41 = vadd.f32 %v3792_v5, %v3791_v22  ;;  %v18341_v3 = vrot.slane %v15256_v20, %v11587_v40  ;;  %v5754_v59 = vpack.c.bf16 %v15623_v37, %v15623_v37 }
 0x483   :  { %v5438_v39 = vmul.f32 %v18342_v11, %v3729_v62  ;;  %v3777_v21 = vadd.f32 %v3776_v36, %v3775_v23  ;;  %v3735_v58 = vadd.f32 %v3734_v61, %v3733_v53  ;;  %v18343_v7 = vrot.slane %v15186_v25, %v11609_v50  ;;  %v18346_v62 = vld [vmem:[#allocation25_spill] sm:$0xff]  ;;  %v18347_v36 = vld [vmem:[#allocation20_spill] sm:$0xff] }
 0x484   :  { %v5762_v15 = vpack.c.bf16 %v5424_v35, %v5424_v35  ;;  %v3783_v0 = vadd.f32 %v3782_v54, %v3781_v32  ;;  %v5428_v42 = vmul.f32 %v18344_v17, %v3699_v16  ;;  %v3794_v8 = vrot.slane %v3793_v41, 1  ;;  %v18349_v54 = vld [vmem:[#allocation19_spill] sm:$0xff] }
 0x485   :  { %2148 = vbcast.lane.b32.xlu1 %v18341_v3, 256  ;;  %v5755_v22 = vpack.c.bf16 %v5410_v56, %v5410_v56  ;;  %v5763_v12 = vpack.c.bf16 %v5426_v24, %v5426_v24  ;;  %v3741_v43 = vadd.f32 %v3740_v27, %v3739_v26  ;;  %v3789_v9 = vadd.f32 %v3788_v49, %v3787_v52  ;;  %v1953_v56 = vpop.permute.xlu0 %1952  ;;  %v18350_v27 = vld [vmem:[#allocation7_spill] sm:$0xff]  ;;  %v18351_v49 = vld [vmem:[#allocation54_spill] sm:$0xff]  ;;  %v18353_v3 = vld [vmem:[#allocation56_spill] sm:$0xff] }
 0x486   :  { %1994 = vbcast.lane.b32.xlu0 %v18343_v7, 256  ;;  %v5776_v5 = vpack.c.bf16 %v5452_v30, %v5452_v30  ;;  %v5756_v48 = vpack.c.bf16 %v5412_v38, %v5412_v38  ;;  %v3747_v37 = vadd.f32 %v3746_v57, %v3745_v2  ;;  %v3795_v55 = vadd.f32 %v3794_v8, %v3793_v41  ;;  %v2009_v30 = vpop.permute.xlu1 %2008  ;;  %v18352_v57 = vld [vmem:[#allocation22_spill] sm:$0xff] }
 0x487   :  { %v18345_v53 = vrot.slane %v15215_v51, %v11609_v50  ;;  %v15682_v23 = vunpack.c.l.b16 %v5768_v13  ;;  %v6635_v25 = vunpack.c.l.b16 %v5754_v59  ;;  %v5454_v32 = vmul.f32 %v18346_v62, %v3777_v21 }
 0x488   :  { %v5440_v61 = vmul.f32 %v18347_v36, %v3735_v58  ;;  %v18348_v35 = vrot.slane %v15236_v1, %v11598_v45  ;;  %v5769_v26 = vpack.c.bf16 %v5438_v39, %v5438_v39  ;;  %v6643_v52 = vunpack.c.l.b16 %v5762_v15 }
 0x489   :  { %2050 = vbcast.lane.b32.xlu1 %v18345_v53, 256  ;;  %v5456_v2 = vmul.f32 %v18349_v54, %v3783_v0  ;;  %v5764_v16 = vpack.c.bf16 %v5428_v42, %v5428_v42  ;;  %v6636_v24 = vunpack.c.l.b16 %v5755_v22  ;;  %v6644_v51 = vunpack.c.l.b16 %v5763_v12 }
 0x48a   :  { %2099 = vbcast.lane.b32.xlu0 %v18348_v35, 256  ;;  %v5442_v13 = vmul.f32 %v18350_v27, %v3741_v43  ;;  %v5458_v19 = vmul.f32 %v18351_v49, %v3789_v9  ;;  %v15692_v10 = vunpack.c.l.b16 %v5776_v5  ;;  %v6637_v38 = vunpack.c.l.b16 %v5756_v48  ;;  %v2016_v62 = vpop.permute.xlu1 %2015 }
 0x48b   :  { %v5444_v41 = vmul.f32 %v18352_v57, %v3747_v37  ;;  %v5460_v59 = vmul.f32 %v18353_v3, %v3795_v55  ;;  %v18354_v11 = vrot.slane %v15256_v20, %v11598_v45  ;;  %v7045_v39 = vrot.slane %v15682_v23, 5  ;;  %v1960_v55 = vpop.permute.xlu0 %1959  ;;  %v18362_v3 = vld [vmem:[#allocation43_spill] sm:$0xff] }
 0x48c   :  { %v7021_v21 = vrot.slane %v6635_v25, 3  ;;  %v5777_v58 = vpack.c.bf16 %v5454_v32, %v5454_v32  ;;  %v5770_v7 = vpack.c.bf16 %v5440_v61, %v5440_v61  ;;  %v18355_v15 = vrot.slane %v15236_v1, %v11609_v50 }
 0x48d   :  { %2155 = vbcast.lane.b32.xlu1 %v18354_v11, 256  ;;  %v6650_v0 = vunpack.c.l.b16 %v5769_v26  ;;  %v7035_v17 = vrot.slane %v6643_v52, 3  ;;  %v5778_v42 = vpack.c.bf16 %v5456_v2, %v5456_v2  ;;  %v6645_v8 = vunpack.c.l.b16 %v5764_v16 }
 0x48e   :  { %2106 = vbcast.lane.b32.xlu0 %v18355_v15, 256  ;;  %v7023_v22 = vrot.slane %v6636_v24, 2  ;;  %v7037_v12 = vrot.slane %v6644_v51, 2  ;;  %v5771_v43 = vpack.c.bf16 %v5442_v13, %v5442_v13  ;;  %v5779_v9 = vpack.c.bf16 %v5458_v19, %v5458_v19 }
 0x48f   :  { %v7059_v5 = vrot.slane %v15692_v10, 5  ;;  %v5772_v48 = vpack.c.bf16 %v5444_v41, %v5444_v41  ;;  %v5780_v37 = vpack.c.bf16 %v5460_v59, %v5460_v59  ;;  %v7025_v53 = vrot.slane %v6637_v38, 1 }
 0x490   :  { %v18356_v23 = vrot.slane %v15256_v20, %v11609_v50  ;;  %v6658_v1 = vunpack.c.l.b16 %v5777_v58  ;;  %v6651_v25 = vunpack.c.l.b16 %v5770_v7  ;;  %v18357_v32 = vrot.slane %v15548_v33, 4 }
 0x491   :  { %v18358_v61 = vrot.slane %v15610_v44, 4  ;;  %v18359_v26 = vrot.slane %v15104_v6, %v17985_v31  ;;  %v6659_v52 = vunpack.c.l.b16 %v5778_v42  ;;  %v7039_v2 = vrot.slane %v6645_v8, 1  ;;  %v2065_v42 = vpop.permute.xlu0 %2064 }
 0x492   :  { %2162 = vbcast.lane.b32.xlu1 %v18356_v23, 256  ;;  %v7020_v36 = vsel %vm6736_vm4, %v18357_v32, %v15510_v34  ;;  %v6652_v16 = vunpack.c.l.b16 %v5771_v43  ;;  %v6660_v24 = vunpack.c.l.b16 %v5779_v9  ;;  %v6653_v51 = vunpack.c.l.b16 %v5772_v48  ;;  %v18368_v43 = vld [vmem:[#allocation4_spill] sm:$0xff]  ;;  %v18371_v23 = vld [vmem:[#allocation55_spill] sm:$0xff]  ;;  %v18373_v32 = vld [vmem:[#allocation14_spill] sm:$0xff] }
 0x493   :  { %v7034_v35 = vsel %vm6736_vm4, %v18358_v61, %v15569_v60  ;;  %2176 = vbcast.lane.b32.xlu0 %v18359_v26, 256  ;;  %v7022_v20 = vsel %vm6739_vm5, %v7021_v21, %v7020_v36  ;;  %v6661_v44 = vunpack.c.l.b16 %v5780_v37  ;;  %v18360_v13 = vrot.slane %v18298_v63, %v17985_v31  ;;  %v18364_v21 = vld [vmem:[#allocation37_spill] sm:$0xff] }
 0x494   :  { %v7036_v54 = vsel %vm6739_vm5, %v7035_v17, %v7034_v35  ;;  %v7024_v33 = vsel %vm6742_vm6, %v7023_v22, %v7022_v20  ;;  %v7047_v49 = vrot.slane %v6650_v0, 4  ;;  %v7061_v19 = vrot.slane %v6658_v1, 4  ;;  %v2121_v22 = vpop.permute.xlu1 %2120  ;;  %v18377_v35 = vld [vmem:[#allocation59_spill] sm:$0xff] }
 0x495   :  { %v7038_v34 = vsel %vm6742_vm6, %v7037_v12, %v7036_v54  ;;  %v7026_v60 = vsel %vm6745_vm7, %v7025_v53, %v7024_v33  ;;  %v7049_v10 = vrot.slane %v6651_v25, 3  ;;  %v18361_v57 = vrot.slane %v15104_v6, %v18296_v4 }
 0x496   :  { %v7040_v27 = vsel %vm6745_vm7, %v7039_v2, %v7038_v34  ;;  %2232 = vbcast.lane.b32.xlu1 %v18360_v13, 256  ;;  %v7063_v41 = vrot.slane %v6659_v52, 3  ;;  %v18363_v59 = vunpack.c.h.bf16 %v18362_v3  ;;  %v18365_v58 = vunpack.c.l.bf16 %v18364_v21 }
 0x497   :  { %v7191_v38 = vpack.c.b16 %v7040_v27, %v7026_v60  ;;  %2183 = vbcast.lane.b32.xlu0 %v18361_v57, 256  ;;  %v18366_v15 = vunpack.c.h.bf16 %v15424_v47  ;;  %v7051_v8 = vrot.slane %v6652_v16, 2  ;;  %v7065_v0 = vrot.slane %v6660_v24, 2  ;;  %v18379_v60 = vld [vmem:[#allocation10_spill] sm:$0xff] }
 0x498   :  { %v2581_v11 = vmul.f32 %v18363_v59, %v1953_v56  ;;  %v2582_v7 = vmul.f32 %v18365_v58, %v1960_v55  ;;  %v18367_v12 = vrot.slane %v15475_v14, 6  ;;  %v18369_v9 = vrot.slane %v18368_v43, 6 }
 0x499   :  { %v2589_v17 = vmul.f32 %v18366_v15, %v2009_v30  ;;  %10403 = vmatprep.mubr.bf16.mxu0 %v7191_v38  ;;  %v7053_v37 = vrot.slane %v6653_v51, 1  ;;  %v7067_v55 = vrot.slane %v6661_v44, 1  ;;  %v18370_v53 = vrot.slane %v18298_v63, %v18296_v4  ;;  %v18381_v38 = vld [vmem:[#allocation45_spill] sm:$0xff] }
 0x49a   :  { %v7044_v6 = vsel %vm6730_vm2, %v18367_v12, %v15577_v46  ;;  %v7058_v56 = vsel %vm6730_vm2, %v18369_v9, %v15649_v18  ;;  %v18372_v1 = vunpack.c.h.bf16 %v18371_v23  ;;  %v18374_v18 = vrot.slane %v18373_v32, %v17985_v31  ;;  %v18384_v15 = vld [vmem:[#allocation17_spill] sm:$0xff] }
 0x49b   :  { %v7046_v48 = vsel %vm6733_vm3, %v7045_v39, %v7044_v6  ;;  %v7060_v30 = vsel %vm6733_vm3, %v7059_v5, %v7058_v56  ;;  %2239 = vbcast.lane.b32.xlu1 %v18370_v53, 256  ;;  %v15759_v39 = vld [vmem:[%s17479_s1 + $0xe0] sm:$0xff]  ;;  %v18375_v5 = vld [vmem:[#allocation57_spill] sm:$0xff]  ;;  %v18378_v26 = vunpack.c.h.bf16 %v18377_v35  ;;  %v3802_v2 = vrot.slane %v2581_v11, 4 }
 0x49c   :  { %v2597_v14 = vmul.f32 %v18372_v1, %v2065_v42  ;;  %v7048_v46 = vsel %vm6736_vm4, %v7047_v49, %v7046_v48  ;;  %v7062_v25 = vsel %vm6736_vm4, %v7061_v19, %v7060_v30  ;;  %2288 = vbcast.lane.b32.xlu0 %v18374_v18, 256  ;;  %v2167_v63 = vrot.slane %v15759_v39, %v17861_v29  ;;  %v15781_v19 = vld [vmem:[%s17479_s1 + $0xe8] sm:$0xff]  ;;  %v18387_v56 = vld [vmem:[#allocation15_spill] sm:$0xff]  ;;  %v18388_v30 = vld [vmem:[#allocation26_spill] sm:$0xff] }
 0x49d   :  { %v18376_v36 = vunpack.c.l.bf16 %v18375_v5  ;;  %v2605_v52 = vmul.f32 %v18378_v26, %v2121_v22  ;;  %v7050_v20 = vsel %vm6739_vm5, %v7049_v10, %v7048_v46  ;;  %v7064_v54 = vsel %vm6739_vm5, %v7063_v41, %v7062_v25  ;;  %v18389_v18 = vld [vmem:[#allocation9_spill] sm:$0xff] }
 0x49e   :  { %v7052_v16 = vsel %vm6742_vm6, %v7051_v8, %v7050_v20  ;;  %v7066_v24 = vsel %vm6742_vm6, %v7065_v0, %v7064_v54  ;;  %v2188_v33 = vrot.slane %v15759_v39, %v18001_v28  ;;  %v3808_v34 = vrot.slane %v2582_v7, 4 }
 0x49f   :  { %v2590_v61 = vmul.f32 %v18376_v36, %v2016_v62  ;;  %v3850_v51 = vrot.slane %v2589_v17, 4  ;;  %v7054_v44 = vsel %vm6745_vm7, %v7053_v37, %v7052_v16  ;;  %v7068_v62 = vsel %vm6745_vm7, %v7067_v55, %v7066_v24 }
 0x4a0   :  { %v18380_v27 = vrot.slane %v18379_v60, %v17985_v31  ;;  %v3898_v13 = vrot.slane %v2597_v14, 4  ;;  %v7192_v49 = vpack.c.b16 %v7068_v62, %v7054_v44  ;;  %2169 = vbcast.lane.b32.xlu0 %v2167_v63, 256  ;;  %v2223_v10 = vrot.slane %v15781_v19, %v17861_v29  ;;  %v15830_v62 = vld [vmem:[%s17479_s1 + $0xf0] sm:$0xff] }
 0x4a1   :  { %v18382_v57 = vrot.slane %v18381_v38, 3  ;;  %v3856_v41 = vrot.slane %v2590_v61, 4  ;;  %v3946_v59 = vrot.slane %v2605_v52, 4  ;;  %v18383_v58 = vrot.slane %v18381_v38, 4 }
 0x4a2   :  { %2344 = vbcast.lane.b32.xlu1 %v18380_v27, 256  ;;  %v3803_v31 = vadd.f32 %v3802_v2, %v2581_v11  ;;  %v4772_v42 = vrot.slane %v18384_v15, 1  ;;  %10404 = vmatmul.mubr.bf16.gmra.mrb[20].mxu0 %v7192_v49  ;;  %v18385_v8 = vrot.slane %v18381_v38, 5  ;;  %v3809_v0 = vadd.f32 %v3808_v34, %v2582_v7 }
 0x4a3   :  { %11222 = vrcp.f32 %v18382_v57  ;;  %v3851_v22 = vadd.f32 %v3850_v51, %v2589_v17  ;;  %v2244_v12 = vrot.slane %v15781_v19, %v18001_v28  ;;  %v18386_v6 = vrot.slane %v18381_v38, 6 }
 0x4a4   :  { %11224 = vrcp.f32 %v18383_v58  ;;  %v3899_v43 = vadd.f32 %v3898_v13, %v2597_v14  ;;  %v4773_v9 = vrot.slane %v18384_v15, 2  ;;  %2225 = vbcast.lane.b32.xlu0 %v2223_v10, 256  ;;  %v2293_v11 = vrot.slane %v18373_v32, %v18296_v4 }
 0x4a5   :  { %11226 = vrcp.f32 %v18385_v8  ;;  %v15801_v48 = vmax.f32 %v18387_v56, 1.0  ;;  %v3857_v7 = vadd.f32 %v3856_v41, %v2590_v61  ;;  %v3947_v17 = vadd.f32 %v3946_v59, %v2605_v52 }
 0x4a6   :  { %2190 = vbcast.lane.b32.xlu1 %v2188_v33, 256  ;;  %11228 = vrcp.f32 %v18386_v6  ;;  %v4774_v37 = vrot.slane %v18384_v15, 3  ;;  %v15805_v55 = vmax.f32 %v18388_v30, 1.0  ;;  %v3804_v53 = vrot.slane %v3803_v31, 2  ;;  %v15821_v33 = vpop.xlane.xlu0 %4522 }
 0x4a7   :  { %11230 = vrcp.f32 %v18384_v15  ;;  %v4775_v23 = vrot.slane %v18384_v15, 4  ;;  %v3810_v1 = vrot.slane %v3809_v0, 2  ;;  %v3852_v14 = vrot.slane %v3851_v22, 2 }
 0x4a8   :  { %11232 = vrcp.f32 %v4772_v42  ;;  %v2349_v46 = vrot.slane %v18379_v60, %v18296_v4  ;;  %v4776_v25 = vrot.slane %v18384_v15, 5  ;;  %v3900_v32 = vrot.slane %v3899_v43, 2  ;;  %2295 = vbcast.lane.b32.xlu0 %v2293_v11, 256 }
 0x4a9   :  { %11234 = vrcp.f32 %v4773_v9  ;;  %v2195_v63 = vrot.slane %v15759_v39, %v18389_v18  ;;  %v4777_v36 = vrot.slane %v18384_v15, 6  ;;  %v4779_v61 = vrot.slane %v15801_v48, 1 }
 0x4aa   :  { %2246 = vbcast.lane.b32.xlu1 %v2244_v12, 256  ;;  %v3858_v35 = vrot.slane %v3857_v7, 2  ;;  %v3948_v26 = vrot.slane %v3947_v17, 2  ;;  %11236 = vrcp.f32 %v4774_v37  ;;  %v3805_v20 = vadd.f32 %v3804_v53, %v3803_v31  ;;  %v1946_v9 = vpop.permute.xlu0 %1945 }
 0x4ab   :  { %v4786_v4 = vrot.slane %v15805_v55, 1  ;;  %11238 = vrcp.f32 %v4775_v23  ;;  %v4771_v54 = vrot.slane %v18381_v38, 7  ;;  %v3811_v16 = vadd.f32 %v3810_v1, %v3809_v0 }
 0x4ac   :  { %v3853_v24 = vadd.f32 %v3852_v14, %v3851_v22  ;;  %v2251_v34 = vrot.slane %v15781_v19, %v18389_v18  ;;  %11240 = vrcp.f32 %v4776_v25  ;;  %v3901_v44 = vadd.f32 %v3900_v32, %v3899_v43  ;;  %2197 = vbcast.lane.b32.xlu0 %v2195_v63, 256  ;;  %v15839_v41 = vpop.xlane.xlu1 %4525 }
 0x4ad   :  { %v15815_v52 = vpop.eup %11222  ;;  %v2279_v60 = vrot.slane %v15830_v62, %v17861_v29  ;;  %11242 = vrcp.f32 %v4777_v36  ;;  %v3859_v13 = vadd.f32 %v3858_v35, %v3857_v7  ;;  %v3949_v49 = vadd.f32 %v3948_v26, %v3947_v17  ;;  %v18391_v26 = vld [vmem:[#allocation60_spill] sm:$0xff] }
 0x4ae   :  { %v15819_v2 = vpop.eup %11224  ;;  %2351 = vbcast.lane.b32.xlu1 %v2349_v46, 256  ;;  %11244 = vrcp.f32 %v4779_v61  ;;  %v4778_v10 = vrot.slane %v18384_v15, 7  ;;  %v3806_v57 = vrot.slane %v3805_v20, 1  ;;  %v3812_v59 = vrot.slane %v3811_v16, 1  ;;  %v15848_v15 = vld [vmem:[%s17479_s1 + $0xf8] sm:$0xff] }
 0x4af   :  { %v15825_v51 = vpop.eup %11226  ;;  %11246 = vrcp.f32 %v4786_v4  ;;  %v3854_v58 = vrot.slane %v3853_v24, 1  ;;  %v2300_v31 = vrot.slane %v15830_v62, %v18001_v28  ;;  %v3902_v8 = vrot.slane %v3901_v44, 1 }
 0x4b0   :  { %v15834_v27 = vpop.eup %11228  ;;  %11248 = vrcp.f32 %v4771_v54  ;;  %v9922_v0 = vunpack.c.l.bf16 %v18362_v3  ;;  %v4780_v22 = vrot.slane %v15801_v48, 2  ;;  %2281 = vbcast.lane.b32.xlu0 %v2279_v60, 256  ;;  %v2335_v12 = vrot.slane %v15848_v15, %v17861_v29  ;;  %v1967_v46 = vpop.permute.xlu1 %1966  ;;  %v15881_v54 = vld [vmem:[%s17482_s0 + $0x368] sm:$0xff]  }
 0x4b1   :  { %v15837_v38 = vpop.eup %11230  ;;  %v3860_v6 = vrot.slane %v3859_v13, 1  ;;  %v3950_v43 = vrot.slane %v3949_v49, 1  ;;  %v4781_v11 = vrot.slane %v15801_v48, 3  ;;  %11250 = vrcp.f32 %v4778_v10  ;;  %v2002_v60 = vpop.permute.xlu0 %2001 }
 0x4b2   :  { %2253 = vbcast.lane.b32.xlu1 %v2251_v34, 256  ;;  %v11233_v42 = vpop.eup %11232  ;;  %v3807_v7 = vadd.f32 %v3806_v57, %v3805_v20  ;;  %v9938_v3 = vunpack.c.l.bf16 %v15424_v47  ;;  %11252 = vrcp.f32 %v15801_v48  ;;  %v4782_v17 = vrot.slane %v15801_v48, 4 }
 0x4b3   :  { %v11235_v56 = vpop.eup %11234  ;;  %v3813_v30 = vadd.f32 %v3812_v59, %v3811_v16  ;;  %v3855_v53 = vadd.f32 %v3854_v58, %v3853_v24  ;;  %v2356_v29 = vrot.slane %v15848_v15, %v18001_v28  ;;  %v4783_v23 = vrot.slane %v15801_v48, 5  ;;  %v15872_v28 = vld [vmem:[%s17482_s0 + $0x348] sm:$0xff]   ;;  %v18392_v24 = vld [vmem:[#allocation61_spill] sm:$0xff] }
 0x4b4   :  { %v15856_v37 = vpop.eup %11236  ;;  %v3903_v14 = vadd.f32 %v3902_v8, %v3901_v44  ;;  %11254 = vrcp.f32 %v4780_v22  ;;  %2337 = vbcast.lane.b32.xlu0 %v2335_v12, 256  ;;  %v2202_v47 = vrot.slane %v15759_v39, %v11587_v40  ;;  %v4784_v25 = vrot.slane %v15801_v48, 6 }
 0x4b5   :  { %v15861_v1 = vpop.eup %11238  ;;  %v3861_v63 = vadd.f32 %v3860_v6, %v3859_v13  ;;  %v3951_v36 = vadd.f32 %v3950_v43, %v3949_v49  ;;  %v9927_v61 = vunpack.c.h.bf16 %v18364_v21  ;;  %11256 = vrcp.f32 %v4781_v11  ;;  %v2023_v6 = vpop.permute.xlu1 %2022 }
 0x4b6   :  { %2302 = vbcast.lane.b32.xlu1 %v2300_v31, 256  ;;  %v15866_v32 = vpop.eup %11240  ;;  %v5464_v20 = vmul.f32 %v18391_v26, %v3807_v7  ;;  %v9943_v4 = vunpack.c.h.bf16 %v18375_v5  ;;  %11258 = vrcp.f32 %v4782_v17  ;;  %v5466_v34 = vmul.f32 %v18392_v24, %v3813_v30 }
 0x4b7   :  { %v15874_v35 = vpop.eup %11242  ;;  %v5480_v44 = vmul.f32 %v11233_v42, %v3855_v53  ;;  %v2258_v13 = vrot.slane %v15781_v19, %v11587_v40  ;;  %11260 = vrcp.f32 %v4783_v23  ;;  %v9958_v10 = vunpack.c.l.bf16 %v15872_v28 }
 0x4b8   :  { %18390 = vst [vmem:[#allocation6_spill] sm:$0xff] %v15874_v35  ;;  %v11245_v16 = vpop.eup %11244  ;;  %2204 = vbcast.lane.b32.xlu0 %v2202_v47, 256  ;;  %v2307_v57 = vrot.slane %v15830_v62, %v18389_v18  ;;  %11262 = vrcp.f32 %v4784_v25  ;;  %v5482_v58 = vmul.f32 %v11235_v56, %v3861_v63  ;;  %v4787_v42 = vrot.slane %v15805_v55, 2  ;;  %v2072_v63 = vpop.permute.xlu0 %2071 }
 0x4b9   :  { %v11247_v49 = vpop.eup %11246  ;;  %v5496_v5 = vmul.f32 %v11245_v16, %v3903_v14  ;;  %v9974_v8 = vunpack.c.l.bf16 %v15881_v54  ;;  %v5782_v22 = vpack.c.bf16 %v5464_v20, %v5464_v20  ;;  %v2580_v12 = vmul.f32 %v9922_v0, %v1946_v9  ;;  %v18401_v9 = vld [vmem:[#allocation31_spill] sm:$0xff] }
 0x4ba   :  { %2358 = vbcast.lane.b32.xlu1 %v2356_v29, 256  ;;  %v15890_v59 = vpop.eup %11248  ;;  %v5512_v31 = vmul.f32 %v11247_v49, %v3951_v36  ;;  %11264 = vrcp.f32 %v15805_v55  ;;  %v4788_v43 = vrot.slane %v15805_v55, 3  ;;  %v5783_v7 = vpack.c.bf16 %v5466_v34, %v5466_v34  ;;  %v2128_v49 = vpop.permute.xlu1 %2127 }
 0x4bb   :  { %18393 = vst [vmem:[#allocation44_spill] sm:$0xff] %v15890_v59  ;;  %v15896_v11 = vpop.eup %11250  ;;  %v5790_v17 = vpack.c.bf16 %v5480_v44, %v5480_v44  ;;  %v2363_v56 = vrot.slane %v15848_v15, %v18389_v18  ;;  %v4789_v30 = vrot.slane %v15805_v55, 4  ;;  %v5798_v29 = vpack.c.bf16 %v5496_v5, %v5496_v5 }
 0x4bc   :  { %18394 = vst [vmem:[#allocation13_spill] sm:$0xff] %v15896_v11  ;;  %v15901_v53 = vpop.eup %11252  ;;  %v2588_v23 = vmul.f32 %v9938_v3, %v2002_v60  ;;  %2309 = vbcast.lane.b32.xlu0 %v2307_v57, 256  ;;  %v2209_v0 = vrot.slane %v15759_v39, %v11598_v45  ;;  %v5791_v14 = vpack.c.bf16 %v5482_v58, %v5482_v58  ;;  %11266 = vrcp.f32 %v4787_v42 }
 0x4bd   :  { %v5806_v47 = vpack.c.bf16 %v5512_v31, %v5512_v31  ;;  %v2583_v25 = vmul.f32 %v9927_v61, %v1967_v46  ;;  %v15908_v18 = vunpack.c.l.b16 %v5782_v22  ;;  %v3796_v26 = vrot.slane %v2580_v12, 4  ;;  %v16004_v61 = vld [vmem:[%s17482_s0 + $0x338] sm:$0xff]  }
 0x4be   :  { %2260 = vbcast.lane.b32.xlu1 %v2258_v13, 256  ;;  %v15906_v36 = vpop.eup %11254  ;;  %v2591_v20 = vmul.f32 %v9943_v4, %v2023_v6  ;;  %v15913_v24 = vunpack.c.l.b16 %v5783_v7  ;;  %v15915_v34 = vunpack.c.l.b16 %v5790_v17  ;;  %v2265_v46 = vrot.slane %v15781_v19, %v11598_v45 }
 0x4bf   :  { %v15911_v3 = vpop.eup %11256  ;;  %v15922_v60 = vunpack.c.l.b16 %v5798_v29  ;;  %v3844_v13 = vrot.slane %v2588_v23, 4  ;;  %v2598_v4 = vmul.f32 %v9958_v10, %v2072_v63  ;;  %v2314_v5 = vrot.slane %v15830_v62, %v11587_v40 }
 0x4c0   :  { %v15920_v44 = vpop.eup %11258  ;;  %2211 = vbcast.lane.b32.xlu0 %v2209_v0, 256  ;;  %v15928_v58 = vunpack.c.l.b16 %v5791_v14  ;;  %v15930_v31 = vunpack.c.l.b16 %v5806_v47  ;;  %v3814_v42 = vrot.slane %v2583_v25, 4  ;;  %11268 = vrcp.f32 %v4788_v43 }
 0x4c1   :  { %v15926_v57 = vpop.eup %11260  ;;  %v3797_v7 = vadd.f32 %v3796_v26, %v2580_v12  ;;  %v3862_v17 = vrot.slane %v2591_v20, 4  ;;  %11270 = vrcp.f32 %v4789_v30  ;;  %v2606_v29 = vmul.f32 %v9974_v8, %v2128_v49  ;;  %v15947_v30 = vld [vmem:[%s17482_s0 + $0x310] sm:$0xff]  }
 0x4c2   :  { %2365 = vbcast.lane.b32.xlu1 %v2363_v56, 256  ;;  %18395 = vst [vmem:[#allocation48_spill] sm:$0xff] %v15926_v57  ;;  %v15932_v22 = vpop.eup %11262  ;;  %v2370_v0 = vrot.slane %v15848_v15, %v11587_v40  ;;  %v3845_v47 = vadd.f32 %v3844_v13, %v2588_v23  ;;  %v3904_v63 = vrot.slane %v2598_v4, 4  ;;  %v2216_v12 = vrot.slane %v15759_v39, %v11609_v50  ;;  %v15956_v23 = vld [vmem:[%s17482_s0 + $0x330] sm:$0xff]   ;;  %v18402_v57 = vld [vmem:[#allocation28_spill] sm:$0xff] }
 0x4c3   :  { %18396 = vst [vmem:[#allocation52_spill] sm:$0xff] %v15932_v22  ;;  %v3815_v40 = vadd.f32 %v3814_v42, %v2583_v25  ;;  %v3798_v13 = vrot.slane %v3797_v7, 2  ;;  %v3863_v39 = vadd.f32 %v3862_v17, %v2591_v20  ;;  %v2272_v49 = vrot.slane %v15781_v19, %v11609_v50  ;;  %v15972_v20 = vld [vmem:[%s17482_s0 + $0x350] sm:$0xff]  }
 0x4c4   :  { %v15939_v14 = vpop.eup %11264  ;;  %2316 = vbcast.lane.b32.xlu0 %v2314_v5, 256  ;;  %v2328_v5 = vrot.slane %v15830_v62, %v11609_v50  ;;  %v3952_v26 = vrot.slane %v2606_v29, 4  ;;  %v2377_v25 = vrot.slane %v15848_v15, %v11598_v45  ;;  %v2384_v42 = vrot.slane %v15848_v15, %v11609_v50  ;;  %v15984_v50 = vld [vmem:[%s17482_s0 + $0x318] sm:$0xff]  }
 0x4c5   :  { %v3846_v19 = vrot.slane %v3845_v47, 2  ;;  %v3905_v17 = vadd.f32 %v3904_v63, %v2598_v4  ;;  %v3816_v15 = vrot.slane %v3815_v40, 2  ;;  %v15989_v4 = vld [vmem:[%s17482_s0 + $0x360] sm:$0xff]   ;;  %v3864_v10 = vrot.slane %v3863_v39, 2 }
 0x4c6   :  { %2267 = vbcast.lane.b32.xlu1 %v2265_v46, 256  ;;  %v2321_v46 = vrot.slane %v15830_v62, %v11598_v45  ;;  %v15962_v43 = vpop.eup %11266  ;;  %v15977_v62 = vld [vmem:[%s17482_s0 + $0x340] sm:$0xff]   ;;  %v3799_v45 = vadd.f32 %v3798_v13, %v3797_v7  ;;  %v16009_v8 = vmax.f32 %v15821_v33, 1.0  ;;  %v16016_v13 = vld [vmem:[%s17482_s0 + $0x358] sm:$0xff]   ;;  %v18397_v7 = vrot.slane %v15805_v55, 5 }
 0x4c7   :  { %v3847_v56 = vadd.f32 %v3846_v19, %v3845_v47  ;;  %v3906_v21 = vrot.slane %v3905_v17, 2  ;;  %v3865_v11 = vadd.f32 %v3864_v10, %v3863_v39  ;;  %v18398_v33 = vrot.slane %v15801_v48, 7 }
 0x4c8   :  { %2218 = vbcast.lane.b32.xlu0 %v2216_v12, 256  ;;  %v3953_v12 = vadd.f32 %v3952_v26, %v2606_v29  ;;  %v3817_v29 = vadd.f32 %v3816_v15, %v3815_v40  ;;  %11272 = vrcp.f32 %v18397_v7  ;;  %v3800_v16 = vrot.slane %v3799_v45, 1 }
 0x4c9   :  { %11274 = vrcp.f32 %v18398_v33  ;;  %v4793_v40 = vrot.slane %v16009_v8, 1  ;;  %v3848_v15 = vrot.slane %v3847_v56, 1  ;;  %v18399_v7 = vrot.slane %v15805_v55, 6 }
 0x4ca   :  { %2372 = vbcast.lane.b32.xlu1 %v2370_v0, 256  ;;  %v15997_v0 = vld [vmem:[%s17482_s0 + $0x370] sm:$0xff]   ;;  %v16006_v63 = vpop.eup %11268  ;;  %v3954_v19 = vrot.slane %v3953_v12, 2  ;;  %v4794_v10 = vrot.slane %v16009_v8, 2  ;;  %v3818_v39 = vrot.slane %v3817_v29, 1  ;;  %v18400_v47 = vrot.slane %v15805_v55, 7 }
 0x4cb   :  { %v16018_v6 = vpop.eup %11270  ;;  %11276 = vrcp.f32 %v18399_v7  ;;  %v3801_v48 = vadd.f32 %v3800_v16, %v3799_v45  ;;  %v3866_v33 = vrot.slane %v3865_v11, 1  ;;  %v4797_v22 = vrot.slane %v16009_v8, 5 }
 0x4cc   :  { %2323 = vbcast.lane.b32.xlu0 %v2321_v46, 256  ;;  %11278 = vrcp.f32 %v18400_v47  ;;  %v4796_v46 = vrot.slane %v16009_v8, 4  ;;  %v3849_v55 = vadd.f32 %v3848_v15, %v3847_v56  ;;  %v16045_v16 = vmax.f32 %v15839_v41, 1.0  ;;  %v11380_v56 = vld [vmem:[%s17487_s7] ss:$0 sm:$0xff] }
 0x4cd   :  { %11280 = vrcp.f32 %v4793_v40  ;;  %v3819_v45 = vadd.f32 %v3818_v39, %v3817_v29  ;;  %v3867_v40 = vadd.f32 %v3866_v33, %v3865_v11  ;;  %v18405_v39 = vld [vmem:[#allocation40_spill] sm:$0xff] }
 0x4ce   :  { %2274 = vbcast.lane.b32.xlu1 %v2272_v49, 256  ;;  %v3907_v49 = vadd.f32 %v3906_v21, %v3905_v17  ;;  %11282 = vrcp.f32 %v4794_v10 }
 0x4cf   :  { %11284 = vrcp.f32 %v16009_v8  ;;  %v5468_v33 = vmul.f32 %v15815_v52, %v3819_v45 }
 0x4d0   :  { %2330 = vbcast.lane.b32.xlu0 %v2328_v5, 256  ;;  %v3955_v5 = vadd.f32 %v3954_v19, %v3953_v12  ;;  %v3908_v47 = vrot.slane %v3907_v49, 1 }
 0x4d1   :  { %v10401_v17 = vpop.f32.mrb[16].mxu0 }
 0x4d2   :  { %2379 = vbcast.lane.b32.xlu1 %v2377_v25, 256  ;;  %v4795_v25 = vrot.slane %v16009_v8, 3  ;;  %v7368_v59 = vadd.f32 %v10401_v17, %v18401_v9  ;;  %v7359_v35 = vpop.f32.mrb[17].mxu0  ;;  %v18404_v9 = vld [vmem:[#allocation39_spill] sm:$0xff]  ;;  %v16054_v7 = vpop.eup %11272  ;;  %v3956_v41 = vrot.slane %v3955_v5, 1  ;;  %v3909_v26 = vadd.f32 %v3908_v47, %v3907_v49 }
 0x4d3   :  { %v7360_v21 = vadd.f32 %v7359_v35, %v18402_v57  ;;  %v10402_v12 = vpop.f32.mrb[18].mxu0  ;;  %v5478_v57 = vmul.f32 %v15837_v38, %v3849_v55  ;;  %v16058_v11 = vpop.eup %11274  ;;  %v4801_v55 = vrot.slane %v16045_v16, 2 }
 0x4d4   :  { %v7447_v15 = vadd.f32 %v11380_v56, %v7368_v59  ;;  %v7371_v17 = vadd.f32 %v10402_v12, %v18404_v9  ;;  %v7362_v10 = vpop.f32.mrb[19].mxu0  ;;  %11286 = vrcp.f32 %v4795_v25  ;;  %v4800_v12 = vrot.slane %v16045_v16, 1 }
 0x4d5   :  { %v7445_v29 = vadd.f32 %v11380_v56, %v7360_v21  ;;  %v7363_v35 = vadd.f32 %v7362_v10, %v18405_v39  ;;  %11288 = vrcp.f32 %v4796_v46  ;;  %v5484_v21 = vmul.f32 %v15856_v37, %v3867_v40  ;;  %v16077_v37 = vld [vmem:[%s17482_s0 + $0x380] sm:$0xff]  }
 0x4d6   :  { %2386 = vbcast.lane.b32.xlu1 %v2384_v42, 256  ;;  %v18403_v42 = vld [vmem:[#allocation58_spill] sm:$0xff]  ;;  %11290 = vrcp.f32 %v4797_v22  ;;  %v7479_v10 = vmax.f32 %v7447_v15, 0.0  ;;  %v3957_v38 = vadd.f32 %v3956_v41, %v3955_v5  ;;  %v5789_v47 = vpack.c.bf16 %v5478_v57, %v5478_v57  ;;  %v16089_v41 = vld [vmem:[%s17482_s0 + $0x388] sm:$0xff]  }
 0x4d7   :  { %v5462_v19 = vmul.f32 %v18403_v42, %v3801_v48  ;;  %v7448_v48 = vadd.f32 %v11380_v56, %v7371_v17  ;;  %v7446_v59 = vadd.f32 %v11380_v56, %v7363_v35  ;;  %v16062_v42 = vpop.eup %11276  ;;  %v7477_v49 = vmax.f32 %v7445_v29, 0.0  ;;  %v16072_v22 = vld [vmem:[%s17482_s0 + $0x378] sm:$0xff]  }
 0x4d8   :  { %v16065_v39 = vpop.eup %11278  ;;  %v5498_v52 = vmul.f32 %v15906_v36, %v3909_v26  ;;  %v4802_v5 = vrot.slane %v16045_v16, 3  ;;  %v5784_v40 = vpack.c.bf16 %v5468_v33, %v5468_v33  ;;  %11292 = vrcp.f32 %v16045_v16 }
 0x4d9   :  { %v5781_v9 = vpack.c.bf16 %v5462_v19, %v5462_v19  ;;  %v7480_v25 = vmax.f32 %v7448_v48, 0.0  ;;  %v7478_v46 = vmax.f32 %v7446_v59, 0.0  ;;  %v16080_v19 = vpop.eup %11280  ;;  %v4803_v36 = vrot.slane %v16045_v16, 4 }
 0x4da   :  { %v16084_v26 = vpop.eup %11282  ;;  %v5792_v17 = vpack.c.bf16 %v5484_v21, %v5484_v21  ;;  %11294 = vrcp.f32 %v4800_v12  ;;  %v4804_v29 = vrot.slane %v16045_v16, 5  ;;  %v5514_v57 = vmul.f32 %v15962_v43, %v3957_v38  ;;  %v16100_v21 = vld [vmem:[%s17482_s0 + $0x3a0] sm:$0xff]   ;;  %v16191_v38 = vld [vmem:[%s17482_s0 + $0x3e8] sm:$0xff]  }
 0x4db   :  { %v7534_v45 = vpack.c.bf16 %v7480_v25, %v7479_v10  ;;  %v7533_v56 = vpack.c.bf16 %v7478_v46, %v7477_v49  ;;  %v6662_v15 = vunpack.c.l.b16 %v5781_v9  ;;  %v16092_v35 = vpop.eup %11284  ;;  %11296 = vrcp.f32 %v4801_v55  ;;  %v16105_v12 = vld [vmem:[%s17482_s0 + $0x3c0] sm:$0xff]   ;;  %18428 = vst [vmem:[#allocation56_spill] sm:$0xff] %v16191_v38 }
 0x4dc   :  { %18406 = vst [vmem:[#allocation47_spill] sm:$0xff] %v16092_v35  ;;  %v6670_v59 = vunpack.c.l.b16 %v5789_v47  ;;  %v5799_v9 = vpack.c.bf16 %v5498_v52, %v5498_v52  ;;  %11298 = vrcp.f32 %v4802_v5  ;;  %v4805_v43 = vrot.slane %v16045_v16, 6 }
 0x4dd   :  { %10495 = vmatprep.mubr.bf16.mxu1 %v7533_v56  ;;  %v6665_v25 = vunpack.c.l.b16 %v5784_v40  ;;  %11300 = vrcp.f32 %v4803_v36  ;;  %v18409_v55 = vrot.slane %v15908_v18, 7  ;;  %v6673_v52 = vunpack.c.l.b16 %v5792_v17  ;;  %v16130_v18 = vld [vmem:[%s17482_s0 + $0x3e0] sm:$0xff]  }
 0x4de   :  { %10496 = vmatmul.mubr.bf16.gmra.mrb[48].mxu1 %v7534_v45  ;;  %v16108_v10 = vpop.eup %11286  ;;  %v16120_v45 = vld [vmem:[%s17482_s0 + $0x3a8] sm:$0xff]   ;;  %11302 = vrcp.f32 %v4804_v29  ;;  %v4806_v5 = vrot.slane %v16045_v16, 7  ;;  %v5807_v56 = vpack.c.bf16 %v5514_v57, %v5514_v57  ;;  %v18412_v17 = vrot.slane %v15915_v34, 7  ;;  %v16173_v34 = vld [vmem:[%s17482_s0 + $0x390] sm:$0xff]  }
 0x4df   :  { %18407 = vst [vmem:[#allocation53_spill] sm:$0xff] %v16108_v10  ;;  %v16112_v46 = vpop.eup %11288  ;;  %v7070_v47 = vsel %vm6727_vm1, %v18409_v55, %v6662_v15  ;;  %v18411_v15 = vrot.slane %v16009_v8, 6  ;;  %v16137_v29 = vunpack.c.l.b16 %v5799_v9  ;;  %v7073_v55 = vrot.slane %v6665_v25, 5  ;;  %v16152_v9 = vld [vmem:[%s17482_s0 + $0x3c8] sm:$0xff]   ;;  %18423 = vst [vmem:[#allocation20_spill] sm:$0xff] %v16173_v34 }
 0x4e0   :  { %18408 = vst [vmem:[#allocation5_spill] sm:$0xff] %v16112_v46  ;;  %v16123_v40 = vpop.eup %11290  ;;  %v7084_v16 = vsel %vm6727_vm1, %v18412_v17, %v6670_v59  ;;  %v18415_v36 = vrot.slane %v15913_v24, 6  ;;  %v18416_v48 = vrot.slane %v16009_v8, 7  ;;  %18417 = vst [vmem:[#allocation27_spill] sm:$0xff] %v16152_v9  ;;  %v16156_v25 = vunpack.c.l.b16 %v5807_v56 }
 0x4e1   :  { %18410 = vst [vmem:[#allocation50_spill] sm:$0xff] %v16123_v40  ;;  %v4529_v49 = vpop.xlane.xlu0 %4528  ;;  %11304 = vrcp.f32 %v18411_v15  ;;  %18413 = vst [vmem:[#allocation49_spill] sm:$0xff] %v16137_v29  ;;  %v7087_v15 = vrot.slane %v6673_v52, 5  ;;  %v18422_v17 = vunpack.c.l.bf16 %v15947_v30  ;;  %v18451_v9 = vunpack.c.l.bf16 %v15972_v20 }
 0x4e2   :  { %v16139_v57 = vmax.f32 %v4529_v49, 1.0  ;;  %11306 = vrcp.f32 %v4805_v43  ;;  %v7072_v33 = vsel %vm6730_vm2, %v18415_v36, %v7070_v47  ;;  %v16154_v43 = vpop.eup %11292  ;;  %18419 = vst [vmem:[#allocation35_spill] sm:$0xff] %v16156_v25 }
 0x4e3   :  { %11308 = vrcp.f32 %v18416_v48  ;;  %18418 = vst [vmem:[#allocation16_spill] sm:$0xff] %v16154_v43  ;;  %v18420_v48 = vrot.slane %v15928_v58, 6  ;;  %v18438_v58 = vunpack.c.l.bf16 %v15956_v23 }
 0x4e4   :  { %18414 = vst [vmem:[#allocation38_spill] sm:$0xff] %v16139_v57  ;;  %11310 = vrcp.f32 %v4806_v5  ;;  %v4807_v49 = vrot.slane %v16139_v57, 1  ;;  %v16163_v52 = vpop.eup %11294  ;;  %v4808_v56 = vrot.slane %v16139_v57, 2  ;;  %v4811_v46 = vrot.slane %v16139_v57, 5 }
 0x4e5   :  { %v1974_v24 = vpop.permute.xlu0 %1973  ;;  %v7086_v47 = vsel %vm6730_vm2, %v18420_v48, %v7084_v16  ;;  %18421 = vst [vmem:[#allocation25_spill] sm:$0xff] %v16163_v52  ;;  %v16175_v8 = vpop.eup %11296  ;;  %v16179_v16 = vsel %vm6733_vm3, %v7073_v55, %v7072_v33  ;;  %11312 = vrcp.f32 %v16139_v57  ;;  %v16197_v33 = vld [vmem:[%s17482_s0 + $0x3b0] sm:$0xff]   ;;  %v4810_v55 = vrot.slane %v16139_v57, 4 }
 0x4e6   :  { %v2584_v5 = vmul.f32 %v18422_v17, %v1974_v24  ;;  %18424 = vst [vmem:[#allocation19_spill] sm:$0xff] %v16175_v8  ;;  %18425 = vst [vmem:[#allocation7_spill] sm:$0xff] %v16179_v16  ;;  %v4809_v24 = vrot.slane %v16139_v57, 3  ;;  %v16183_v17 = vpop.eup %11298  ;;  %v16186_v59 = vsel %vm6733_vm3, %v7087_v15, %v7086_v47  ;;  %11314 = vrcp.f32 %v4807_v49 }
 0x4e7   :  { %18426 = vst [vmem:[#allocation54_spill] sm:$0xff] %v16183_v17  ;;  %18427 = vst [vmem:[#allocation22_spill] sm:$0xff] %v16186_v59  ;;  %v16200_v48 = vpop.eup %11300  ;;  %v18433_v16 = vunpack.c.l.bf16 %v15977_v62  ;;  %11316 = vrcp.f32 %v4808_v56 }
 0x4e8   :  { %v3820_v36 = vrot.slane %v2584_v5, 4  ;;  %18429 = vst [vmem:[#allocation43_spill] sm:$0xff] %v16197_v33  ;;  %18430 = vst [vmem:[#allocation37_spill] sm:$0xff] %v16200_v48  ;;  %v16205_v17 = vpop.eup %11302  ;;  %11318 = vrcp.f32 %v4809_v24 }
 0x4e9   :  { %v4532_v15 = vpop.xlane.xlu1 %4531  ;;  %v2058_v47 = vpop.permute.xlu0 %2057  ;;  %18431 = vst [vmem:[#allocation4_spill] sm:$0xff] %v16205_v17  ;;  %11320 = vrcp.f32 %v4810_v55  ;;  %v18439_v55 = vunpack.c.l.bf16 %v15989_v4 }
 0x4ea   :  { %v3821_v29 = vadd.f32 %v3820_v36, %v2584_v5  ;;  %v16207_v59 = vmax.f32 %v4532_v15, 1.0  ;;  %v2596_v10 = vmul.f32 %v18433_v16, %v2058_v47  ;;  %11322 = vrcp.f32 %v4811_v46 }
 0x4eb   :  { %v16211_v43 = vpop.eup %11304 }
 0x4ec   :  { %18432 = vst [vmem:[#allocation55_spill] sm:$0xff] %v16207_v59  ;;  %18434 = vst [vmem:[#allocation14_spill] sm:$0xff] %v16211_v43  ;;  %v16216_v40 = vpop.eup %11306  ;;  %v3822_v25 = vrot.slane %v3821_v29, 2  ;;  %v3892_v17 = vrot.slane %v2596_v10, 4  ;;  %v4814_v16 = vrot.slane %v16207_v59, 1  ;;  %v4815_v15 = vrot.slane %v16207_v59, 2 }
 0x4ed   :  { %18435 = vst [vmem:[#allocation57_spill] sm:$0xff] %v16216_v40  ;;  %v16219_v5 = vpop.eup %11308  ;;  %v2030_v62 = vpop.permute.xlu1 %2029  ;;  %11324 = vrcp.f32 %v16207_v59  ;;  %v4816_v46 = vrot.slane %v16207_v59, 3 }
 0x4ee   :  { %18436 = vst [vmem:[#allocation59_spill] sm:$0xff] %v16219_v5  ;;  %v2114_v56 = vpop.permute.xlu0 %2113  ;;  %v16224_v49 = vpop.eup %11310  ;;  %v3823_v24 = vadd.f32 %v3822_v25, %v3821_v29  ;;  %v3893_v48 = vadd.f32 %v3892_v17, %v2596_v10  ;;  %v2592_v40 = vmul.f32 %v18438_v58, %v2030_v62  ;;  %v16233_v5 = vld [vmem:[%s17482_s0 + $0x3d0] sm:$0xff]   ;;  %11326 = vrcp.f32 %v4814_v16  ;;  %v16247_v29 = vld [vmem:[%s17482_s0 + $0x398] sm:$0xff]  }
 0x4ef   :  { %18437 = vst [vmem:[#allocation10_spill] sm:$0xff] %v16224_v49  ;;  %v2604_v36 = vmul.f32 %v18439_v55, %v2114_v56  ;;  %18440 = vst [vmem:[#allocation45_spill] sm:$0xff] %v16233_v5  ;;  %v16242_v49 = vpop.eup %11312  ;;  %v18444_v16 = vunpack.c.h.bf16 %v15872_v28  ;;  %v18445_v55 = vunpack.c.h.bf16 %v15947_v30  ;;  %11328 = vrcp.f32 %v4815_v15 }
 0x4f0   :  { %v3824_v10 = vrot.slane %v3823_v24, 1  ;;  %v3894_v25 = vrot.slane %v3893_v48, 2  ;;  %v3868_v17 = vrot.slane %v2592_v40, 4  ;;  %18441 = vst [vmem:[#allocation17_spill] sm:$0xff] %v16242_v49  ;;  %18442 = vst [vmem:[#allocation15_spill] sm:$0xff] %v16247_v29  ;;  %v16249_v38 = vpop.eup %11314  ;;  %11330 = vrcp.f32 %v4816_v46 }
 0x4f1   :  { %v3940_v58 = vrot.slane %v2604_v36, 4  ;;  %v2079_v62 = vpop.permute.xlu1 %2078  ;;  %18443 = vst [vmem:[#allocation26_spill] sm:$0xff] %v16249_v38 }
 0x4f2   :  { %v1981_v4 = vpop.permute.xlu0 %1980  ;;  %v3825_v43 = vadd.f32 %v3824_v10, %v3823_v24  ;;  %v3895_v34 = vadd.f32 %v3894_v25, %v3893_v48  ;;  %v3869_v35 = vadd.f32 %v3868_v17, %v2592_v40  ;;  %v2599_v56 = vmul.f32 %v18444_v16, %v2079_v62  ;;  %v16257_v48 = vpop.eup %11316 }
 0x4f3   :  { %v3941_v8 = vadd.f32 %v3940_v58, %v2604_v36  ;;  %v2585_v5 = vmul.f32 %v18445_v55, %v1981_v4  ;;  %18446 = vst [vmem:[#allocation9_spill] sm:$0xff] %v16257_v48  ;;  %v16259_v25 = vpop.eup %11318 }
 0x4f4   :  { %v3896_v40 = vrot.slane %v3895_v34, 1  ;;  %v3870_v36 = vrot.slane %v3869_v35, 2  ;;  %18447 = vst [vmem:[#allocation60_spill] sm:$0xff] %v16259_v25  ;;  %v3910_v17 = vrot.slane %v2599_v56, 4  ;;  %v16263_v4 = vpop.eup %11320  ;;  %v5470_v55 = vmul.f32 %v15819_v2, %v3825_v43 }
 0x4f5   :  { %v3942_v10 = vrot.slane %v3941_v8, 2  ;;  %v3826_v58 = vrot.slane %v2585_v5, 4  ;;  %v2135_v49 = vpop.permute.xlu1 %2134  ;;  %18448 = vst [vmem:[#allocation61_spill] sm:$0xff] %v16263_v4  ;;  %v16266_v33 = vpop.eup %11322  ;;  %v18450_v25 = vunpack.c.h.bf16 %v15881_v54 }
 0x4f6   :  { %v2086_v28 = vpop.permute.xlu0 %2085  ;;  %v3897_v16 = vadd.f32 %v3896_v40, %v3895_v34  ;;  %v3871_v24 = vadd.f32 %v3870_v36, %v3869_v35  ;;  %18449 = vst [vmem:[#allocation31_spill] sm:$0xff] %v16266_v33  ;;  %v3911_v15 = vadd.f32 %v3910_v17, %v2599_v56  ;;  %v5785_v40 = vpack.c.bf16 %v5470_v55, %v5470_v55  ;;  %v16281_v17 = vld [vmem:[%s17482_s0 + $0x3f0] sm:$0xff]  }
 0x4f7   :  { %v3943_v47 = vadd.f32 %v3942_v10, %v3941_v8  ;;  %v3827_v48 = vadd.f32 %v3826_v58, %v2585_v5  ;;  %v2607_v38 = vmul.f32 %v18450_v25, %v2135_v49  ;;  %v2600_v52 = vmul.f32 %v18451_v9, %v2086_v28  ;;  %v16274_v2 = vpop.eup %11324 }
 0x4f8   :  { %v5494_v62 = vmul.f32 %v15901_v53, %v3897_v16  ;;  %v3872_v30 = vrot.slane %v3871_v24, 1  ;;  %18452 = vst [vmem:[#allocation28_spill] sm:$0xff] %v16274_v2  ;;  %v3912_v35 = vrot.slane %v3911_v15, 2  ;;  %v16276_v36 = vpop.eup %11326 }
 0x4f9   :  { %v3944_v57 = vrot.slane %v3943_v47, 1  ;;  %v3828_v34 = vrot.slane %v3827_v48, 2  ;;  %v3958_v43 = vrot.slane %v2607_v38, 4  ;;  %v3916_v8 = vrot.slane %v2600_v52, 4  ;;  %v2037_v56 = vpop.permute.xlu1 %2036 }
 0x4fa   :  { %v1988_v5 = vpop.permute.xlu0 %1987  ;;  %v3873_v54 = vadd.f32 %v3872_v30, %v3871_v24  ;;  %v3913_v9 = vadd.f32 %v3912_v35, %v3911_v15  ;;  %v5797_v58 = vpack.c.bf16 %v5494_v62, %v5494_v62  ;;  %v18453_v24 = vunpack.c.h.bf16 %v15956_v23 }
 0x4fb   :  { %v3945_v49 = vadd.f32 %v3944_v57, %v3943_v47  ;;  %v3829_v53 = vadd.f32 %v3828_v34, %v3827_v48  ;;  %v3959_v10 = vadd.f32 %v3958_v43, %v2607_v38  ;;  %v3917_v25 = vadd.f32 %v3916_v8, %v2600_v52  ;;  %v16287_v52 = vpop.eup %11328 }
 0x4fc   :  { %v5486_v28 = vmul.f32 %v15861_v1, %v3873_v54  ;;  %v2593_v57 = vmul.f32 %v18453_v24, %v2037_v56  ;;  %v3914_v47 = vrot.slane %v3913_v9, 1  ;;  %v16289_v15 = vunpack.c.l.b16 %v5785_v40 }
 0x4fd   :  { %v5510_v16 = vmul.f32 %v15939_v14, %v3945_v49  ;;  %v3830_v46 = vrot.slane %v3829_v53, 1  ;;  %v3960_v30 = vrot.slane %v3959_v10, 2  ;;  %v3918_v55 = vrot.slane %v3917_v25, 2  ;;  %v2142_v48 = vpop.permute.xlu1 %2141 }
 0x4fe   :  { %v2093_v38 = vpop.permute.xlu0 %2092  ;;  %v5793_v35 = vpack.c.bf16 %v5486_v28, %v5486_v28  ;;  %v3874_v34 = vrot.slane %v2593_v57, 4  ;;  %v3915_v1 = vadd.f32 %v3914_v47, %v3913_v9  ;;  %v6678_v23 = vunpack.c.l.b16 %v5797_v58 }
 0x4ff   :  { %v3831_v43 = vadd.f32 %v3830_v46, %v3829_v53  ;;  %v3961_v14 = vadd.f32 %v3960_v30, %v3959_v10  ;;  %v3919_v8 = vadd.f32 %v3918_v55, %v3917_v25  ;;  %v5805_v56 = vpack.c.bf16 %v5510_v16, %v5510_v16 }
 0x500   :  { %v3875_v54 = vadd.f32 %v3874_v34, %v2593_v57  ;;  %v18454_v49 = vunpack.c.l.bf16 %v15984_v50  ;;  %v5500_v4 = vmul.f32 %v15911_v3, %v3915_v1  ;;  %v16296_v2 = vunpack.c.l.b16 %v5793_v35 }
 0x501   :  { %v5472_v33 = vmul.f32 %v15825_v51, %v3831_v43  ;;  %v3962_v40 = vrot.slane %v3961_v14, 1  ;;  %v3920_v29 = vrot.slane %v3919_v8, 1  ;;  %v2044_v28 = vpop.permute.xlu1 %2043  ;;  %v18455_v10 = vrot.slane %v16207_v59, 4 }
 0x502   :  { %v2586_v24 = vmul.f32 %v18454_v49, %v1988_v5  ;;  %v3876_v62 = vrot.slane %v3875_v54, 2  ;;  %v1995_v53 = vpop.permute.xlu0 %1994  ;;  %v5800_v25 = vpack.c.bf16 %v5500_v4, %v5500_v4  ;;  %v16300_v5 = vpop.eup %11330  ;;  %v18456_v51 = vunpack.c.l.bf16 %v15997_v0 }
 0x503   :  { %11332 = vrcp.f32 %v18455_v10  ;;  %v5786_v58 = vpack.c.bf16 %v5472_v33, %v5472_v33  ;;  %v3963_v16 = vadd.f32 %v3962_v40, %v3961_v14  ;;  %v3921_v57 = vadd.f32 %v3920_v29, %v3919_v8 }
 0x504   :  { %v3832_v9 = vrot.slane %v2586_v24, 4  ;;  %v3877_v3 = vadd.f32 %v3876_v62, %v3875_v54  ;;  %v2608_v46 = vmul.f32 %v18456_v51, %v2142_v48  ;;  %v18457_v30 = vunpack.c.h.bf16 %v15972_v20 }
 0x505   :  { %v18458_v34 = vrot.slane %v15922_v60, 7  ;;  %v6686_v33 = vunpack.c.l.b16 %v5805_v56  ;;  %v16312_v4 = vunpack.c.l.b16 %v5800_v25  ;;  %v2149_v29 = vpop.permute.xlu1 %2148  ;;  %v16315_v54 = vunpack.c.l.b16 %v5786_v58 }
 0x506   :  { %v3833_v47 = vadd.f32 %v3832_v9, %v2586_v24  ;;  %v2601_v55 = vmul.f32 %v18457_v30, %v2093_v38  ;;  %v3878_v43 = vrot.slane %v3877_v3, 1  ;;  %v3964_v14 = vrot.slane %v2608_v46, 4  ;;  %v2100_v56 = vpop.permute.xlu0 %2099 }
 0x507   :  { %v16310_v1 = vsel %vm6727_vm1, %v18458_v34, %v6678_v23  ;;  %v5516_v20 = vmul.f32 %v16006_v63, %v3963_v16  ;;  %v5502_v38 = vmul.f32 %v15920_v44, %v3921_v57  ;;  %v18459_v40 = vrot.slane %v15930_v31, 7 }
 0x508   :  { %v3834_v62 = vrot.slane %v3833_v47, 2  ;;  %v3922_v8 = vrot.slane %v2601_v55, 4  ;;  %v3879_v60 = vadd.f32 %v3878_v43, %v3877_v3  ;;  %v3965_v23 = vadd.f32 %v3964_v14, %v2608_v46 }
 0x509   :  { %v16322_v9 = vsel %vm6727_vm1, %v18459_v40, %v6686_v33  ;;  %v18460_v25 = vunpack.c.l.bf16 %v16004_v61  ;;  %v18461_v51 = vunpack.c.h.bf16 %v15984_v50  ;;  %v5801_v46 = vpack.c.bf16 %v5502_v38, %v5502_v38 }
 0x50a   :  { %v3835_v49 = vadd.f32 %v3834_v62, %v3833_v47  ;;  %v3923_v24 = vadd.f32 %v3922_v8, %v2601_v55  ;;  %v5488_v44 = vmul.f32 %v15866_v32, %v3879_v60  ;;  %v3966_v57 = vrot.slane %v3965_v23, 2  ;;  %v16330_v55 = vpop.permute.xlu1 %2050 }
 0x50b   :  { %v2594_v58 = vmul.f32 %v18460_v25, %v2044_v28  ;;  %v2587_v63 = vmul.f32 %v18461_v51, %v1995_v53  ;;  %v5808_v47 = vpack.c.bf16 %v5516_v20, %v5516_v20  ;;  %v18463_v32 = vunpack.c.h.bf16 %v15997_v0  ;;  %v2107_v51 = vpop.permute.xlu0 %2106  ;;  %v11381_v0 = vld [vmem:[%s17488_s10] ss:$0 sm:$0xff] }
 0x50c   :  { %v3836_v16 = vrot.slane %v3835_v49, 1  ;;  %v3924_v3 = vrot.slane %v3923_v24, 2  ;;  %v3967_v28 = vadd.f32 %v3966_v57, %v3965_v23  ;;  %v5794_v50 = vpack.c.bf16 %v5488_v44, %v5488_v44 }
 0x50d   :  { %v3880_v30 = vrot.slane %v2594_v58, 4  ;;  %v3838_v31 = vrot.slane %v2587_v63, 4  ;;  %v16332_v34 = vpop.eup %11332  ;;  %v2609_v8 = vmul.f32 %v18463_v32, %v2149_v29  ;;  %v18464_v40 = vunpack.c.l.bf16 %v16016_v13 }
 0x50e   :  { %18462 = vst [vmem:[#allocation58_spill] sm:$0xff] %v16332_v34  ;;  %v3837_v43 = vadd.f32 %v3836_v16, %v3835_v49  ;;  %v3925_v62 = vadd.f32 %v3924_v3, %v3923_v24  ;;  %v3968_v38 = vrot.slane %v3967_v28, 1  ;;  %v16340_v10 = vunpack.c.l.b16 %v5808_v47  ;;  %v10493_v49 = vpop.f32.mrb[44].mxu1 }
 0x50f   :  { %v3881_v53 = vadd.f32 %v3880_v30, %v2594_v58  ;;  %v3839_v14 = vadd.f32 %v3838_v31, %v2587_v63  ;;  %v2602_v25 = vmul.f32 %v18464_v40, %v2100_v56  ;;  %v16342_v48 = vunpack.c.l.b16 %v5801_v46  ;;  %v2156_v30 = vpop.permute.xlu1 %2155 }
 0x510   :  { %v5474_v20 = vmul.f32 %v15834_v27, %v3837_v43  ;;  %v3926_v60 = vrot.slane %v3925_v62, 1  ;;  %v8108_v29 = vadd.f32 %v11381_v0, %v10493_v49  ;;  %v8008_v27 = vpop.f32.mrb[45].mxu1  ;;  %v3969_v63 = vadd.f32 %v3968_v38, %v3967_v28  ;;  %v18465_v49 = vld [vmem:[#allocation48_spill] sm:$0xff] }
 0x511   :  { %v3882_v23 = vrot.slane %v3881_v53, 2  ;;  %v3840_v24 = vrot.slane %v3839_v14, 2  ;;  %v3970_v44 = vrot.slane %v2609_v8, 4  ;;  %v8106_v16 = vadd.f32 %v11381_v0, %v8008_v27  ;;  %v10494_v57 = vpop.f32.mrb[46].mxu1 }
 0x512   :  { %v5787_v58 = vpack.c.bf16 %v5474_v20, %v5474_v20  ;;  %v3927_v56 = vadd.f32 %v3926_v60, %v3925_v62  ;;  %v16347_v46 = vunpack.c.l.b16 %v5794_v50  ;;  %v8109_v31 = vadd.f32 %v11381_v0, %v10494_v57  ;;  %v8011_v43 = vpop.f32.mrb[47].mxu1  ;;  %v2177_v62 = vpop.permute.xlu0 %2176  ;;  %v10768_v50 = vld [vmem:[%s17489_s12] sm:$0xff]  }
 0x513   :  { %v3883_v3 = vadd.f32 %v3882_v23, %v3881_v53  ;;  %v3841_v47 = vadd.f32 %v3840_v24, %v3839_v14  ;;  %v5518_v32 = vmul.f32 %v16018_v6, %v3969_v63  ;;  %v3928_v40 = vrot.slane %v2602_v25, 4  ;;  %v10769_v23 = vld [vmem:[%s17489_s12 + $0x8] sm:$0xff]   ;;  %10511 = vmatprep.subr.bf16.mxu0 %v10768_v50 }
 0x514   :  { %v8140_v33 = vmax.f32 %v8108_v29, 0.0  ;;  %v8107_v35 = vadd.f32 %v11381_v0, %v8011_v43  ;;  %v5504_v20 = vmul.f32 %v18465_v49, %v3927_v56  ;;  %v8138_v28 = vmax.f32 %v8106_v16, 0.0  ;;  %v2163_v56 = vpop.permute.xlu1 %2162  ;;  %10512 = vmatpush3.bf16.msra.mxu0 %v10768_v50 }
 0x515   :  { %v3884_v59 = vrot.slane %v3883_v3, 1  ;;  %v8141_v38 = vmax.f32 %v8109_v31, 0.0  ;;  %v5809_v27 = vpack.c.bf16 %v5518_v32, %v5518_v32  ;;  %v3842_v34 = vrot.slane %v3841_v47, 1  ;;  %10513 = vmatprep.subr.bf16.mxu0 %v10769_v23 }
 0x516   :  { %v16354_v53 = vunpack.c.l.b16 %v5787_v58  ;;  %v8139_v14 = vmax.f32 %v8107_v35, 0.0  ;;  %v5802_v60 = vpack.c.bf16 %v5504_v20, %v5504_v20  ;;  %v3971_v6 = vadd.f32 %v3970_v44, %v2609_v8 }
 0x517   :  { %v16360_v0 = vpack.c.bf16 %v8141_v38, %v8140_v33  ;;  %v16362_v29 = vunpack.c.l.b16 %v5809_v27  ;;  %v3929_v63 = vadd.f32 %v3928_v40, %v2602_v25  ;;  %v3885_v58 = vadd.f32 %v3884_v59, %v3883_v3  ;;  %v10770_v25 = vld [vmem:[%s17489_s12 + $0x10] sm:$0xff]   ;;  %v18469_v38 = vld [vmem:[#allocation6_spill] sm:$0xff] }
 0x518   :  { %v16365_v57 = vpack.c.bf16 %v8139_v14, %v8138_v28  ;;  %v3972_v35 = vrot.slane %v3971_v6, 2  ;;  %v3843_v44 = vadd.f32 %v3842_v34, %v3841_v47  ;;  %v18466_v33 = vunpack.c.h.bf16 %v16004_v61  ;;  %v2184_v28 = vpop.permute.xlu0 %2183  ;;  %10514 = vmatpush3.bf16.msra.mxu0 %v10769_v23 }
 0x519   :  { %v3930_v31 = vrot.slane %v3929_v63, 2  ;;  %v16375_v40 = vunpack.c.l.b16 %v5802_v60  ;;  %v18467_v3 = vunpack.c.h.bf16 %v16016_v13  ;;  %v18468_v61 = vunpack.c.l.bf16 %v16072_v22  ;;  %10515 = vmatprep.subr.bf16.mxu0 %v10770_v25 }
 0x51a   :  { %v2595_v43 = vmul.f32 %v18466_v33, %v16330_v55  ;;  %v3973_v59 = vadd.f32 %v3972_v35, %v3971_v6  ;;  %v5490_v27 = vmul.f32 %v18469_v38, %v3885_v58  ;;  %v18470_v33 = vunpack.c.h.bf16 %v16077_v37  ;;  %v18471_v6 = vld [vmem:[#allocation44_spill] sm:$0xff]  ;;  %v2233_v38 = vpop.permute.xlu1 %2232 }
 0x51b   :  { %v2603_v49 = vmul.f32 %v18467_v3, %v2107_v51  ;;  %v3931_v47 = vadd.f32 %v3930_v31, %v3929_v63  ;;  %v2610_v55 = vmul.f32 %v18468_v61, %v2156_v30  ;;  %v5476_v35 = vmul.f32 %v18471_v6, %v3843_v44  ;;  %v10771_v63 = vld [vmem:[%s17489_s12 + $0x18] sm:$0xff]  }
 0x51c   :  { %v3886_v20 = vrot.slane %v2595_v43, 4  ;;  %v3974_v50 = vrot.slane %v3973_v59, 1  ;;  %v2613_v60 = vmul.f32 %v18470_v33, %v2177_v62  ;;  %v18472_v23 = vunpack.c.h.bf16 %v16072_v22  ;;  %10516 = vmatpush3.bf16.msra.mxu0 %v10770_v25  ;;  %v18474_v22 = vld [vmem:[#allocation52_spill] sm:$0xff] }
 0x51d   :  { %v3934_v14 = vrot.slane %v2603_v49, 4  ;;  %v3932_v13 = vrot.slane %v3931_v47, 1  ;;  %v3976_v3 = vrot.slane %v2610_v55, 4  ;;  %v5795_v33 = vpack.c.bf16 %v5490_v27, %v5490_v27  ;;  %10517 = vmatprep.subr.bf16.mxu0 %v10771_v63 }
 0x51e   :  { %v3887_v51 = vadd.f32 %v3886_v20, %v2595_v43  ;;  %v3975_v31 = vadd.f32 %v3974_v50, %v3973_v59  ;;  %v3994_v61 = vrot.slane %v2613_v60, 4  ;;  %v2611_v44 = vmul.f32 %v18472_v23, %v2163_v56  ;;  %v2289_v50 = vpop.permute.xlu0 %2288 }
 0x51f   :  { %v3935_v58 = vadd.f32 %v3934_v14, %v2603_v49  ;;  %v3933_v34 = vadd.f32 %v3932_v13, %v3931_v47  ;;  %v3977_v62 = vadd.f32 %v3976_v3, %v2610_v55  ;;  %v18473_v6 = vunpack.c.l.bf16 %v16089_v41  ;;  %v10772_v47 = vld [vmem:[%s17489_s12 + $0x20] sm:$0xff]  }
 0x520   :  { %v3888_v24 = vrot.slane %v3887_v51, 2  ;;  %v3995_v20 = vadd.f32 %v3994_v61, %v2613_v60  ;;  %v5520_v8 = vmul.f32 %v16054_v7, %v3975_v31  ;;  %v3982_v49 = vrot.slane %v2611_v44, 4  ;;  %v2240_v31 = vpop.permute.xlu1 %2239  ;;  %10518 = vmatpush3.bf16.msra.mxu0 %v10771_v63 }
 0x521   :  { %v3936_v43 = vrot.slane %v3935_v58, 2  ;;  %v2614_v16 = vmul.f32 %v18473_v6, %v2184_v28  ;;  %v3978_v59 = vrot.slane %v3977_v62, 2  ;;  %v5506_v56 = vmul.f32 %v18474_v22, %v3933_v34  ;;  %10519 = vmatprep.subr.bf16.mxu0 %v10772_v47  ;;  %v10773_v34 = vld [vmem:[%s17489_s12 + $0x28] sm:$0xff]  }
 0x522   :  { %v3889_v30 = vadd.f32 %v3888_v24, %v3887_v51  ;;  %v3996_v27 = vrot.slane %v3995_v20, 2  ;;  %v5788_v60 = vpack.c.bf16 %v5476_v35, %v5476_v35  ;;  %v3983_v25 = vadd.f32 %v3982_v49, %v2611_v44  ;;  %v2170_v63 = vpop.permute.xlu0 %2169 }
 0x523   :  { %v3937_v55 = vadd.f32 %v3936_v43, %v3935_v58  ;;  %v4000_v14 = vrot.slane %v2614_v16, 4  ;;  %v3979_v28 = vadd.f32 %v3978_v59, %v3977_v62  ;;  %v16399_v3 = vunpack.c.l.b16 %v5795_v33  ;;  %v18475_v43 = vld [vmem:[#allocation13_spill] sm:$0xff] }
 0x524   :  { %v3890_v13 = vrot.slane %v3889_v30, 1  ;;  %v3997_v24 = vadd.f32 %v3996_v27, %v3995_v20  ;;  %v5810_v61 = vpack.c.bf16 %v5520_v8, %v5520_v8  ;;  %v3984_v32 = vrot.slane %v3983_v25, 2  ;;  %10520 = vmatpush3.bf16.msra.mxu0 %v10772_v47  ;;  %v2345_v47 = vpop.permute.xlu1 %2344 }
 0x525   :  { %v3938_v7 = vrot.slane %v3937_v55, 1  ;;  %v4001_v51 = vadd.f32 %v4000_v14, %v2614_v16  ;;  %v3980_v6 = vrot.slane %v3979_v28, 1  ;;  %v5803_v35 = vpack.c.bf16 %v5506_v56, %v5506_v56  ;;  %10521 = vmatprep.subr.bf16.mxu0 %v10773_v34 }
 0x526   :  { %v3891_v23 = vadd.f32 %v3890_v13, %v3889_v30  ;;  %v3998_v62 = vrot.slane %v3997_v24, 1  ;;  %v16404_v33 = vunpack.c.l.b16 %v5788_v60  ;;  %v3985_v59 = vadd.f32 %v3984_v32, %v3983_v25  ;;  %v10774_v32 = vld [vmem:[%s17489_s12 + $0x30] sm:$0xff]  }
 0x527   :  { %v3939_v58 = vadd.f32 %v3938_v7, %v3937_v55  ;;  %v4002_v44 = vrot.slane %v4001_v51, 2  ;;  %v3981_v16 = vadd.f32 %v3980_v6, %v3979_v28  ;;  %v18476_v22 = vunpack.c.h.bf16 %v16100_v21 }
 0x528   :  { %v5492_v20 = vmul.f32 %v18475_v43, %v3891_v23  ;;  %v3999_v30 = vadd.f32 %v3998_v62, %v3997_v24  ;;  %v16410_v14 = vunpack.c.l.b16 %v5810_v61  ;;  %v3986_v55 = vrot.slane %v3985_v59, 1  ;;  %10522 = vmatpush3.bf16.msra.mxu0 %v10773_v34  ;;  %v2226_v43 = vpop.permute.xlu0 %2225 }
 0x529   :  { %v5508_v8 = vmul.f32 %v16058_v11, %v3939_v58  ;;  %v4003_v49 = vadd.f32 %v4002_v44, %v4001_v51  ;;  %v2621_v27 = vmul.f32 %v18476_v22, %v2233_v38  ;;  %v5522_v56 = vmul.f32 %v16062_v42, %v3981_v16  ;;  %10523 = vmatprep.subr.bf16.mxu0 %v10774_v32 }
 0x52a   :  { %v18477_v60 = vunpack.c.h.bf16 %v16105_v12  ;;  %v16418_v11 = vunpack.c.l.b16 %v5803_v35  ;;  %v5528_v28 = vmul.f32 %v16080_v19, %v3999_v30  ;;  %v5796_v7 = vpack.c.bf16 %v5492_v20, %v5492_v20  ;;  %v10775_v20 = vld [vmem:[%s17489_s12 + $0x38] sm:$0xff]  }
 0x52b   :  { %v4004_v25 = vrot.slane %v4003_v49, 1  ;;  %v4042_v38 = vrot.slane %v2621_v27, 4  ;;  %v5804_v24 = vpack.c.bf16 %v5508_v8, %v5508_v8  ;;  %v5811_v51 = vpack.c.bf16 %v5522_v56, %v5522_v56 }
 0x52c   :  { %v2629_v13 = vmul.f32 %v18477_v60, %v2289_v50  ;;  %v5814_v23 = vpack.c.bf16 %v5528_v28, %v5528_v28  ;;  %v3987_v50 = vadd.f32 %v3986_v55, %v3985_v59  ;;  %v18478_v44 = vunpack.c.l.bf16 %v16120_v45  ;;  %v2191_v28 = vpop.permute.xlu1 %2190  ;;  %10524 = vmatpush3.bf16.msra.mxu0 %v10774_v32 }
 0x52d   :  { %v4043_v6 = vadd.f32 %v4042_v38, %v2621_v27  ;;  %v4005_v62 = vadd.f32 %v4004_v25, %v4003_v49  ;;  %v16429_v8 = vunpack.c.l.b16 %v5811_v51  ;;  %v18479_v34 = vunpack.c.l.bf16 %v16077_v37  ;;  %10525 = vmatprep.subr.bf16.mxu0 %v10775_v20 }
 0x52e   :  { %v4090_v42 = vrot.slane %v2629_v13, 4  ;;  %v2622_v19 = vmul.f32 %v18478_v44, %v2240_v31  ;;  %v16433_v22 = vunpack.c.l.b16 %v5796_v7  ;;  %v16435_v49 = vunpack.c.l.b16 %v5804_v24 }
 0x52f   :  { %v4044_v59 = vrot.slane %v4043_v6, 2  ;;  %v2612_v30 = vmul.f32 %v18479_v34, %v2170_v63  ;;  %v16437_v56 = vunpack.c.l.b16 %v5814_v23  ;;  %v16440_v55 = vmul.f32 %v16065_v39, %v3987_v50 }
 0x530   :  { %v4091_v35 = vadd.f32 %v4090_v42, %v2629_v13  ;;  %v4048_v31 = vrot.slane %v2622_v19, 4  ;;  %v5530_v25 = vmul.f32 %v16084_v26, %v4005_v62  ;;  %v18480_v63 = vunpack.c.h.bf16 %v16130_v18  ;;  %v2296_v26 = vpop.permute.xlu0 %2295  ;;  %10526 = vmatpush3.bf16.msra.mxu0 %v10775_v20 }
 0x531   :  { %v4045_v60 = vadd.f32 %v4044_v59, %v4043_v6  ;;  %v3988_v13 = vrot.slane %v2612_v30, 4  ;;  %v18481_v23 = vunpack.c.l.bf16 %v16100_v21  ;;  %v18482_v32 = vunpack.c.h.bf16 %v16089_v41  ;;  %v18483_v21 = vld [vmem:[#allocation25_spill] sm:$0xff] }
 0x532   :  { %v4092_v27 = vrot.slane %v4091_v35, 2  ;;  %v4049_v37 = vadd.f32 %v4048_v31, %v2622_v19  ;;  %v2637_v7 = vmul.f32 %v18480_v63, %v2345_v47  ;;  %v5812_v62 = vpack.c.bf16 %v16440_v55, %v16440_v55 }
 0x533   :  { %v4046_v51 = vrot.slane %v4045_v60, 1  ;;  %v3989_v42 = vadd.f32 %v3988_v13, %v2612_v30  ;;  %v2620_v39 = vmul.f32 %v18481_v23, %v2226_v43  ;;  %v2615_v59 = vmul.f32 %v18482_v32, %v2191_v28  ;;  %v18484_v23 = vld [vmem:[#allocation27_spill] sm:$0xff]  ;;  %v18486_v28 = vld [vmem:[#allocation26_spill] sm:$0xff] }
 0x534   :  { %v4093_v38 = vadd.f32 %v4092_v27, %v4091_v35  ;;  %v4050_v6 = vrot.slane %v4049_v37, 2  ;;  %v4138_v44 = vrot.slane %v2637_v7, 4  ;;  %v18485_v24 = vunpack.c.l.bf16 %v18484_v23 }
 0x535   :  { %v4047_v35 = vadd.f32 %v4046_v51, %v4045_v60  ;;  %v3990_v47 = vrot.slane %v3989_v42, 2  ;;  %v4036_v19 = vrot.slane %v2620_v39, 4  ;;  %v4006_v31 = vrot.slane %v2615_v59, 4 }
 0x536   :  { %v4094_v50 = vrot.slane %v4093_v38, 1  ;;  %v4051_v27 = vadd.f32 %v4050_v6, %v4049_v37  ;;  %v4139_v30 = vadd.f32 %v4138_v44, %v2637_v7  ;;  %v2630_v41 = vmul.f32 %v18485_v24, %v2296_v26  ;;  %v18487_v24 = vld [vmem:[#allocation19_spill] sm:$0xff] }
 0x537   :  { %v5544_v43 = vmul.f32 %v18483_v21, %v4047_v35  ;;  %v3991_v13 = vadd.f32 %v3990_v47, %v3989_v42  ;;  %v4037_v63 = vadd.f32 %v4036_v19, %v2620_v39  ;;  %v4007_v55 = vadd.f32 %v4006_v31, %v2615_v59 }
 0x538   :  { %v4095_v34 = vadd.f32 %v4094_v50, %v4093_v38  ;;  %v4052_v58 = vrot.slane %v4051_v27, 1  ;;  %v4140_v16 = vrot.slane %v4139_v30, 2  ;;  %v5815_v60 = vpack.c.bf16 %v5530_v25, %v5530_v25  ;;  %v18488_v25 = vld [vmem:[#allocation47_spill] sm:$0xff] }
 0x539   :  { %v3992_v51 = vrot.slane %v3991_v13, 1  ;;  %v4038_v61 = vrot.slane %v4037_v63, 2  ;;  %v4096_v20 = vrot.slane %v2630_v41, 4  ;;  %v5822_v38 = vpack.c.bf16 %v5544_v43, %v5544_v43 }
 0x53a   :  { %v5560_v32 = vmul.f32 %v18486_v28, %v4095_v34  ;;  %v4053_v37 = vadd.f32 %v4052_v58, %v4051_v27  ;;  %v4141_v7 = vadd.f32 %v4140_v16, %v4139_v30  ;;  %v4008_v50 = vrot.slane %v4007_v55, 2  ;;  %v2247_v34 = vpop.permute.xlu1 %2246 }
 0x53b   :  { %v3993_v44 = vadd.f32 %v3992_v51, %v3991_v13  ;;  %v4039_v42 = vadd.f32 %v4038_v61, %v4037_v63  ;;  %v4097_v39 = vadd.f32 %v4096_v20, %v2630_v41  ;;  %v7125_v35 = vrot.slane %v16437_v56, 7  ;;  %v2198_v61 = vpop.permute.xlu0 %2197 }
 0x53c   :  { %v5830_v6 = vpack.c.bf16 %v5560_v32, %v5560_v32  ;;  %v5546_v26 = vmul.f32 %v18487_v24, %v4053_v37  ;;  %v4142_v47 = vrot.slane %v4141_v7, 1  ;;  %v4009_v19 = vadd.f32 %v4008_v50, %v4007_v55 }
 0x53d   :  { %v16458_v59 = vunpack.c.l.b16 %v5815_v60  ;;  %v5526_v31 = vmul.f32 %v18488_v25, %v3993_v44  ;;  %v4040_v21 = vrot.slane %v4039_v42, 1  ;;  %v4098_v43 = vrot.slane %v4097_v39, 2  ;;  %v18490_v44 = vld [vmem:[#allocation53_spill] sm:$0xff] }
 0x53e   :  { %v16461_v58 = vunpack.c.l.b16 %v5822_v38  ;;  %v5823_v16 = vpack.c.bf16 %v5546_v26, %v5546_v26  ;;  %v4143_v27 = vadd.f32 %v4142_v47, %v4141_v7  ;;  %v4010_v30 = vrot.slane %v4009_v19, 1  ;;  %v18489_v38 = vld [vmem:[#allocation16_spill] sm:$0xff]  ;;  %v2352_v26 = vpop.permute.xlu1 %2351 }
 0x53f   :  { %v16463_v13 = vunpack.c.l.b16 %v5830_v6  ;;  %v5813_v56 = vpack.c.bf16 %v5526_v31, %v5526_v31  ;;  %v4041_v63 = vadd.f32 %v4040_v21, %v4039_v42  ;;  %v4099_v41 = vadd.f32 %v4098_v43, %v4097_v39  ;;  %v18491_v42 = vld [vmem:[#allocation7_spill] sm:$0xff] }
 0x540   :  { %v16465_v28 = vunpack.c.l.b16 %v5812_v62  ;;  %v16467_v32 = vunpack.c.l.b16 %v5823_v16  ;;  %v5576_v55 = vmul.f32 %v16276_v36, %v4143_v27  ;;  %v4011_v60 = vadd.f32 %v4010_v30, %v4009_v19 }
 0x541   :  { %v7127_v51 = vrot.slane %v16458_v59, 6  ;;  %v6694_v20 = vunpack.c.l.b16 %v5813_v56  ;;  %v5542_v37 = vmul.f32 %v18489_v38, %v4041_v63  ;;  %v4100_v7 = vrot.slane %v4099_v41, 1  ;;  %v2282_v63 = vpop.permute.xlu0 %2281 }
 0x542   :  { %v7139_v50 = vrot.slane %v16461_v58, 7  ;;  %v5838_v6 = vpack.c.bf16 %v5576_v55, %v5576_v55  ;;  %v5532_v24 = vmul.f32 %v18490_v44, %v4011_v60  ;;  %v18492_v62 = vrot.slane %v16289_v15, 4  ;;  %v18495_v15 = vld [vmem:[#allocation22_spill] sm:$0xff] }
 0x543   :  { %v7153_v36 = vrot.slane %v16463_v13, 7  ;;  %v4101_v47 = vadd.f32 %v4100_v7, %v4099_v41  ;;  %v18493_v19 = vrot.slane %v16315_v54, 3  ;;  %v7081_v31 = vrot.slane %v16404_v33, 1  ;;  %v16494_v54 = vld [vmem:[%s17490_s11] sm:$0xff]  }
 0x544   :  { %v7076_v39 = vsel %vm6736_vm4, %v18492_v62, %v18491_v42  ;;  %v7141_v21 = vrot.slane %v16467_v32, 6  ;;  %v5821_v43 = vpack.c.bf16 %v5542_v37, %v5542_v37  ;;  %v18494_v16 = vrot.slane %v16354_v53, 2  ;;  %v18500_v42 = vld [vmem:[#allocation20_spill] sm:$0xff]  ;;  %10559 = vmatprep.subr.bf16.mxu0 %v16494_v54 }
 0x545   :  { %v7078_v25 = vsel %vm6739_vm5, %v18493_v19, %v7076_v39  ;;  %v18496_v30 = vrot.slane %v16296_v2, 4  ;;  %v16497_v33 = vsel %vm6727_vm1, %v7125_v35, %v6694_v20  ;;  %v5816_v41 = vpack.c.bf16 %v5532_v24, %v5532_v24  ;;  %v18502_v20 = vld [vmem:[#allocation9_spill] sm:$0xff] }
 0x546   :  { %v7080_v27 = vsel %vm6742_vm6, %v18494_v16, %v7078_v25  ;;  %v18497_v55 = vrot.slane %v16347_v46, 3  ;;  %v7095_v60 = vrot.slane %v16433_v22, 1  ;;  %v16503_v38 = vunpack.c.l.b16 %v5838_v6  ;;  %v18503_v6 = vld [vmem:[#allocation56_spill] sm:$0xff]  ;;  %v2254_v16 = vpop.permute.xlu1 %2253 }
 0x547   :  { %v7090_v56 = vsel %vm6736_vm4, %v18496_v30, %v18495_v15  ;;  %v18498_v2 = vrot.slane %v16399_v3, 2  ;;  %v18499_v7 = vunpack.c.h.bf16 %v16120_v45  ;;  %v18501_v62 = vunpack.c.l.bf16 %v18500_v42 }
 0x548   :  { %v7092_v53 = vsel %vm6739_vm5, %v18497_v55, %v7090_v56  ;;  %v16514_v46 = vmul.f32 %v18502_v20, %v4101_v47  ;;  %v7082_v24 = vsel %vm6745_vm7, %v7081_v31, %v7080_v27  ;;  %v18504_v39 = vunpack.c.l.bf16 %v18503_v6  ;;  %v18506_v56 = vld [vmem:[#allocation49_spill] sm:$0xff] }
 0x549   :  { %v7094_v37 = vsel %vm6742_vm6, %v18498_v2, %v7092_v53  ;;  %v2623_v44 = vmul.f32 %v18499_v7, %v2247_v34  ;;  %v2616_v35 = vmul.f32 %v18501_v62, %v2198_v61  ;;  %v16520_v19 = vunpack.c.l.b16 %v5821_v43 }
 0x54a   :  { %v7096_v22 = vsel %vm6745_vm7, %v7095_v60, %v7094_v37  ;;  %v2638_v3 = vmul.f32 %v18504_v39, %v2352_v26  ;;  %v16522_v15 = vunpack.c.l.b16 %v5816_v41  ;;  %v18505_v30 = vunpack.c.l.bf16 %v16105_v12  ;;  %v2338_v41 = vpop.permute.xlu0 %2337 }
 0x54b   :  { %v7193_v25 = vpack.c.b16 %v7096_v22, %v7082_v24  ;;  %v4054_v45 = vrot.slane %v2623_v44, 4  ;;  %v4012_v34 = vrot.slane %v2616_v35, 4  ;;  %v18507_v31 = vrot.slane %v18506_v56, 6 }
 0x54c   :  { %v4144_v61 = vrot.slane %v2638_v3, 4  ;;  %v2628_v47 = vmul.f32 %v18505_v30, %v2282_v63  ;;  %v18508_v43 = vrot.slane %v16312_v4, 5  ;;  %v7109_v60 = vrot.slane %v16435_v49, 1  ;;  %v2303_v30 = vpop.permute.xlu1 %2302 }
 0x54d   :  { %v7100_v27 = vsel %vm6730_vm2, %v18507_v31, %v16310_v1  ;;  %10407 = vmatprep.mubr.bf16.mxu0 %v7193_v25  ;;  %v4055_v55 = vadd.f32 %v4054_v45, %v2623_v44  ;;  %v4013_v26 = vadd.f32 %v4012_v34, %v2616_v35  ;;  %v5831_v2 = vpack.c.bf16 %v16514_v46, %v16514_v46  ;;  %v18511_v35 = vld [vmem:[#allocation35_spill] sm:$0xff] }
 0x54e   :  { %v7102_v53 = vsel %vm6733_vm3, %v18508_v43, %v7100_v27  ;;  %v4145_v12 = vadd.f32 %v4144_v61, %v2638_v3  ;;  %v4084_v63 = vrot.slane %v2628_v47, 4  ;;  %v18509_v37 = vrot.slane %v16342_v48, 4  ;;  %v18518_v43 = vld [vmem:[#allocation43_spill] sm:$0xff] }
 0x54f   :  { %v4056_v1 = vrot.slane %v4055_v55, 2  ;;  %v4014_v62 = vrot.slane %v4013_v26, 2  ;;  %v18510_v44 = vrot.slane %v16375_v40, 3  ;;  %v18512_v20 = vrot.slane %v18511_v35, 6 }
 0x550   :  { %v7104_v7 = vsel %vm6736_vm4, %v18509_v37, %v7102_v53  ;;  %v4146_v24 = vrot.slane %v4145_v12, 2  ;;  %v4085_v22 = vadd.f32 %v4084_v63, %v2628_v47  ;;  %v18513_v46 = vrot.slane %v16418_v11, 2 }
 0x551   :  { %v7106_v4 = vsel %vm6739_vm5, %v18510_v44, %v7104_v7  ;;  %v7114_v49 = vsel %vm6730_vm2, %v18512_v20, %v16322_v9  ;;  %v18514_v48 = vrot.slane %v16340_v10, 5  ;;  %v4057_v25 = vadd.f32 %v4056_v1, %v4055_v55 }
 0x552   :  { %v7108_v39 = vsel %vm6742_vm6, %v18513_v46, %v7106_v4  ;;  %v4015_v45 = vadd.f32 %v4014_v62, %v4013_v26  ;;  %v18515_v34 = vrot.slane %v16362_v29, 4  ;;  %v4147_v9 = vadd.f32 %v4146_v24, %v4145_v12  ;;  %v18522_v24 = vld [vmem:[#allocation54_spill] sm:$0xff]  ;;  %v18523_v46 = vld [vmem:[#allocation5_spill] sm:$0xff] }
 0x553   :  { %v7116_v3 = vsel %vm6733_vm3, %v18514_v48, %v7114_v49  ;;  %v7110_v40 = vsel %vm6745_vm7, %v7109_v60, %v7108_v39  ;;  %v4086_v56 = vrot.slane %v4085_v22, 2  ;;  %v18516_v47 = vrot.slane %v16410_v14, 3  ;;  %v2205_v60 = vpop.permute.xlu0 %2204 }
 0x554   :  { %v7118_v61 = vsel %vm6736_vm4, %v18515_v34, %v7116_v3  ;;  %v7123_v31 = vrot.slane %v16465_v28, 1  ;;  %v4058_v10 = vrot.slane %v4057_v25, 1  ;;  %v4016_v27 = vrot.slane %v4015_v45, 1 }
 0x555   :  { %v7120_v11 = vsel %vm6739_vm5, %v18516_v47, %v7118_v61  ;;  %v18517_v55 = vrot.slane %v16429_v8, 2  ;;  %v18519_v53 = vunpack.c.l.bf16 %v18518_v43  ;;  %v4148_v63 = vrot.slane %v4147_v9, 1  ;;  %v18525_v47 = vld [vmem:[#allocation17_spill] sm:$0xff] }
 0x556   :  { %v4087_v37 = vadd.f32 %v4086_v56, %v4085_v22  ;;  %v18520_v14 = vunpack.c.l.bf16 %v16130_v18  ;;  %v4059_v1 = vadd.f32 %v4058_v10, %v4057_v25  ;;  %v4017_v62 = vadd.f32 %v4016_v27, %v4015_v45 }
 0x557   :  { %v7122_v26 = vsel %vm6742_vm6, %v18517_v55, %v7120_v11  ;;  %v2624_v29 = vmul.f32 %v18519_v53, %v2254_v16  ;;  %v4149_v4 = vadd.f32 %v4148_v63, %v4147_v9  ;;  %v18521_v20 = vunpack.c.h.bf16 %v18484_v23  ;;  %v2310_v9 = vpop.permute.xlu0 %2309 }
 0x558   :  { %v7124_v12 = vsel %vm6745_vm7, %v7123_v31, %v7122_v26  ;;  %v2636_v7 = vmul.f32 %v18520_v14, %v2338_v41  ;;  %v4088_v35 = vrot.slane %v4087_v37, 1  ;;  %v5548_v16 = vmul.f32 %v18522_v24, %v4059_v1  ;;  %v2359_v41 = vpop.permute.xlu1 %2358 }
 0x559   :  { %v7194_v28 = vpack.c.b16 %v7124_v12, %v7110_v40  ;;  %v4060_v44 = vrot.slane %v2624_v29, 4  ;;  %v2631_v49 = vmul.f32 %v18521_v20, %v2303_v30  ;;  %v5534_v39 = vmul.f32 %v18523_v46, %v4017_v62 }
 0x55a   :  { %v4132_v8 = vrot.slane %v2636_v7, 4  ;;  %v18524_v48 = vunpack.c.h.bf16 %v18500_v42  ;;  %v5578_v3 = vmul.f32 %v16287_v52, %v4149_v4  ;;  %v4089_v25 = vadd.f32 %v4088_v35, %v4087_v37  ;;  %v18527_v4 = vld [vmem:[#allocation45_spill] sm:$0xff] }
 0x55b   :  { %10408 = vmatmul.mubr.bf16.gmra.mrb[24].mxu0 %v7194_v28  ;;  %v4061_v22 = vadd.f32 %v4060_v44, %v2624_v29  ;;  %v4102_v40 = vrot.slane %v2631_v49, 4  ;;  %v16575_v34 = vunpack.c.l.b16 %v5831_v2  ;;  %v5824_v61 = vpack.c.bf16 %v5548_v16, %v5548_v16  ;;  %v2212_v20 = vpop.permute.xlu0 %2211 }
 0x55c   :  { %v2617_v18 = vmul.f32 %v18524_v48, %v2205_v60  ;;  %v4133_v45 = vadd.f32 %v4132_v8, %v2636_v7  ;;  %v5817_v56 = vpack.c.bf16 %v5534_v39, %v5534_v39  ;;  %v5558_v11 = vmul.f32 %v18525_v47, %v4089_v25  ;;  %v2261_v14 = vpop.permute.xlu1 %2260 }
 0x55d   :  { %v4062_v23 = vrot.slane %v4061_v22, 2  ;;  %v4103_v10 = vadd.f32 %v4102_v40, %v2631_v49  ;;  %v7167_v42 = vrot.slane %v16503_v38, 7  ;;  %v16583_v52 = vsel %vm6727_vm1, %v7139_v50, %v16520_v19 }
 0x55e   :  { %v4018_v30 = vrot.slane %v2617_v18, 4  ;;  %v4134_v31 = vrot.slane %v4133_v45, 2  ;;  %v7129_v55 = vrot.slane %v16522_v15, 5  ;;  %v5839_v26 = vpack.c.bf16 %v5578_v3, %v5578_v3 }
 0x55f   :  { %v4063_v27 = vadd.f32 %v4062_v23, %v4061_v22  ;;  %v4104_v29 = vrot.slane %v4103_v10, 2  ;;  %v16587_v63 = vunpack.c.l.b16 %v5824_v61  ;;  %v16589_v7 = vunpack.c.l.b16 %v5817_v56  ;;  %v18530_v22 = vld [vmem:[#allocation37_spill] sm:$0xff]  ;;  %v18532_v61 = vld [vmem:[#allocation15_spill] sm:$0xff] }
 0x560   :  { %v4019_v2 = vadd.f32 %v4018_v30, %v2617_v18  ;;  %v4135_v53 = vadd.f32 %v4134_v31, %v4133_v45  ;;  %v5829_v58 = vpack.c.bf16 %v5558_v11, %v5558_v11  ;;  %v18526_v28 = vunpack.c.h.bf16 %v18503_v6  ;;  %v18531_v45 = vld [vmem:[#allocation28_spill] sm:$0xff] }
 0x561   :  { %v4064_v37 = vrot.slane %v4063_v27, 1  ;;  %v4105_v50 = vadd.f32 %v4104_v29, %v4103_v10  ;;  %v18528_v35 = vunpack.c.l.bf16 %v18527_v4  ;;  %v16595_v49 = vunpack.c.l.b16 %v5839_v26  ;;  %v18534_v10 = vld [vmem:[#allocation60_spill] sm:$0xff]  ;;  %v2366_v26 = vpop.permute.xlu1 %2365 }
 0x562   :  { %v4020_v12 = vrot.slane %v4019_v2, 2  ;;  %v4136_v1 = vrot.slane %v4135_v53, 1  ;;  %v2639_v44 = vmul.f32 %v18526_v28, %v2359_v41  ;;  %v18529_v46 = vunpack.c.h.bf16 %v18518_v43 }
 0x563   :  { %v4065_v19 = vadd.f32 %v4064_v37, %v4063_v27  ;;  %v2632_v8 = vmul.f32 %v18528_v35, %v2310_v9  ;;  %v4106_v16 = vrot.slane %v4105_v50, 1  ;;  %v18533_v23 = vunpack.c.l.bf16 %v18532_v61 }
 0x564   :  { %v4021_v62 = vadd.f32 %v4020_v12, %v4019_v2  ;;  %v4137_v24 = vadd.f32 %v4136_v1, %v4135_v53  ;;  %v2625_v39 = vmul.f32 %v18529_v46, %v2261_v14  ;;  %v4150_v3 = vrot.slane %v2639_v44, 4  ;;  %v18535_v1 = vld [vmem:[#allocation50_spill] sm:$0xff] }
 0x565   :  { %v5550_v48 = vmul.f32 %v18530_v22, %v4065_v19  ;;  %v4108_v25 = vrot.slane %v2632_v8, 4  ;;  %v4107_v6 = vadd.f32 %v4106_v16, %v4105_v50  ;;  %v2618_v30 = vmul.f32 %v18533_v23, %v2212_v20 }
 0x566   :  { %v4022_v18 = vrot.slane %v4021_v62, 1  ;;  %v5574_v40 = vmul.f32 %v18531_v45, %v4137_v24  ;;  %v4066_v41 = vrot.slane %v2625_v39, 4  ;;  %v6710_v9 = vunpack.c.l.b16 %v5829_v58 }
 0x567   :  { %v4151_v47 = vadd.f32 %v4150_v3, %v2639_v44  ;;  %v4109_v11 = vadd.f32 %v4108_v25, %v2632_v8  ;;  %v5825_v31 = vpack.c.bf16 %v5550_v48, %v5550_v48  ;;  %v5564_v43 = vmul.f32 %v18534_v10, %v4107_v6  ;;  %v16620_v3 = vld [vmem:[%s17482_s0 + $0x3b8] sm:$0xff]   ;;  %v2268_v6 = vpop.permute.xlu1 %2267  ;;  %v18537_v10 = vld [vmem:[#allocation61_spill] sm:$0xff] }
 0x568   :  { %v4023_v56 = vadd.f32 %v4022_v18, %v4021_v62  ;;  %v4067_v27 = vadd.f32 %v4066_v41, %v2625_v39  ;;  %v4024_v2 = vrot.slane %v2618_v30, 4  ;;  %v7143_v53 = vrot.slane %v16587_v63, 5  ;;  %v2317_v62 = vpop.permute.xlu0 %2316 }
 0x569   :  { %v5837_v29 = vpack.c.bf16 %v5574_v40, %v5574_v40  ;;  %v4152_v37 = vrot.slane %v4151_v47, 2  ;;  %v4110_v12 = vrot.slane %v4109_v11, 2  ;;  %v7131_v14 = vrot.slane %v16589_v7, 4 }
 0x56a   :  { %v5536_v50 = vmul.f32 %v18535_v1, %v4023_v56  ;;  %v4068_v19 = vrot.slane %v4067_v27, 2  ;;  %v4025_v58 = vadd.f32 %v4024_v2, %v2618_v30  ;;  %v5832_v44 = vpack.c.bf16 %v5564_v43, %v5564_v43  ;;  %v11383_v2 = vld [vmem:[%s17482_s0 + $0x398] sm:$0xff]  }
 0x56b   :  { %v4153_v4 = vadd.f32 %v4152_v37, %v4151_v47  ;;  %v4111_v35 = vadd.f32 %v4110_v12, %v4109_v11  ;;  %v16611_v8 = vsel %vm6727_vm1, %v7153_v36, %v6710_v9  ;;  %v16613_v20 = vunpack.c.l.b16 %v5825_v31  ;;  %v11382_v36 = vld [vmem:[%s17482_s0 + $0x3d0] sm:$0xff]  }
 0x56c   :  { %v4069_v24 = vadd.f32 %v4068_v19, %v4067_v27  ;;  %v4026_v16 = vrot.slane %v4025_v58, 2  ;;  %v6718_v46 = vunpack.c.l.b16 %v5837_v29  ;;  %v18536_v48 = vunpack.c.l.bf16 %v16281_v17  ;;  %v2219_v11 = vpop.permute.xlu0 %2218  ;;  %v18538_v29 = vld [vmem:[#allocation4_spill] sm:$0xff] }
 0x56d   :  { %v4154_v39 = vrot.slane %v4153_v4, 1  ;;  %v4112_v22 = vrot.slane %v4111_v35, 1  ;;  %v5818_v25 = vpack.c.bf16 %v5536_v50, %v5536_v50  ;;  %v10027_v40 = vunpack.c.h.bf16 %v11382_v36 }
 0x56e   :  { %v2640_v18 = vmul.f32 %v18536_v48, %v2366_v26  ;;  %v4070_v13 = vrot.slane %v4069_v24, 1  ;;  %v4027_v45 = vadd.f32 %v4026_v16, %v4025_v58  ;;  %v16625_v41 = vunpack.c.l.b16 %v5832_v44 }
 0x56f   :  { %v4155_v61 = vadd.f32 %v4154_v39, %v4153_v4  ;;  %v4113_v23 = vadd.f32 %v4112_v22, %v4111_v35  ;;  %v2633_v56 = vmul.f32 %v10027_v40, %v2317_v62  ;;  %v10014_v47 = vunpack.c.l.bf16 %v16620_v3  ;;  %v2373_v39 = vpop.permute.xlu1 %2372 }
 0x570   :  { %v4156_v17 = vrot.slane %v2640_v18, 4  ;;  %v4071_v30 = vadd.f32 %v4070_v13, %v4069_v24  ;;  %v4028_v9 = vrot.slane %v4027_v45, 1  ;;  %v9999_v26 = vunpack.c.h.bf16 %v11383_v2 }
 0x571   :  { %v5580_v31 = vmul.f32 %v16300_v5, %v4155_v61  ;;  %v5566_v43 = vmul.f32 %v18537_v10, %v4113_v23  ;;  %v4114_v1 = vrot.slane %v2633_v56, 4  ;;  %v2626_v50 = vmul.f32 %v10014_v47, %v2268_v6  ;;  %v18539_v5 = vld [vmem:[#allocation14_spill] sm:$0xff] }
 0x572   :  { %v4157_v27 = vadd.f32 %v4156_v17, %v2640_v18  ;;  %v5552_v37 = vmul.f32 %v18538_v29, %v4071_v30  ;;  %v4029_v12 = vadd.f32 %v4028_v9, %v4027_v45  ;;  %v16634_v19 = vunpack.c.l.b16 %v5818_v25  ;;  %v2324_v30 = vpop.permute.xlu0 %2323  ;;  %v18551_v9 = vld [vmem:[#allocation18_spill] sm:$0xff] }
 0x573   :  { %v5840_v58 = vpack.c.bf16 %v5580_v31, %v5580_v31  ;;  %v2619_v44 = vmul.f32 %v9999_v26, %v2219_v11  ;;  %v5833_v4 = vpack.c.bf16 %v5566_v43, %v5566_v43  ;;  %v4115_v24 = vadd.f32 %v4114_v1, %v2633_v56  ;;  %v10170_v31 = vld [vmem:[%s17482_s0 + $0x3d8] sm:$0xff]  }
 0x574   :  { %v4158_v62 = vrot.slane %v4157_v27, 2  ;;  %v5538_v35 = vmul.f32 %v18539_v5, %v4029_v12  ;;  %v4072_v16 = vrot.slane %v2626_v50, 4  ;;  %v5826_v48 = vpack.c.bf16 %v5552_v37, %v5552_v37  ;;  %v2275_v37 = vpop.permute.xlu1 %2274  ;;  %v18540_v12 = vld [vmem:[#allocation58_spill] sm:$0xff]  ;;  %v18541_v5 = vld [vmem:[#allocation55_spill] sm:$0xff] }
 0x575   :  { %v4030_v13 = vrot.slane %v2619_v44, 4  ;;  %v16638_v36 = vunpack.c.l.b16 %v5840_v58  ;;  %v4116_v40 = vrot.slane %v4115_v24, 2  ;;  %v16643_v6 = vsel %vm6727_vm1, %v7167_v42, %v6718_v46  ;;  %v11384_v46 = vld [vmem:[%s17482_s0 + $0x3f0] sm:$0xff]  }
 0x576   :  { %v4159_v18 = vadd.f32 %v4158_v62, %v4157_v27  ;;  %v5819_v45 = vpack.c.bf16 %v5538_v35, %v5538_v35  ;;  %v4073_v25 = vadd.f32 %v4072_v16, %v2626_v50  ;;  %v16647_v56 = vunpack.c.l.b16 %v5833_v4  ;;  %v10405_v16 = vpop.f32.mrb[20].mxu0 }
 0x577   :  { %v4031_v17 = vadd.f32 %v4030_v13, %v2619_v44  ;;  %v4117_v47 = vadd.f32 %v4116_v40, %v4115_v24  ;;  %v16652_v10 = vunpack.c.l.b16 %v5826_v48  ;;  %v10043_v43 = vunpack.c.h.bf16 %v11384_v46  ;;  %v2331_v40 = vpop.permute.xlu0 %2330 }
 0x578   :  { %v4160_v23 = vrot.slane %v4159_v18, 1  ;;  %v4074_v11 = vrot.slane %v4073_v25, 2  ;;  %v16658_v2 = vunpack.c.l.b16 %v5819_v45  ;;  %v10030_v62 = vunpack.c.l.bf16 %v10170_v31  ;;  %v2380_v27 = vpop.permute.xlu1 %2379 }
 0x579   :  { %v4032_v42 = vrot.slane %v4031_v17, 2  ;;  %v4118_v26 = vrot.slane %v4117_v47, 1  ;;  %v2641_v58 = vmul.f32 %v10043_v43, %v2373_v39  ;;  %v18542_v35 = vrot.slane %v18541_v5, 5  ;;  %v18544_v43 = vld [vmem:[#allocation38_spill] sm:$0xff] }
 0x57a   :  { %v4161_v38 = vadd.f32 %v4160_v23, %v4159_v18  ;;  %v4075_v29 = vadd.f32 %v4074_v11, %v4073_v25  ;;  %v10015_v24 = vunpack.c.h.bf16 %v16620_v3  ;;  %v2634_v45 = vmul.f32 %v10030_v62, %v2324_v30  ;;  %v7375_v25 = vpop.f32.mrb[21].mxu0  ;;  %v18543_v23 = vld [vmem:[#allocation31_spill] sm:$0xff] }
 0x57b   :  { %v4033_v50 = vadd.f32 %v4032_v42, %v4031_v17  ;;  %v4119_v44 = vadd.f32 %v4118_v26, %v4117_v47  ;;  %11334 = vrcp.f32 %v18542_v35  ;;  %v4162_v13 = vrot.slane %v2641_v58, 4  ;;  %v16665_v42 = vpop.f32.mrb[22].mxu0 }
 0x57c   :  { %v5582_v1 = vmul.f32 %v18540_v12, %v4161_v38  ;;  %v4076_v4 = vrot.slane %v4075_v29, 1  ;;  %v2627_v17 = vmul.f32 %v10015_v24, %v2275_v37  ;;  %v10031_v39 = vunpack.c.h.bf16 %v10170_v31  ;;  %v16669_v12 = vpop.f32.mrb[23].mxu0  ;;  %v18546_v37 = vld [vmem:[#allocation57_spill] sm:$0xff] }
 0x57d   :  { %v4034_v18 = vrot.slane %v4033_v50, 1  ;;  %v5568_v11 = vmul.f32 %v18543_v23, %v4119_v44  ;;  %v4163_v46 = vadd.f32 %v4162_v13, %v2641_v58  ;;  %v18545_v26 = vrot.slane %v18544_v43, 6  ;;  %v18547_v58 = vld [vmem:[#allocation59_spill] sm:$0xff] }
 0x57e   :  { %v5841_v48 = vpack.c.bf16 %v5582_v1, %v5582_v1  ;;  %v4077_v38 = vadd.f32 %v4076_v4, %v4075_v29  ;;  %v4120_v3 = vrot.slane %v2634_v45, 4  ;;  %v4078_v62 = vrot.slane %v2627_v17, 4 }
 0x57f   :  { %v4035_v47 = vadd.f32 %v4034_v18, %v4033_v50  ;;  %11336 = vrcp.f32 %v18545_v26  ;;  %v5834_v30 = vpack.c.bf16 %v5568_v11, %v5568_v11  ;;  %v2635_v35 = vmul.f32 %v10031_v39, %v2331_v40 }
 0x580   :  { %v16671_v1 = vunpack.c.l.b16 %v5841_v48  ;;  %v5554_v31 = vmul.f32 %v18546_v37, %v4077_v38  ;;  %v4164_v44 = vrot.slane %v4163_v46, 2  ;;  %v4121_v4 = vadd.f32 %v4120_v3, %v2634_v45  ;;  %v10174_v48 = vld [vmem:[%s17482_s0 + $0x3f8] sm:$0xff]  }
 0x581   :  { %v5540_v24 = vmul.f32 %v18547_v58, %v4035_v47  ;;  %v4079_v18 = vadd.f32 %v4078_v62, %v2627_v17  ;;  %v4126_v13 = vrot.slane %v2635_v35, 4  ;;  %v18548_v39 = vrot.slane %v18544_v43, 7 }
 0x582   :  { %v4165_v40 = vadd.f32 %v4164_v44, %v4163_v46  ;;  %v4122_v11 = vrot.slane %v4121_v4, 2  ;;  %v16684_v45 = vunpack.c.l.b16 %v5834_v30  ;;  %v5827_v47 = vpack.c.bf16 %v5554_v31, %v5554_v31  ;;  %v2387_v44 = vpop.permute.xlu1 %2386  ;;  %v18550_v31 = vld [vmem:[#allocation41_spill] sm:$0xff] }
 0x583   :  { %11338 = vrcp.f32 %v18548_v39  ;;  %v4080_v26 = vrot.slane %v4079_v18, 2  ;;  %v4127_v3 = vadd.f32 %v4126_v13, %v2635_v35  ;;  %v10046_v37 = vunpack.c.l.bf16 %v10174_v48 }
 0x584   :  { %v4166_v17 = vrot.slane %v4165_v40, 1  ;;  %v4123_v62 = vadd.f32 %v4122_v11, %v4121_v4  ;;  %v5820_v29 = vpack.c.bf16 %v5540_v24, %v5540_v24  ;;  %v18549_v46 = vrot.slane %v18541_v5, 6 }
 0x585   :  { %v11335_v58 = vpop.eup %11334  ;;  %v4081_v28 = vadd.f32 %v4080_v26, %v4079_v18  ;;  %v4128_v61 = vrot.slane %v4127_v3, 2  ;;  %v2642_v60 = vmul.f32 %v10046_v37, %v2380_v27  ;;  %v10047_v38 = vunpack.c.h.bf16 %v10174_v48 }
 0x586   :  { %11340 = vrcp.f32 %v18549_v46  ;;  %v4167_v43 = vadd.f32 %v4166_v17, %v4165_v40  ;;  %v4124_v39 = vrot.slane %v4123_v62, 1  ;;  %v4820_v35 = vrot.slane %v18541_v5, 7 }
 0x587   :  { %v4082_v30 = vrot.slane %v4081_v28, 1  ;;  %v4129_v50 = vadd.f32 %v4128_v61, %v4127_v3  ;;  %v7384_v13 = vadd.f32 %v10405_v16, %v18550_v31  ;;  %v4168_v24 = vrot.slane %v2642_v60, 4  ;;  %v16696_v61 = vld [vmem:[%s17487_s7] ss:$0 sm:$0xff]  ;;  %v18552_v3 = vld [vmem:[#allocation10_spill] sm:$0xff] }
 0x588   :  { %v5584_v11 = vmul.f32 %v11335_v58, %v4167_v43  ;;  %v4125_v23 = vadd.f32 %v4124_v39, %v4123_v62  ;;  %v2643_v18 = vmul.f32 %v10047_v38, %v2387_v44  ;;  %v16690_v26 = vunpack.c.l.b16 %v5827_v47  ;;  %v18553_v44 = vld [vmem:[#allocation21_spill] sm:$0xff] }
 0x589   :  { %v11337_v4 = vpop.eup %11336  ;;  %v4083_v22 = vadd.f32 %v4082_v30, %v4081_v28  ;;  %v4130_v46 = vrot.slane %v4129_v50, 1  ;;  %v7376_v40 = vadd.f32 %v7375_v25, %v18551_v9  ;;  %v4169_v27 = vadd.f32 %v4168_v24, %v2642_v60 }
 0x58a   :  { %v5570_v17 = vmul.f32 %v11337_v4, %v4125_v23  ;;  %v4174_v48 = vrot.slane %v2643_v18, 4  ;;  %v7451_v5 = vadd.f32 %v16696_v61, %v7384_v13  ;;  %v5842_v16 = vpack.c.bf16 %v5584_v11, %v5584_v11  ;;  %v18554_v4 = vld [vmem:[#allocation36_spill] sm:$0xff] }
 0x58b   :  { %v5556_v62 = vmul.f32 %v18552_v3, %v4083_v22  ;;  %v4131_v38 = vadd.f32 %v4130_v46, %v4129_v50  ;;  %11342 = vrcp.f32 %v4820_v35  ;;  %v6701_v28 = vunpack.c.l.b16 %v5820_v29 }
 0x58c   :  { %v4170_v37 = vrot.slane %v4169_v27, 2  ;;  %v4175_v58 = vadd.f32 %v4174_v48, %v2643_v18  ;;  %v7449_v9 = vadd.f32 %v16696_v61, %v7376_v40  ;;  %v5835_v60 = vpack.c.bf16 %v5570_v17, %v5570_v17 }
 0x58d   :  { %v11339_v47 = vpop.eup %11338  ;;  %v5828_v25 = vpack.c.bf16 %v5556_v62, %v5556_v62  ;;  %v7387_v43 = vadd.f32 %v16665_v42, %v18553_v44  ;;  %v7149_v39 = vrot.slane %v16690_v26, 2  ;;  %v7483_v13 = vmax.f32 %v7451_v5, 0.0 }
 0x58e   :  { %v5572_v23 = vmul.f32 %v11339_v47, %v4131_v38  ;;  %v4171_v30 = vadd.f32 %v4170_v37, %v4169_v27  ;;  %v4176_v31 = vrot.slane %v4175_v58, 2  ;;  %v6723_v50 = vunpack.c.l.b16 %v5842_v16 }
 0x58f   :  { %v7452_v29 = vadd.f32 %v16696_v61, %v7387_v43  ;;  %v7379_v11 = vadd.f32 %v16669_v12, %v18554_v4  ;;  %v6709_v24 = vunpack.c.l.b16 %v5828_v25  ;;  %v7481_v40 = vmax.f32 %v7449_v9, 0.0 }
 0x590   :  { %v11341_v22 = vpop.eup %11340  ;;  %v5836_v35 = vpack.c.bf16 %v5572_v23, %v5572_v23  ;;  %v4172_v18 = vrot.slane %v4171_v30, 1  ;;  %v4177_v46 = vadd.f32 %v4176_v31, %v4175_v58  ;;  %v6716_v17 = vunpack.c.l.b16 %v5835_v60 }
 0x591   :  { %v7484_v48 = vmax.f32 %v7452_v29, 0.0  ;;  %v7450_v42 = vadd.f32 %v16696_v61, %v7379_v11  ;;  %v7128_v26 = vsel %vm6730_vm2, %v7127_v51, %v16497_v33  ;;  %v7137_v38 = vrot.slane %v6701_v28, 1 }
 0x592   :  { %v6717_v27 = vunpack.c.l.b16 %v5836_v35  ;;  %v4173_v5 = vadd.f32 %v4172_v18, %v4171_v30  ;;  %v4178_v16 = vrot.slane %v4177_v46, 1  ;;  %v7130_v12 = vsel %vm6733_vm3, %v7129_v55, %v7128_v26  ;;  %v11387_v26 = vld [vmem:[%s17485_s3 + $0x8] sm:$0xff]  }
 0x593   :  { %v7482_v3 = vmax.f32 %v7450_v42, 0.0  ;;  %v7132_v62 = vsel %vm6736_vm4, %v7131_v14, %v7130_v12  ;;  %v7142_v59 = vsel %vm6730_vm2, %v7141_v21, %v16583_v52  ;;  %v7151_v15 = vrot.slane %v6709_v24, 1  ;;  %v10777_v42 = vld [vmem:[%s17490_s11 + $0x8] sm:$0xff]   ;;  %v11389_v12 = vld [vmem:[%s17485_s3 + $0x18] sm:$0xff]  }
 0x594   :  { %v5586_v47 = vmul.f32 %v11341_v22, %v4173_v5  ;;  %v4179_v51 = vadd.f32 %v4178_v16, %v4177_v46  ;;  %v7144_v33 = vsel %vm6733_vm3, %v7143_v53, %v7142_v59  ;;  %v18555_v55 = vrot.slane %v16634_v19, 3  ;;  %v10778_v5 = vld [vmem:[%s17490_s11 + $0x10] sm:$0xff]   ;;  %v10779_v16 = vld [vmem:[%s17490_s11 + $0x18] sm:$0xff]  }
 0x595   :  { %v11343_v37 = vpop.eup %11342  ;;  %v18556_v14 = vrot.slane %v16613_v20, 4  ;;  %v7535_v58 = vpack.c.bf16 %v7482_v3, %v7481_v40  ;;  %v7536_v32 = vpack.c.bf16 %v7484_v48, %v7483_v13  ;;  %v18557_v52 = vrot.slane %v16658_v2, 2  ;;  %v10780_v3 = vld [vmem:[%s17490_s11 + $0x20] sm:$0xff]  }
 0x596   :  { %v7134_v7 = vsel %vm6739_vm5, %v18555_v55, %v7132_v62  ;;  %v5843_v9 = vpack.c.bf16 %v5586_v47, %v5586_v47  ;;  %v5588_v21 = vmul.f32 %v11343_v37, %v4179_v51  ;;  %v18558_v53 = vrot.slane %v16652_v10, 3  ;;  %v10781_v62 = vld [vmem:[%s17490_s11 + $0x28] sm:$0xff]   ;;  %v11392_v47 = vld [vmem:[%s17485_s3 + $0x30] sm:$0xff]   ;;  %v16807_v51 = vld [vmem:[%s17488_s10] ss:$0 sm:$0xff] }
 0x597   :  { %v7146_v28 = vsel %vm6736_vm4, %v18556_v14, %v7144_v33  ;;  %v7136_v63 = vsel %vm6742_vm6, %v18557_v52, %v7134_v7  ;;  %v7161_v19 = vrot.slane %v16684_v45, 3  ;;  %v7175_v25 = vrot.slane %v6723_v50, 3  ;;  %10499 = vmatprep.mubr.bf16.mxu1 %v7535_v58  ;;  %v10782_v7 = vld [vmem:[%s17490_s11 + $0x30] sm:$0xff]  }
 0x598   :  { %v7148_v60 = vsel %vm6739_vm5, %v18558_v53, %v7146_v28  ;;  %v7138_v23 = vsel %vm6745_vm7, %v7137_v38, %v7136_v63  ;;  %v6724_v44 = vunpack.c.l.b16 %v5843_v9  ;;  %v5844_v43 = vpack.c.bf16 %v5588_v21, %v5588_v21  ;;  %10500 = vmatmul.mubr.bf16.gmra.mrb[52].mxu1 %v7536_v32  ;;  %v11391_v38 = vld [vmem:[%s17485_s3 + $0x28] sm:$0xff]   ;;  %v10783_v63 = vld [vmem:[%s17490_s11 + $0x38] sm:$0xff]  }
 0x599   :  { %v7150_v20 = vsel %vm6742_vm6, %v7149_v39, %v7148_v60  ;;  %v18559_v2 = vrot.slane %v16575_v34, 6  ;;  %v7163_v31 = vrot.slane %v6716_v17, 2  ;;  %v18560_v45 = vrot.slane %v16625_v41, 5  ;;  %v11394_v60 = vld [vmem:[%s17485_s3 + $0x38] sm:$0xff]  }
 0x59a   :  { %v7152_v30 = vsel %vm6745_vm7, %v7151_v15, %v7150_v20  ;;  %v18561_v39 = vrot.slane %v16595_v49, 6  ;;  %v7177_v35 = vrot.slane %v6724_v44, 2  ;;  %v6725_v29 = vunpack.c.l.b16 %v5844_v43  ;;  %v11397_v20 = vld [vmem:[%s17485_s3 + $0x50] sm:$0xff]   ;;  %v11398_v44 = vld [vmem:[%s17485_s3 + $0x58] sm:$0xff]   ;;  %v11399_v43 = vld [vmem:[%s17485_s3 + $0x60] sm:$0xff]  }
 0x59b   :  { %v7156_v10 = vsel %vm6730_vm2, %v18559_v2, %v16611_v8  ;;  %v7195_v13 = vpack.c.b16 %v7152_v30, %v7138_v23  ;;  %v7165_v4 = vrot.slane %v6717_v27, 1  ;;  %v18562_v11 = vrot.slane %v16638_v36, 5  ;;  %v11388_v27 = vld [vmem:[%s17485_s3 + $0x10] sm:$0xff]   ;;  %v11396_v23 = vld [vmem:[%s17485_s3 + $0x48] sm:$0xff]  }
 0x59c   :  { %v7158_v22 = vsel %vm6733_vm3, %v18560_v45, %v7156_v10  ;;  %v7170_v50 = vsel %vm6730_vm2, %v18561_v39, %v16643_v6  ;;  %v18563_v8 = vrot.slane %v16647_v56, 4  ;;  %v18564_v41 = vrot.slane %v16671_v1, 4  ;;  %v11386_v1 = vld [vmem:[%s17485_s3] sm:$0xff]   ;;  %v11400_v30 = vld [vmem:[%s17485_s3 + $0x68] sm:$0xff]   ;;  %v11401_v2 = vld [vmem:[%s17485_s3 + $0x70] sm:$0xff]  }
 0x59d   :  { %v7172_v34 = vsel %vm6733_vm3, %v18562_v11, %v7170_v50  ;;  %10411 = vmatprep.mubr.bf16.mxu0 %v7195_v13  ;;  %v7179_v46 = vrot.slane %v6725_v29, 1  ;;  %v11402_v10 = vld [vmem:[%s17485_s3 + $0x78] sm:$0xff]   ;;  %v18567_v45 = vld [vmem:[#allocation8_spill] sm:$0xff]  ;;  %v18570_v50 = vld [vmem:[#allocation3_spill] sm:$0xff] }
 0x59e   :  { %v7160_v24 = vsel %vm6736_vm4, %v18563_v8, %v7158_v22  ;;  %v7174_v18 = vsel %vm6736_vm4, %v18564_v41, %v7172_v34  ;;  %v18566_v13 = vld [vmem:[#allocation30_spill] sm:$0xff]  ;;  %v10786_v29 = vld [vmem:[%s17491_s4 + $0x4] ss:$16 sps:$4 sm:$0xff]   ;;  %v10790_v11 = vld [vmem:[%s17491_s4 + $0x40] ss:$16 sps:$4 sm:$0xff]  }
 0x59f   :  { %v7162_v49 = vsel %vm6739_vm5, %v7161_v19, %v7160_v24  ;;  %v7176_v6 = vsel %vm6739_vm5, %v7175_v25, %v7174_v18  ;;  %v11395_v25 = vld [vmem:[%s17485_s3 + $0x40] sm:$0xff]   ;;  %v18568_v22 = vld [vmem:[#allocation46_spill] sm:$0xff]  ;;  %8903 = vmatprep.subr.bf16.mxu1 %v10786_v29 }
 0x5a0   :  { %v7164_v40 = vsel %vm6742_vm6, %v7163_v31, %v7162_v49  ;;  %v7178_v36 = vsel %vm6742_vm6, %v7177_v35, %v7176_v6  ;;  %v18565_v31 = vld [vmem:[#allocation51_spill] sm:$0xff]  ;;  %v18569_v39 = vld [vmem:[#allocation42_spill] sm:$0xff] }
 0x5a1   :  { %v7166_v17 = vsel %vm6745_vm7, %v7165_v4, %v7164_v40  ;;  %v7180_v48 = vsel %vm6745_vm7, %v7179_v46, %v7178_v36  ;;  %v10784_v35 = vld [vmem:[%s17491_s4] ss:$16 sps:$4 sm:$0xff]   ;;  %v10789_v4 = vld [vmem:[%s17491_s4 + $0x24] ss:$16 sps:$4 sm:$0xff]   ;;  %v18571_v46 = vld [vmem:[#allocation24_spill] sm:$0xff] }
 0x5a2   :  { %v7196_v56 = vpack.c.b16 %v7180_v48, %v7166_v17  ;;  %8904 = vmatpush1.bf16.msra.mxu1 %v10784_v35  ;;  %v10795_v34 = vld [vmem:[%s17491_s4 + $0x64] ss:$16 sps:$4 sm:$0xff]   ;;  %v10793_v8 = vld [vmem:[%s17491_s4 + $0x60] ss:$16 sps:$4 sm:$0xff]  }
 0x5a3   :  { %8905 = vmatprep.subr.bf16.mxu1 %v10789_v4  ;;  %v10798_v24 = vld [vmem:[%s17491_s4 + $0x84] ss:$16 sps:$4 sm:$0xff]   ;;  %v10796_v41 = vld [vmem:[%s17491_s4 + $0x80] ss:$16 sps:$4 sm:$0xff]  }
 0x5a4   :  { %10412 = vmatmul.mubr.bf16.gmra.mrb[28].mxu0 %v7196_v56  ;;  %v10801_v18 = vld [vmem:[%s17491_s4 + $0xa4] ss:$16 sps:$4 sm:$0xff]   ;;  %v10799_v49 = vld [vmem:[%s17491_s4 + $0xa0] ss:$16 sps:$4 sm:$0xff]  }
 0x5a5   :  { %10527 = vmatprep.mubr.bf16.mxu0 %v11386_v1  ;;  %v18572_v17 = vld [vmem:[#allocation11_spill] sm:$0xff]  ;;  %v18578_v4 = vld [vmem:[#allocation33_spill] sm:$0xff] }
 0x5ac   :  { %10528 = vmatmul.mubr.bf16.vlgmr.msra.gmra.mrb[32].mxu0 %v11387_v26 }
 0x5ad   :  { %10531 = vmatprep.mubr.bf16.mxu0 %v11388_v27  ;;  %10560 = vmatpush3.bf16.msra.mxu0 %v16494_v54  ;;  %v11390_v54 = vld [vmem:[%s17485_s3 + $0x20] sm:$0xff]  }
 0x5ae   :  { %10561 = vmatprep.subr.bf16.mxu0 %v10777_v42 }
 0x5b1   :  { %10562 = vmatpush3.bf16.msra.mxu0 %v10777_v42  ;;  %v10497_v59 = vpop.f32.mrb[48].mxu1  ;;  %v18573_v42 = vld [vmem:[#allocation29_spill] sm:$0xff] }
 0x5b2   :  { %10563 = vmatprep.subr.bf16.mxu0 %v10778_v5  ;;  %v8112_v33 = vadd.f32 %v16807_v51, %v10497_v59  ;;  %v8024_v15 = vpop.f32.mrb[49].mxu1 }
 0x5b3   :  { %v8110_v37 = vadd.f32 %v16807_v51, %v8024_v15  ;;  %v10498_v55 = vpop.f32.mrb[50].mxu1 }
 0x5b4   :  { %10532 = vmatmul.mubr.bf16.gmra.mrb[36].mxu0 %v11389_v12  ;;  %v8113_v14 = vadd.f32 %v16807_v51, %v10498_v55  ;;  %v8027_v28 = vpop.f32.mrb[51].mxu1  ;;  %v8144_v32 = vmax.f32 %v8112_v33, 0.0  ;;  %v10804_v55 = vld [vmem:[%s17491_s4 + $0xc4] ss:$16 sps:$4 sm:$0xff]  }
 0x5b5   :  { %10535 = vmatprep.mubr.bf16.mxu0 %v11390_v54  ;;  %10564 = vmatpush3.bf16.msra.mxu0 %v10778_v5  ;;  %v8111_v58 = vadd.f32 %v16807_v51, %v8027_v28  ;;  %v8142_v21 = vmax.f32 %v8110_v37, 0.0  ;;  %v10802_v37 = vld [vmem:[%s17491_s4 + $0xc0] ss:$16 sps:$4 sm:$0xff]  }
 0x5b6   :  { %10565 = vmatprep.subr.bf16.mxu0 %v10779_v16  ;;  %v8145_v9 = vmax.f32 %v8113_v14, 0.0  ;;  %v10807_v14 = vld [vmem:[%s17491_s4 + $0xe4] ss:$16 sps:$4 sm:$0xff]  }
 0x5b7   :  { %v8143_v52 = vmax.f32 %v8111_v58, 0.0 }
 0x5b8   :  { %v8167_v53 = vpack.c.bf16 %v8145_v9, %v8144_v32 }
 0x5b9   :  { %10566 = vmatpush3.bf16.msra.mxu0 %v10779_v16  ;;  %v8166_v19 = vpack.c.bf16 %v8143_v52, %v8142_v21  ;;  %v18574_v16 = vld [vmem:[#allocation23_spill] sm:$0xff] }
 0x5ba   :  { %10567 = vmatprep.subr.bf16.mxu0 %v10780_v3 }
 0x5bc   :  { %10536 = vmatmul.mubr.bf16.gmra.mrb[40].mxu0 %v11391_v38 }
 0x5bd   :  { %10539 = vmatprep.mubr.bf16.mxu0 %v11392_v47  ;;  %10568 = vmatpush3.bf16.msra.mxu0 %v10780_v3 }
 0x5be   :  { %10569 = vmatprep.subr.bf16.mxu0 %v10781_v62 }
 0x5c1   :  { %10570 = vmatpush3.bf16.msra.mxu0 %v10781_v62 }
 0x5c2   :  { %10571 = vmatprep.subr.bf16.mxu0 %v10782_v7 }
 0x5c4   :  { %10540 = vmatmul.mubr.bf16.gmra.mrb[44].mxu0 %v11394_v60 }
 0x5c5   :  { %10543 = vmatprep.mubr.bf16.mxu0 %v11395_v25  ;;  %10572 = vmatpush3.bf16.msra.mxu0 %v10782_v7  ;;  %v10805_v7 = vld [vmem:[%s17491_s4 + $0xe0] ss:$16 sps:$4 sm:$0xff]  }
 0x5c6   :  { %10573 = vmatprep.subr.bf16.mxu0 %v10783_v63 }
 0x5c9   :  { %10574 = vmatpush3.bf16.msra.mxu0 %v10783_v63 }
 0x5cc   :  { %10544 = vmatmul.mubr.bf16.gmra.mrb[48].mxu0 %v11396_v23 }
 0x5cd   :  { %10547 = vmatprep.mubr.bf16.mxu0 %v11397_v20 }
 0x5d4   :  { %10548 = vmatmul.mubr.bf16.gmra.mrb[52].mxu0 %v11398_v44 }
 0x5d5   :  { %10551 = vmatprep.mubr.bf16.mxu0 %v11399_v43 }
 0x5dc   :  { %10552 = vmatmul.mubr.bf16.gmra.mrb[56].mxu0 %v11400_v30  ;;  %v18575_v30 = vld [vmem:[#allocation12_spill] sm:$0xff] }
 0x5dd   :  { %10555 = vmatprep.mubr.bf16.mxu0 %v11401_v2 }
 0x5e4   :  { %10556 = vmatmul.mubr.bf16.gmra.mrb[60].mxu0 %v11402_v10 }
 0x5e5   :  { %10575 = vmatprep.mubr.bf16.mxu0 %v18565_v31  ;;  %v18576_v31 = vld [vmem:[#allocation32_spill] sm:$0xff] }
 0x5ec   :  { %10576 = vmatmul.mubr.bf16.vlgmr.msra.gmra.mrb[32].mxu0 %v18566_v13 }
 0x5ed   :  { %10579 = vmatprep.mubr.bf16.mxu0 %v18567_v45 }
 0x5f4   :  { %10580 = vmatmul.mubr.bf16.gmra.mrb[36].mxu0 %v18568_v22 }
 0x5f5   :  { %10583 = vmatprep.mubr.bf16.mxu0 %v18569_v39  ;;  %v18577_v39 = vld [vmem:[#allocation34_spill] sm:$0xff] }
 0x5fc   :  { %10584 = vmatmul.mubr.bf16.gmra.mrb[40].mxu0 %v18570_v50 }
 0x5fd   :  { %10587 = vmatprep.mubr.bf16.mxu0 %v16365_v57  ;;  %v10787_v57 = vld [vmem:[%s17491_s4 + $0x20] ss:$16 sps:$4 sm:$0xff]  }
 0x5fe   :  { %8906 = vmatpush1.bf16.msra.mxu1 %v10787_v57 }
 0x604   :  { %10588 = vmatmul.mubr.bf16.gmra.mrb[44].mxu0 %v16360_v0  ;;  %v10792_v0 = vld [vmem:[%s17491_s4 + $0x44] ss:$16 sps:$4 sm:$0xff]  }
 0x605   :  { %10591 = vmatprep.mubr.bf16.mxu0 %v8166_v19  ;;  %8907 = vmatprep.subr.bf16.mxu1 %v10792_v0 }
 0x606   :  { %8908 = vmatpush1.bf16.msra.mxu1 %v10790_v11 }
 0x607   :  { %8909 = vmatprep.subr.bf16.mxu1 %v10795_v34 }
 0x60a   :  { %8910 = vmatpush1.bf16.msra.mxu1 %v10793_v8 }
 0x60b   :  { %8911 = vmatprep.subr.bf16.mxu1 %v10798_v24 }
 0x60c   :  { %10592 = vmatmul.mubr.bf16.gmra.mrb[48].mxu0 %v8167_v53 }
 0x60e   :  { %8912 = vmatpush1.bf16.msra.mxu1 %v10796_v41 }
 0x60f   :  { %8913 = vmatprep.subr.bf16.mxu1 %v10801_v18 }
 0x612   :  { %8914 = vmatpush1.bf16.msra.mxu1 %v10799_v49 }
 0x613   :  { %8915 = vmatprep.subr.bf16.mxu1 %v10804_v55 }
 0x616   :  { %8916 = vmatpush1.bf16.msra.mxu1 %v10802_v37 }
 0x617   :  { %8917 = vmatprep.subr.bf16.mxu1 %v10807_v14 }
 0x61a   :  { %8918 = vmatpush1.bf16.msra.mxu1 %v10805_v7 }
 0x62e   :  { %v10409_v6 = vpop.f32.mrb[24].mxu0 }
 0x62f   :  { %v7400_v40 = vadd.f32 %v10409_v6, %v18571_v46  ;;  %v7391_v36 = vpop.f32.mrb[25].mxu0  ;;  %v11403_v6 = vmov 0   ;;  %v10808_v46 = vld [vmem:[%s17491_s4 + $0x8] ss:$16 sps:$4 sm:$0xff]  }
 0x630   :  { %v7392_v48 = vadd.f32 %v7391_v36, %v18572_v17  ;;  %v10410_v56 = vpop.f32.mrb[26].mxu0  ;;  %v10811_v36 = vld [vmem:[%s17491_s4 + $0x28] ss:$16 sps:$4 sm:$0xff]   ;;  %v10816_v17 = vld [vmem:[%s17491_s4 + $0x4c] ss:$16 sps:$4 sm:$0xff]  }
 0x631   :  { %v7455_v1 = vadd.f32 %v16696_v61, %v7400_v40  ;;  %v7403_v26 = vadd.f32 %v10410_v56, %v18573_v42  ;;  %v7394_v27 = vpop.f32.mrb[27].mxu0  ;;  %v10810_v40 = vld [vmem:[%s17491_s4 + $0xc] ss:$16 sps:$4 sm:$0xff]  }
 0x632   :  { %v7453_v5 = vadd.f32 %v16696_v61, %v7392_v48  ;;  %v7395_v12 = vadd.f32 %v7394_v27, %v18574_v16  ;;  %9096 = vmatprep.subr.bf16.mxu0 %v10810_v40  ;;  %v10814_v48 = vld [vmem:[%s17491_s4 + $0x48] ss:$16 sps:$4 sm:$0xff]  }
 0x633   :  { %v7456_v54 = vadd.f32 %v16696_v61, %v7403_v26  ;;  %v7487_v62 = vmax.f32 %v7455_v1, 0.0  ;;  %9097 = vmatpush1.bf16.msra.mxu0 %v10808_v46  ;;  %v16944_v1 = vld [vmem:[%s17492_s13] ss:$0 sm:$0xff] }
 0x634   :  { %v7454_v3 = vadd.f32 %v16696_v61, %v7395_v12  ;;  %v7485_v59 = vmax.f32 %v7453_v5, 0.0 }
 0x635   :  { %v7488_v38 = vmax.f32 %v7456_v54, 0.0 }
 0x636   :  { %v7486_v47 = vmax.f32 %v7454_v3, 0.0 }
 0x637   :  { %v7538_v33 = vpack.c.bf16 %v7488_v38, %v7487_v62 }
 0x638   :  { %v7537_v15 = vpack.c.bf16 %v7486_v47, %v7485_v59 }
 0x63a   :  { %10503 = vmatprep.mubr.bf16.mxu1 %v7537_v15 }
 0x63b   :  { %10504 = vmatmul.mubr.bf16.gmra.mrb[56].mxu1 %v7538_v33 }
 0x66b   :  { %v10501_v28 = vpop.f32.mrb[52].mxu1 }
 0x66c   :  { %v8116_v58 = vadd.f32 %v16807_v51, %v10501_v28  ;;  %v8040_v32 = vpop.f32.mrb[53].mxu1 }
 0x66d   :  { %v8114_v9 = vadd.f32 %v16807_v51, %v8040_v32  ;;  %v10502_v21 = vpop.f32.mrb[54].mxu1 }
 0x66e   :  { %v8117_v52 = vadd.f32 %v16807_v51, %v10502_v21  ;;  %v8043_v63 = vpop.f32.mrb[55].mxu1  ;;  %v8148_v60 = vmax.f32 %v8116_v58, 0.0 }
 0x66f   :  { %v8115_v53 = vadd.f32 %v16807_v51, %v8043_v63  ;;  %v8146_v25 = vmax.f32 %v8114_v9, 0.0 }
 0x670   :  { %v8149_v19 = vmax.f32 %v8117_v52, 0.0 }
 0x671   :  { %v8147_v23 = vmax.f32 %v8115_v53, 0.0  ;;  %v10817_v53 = vld [vmem:[%s17491_s4 + $0x68] ss:$16 sps:$4 sm:$0xff]  }
 0x672   :  { %v8169_v20 = vpack.c.bf16 %v8149_v19, %v8148_v60  ;;  %v10819_v60 = vld [vmem:[%s17491_s4 + $0x6c] ss:$16 sps:$4 sm:$0xff]  }
 0x673   :  { %v8168_v44 = vpack.c.bf16 %v8147_v23, %v8146_v25 }
 0x675   :  { %10595 = vmatprep.mubr.bf16.mxu0 %v8168_v44 }
 0x676   :  { %10596 = vmatmul.mubr.bf16.gmra.mrb[52].mxu0 %v8169_v20 }
 0x677   :  { %v10413_v43 = vpop.f32.mrb[28].mxu0 }
 0x678   :  { %v7416_v2 = vadd.f32 %v10413_v43, %v18575_v30  ;;  %v7407_v10 = vpop.f32.mrb[29].mxu0 }
 0x679   :  { %v7408_v13 = vadd.f32 %v7407_v10, %v18576_v31  ;;  %v10414_v45 = vpop.f32.mrb[30].mxu0 }
 0x67a   :  { %v7459_v22 = vadd.f32 %v16696_v61, %v7416_v2  ;;  %v7419_v50 = vadd.f32 %v10414_v45, %v18577_v39  ;;  %v7410_v35 = vpop.f32.mrb[31].mxu0 }
 0x67b   :  { %v7457_v29 = vadd.f32 %v16696_v61, %v7408_v13  ;;  %v7411_v57 = vadd.f32 %v7410_v35, %v18578_v4  ;;  %v10820_v35 = vld [vmem:[%s17491_s4 + $0x88] ss:$16 sps:$4 sm:$0xff]  }
 0x67c   :  { %v7460_v0 = vadd.f32 %v16696_v61, %v7419_v50  ;;  %v7491_v34 = vmax.f32 %v7459_v22, 0.0 }
 0x67d   :  { %v7458_v11 = vadd.f32 %v16696_v61, %v7411_v57  ;;  %v7489_v24 = vmax.f32 %v7457_v29, 0.0  ;;  %v10813_v61 = vld [vmem:[%s17491_s4 + $0x2c] ss:$16 sps:$4 sm:$0xff]  }
 0x67e   :  { %v7492_v8 = vmax.f32 %v7460_v0, 0.0  ;;  %9098 = vmatprep.subr.bf16.mxu0 %v10813_v61  ;;  %v10822_v29 = vld [vmem:[%s17491_s4 + $0x8c] ss:$16 sps:$4 sm:$0xff]   ;;  %v10826_v61 = vld [vmem:[%s17491_s4 + $0xc8] ss:$16 sps:$4 sm:$0xff]  }
 0x67f   :  { %v7490_v41 = vmax.f32 %v7458_v11, 0.0  ;;  %9099 = vmatpush1.bf16.msra.mxu0 %v10811_v36  ;;  %v10825_v57 = vld [vmem:[%s17491_s4 + $0xac] ss:$16 sps:$4 sm:$0xff]  }
 0x680   :  { %v7540_v18 = vpack.c.bf16 %v7492_v8, %v7491_v34  ;;  %9100 = vmatprep.subr.bf16.mxu0 %v10816_v17  ;;  %v10831_v36 = vld [vmem:[%s17491_s4 + $0xec] ss:$16 sps:$4 sm:$0xff]   ;;  %v10829_v17 = vld [vmem:[%s17491_s4 + $0xe8] ss:$16 sps:$4 sm:$0xff]  }
 0x681   :  { %v7539_v49 = vpack.c.bf16 %v7490_v41, %v7489_v24  ;;  %v10823_v24 = vld [vmem:[%s17491_s4 + $0xa8] ss:$16 sps:$4 sm:$0xff]  }
 0x683   :  { %10507 = vmatprep.mubr.bf16.mxu1 %v7539_v49  ;;  %9101 = vmatpush1.bf16.msra.mxu0 %v10814_v48  ;;  %v10828_v49 = vld [vmem:[%s17491_s4 + $0xcc] ss:$16 sps:$4 sm:$0xff]  }
 0x684   :  { %10508 = vmatmul.mubr.bf16.gmra.mrb[60].mxu1 %v7540_v18  ;;  %9102 = vmatprep.subr.bf16.mxu0 %v10819_v60 }
 0x685   :  { %8935 = vmatprep.mubr.bf16.mxu1 %v11403_v6 }
 0x687   :  { %9103 = vmatpush1.bf16.msra.mxu0 %v10817_v53 }
 0x688   :  { %9104 = vmatprep.subr.bf16.mxu0 %v10822_v29 }
 0x68b   :  { %9105 = vmatpush1.bf16.msra.mxu0 %v10820_v35 }
 0x68c   :  { %9106 = vmatprep.subr.bf16.mxu0 %v10825_v57 }
 0x68f   :  { %9107 = vmatpush1.bf16.msra.mxu0 %v10823_v24 }
 0x690   :  { %9108 = vmatprep.subr.bf16.mxu0 %v10828_v49 }
 0x693   :  { %9109 = vmatpush1.bf16.msra.mxu0 %v10826_v61 }
 0x694   :  { %9110 = vmatprep.subr.bf16.mxu0 %v10831_v36 }
 0x697   :  { %9111 = vmatpush1.bf16.msra.mxu0 %v10829_v17 }
 0x6bf   :  { %v10577_v56 = vpop.f32.mrb[32].mxu0 }
 0x6c0   :  { %v8497_v42 = vpop.f32.mrb[33].mxu0  ;;  %v8633_v27 = vadd.f32 %v10577_v56, %v16944_v1 }
 0x6c1   :  { %v10578_v26 = vpop.f32.mrb[34].mxu0  ;;  %v8631_v12 = vadd.f32 %v16944_v1, %v8497_v42 }
 0x6c2   :  { %v8634_v5 = vadd.f32 %v10578_v26, %v16944_v1  ;;  %v8500_v16 = vpop.f32.mrb[35].mxu0 }
 0x6c3   :  { %v8632_v54 = vadd.f32 %v16944_v1, %v8500_v16 }
 0x6c4   :  { %v16950_v3 = vpack.c.bf16 %v8634_v5, %v8633_v27 }
 0x6c5   :  { %v16952_v62 = vpack.c.bf16 %v8632_v54, %v8631_v12 }
 0x6c7   :  { %v10581_v38 = vpop.f32.mrb[36].mxu0  ;;  %8936 = vmatmul.mubr.bf16.vlgmr.msra.gmra.mrb[64].mxu1 %v16952_v62 }
 0x6c8   :  { %v8513_v59 = vpop.f32.mrb[37].mxu0  ;;  %8945 = vmatprep.mubr.bf16.mxu1 %v11403_v6  ;;  %v8637_v33 = vadd.f32 %v10581_v38, %v16944_v1 }
 0x6c9   :  { %v10582_v47 = vpop.f32.mrb[38].mxu0  ;;  %v8635_v55 = vadd.f32 %v16944_v1, %v8513_v59 }
 0x6ca   :  { %v8638_v15 = vadd.f32 %v10582_v47, %v16944_v1  ;;  %v8516_v37 = vpop.f32.mrb[39].mxu0 }
 0x6cb   :  { %v8636_v7 = vadd.f32 %v16944_v1, %v8516_v37 }
 0x6cc   :  { %v16960_v14 = vpack.c.bf16 %v8638_v15, %v8637_v33 }
 0x6cd   :  { %v16962_v28 = vpack.c.bf16 %v8636_v7, %v8635_v55 }
 0x6cf   :  { %v10585_v58 = vpop.f32.mrb[40].mxu0  ;;  %8946 = vmatmul.mubr.bf16.gmra.mrb[68].mxu1 %v16950_v3 }
 0x6d0   :  { %v8529_v32 = vpop.f32.mrb[41].mxu0  ;;  %8955 = vmatprep.mubr.bf16.mxu1 %v11403_v6  ;;  %v8641_v21 = vadd.f32 %v10585_v58, %v16944_v1 }
 0x6d1   :  { %v10586_v9 = vpop.f32.mrb[42].mxu0  ;;  %v8639_v19 = vadd.f32 %v16944_v1, %v8529_v32 }
 0x6d2   :  { %v8642_v52 = vadd.f32 %v10586_v9, %v16944_v1  ;;  %v8532_v63 = vpop.f32.mrb[43].mxu0 }
 0x6d3   :  { %v8640_v25 = vadd.f32 %v16944_v1, %v8532_v63 }
 0x6d4   :  { %v16976_v23 = vpack.c.bf16 %v8642_v52, %v8641_v21 }
 0x6d5   :  { %v16978_v20 = vpack.c.bf16 %v8640_v25, %v8639_v19 }
 0x6d7   :  { %v10589_v44 = vpop.f32.mrb[44].mxu0  ;;  %8956 = vmatmul.mubr.bf16.gmra.mrb[72].mxu1 %v16962_v28 }
 0x6d8   :  { %v8545_v43 = vpop.f32.mrb[45].mxu0  ;;  %8965 = vmatprep.mubr.bf16.mxu1 %v11403_v6  ;;  %v8645_v2 = vadd.f32 %v10589_v44, %v16944_v1 }
 0x6d9   :  { %v10590_v30 = vpop.f32.mrb[46].mxu0  ;;  %v8643_v13 = vadd.f32 %v16944_v1, %v8545_v43 }
 0x6da   :  { %v8646_v10 = vadd.f32 %v10590_v30, %v16944_v1  ;;  %v8548_v31 = vpop.f32.mrb[47].mxu0 }
 0x6db   :  { %v8644_v45 = vadd.f32 %v16944_v1, %v8548_v31 }
 0x6dc   :  { %v16986_v22 = vpack.c.bf16 %v8646_v10, %v8645_v2 }
 0x6dd   :  { %v16988_v39 = vpack.c.bf16 %v8644_v45, %v8643_v13 }
 0x6df   :  { %v10593_v50 = vpop.f32.mrb[48].mxu0  ;;  %8966 = vmatmul.mubr.bf16.gmra.mrb[76].mxu1 %v16960_v14 }
 0x6e0   :  { %v8561_v4 = vpop.f32.mrb[49].mxu0  ;;  %8975 = vmatprep.mubr.bf16.mxu1 %v11403_v6  ;;  %v8649_v11 = vadd.f32 %v10593_v50, %v16944_v1 }
 0x6e1   :  { %v10594_v0 = vpop.f32.mrb[50].mxu0  ;;  %v8647_v41 = vadd.f32 %v16944_v1, %v8561_v4 }
 0x6e2   :  { %v8650_v34 = vadd.f32 %v10594_v0, %v16944_v1  ;;  %v8564_v8 = vpop.f32.mrb[51].mxu0 }
 0x6e3   :  { %v8648_v18 = vadd.f32 %v16944_v1, %v8564_v8 }
 0x6e4   :  { %v17011_v46 = vpack.c.bf16 %v8650_v34, %v8649_v11 }
 0x6e5   :  { %v17013_v40 = vpack.c.bf16 %v8648_v18, %v8647_v41 }
 0x6e7   :  { %8976 = vmatmul.mubr.bf16.gmra.mrb[80].mxu1 %v16978_v20 }
 0x6e8   :  { %8985 = vmatprep.mubr.bf16.mxu1 %v11403_v6 }
 0x6ef   :  { %8986 = vmatmul.mubr.bf16.gmra.mrb[84].mxu1 %v16976_v23 }
 0x6f0   :  { %8995 = vmatprep.mubr.bf16.mxu1 %v11403_v6 }
 0x6f7   :  { %8996 = vmatmul.mubr.bf16.gmra.mrb[88].mxu1 %v16988_v39 }
 0x6f8   :  { %9005 = vmatprep.mubr.bf16.mxu1 %v11403_v6 }
 0x6ff   :  { %9006 = vmatmul.mubr.bf16.gmra.mrb[92].mxu1 %v16986_v22 }
 0x700   :  { %9015 = vmatprep.mubr.bf16.mxu1 %v11403_v6 }
 0x707   :  { %9016 = vmatmul.mubr.bf16.gmra.mrb[96].mxu1 %v17013_v40 }
 0x708   :  { %9025 = vmatprep.mubr.bf16.mxu1 %v11403_v6 }
 0x70e   :  { %v10505_v48 = vpop.f32.mrb[56].mxu1 }
 0x70f   :  { %9026 = vmatmul.mubr.bf16.gmra.mrb[100].mxu1 %v17011_v46  ;;  %v8120_v56 = vadd.f32 %v16807_v51, %v10505_v48  ;;  %v8056_v42 = vpop.f32.mrb[57].mxu1 }
 0x710   :  { %9035 = vmatprep.mubr.bf16.mxu1 %v11403_v6  ;;  %v8118_v26 = vadd.f32 %v16807_v51, %v8056_v42  ;;  %v10506_v27 = vpop.f32.mrb[58].mxu1 }
 0x711   :  { %v8121_v5 = vadd.f32 %v16807_v51, %v10506_v27  ;;  %v8059_v16 = vpop.f32.mrb[59].mxu1  ;;  %v8152_v54 = vmax.f32 %v8120_v56, 0.0 }
 0x712   :  { %v8119_v12 = vadd.f32 %v16807_v51, %v8059_v16  ;;  %v8150_v59 = vmax.f32 %v8118_v26, 0.0 }
 0x713   :  { %v8153_v38 = vmax.f32 %v8121_v5, 0.0 }
 0x714   :  { %v8151_v47 = vmax.f32 %v8119_v12, 0.0 }
 0x715   :  { %v8171_v33 = vpack.c.bf16 %v8153_v38, %v8152_v54 }
 0x716   :  { %v8170_v15 = vpack.c.bf16 %v8151_v47, %v8150_v59 }
 0x718   :  { %10599 = vmatprep.mubr.bf16.mxu0 %v8170_v15 }
 0x719   :  { %10600 = vmatmul.mubr.bf16.gmra.mrb[56].mxu0 %v8171_v33 }
 0x749   :  { %v10597_v37 = vpop.f32.mrb[52].mxu0 }
 0x74a   :  { %v8577_v55 = vpop.f32.mrb[53].mxu0  ;;  %v8653_v58 = vadd.f32 %v10597_v37, %v16944_v1 }
 0x74b   :  { %v10598_v7 = vpop.f32.mrb[54].mxu0  ;;  %v8651_v21 = vadd.f32 %v16944_v1, %v8577_v55 }
 0x74c   :  { %v8654_v32 = vadd.f32 %v10598_v7, %v16944_v1  ;;  %v8580_v9 = vpop.f32.mrb[55].mxu0 }
 0x74d   :  { %v8652_v52 = vadd.f32 %v16944_v1, %v8580_v9 }
 0x74e   :  { %v17044_v63 = vpack.c.bf16 %v8654_v32, %v8653_v58 }
 0x74f   :  { %v17046_v53 = vpack.c.bf16 %v8652_v52, %v8651_v21 }
 0x751   :  { %9036 = vmatmul.mubr.bf16.gmra.mrb[104].mxu1 %v17046_v53 }
 0x752   :  { %9045 = vmatprep.mubr.bf16.mxu1 %v11403_v6 }
 0x757   :  { %v10509_v60 = vpop.f32.mrb[60].mxu1 }
 0x758   :  { %v8124_v19 = vadd.f32 %v16807_v51, %v10509_v60  ;;  %v8072_v25 = vpop.f32.mrb[61].mxu1 }
 0x759   :  { %v8122_v44 = vadd.f32 %v16807_v51, %v8072_v25  ;;  %v10510_v43 = vpop.f32.mrb[62].mxu1  ;;  %9046 = vmatmul.mubr.bf16.gmra.mrb[108].mxu1 %v17044_v63 }
 0x75a   :  { %v8125_v30 = vadd.f32 %v16807_v51, %v10510_v43  ;;  %v8075_v2 = vpop.f32.mrb[63].mxu1  ;;  %v8156_v31 = vmax.f32 %v8124_v19, 0.0  ;;  %9055 = vmatprep.mubr.bf16.mxu1 %v11403_v6 }
 0x75b   :  { %v8123_v10 = vadd.f32 %v16807_v51, %v8075_v2  ;;  %v8154_v45 = vmax.f32 %v8122_v44, 0.0 }
 0x75c   :  { %v8157_v13 = vmax.f32 %v8125_v30, 0.0 }
 0x75d   :  { %v8155_v50 = vmax.f32 %v8123_v10, 0.0 }
 0x75e   :  { %v8173_v35 = vpack.c.bf16 %v8157_v13, %v8156_v31 }
 0x75f   :  { %v8172_v29 = vpack.c.bf16 %v8155_v50, %v8154_v45 }
 0x761   :  { %10603 = vmatprep.mubr.bf16.mxu0 %v8172_v29 }
 0x762   :  { %10604 = vmatmul.mubr.bf16.gmra.mrb[60].mxu0 %v8173_v35 }
 0x763   :  { %9128 = vmatprep.mubr.bf16.mxu0 %v11403_v6 }
 0x76a   :  { %9129 = vmatmul.mubr.bf16.vlgmr.msra.gmra.mrb[64].mxu0 %v16952_v62 }
 0x76b   :  { %9138 = vmatprep.mubr.bf16.mxu0 %v11403_v6 }
 0x772   :  { %9139 = vmatmul.mubr.bf16.gmra.mrb[68].mxu0 %v16950_v3 }
 0x773   :  { %9148 = vmatprep.mubr.bf16.mxu0 %v11403_v6 }
 0x77a   :  { %9149 = vmatmul.mubr.bf16.gmra.mrb[72].mxu0 %v16962_v28 }
 0x77b   :  { %9158 = vmatprep.mubr.bf16.mxu0 %v11403_v6 }
 0x782   :  { %9159 = vmatmul.mubr.bf16.gmra.mrb[76].mxu0 %v16960_v14 }
 0x783   :  { %9168 = vmatprep.mubr.bf16.mxu0 %v11403_v6 }
 0x78a   :  { %9169 = vmatmul.mubr.bf16.gmra.mrb[80].mxu0 %v16978_v20 }
 0x78b   :  { %9178 = vmatprep.mubr.bf16.mxu0 %v11403_v6 }
 0x792   :  { %9179 = vmatmul.mubr.bf16.gmra.mrb[84].mxu0 %v16976_v23 }
 0x793   :  { %9188 = vmatprep.mubr.bf16.mxu0 %v11403_v6 }
 0x79a   :  { %v8937_v51 = vpop.f32.mrb[64].mxu1  ;;  %9189 = vmatmul.mubr.bf16.gmra.mrb[88].mxu0 %v16988_v39 }
 0x79b   :  { %9289 = vst [vmem:[%s17493_s14] sm:$0xff] %v8937_v51  ;;  %v8939_v3 = vpop.f32.mrb[65].mxu1  ;;  %9198 = vmatprep.mubr.bf16.mxu0 %v11403_v6 }
 0x79c   :  { %9290 = vst [vmem:[%s17493_s14 + $0x8] sm:$0xff] %v8939_v3  ;;  %v8941_v62 = vpop.f32.mrb[66].mxu1 }
 0x79d   :  { %9293 = vst [vmem:[%s17493_s14 + $0x20] sm:$0xff] %v8941_v62  ;;  %v8943_v14 = vpop.f32.mrb[67].mxu1 }
 0x79e   :  { %9294 = vst [vmem:[%s17493_s14 + $0x28] sm:$0xff] %v8943_v14 }
 0x7a2   :  { %v8947_v28 = vpop.f32.mrb[68].mxu1  ;;  %9199 = vmatmul.mubr.bf16.gmra.mrb[92].mxu0 %v16986_v22 }
 0x7a3   :  { %9297 = vst [vmem:[%s17493_s14 + $0x40] sm:$0xff] %v8947_v28  ;;  %v8949_v23 = vpop.f32.mrb[69].mxu1  ;;  %9208 = vmatprep.mubr.bf16.mxu0 %v11403_v6 }
 0x7a4   :  { %9298 = vst [vmem:[%s17493_s14 + $0x48] sm:$0xff] %v8949_v23  ;;  %v8951_v20 = vpop.f32.mrb[70].mxu1 }
 0x7a5   :  { %9301 = vst [vmem:[%s17493_s14 + $0x60] sm:$0xff] %v8951_v20  ;;  %v8953_v39 = vpop.f32.mrb[71].mxu1 }
 0x7a6   :  { %9302 = vst [vmem:[%s17493_s14 + $0x68] sm:$0xff] %v8953_v39 }
 0x7aa   :  { %v8957_v22 = vpop.f32.mrb[72].mxu1  ;;  %9209 = vmatmul.mubr.bf16.gmra.mrb[96].mxu0 %v17013_v40 }
 0x7ab   :  { %9305 = vst [vmem:[%s17493_s14 + $0x80] sm:$0xff] %v8957_v22  ;;  %v8959_v4 = vpop.f32.mrb[73].mxu1  ;;  %9218 = vmatprep.mubr.bf16.mxu0 %v11403_v6 }
 0x7ac   :  { %9306 = vst [vmem:[%s17493_s14 + $0x88] sm:$0xff] %v8959_v4  ;;  %v8961_v57 = vpop.f32.mrb[74].mxu1 }
 0x7ad   :  { %9309 = vst [vmem:[%s17493_s14 + $0xa0] sm:$0xff] %v8961_v57  ;;  %v8963_v0 = vpop.f32.mrb[75].mxu1 }
 0x7ae   :  { %9310 = vst [vmem:[%s17493_s14 + $0xa8] sm:$0xff] %v8963_v0 }
 0x7b2   :  { %v8967_v11 = vpop.f32.mrb[76].mxu1  ;;  %9219 = vmatmul.mubr.bf16.gmra.mrb[100].mxu0 %v17011_v46 }
 0x7b3   :  { %9313 = vst [vmem:[%s17493_s14 + $0xc0] sm:$0xff] %v8967_v11  ;;  %v8969_v34 = vpop.f32.mrb[77].mxu1  ;;  %9228 = vmatprep.mubr.bf16.mxu0 %v11403_v6 }
 0x7b4   :  { %9314 = vst [vmem:[%s17493_s14 + $0xc8] sm:$0xff] %v8969_v34  ;;  %v8971_v8 = vpop.f32.mrb[78].mxu1 }
 0x7b5   :  { %9317 = vst [vmem:[%s17493_s14 + $0xe0] sm:$0xff] %v8971_v8  ;;  %v8973_v24 = vpop.f32.mrb[79].mxu1 }
 0x7b6   :  { %9318 = vst [vmem:[%s17493_s14 + $0xe8] sm:$0xff] %v8973_v24 }
 0x7ba   :  { %v8977_v41 = vpop.f32.mrb[80].mxu1  ;;  %9229 = vmatmul.mubr.bf16.gmra.mrb[104].mxu0 %v17046_v53 }
 0x7bb   :  { %9321 = vst [vmem:[%s17493_s14 + $0x100] sm:$0xff] %v8977_v41  ;;  %v8979_v18 = vpop.f32.mrb[81].mxu1  ;;  %9238 = vmatprep.mubr.bf16.mxu0 %v11403_v6 }
 0x7bc   :  { %9322 = vst [vmem:[%s17493_s14 + $0x108] sm:$0xff] %v8979_v18  ;;  %v8981_v49 = vpop.f32.mrb[82].mxu1 }
 0x7bd   :  { %9325 = vst [vmem:[%s17493_s14 + $0x120] sm:$0xff] %v8981_v49  ;;  %v8983_v46 = vpop.f32.mrb[83].mxu1 }
 0x7be   :  { %9326 = vst [vmem:[%s17493_s14 + $0x128] sm:$0xff] %v8983_v46 }
 0x7c2   :  { %v8987_v40 = vpop.f32.mrb[84].mxu1  ;;  %9239 = vmatmul.mubr.bf16.gmra.mrb[108].mxu0 %v17044_v63 }
 0x7c3   :  { %9329 = vst [vmem:[%s17493_s14 + $0x140] sm:$0xff] %v8987_v40  ;;  %v8989_v61 = vpop.f32.mrb[85].mxu1  ;;  %9248 = vmatprep.mubr.bf16.mxu0 %v11403_v6 }
 0x7c4   :  { %9330 = vst [vmem:[%s17493_s14 + $0x148] sm:$0xff] %v8989_v61  ;;  %v8991_v36 = vpop.f32.mrb[86].mxu1 }
 0x7c5   :  { %9333 = vst [vmem:[%s17493_s14 + $0x160] sm:$0xff] %v8991_v36  ;;  %v8993_v17 = vpop.f32.mrb[87].mxu1 }
 0x7c6   :  { %9334 = vst [vmem:[%s17493_s14 + $0x168] sm:$0xff] %v8993_v17 }
 0x7ca   :  { %v8997_v48 = vpop.f32.mrb[88].mxu1 }
 0x7cb   :  { %9337 = vst [vmem:[%s17493_s14 + $0x180] sm:$0xff] %v8997_v48  ;;  %v8999_v56 = vpop.f32.mrb[89].mxu1 }
 0x7cc   :  { %9338 = vst [vmem:[%s17493_s14 + $0x188] sm:$0xff] %v8999_v56  ;;  %v9001_v42 = vpop.f32.mrb[90].mxu1 }
 0x7cd   :  { %9341 = vst [vmem:[%s17493_s14 + $0x1a0] sm:$0xff] %v9001_v42  ;;  %v9003_v26 = vpop.f32.mrb[91].mxu1 }
 0x7ce   :  { %9342 = vst [vmem:[%s17493_s14 + $0x1a8] sm:$0xff] %v9003_v26 }
 0x7d2   :  { %v9007_v27 = vpop.f32.mrb[92].mxu1 }
 0x7d3   :  { %9345 = vst [vmem:[%s17493_s14 + $0x1c0] sm:$0xff] %v9007_v27  ;;  %v9009_v5 = vpop.f32.mrb[93].mxu1 }
 0x7d4   :  { %9346 = vst [vmem:[%s17493_s14 + $0x1c8] sm:$0xff] %v9009_v5  ;;  %v9011_v16 = vpop.f32.mrb[94].mxu1 }
 0x7d5   :  { %9349 = vst [vmem:[%s17493_s14 + $0x1e0] sm:$0xff] %v9011_v16  ;;  %v9013_v12 = vpop.f32.mrb[95].mxu1 }
 0x7d6   :  { %9350 = vst [vmem:[%s17493_s14 + $0x1e8] sm:$0xff] %v9013_v12 }
 0x7da   :  { %v9017_v54 = vpop.f32.mrb[96].mxu1 }
 0x7db   :  { %9353 = vst [vmem:[%s17493_s14 + $0x200] sm:$0xff] %v9017_v54  ;;  %v9019_v38 = vpop.f32.mrb[97].mxu1 }
 0x7dc   :  { %9354 = vst [vmem:[%s17493_s14 + $0x208] sm:$0xff] %v9019_v38  ;;  %v9021_v59 = vpop.f32.mrb[98].mxu1 }
 0x7dd   :  { %9357 = vst [vmem:[%s17493_s14 + $0x220] sm:$0xff] %v9021_v59  ;;  %v9023_v47 = vpop.f32.mrb[99].mxu1 }
 0x7de   :  { %9358 = vst [vmem:[%s17493_s14 + $0x228] sm:$0xff] %v9023_v47 }
 0x7e2   :  { %v9027_v33 = vpop.f32.mrb[100].mxu1 }
 0x7e3   :  { %9361 = vst [vmem:[%s17493_s14 + $0x240] sm:$0xff] %v9027_v33  ;;  %v9029_v15 = vpop.f32.mrb[101].mxu1 }
 0x7e4   :  { %9362 = vst [vmem:[%s17493_s14 + $0x248] sm:$0xff] %v9029_v15  ;;  %v9031_v37 = vpop.f32.mrb[102].mxu1 }
 0x7e5   :  { %9365 = vst [vmem:[%s17493_s14 + $0x260] sm:$0xff] %v9031_v37  ;;  %v9033_v55 = vpop.f32.mrb[103].mxu1 }
 0x7e6   :  { %9366 = vst [vmem:[%s17493_s14 + $0x268] sm:$0xff] %v9033_v55 }
 0x7ec   :  { %v10601_v7 = vpop.f32.mrb[56].mxu0 }
 0x7ed   :  { %v8593_v58 = vpop.f32.mrb[57].mxu0  ;;  %v8657_v9 = vadd.f32 %v10601_v7, %v16944_v1 }
 0x7ee   :  { %v10602_v32 = vpop.f32.mrb[58].mxu0  ;;  %v8655_v63 = vadd.f32 %v16944_v1, %v8593_v58 }
 0x7ef   :  { %v8658_v21 = vadd.f32 %v10602_v32, %v16944_v1  ;;  %v8596_v52 = vpop.f32.mrb[59].mxu0 }
 0x7f0   :  { %v8656_v53 = vadd.f32 %v16944_v1, %v8596_v52 }
 0x7f1   :  { %v8676_v60 = vpack.c.bf16 %v8658_v21, %v8657_v9 }
 0x7f2   :  { %v8675_v19 = vpack.c.bf16 %v8656_v53, %v8655_v63 }
 0x7f4   :  { %9056 = vmatmul.mubr.bf16.gmra.mrb[112].mxu1 %v8675_v19  ;;  %9249 = vmatmul.mubr.bf16.gmra.mrb[112].mxu0 %v8675_v19 }
 0x7f5   :  { %9065 = vmatprep.mubr.bf16.mxu1 %v11403_v6  ;;  %9258 = vmatprep.mubr.bf16.mxu0 %v11403_v6 }
 0x7fc   :  { %9066 = vmatmul.mubr.bf16.gmra.mrb[116].mxu1 %v8676_v60  ;;  %9259 = vmatmul.mubr.bf16.gmra.mrb[116].mxu0 %v8676_v60 }
 0x7fd   :  { %9075 = vmatprep.mubr.bf16.mxu1 %v11403_v6  ;;  %9268 = vmatprep.mubr.bf16.mxu0 %v11403_v6 }
 0x824   :  { %v9037_v25 = vpop.f32.mrb[104].mxu1 }
 0x825   :  { %9369 = vst [vmem:[%s17493_s14 + $0x280] sm:$0xff] %v9037_v25  ;;  %v9039_v44 = vpop.f32.mrb[105].mxu1 }
 0x826   :  { %9370 = vst [vmem:[%s17493_s14 + $0x288] sm:$0xff] %v9039_v44  ;;  %v9041_v43 = vpop.f32.mrb[106].mxu1 }
 0x827   :  { %9373 = vst [vmem:[%s17493_s14 + $0x2a0] sm:$0xff] %v9041_v43  ;;  %v9043_v30 = vpop.f32.mrb[107].mxu1 }
 0x828   :  { %9374 = vst [vmem:[%s17493_s14 + $0x2a8] sm:$0xff] %v9043_v30 }
 0x82c   :  { %v9047_v2 = vpop.f32.mrb[108].mxu1 }
 0x82d   :  { %9377 = vst [vmem:[%s17493_s14 + $0x2c0] sm:$0xff] %v9047_v2  ;;  %v9049_v10 = vpop.f32.mrb[109].mxu1 }
 0x82e   :  { %9378 = vst [vmem:[%s17493_s14 + $0x2c8] sm:$0xff] %v9049_v10  ;;  %v9051_v31 = vpop.f32.mrb[110].mxu1 }
 0x82f   :  { %9381 = vst [vmem:[%s17493_s14 + $0x2e0] sm:$0xff] %v9051_v31  ;;  %v9053_v13 = vpop.f32.mrb[111].mxu1 }
 0x830   :  { %9382 = vst [vmem:[%s17493_s14 + $0x2e8] sm:$0xff] %v9053_v13 }
 0x835   :  { %v10605_v45 = vpop.f32.mrb[60].mxu0 }
 0x836   :  { %v8609_v50 = vpop.f32.mrb[61].mxu0  ;;  %v8661_v29 = vadd.f32 %v10605_v45, %v16944_v1 }
 0x837   :  { %v10606_v35 = vpop.f32.mrb[62].mxu0  ;;  %v8659_v62 = vadd.f32 %v16944_v1, %v8609_v50 }
 0x838   :  { %v8662_v51 = vadd.f32 %v10606_v35, %v16944_v1  ;;  %v8612_v3 = vpop.f32.mrb[63].mxu0 }
 0x839   :  { %v8660_v14 = vadd.f32 %v16944_v1, %v8612_v3 }
 0x83a   :  { %v8678_v28 = vpack.c.bf16 %v8662_v51, %v8661_v29 }
 0x83b   :  { %v8677_v23 = vpack.c.bf16 %v8660_v14, %v8659_v62 }
 0x83d   :  { %9076 = vmatmul.mubr.bf16.gmra.mrb[120].mxu1 %v8677_v23  ;;  %v9130_v20 = vpop.f32.mrb[64].mxu0  ;;  %9269 = vmatmul.mubr.bf16.gmra.mrb[120].mxu0 %v8677_v23 }
 0x83e   :  { %9291 = vst [vmem:[%s17493_s14 + $0x10] sm:$0xff] %v9130_v20  ;;  %v9132_v39 = vpop.f32.mrb[65].mxu0  ;;  %9085 = vmatprep.mubr.bf16.mxu1 %v11403_v6  ;;  %9278 = vmatprep.mubr.bf16.mxu0 %v11403_v6 }
 0x83f   :  { %9292 = vst [vmem:[%s17493_s14 + $0x18] sm:$0xff] %v9132_v39  ;;  %v9134_v22 = vpop.f32.mrb[66].mxu0 }
 0x840   :  { %9295 = vst [vmem:[%s17493_s14 + $0x30] sm:$0xff] %v9134_v22  ;;  %v9136_v1 = vpop.f32.mrb[67].mxu0 }
 0x841   :  { %9296 = vst [vmem:[%s17493_s14 + $0x38] sm:$0xff] %v9136_v1 }
 0x845   :  { %9086 = vmatmul.mubr.bf16.gmra.mrb[124].mxu1 %v8678_v28  ;;  %v9140_v4 = vpop.f32.mrb[68].mxu0  ;;  %9279 = vmatmul.mubr.bf16.gmra.mrb[124].mxu0 %v8678_v28 }
 0x846   :  { %9299 = vst [vmem:[%s17493_s14 + $0x50] sm:$0xff] %v9140_v4  ;;  %v9142_v6 = vpop.f32.mrb[69].mxu0 }
 0x847   :  { %9300 = vst [vmem:[%s17493_s14 + $0x58] sm:$0xff] %v9142_v6  ;;  %v9144_v57 = vpop.f32.mrb[70].mxu0 }
 0x848   :  { %9303 = vst [vmem:[%s17493_s14 + $0x70] sm:$0xff] %v9144_v57  ;;  %v9146_v0 = vpop.f32.mrb[71].mxu0 }
 0x849   :  { %9304 = vst [vmem:[%s17493_s14 + $0x78] sm:$0xff] %v9146_v0 }
 0x84d   :  { %v9150_v11 = vpop.f32.mrb[72].mxu0 }
 0x84e   :  { %9307 = vst [vmem:[%s17493_s14 + $0x90] sm:$0xff] %v9150_v11  ;;  %v9152_v34 = vpop.f32.mrb[73].mxu0 }
 0x84f   :  { %9308 = vst [vmem:[%s17493_s14 + $0x98] sm:$0xff] %v9152_v34  ;;  %v9154_v8 = vpop.f32.mrb[74].mxu0 }
 0x850   :  { %9311 = vst [vmem:[%s17493_s14 + $0xb0] sm:$0xff] %v9154_v8  ;;  %v9156_v24 = vpop.f32.mrb[75].mxu0 }
 0x851   :  { %9312 = vst [vmem:[%s17493_s14 + $0xb8] sm:$0xff] %v9156_v24 }
 0x855   :  { %v9160_v41 = vpop.f32.mrb[76].mxu0 }
 0x856   :  { %9315 = vst [vmem:[%s17493_s14 + $0xd0] sm:$0xff] %v9160_v41  ;;  %v9162_v18 = vpop.f32.mrb[77].mxu0 }
 0x857   :  { %9316 = vst [vmem:[%s17493_s14 + $0xd8] sm:$0xff] %v9162_v18  ;;  %v9164_v49 = vpop.f32.mrb[78].mxu0 }
 0x858   :  { %9319 = vst [vmem:[%s17493_s14 + $0xf0] sm:$0xff] %v9164_v49  ;;  %v9166_v46 = vpop.f32.mrb[79].mxu0 }
 0x859   :  { %9320 = vst [vmem:[%s17493_s14 + $0xf8] sm:$0xff] %v9166_v46 }
 0x85d   :  { %v9170_v40 = vpop.f32.mrb[80].mxu0 }
 0x85e   :  { %9323 = vst [vmem:[%s17493_s14 + $0x110] sm:$0xff] %v9170_v40  ;;  %v9172_v61 = vpop.f32.mrb[81].mxu0 }
 0x85f   :  { %9324 = vst [vmem:[%s17493_s14 + $0x118] sm:$0xff] %v9172_v61  ;;  %v9174_v36 = vpop.f32.mrb[82].mxu0 }
 0x860   :  { %9327 = vst [vmem:[%s17493_s14 + $0x130] sm:$0xff] %v9174_v36  ;;  %v9176_v17 = vpop.f32.mrb[83].mxu0 }
 0x861   :  { %9328 = vst [vmem:[%s17493_s14 + $0x138] sm:$0xff] %v9176_v17 }
 0x865   :  { %v9180_v48 = vpop.f32.mrb[84].mxu0 }
 0x866   :  { %9331 = vst [vmem:[%s17493_s14 + $0x150] sm:$0xff] %v9180_v48  ;;  %v9182_v56 = vpop.f32.mrb[85].mxu0 }
 0x867   :  { %9332 = vst [vmem:[%s17493_s14 + $0x158] sm:$0xff] %v9182_v56  ;;  %v9184_v42 = vpop.f32.mrb[86].mxu0 }
 0x868   :  { %9335 = vst [vmem:[%s17493_s14 + $0x170] sm:$0xff] %v9184_v42  ;;  %v9186_v26 = vpop.f32.mrb[87].mxu0 }
 0x869   :  { %9336 = vst [vmem:[%s17493_s14 + $0x178] sm:$0xff] %v9186_v26 }
 0x86d   :  { %v9190_v27 = vpop.f32.mrb[88].mxu0 }
 0x86e   :  { %9339 = vst [vmem:[%s17493_s14 + $0x190] sm:$0xff] %v9190_v27  ;;  %v9192_v5 = vpop.f32.mrb[89].mxu0 }
 0x86f   :  { %9340 = vst [vmem:[%s17493_s14 + $0x198] sm:$0xff] %v9192_v5  ;;  %v9194_v16 = vpop.f32.mrb[90].mxu0 }
 0x870   :  { %9343 = vst [vmem:[%s17493_s14 + $0x1b0] sm:$0xff] %v9194_v16  ;;  %v9196_v12 = vpop.f32.mrb[91].mxu0 }
 0x871   :  { %9344 = vst [vmem:[%s17493_s14 + $0x1b8] sm:$0xff] %v9196_v12 }
 0x875   :  { %v9200_v54 = vpop.f32.mrb[92].mxu0 }
 0x876   :  { %9347 = vst [vmem:[%s17493_s14 + $0x1d0] sm:$0xff] %v9200_v54  ;;  %v9202_v38 = vpop.f32.mrb[93].mxu0 }
 0x877   :  { %9348 = vst [vmem:[%s17493_s14 + $0x1d8] sm:$0xff] %v9202_v38  ;;  %v9204_v59 = vpop.f32.mrb[94].mxu0 }
 0x878   :  { %9351 = vst [vmem:[%s17493_s14 + $0x1f0] sm:$0xff] %v9204_v59  ;;  %v9206_v47 = vpop.f32.mrb[95].mxu0 }
 0x879   :  { %9352 = vst [vmem:[%s17493_s14 + $0x1f8] sm:$0xff] %v9206_v47 }
 0x87d   :  { %v9210_v33 = vpop.f32.mrb[96].mxu0 }
 0x87e   :  { %9355 = vst [vmem:[%s17493_s14 + $0x210] sm:$0xff] %v9210_v33  ;;  %v9212_v15 = vpop.f32.mrb[97].mxu0 }
 0x87f   :  { %9356 = vst [vmem:[%s17493_s14 + $0x218] sm:$0xff] %v9212_v15  ;;  %v9214_v37 = vpop.f32.mrb[98].mxu0 }
 0x880   :  { %9359 = vst [vmem:[%s17493_s14 + $0x230] sm:$0xff] %v9214_v37  ;;  %v9216_v55 = vpop.f32.mrb[99].mxu0 }
 0x881   :  { %9360 = vst [vmem:[%s17493_s14 + $0x238] sm:$0xff] %v9216_v55 }
 0x885   :  { %v9220_v7 = vpop.f32.mrb[100].mxu0 }
 0x886   :  { %9363 = vst [vmem:[%s17493_s14 + $0x250] sm:$0xff] %v9220_v7  ;;  %v9222_v58 = vpop.f32.mrb[101].mxu0 }
 0x887   :  { %9364 = vst [vmem:[%s17493_s14 + $0x258] sm:$0xff] %v9222_v58  ;;  %v9224_v32 = vpop.f32.mrb[102].mxu0 }
 0x888   :  { %9367 = vst [vmem:[%s17493_s14 + $0x270] sm:$0xff] %v9224_v32  ;;  %v9226_v9 = vpop.f32.mrb[103].mxu0 }
 0x889   :  { %9368 = vst [vmem:[%s17493_s14 + $0x278] sm:$0xff] %v9226_v9 }
 0x88d   :  { %v9230_v21 = vpop.f32.mrb[104].mxu0 }
 0x88e   :  { %9371 = vst [vmem:[%s17493_s14 + $0x290] sm:$0xff] %v9230_v21  ;;  %v9232_v52 = vpop.f32.mrb[105].mxu0 }
 0x88f   :  { %9372 = vst [vmem:[%s17493_s14 + $0x298] sm:$0xff] %v9232_v52  ;;  %v9234_v63 = vpop.f32.mrb[106].mxu0 }
 0x890   :  { %9375 = vst [vmem:[%s17493_s14 + $0x2b0] sm:$0xff] %v9234_v63  ;;  %v9236_v53 = vpop.f32.mrb[107].mxu0 }
 0x891   :  { %9376 = vst [vmem:[%s17493_s14 + $0x2b8] sm:$0xff] %v9236_v53 }
 0x895   :  { %v9240_v60 = vpop.f32.mrb[108].mxu0 }
 0x896   :  { %9379 = vst [vmem:[%s17493_s14 + $0x2d0] sm:$0xff] %v9240_v60  ;;  %v9242_v19 = vpop.f32.mrb[109].mxu0 }
 0x897   :  { %9380 = vst [vmem:[%s17493_s14 + $0x2d8] sm:$0xff] %v9242_v19  ;;  %v9244_v25 = vpop.f32.mrb[110].mxu0 }
 0x898   :  { %9383 = vst [vmem:[%s17493_s14 + $0x2f0] sm:$0xff] %v9244_v25  ;;  %v9246_v44 = vpop.f32.mrb[111].mxu0 }
 0x899   :  { %9384 = vst [vmem:[%s17493_s14 + $0x2f8] sm:$0xff] %v9246_v44 }
 0x8c7   :  { %v9057_v43 = vpop.f32.mrb[112].mxu1  ;;  %v9250_v30 = vpop.f32.mrb[112].mxu0 }
 0x8c8   :  { %9385 = vst [vmem:[%s17493_s14 + $0x300] sm:$0xff] %v9057_v43  ;;  %9387 = vst [vmem:[%s17493_s14 + $0x310] sm:$0xff] %v9250_v30  ;;  %v9059_v2 = vpop.f32.mrb[113].mxu1  ;;  %v9252_v10 = vpop.f32.mrb[113].mxu0 }
 0x8c9   :  { %9386 = vst [vmem:[%s17493_s14 + $0x308] sm:$0xff] %v9059_v2  ;;  %9388 = vst [vmem:[%s17493_s14 + $0x318] sm:$0xff] %v9252_v10  ;;  %v9061_v31 = vpop.f32.mrb[114].mxu1  ;;  %v9254_v13 = vpop.f32.mrb[114].mxu0 }
 0x8ca   :  { %9389 = vst [vmem:[%s17493_s14 + $0x320] sm:$0xff] %v9061_v31  ;;  %9391 = vst [vmem:[%s17493_s14 + $0x330] sm:$0xff] %v9254_v13  ;;  %v9063_v45 = vpop.f32.mrb[115].mxu1  ;;  %v9256_v50 = vpop.f32.mrb[115].mxu0 }
 0x8cb   :  { %9390 = vst [vmem:[%s17493_s14 + $0x328] sm:$0xff] %v9063_v45  ;;  %9392 = vst [vmem:[%s17493_s14 + $0x338] sm:$0xff] %v9256_v50 }
 0x8cf   :  { %v9067_v35 = vpop.f32.mrb[116].mxu1  ;;  %v9260_v29 = vpop.f32.mrb[116].mxu0 }
 0x8d0   :  { %9393 = vst [vmem:[%s17493_s14 + $0x340] sm:$0xff] %v9067_v35  ;;  %9395 = vst [vmem:[%s17493_s14 + $0x350] sm:$0xff] %v9260_v29  ;;  %v9069_v51 = vpop.f32.mrb[117].mxu1  ;;  %v9262_v3 = vpop.f32.mrb[117].mxu0 }
 0x8d1   :  { %9394 = vst [vmem:[%s17493_s14 + $0x348] sm:$0xff] %v9069_v51  ;;  %9396 = vst [vmem:[%s17493_s14 + $0x358] sm:$0xff] %v9262_v3  ;;  %v9071_v62 = vpop.f32.mrb[118].mxu1  ;;  %v9264_v14 = vpop.f32.mrb[118].mxu0 }
 0x8d2   :  { %9397 = vst [vmem:[%s17493_s14 + $0x360] sm:$0xff] %v9071_v62  ;;  %9399 = vst [vmem:[%s17493_s14 + $0x370] sm:$0xff] %v9264_v14  ;;  %v9073_v28 = vpop.f32.mrb[119].mxu1  ;;  %v9266_v23 = vpop.f32.mrb[119].mxu0 }
 0x8d3   :  { %9398 = vst [vmem:[%s17493_s14 + $0x368] sm:$0xff] %v9073_v28  ;;  %9400 = vst [vmem:[%s17493_s14 + $0x378] sm:$0xff] %v9266_v23 }
 0x910   :  { %v9077_v20 = vpop.f32.mrb[120].mxu1  ;;  %v9270_v39 = vpop.f32.mrb[120].mxu0 }
 0x911   :  { %9401 = vst [vmem:[%s17493_s14 + $0x380] sm:$0xff] %v9077_v20  ;;  %9403 = vst [vmem:[%s17493_s14 + $0x390] sm:$0xff] %v9270_v39  ;;  %v9079_v22 = vpop.f32.mrb[121].mxu1  ;;  %v9272_v1 = vpop.f32.mrb[121].mxu0 }
 0x912   :  { %9402 = vst [vmem:[%s17493_s14 + $0x388] sm:$0xff] %v9079_v22  ;;  %9404 = vst [vmem:[%s17493_s14 + $0x398] sm:$0xff] %v9272_v1  ;;  %v9081_v4 = vpop.f32.mrb[122].mxu1  ;;  %v9274_v6 = vpop.f32.mrb[122].mxu0 }
 0x913   :  { %9405 = vst [vmem:[%s17493_s14 + $0x3a0] sm:$0xff] %v9081_v4  ;;  %9407 = vst [vmem:[%s17493_s14 + $0x3b0] sm:$0xff] %v9274_v6  ;;  %v9083_v57 = vpop.f32.mrb[123].mxu1  ;;  %v9276_v0 = vpop.f32.mrb[123].mxu0 }
 0x914   :  { %9406 = vst [vmem:[%s17493_s14 + $0x3a8] sm:$0xff] %v9083_v57  ;;  %9408 = vst [vmem:[%s17493_s14 + $0x3b8] sm:$0xff] %v9276_v0 }
 0x918   :  { %v9087_v11 = vpop.f32.mrb[124].mxu1  ;;  %v9280_v34 = vpop.f32.mrb[124].mxu0 }
 0x919   :  { %9409 = vst [vmem:[%s17493_s14 + $0x3c0] sm:$0xff] %v9087_v11  ;;  %9411 = vst [vmem:[%s17493_s14 + $0x3d0] sm:$0xff] %v9280_v34  ;;  %v9089_v8 = vpop.f32.mrb[125].mxu1  ;;  %v9282_v24 = vpop.f32.mrb[125].mxu0 }
 0x91a   :  { %9410 = vst [vmem:[%s17493_s14 + $0x3c8] sm:$0xff] %v9089_v8  ;;  %9412 = vst [vmem:[%s17493_s14 + $0x3d8] sm:$0xff] %v9282_v24  ;;  %v9091_v41 = vpop.f32.mrb[126].mxu1  ;;  %v9284_v18 = vpop.f32.mrb[126].mxu0 }
 0x91b   :  { %9413 = vst [vmem:[%s17493_s14 + $0x3e0] sm:$0xff] %v9091_v41  ;;  %9415 = vst [vmem:[%s17493_s14 + $0x3f0] sm:$0xff] %v9284_v18  ;;  %v9093_v49 = vpop.f32.mrb[127].mxu1  ;;  %v9286_v46 = vpop.f32.mrb[127].mxu0 }
 0x91c   :  { %9414 = vst [vmem:[%s17493_s14 + $0x3e8] sm:$0xff] %v9093_v49  ;;  %9416 = vst [vmem:[%s17493_s14 + $0x3f8] sm:$0xff] %v9286_v46 }

</bundles_post_ra>
